<compile_context>
chip_gen: v7x
topology: tpu7x:2x2x1
jax: 0.10.0
libtpu: 0.0.40
codegen_flags: <defaults>
</compile_context>

<pallas_src>
import jax
import jax.numpy as jnp
from jax.experimental import pallas as pl
from jax.experimental.pallas import tpu as pltpu

CFG = [32, "M", 64, "M", 128, "M", 512, "M"]
NUM_CLASSES = 10
NUM_CLASSES_PAD = 128          # lane-dense FC output; sliced to NUM_CLASSES outside
BN_EPS = 1e-5
DEEP_K_MIN_CIN = 64            # lane-concat im2col only when taps are lane-dense-ish


# ---------------------------------------------------------------------------
# In-kernel building blocks (operate on VMEM-resident values / scratch refs)
# ---------------------------------------------------------------------------
def _maxpool2x2(a):
    """MaxPool2d(2,2).  Pool H first (outer dim: reshape is pure addressing),
    then W (sublane dim: the reshape-split relayout now sees half the data)."""
    n, h, w, c = a.shape
    a = a.reshape(n, h // 2, 2, w, c).max(axis=2)        # pool H: outer dims only
    a = a.reshape(n, h // 2, w // 2, 2, c).max(axis=3)   # pool W: one small relayout
    return a


def _conv3x3_bias_relu(a, pad_ref, w_ref, b_ref, deep):
    """3x3 conv (padding=1, bias=False) with BN scale pre-folded into the
    weights, + folded BN bias + ReLU.  Everything stays in VMEM.

    a      : (nb, H, W, Cin)      bf16 activation
    pad_ref: (nb, H+2, W+2, Cin)  bf16 VMEM scratch (zero-padded copy of `a`)
    w_ref  : deep  -> (9*Cin, Cout) bf16   (rows ordered (ky, kx, cin))
             !deep -> (9, Cin, Cout) bf16  (leading index = ky*3 + kx)
    b_ref  : (1, Cout) f32 folded BN bias
    """
    nb, H, W, Cin = a.shape
    Cout = b_ref.shape[-1]

    # Zero-padding with a single pass over the buffer; every store is
    # sublane-offset-0 and full width (DMA/store friendly for packed bf16).
    zcol = jnp.zeros((nb, H, 1, Cin), jnp.bfloat16)
    zrow = jnp.zeros((nb, 1, W + 2, Cin), jnp.bfloat16)
    pad_ref[:, 1:H + 1, :, :] = jnp.concatenate([zcol, a, zcol], axis=2)
    pad_ref[:, 0:1, :, :] = zrow
    pad_ref[:, H + 1:H + 2, :, :] = zrow

    if deep:
        # Cin >= 64: each tap is (at least half) a lane tile -> lane concat is
        # cheap; one deep contraction with K = 9*Cin.
        taps = [pad_ref[:, ky:ky + H, kx:kx + W, :]
                for ky in range(3) for kx in range(3)]
        col = jnp.concatenate(taps, axis=-1).reshape(nb * H * W, 9 * Cin)
        acc = jnp.dot(col, w_ref[...], preferred_element_type=jnp.float32)
    else:
        # Small Cin (3 / 32): a lane-axis concat of 9 taps at non-128-aligned
        # offsets would force per-tap lane shifts + materialized copies, so
        # accumulate 9 shallow MXU dots instead.
        acc = None
        for k in range(9):
            ky, kx = divmod(k, 3)
            tap = pad_ref[:, ky:ky + H, kx:kx + W, :].reshape(nb * H * W, Cin)
            d = jnp.dot(tap, w_ref[k], preferred_element_type=jnp.float32)
            acc = d if acc is None else acc + d

    out = jnp.maximum(acc + b_ref[...], 0.0)     # bias + ReLU in f32 (v5e-safe)
    return out.reshape(nb, H, W, Cout).astype(jnp.bfloat16)


def _make_vgg_kernel(cfg, deep_flags):
    n_conv = len(deep_flags)

    def kernel(*refs):
        # refs = [x, (w, bias) * n_conv, fc_w, fc_b, out, pad_scratch * n_conv]
        x_ref = refs[0]
        conv_refs = refs[1:1 + 2 * n_conv]
        fcw_ref = refs[1 + 2 * n_conv]
        fcb_ref = refs[2 + 2 * n_conv]
        o_ref = refs[3 + 2 * n_conv]
        pad_refs = refs[4 + 2 * n_conv:]

        a = x_ref[...].astype(jnp.bfloat16)      # (nb, H, W, 3)
        ci = 0
        for v in cfg:
            if v == "M":
                a = _maxpool2x2(a)
            else:
                a = _conv3x3_bias_relu(a, pad_refs[ci],
                                       conv_refs[2 * ci], conv_refs[2 * ci + 1],
                                       deep_flags[ci])
                ci += 1
        # nn.AvgPool2d(kernel_size=1, stride=1) is the identity.
        # Final spatial is 1x1 -> NHWC flatten == PyTorch CHW flatten.
        assert a.shape[1] == 1 and a.shape[2] == 1
        nb = a.shape[0]
        feat = a.reshape(nb, a.shape[-1])                       # bf16 (nb, 512)
        logits = jnp.dot(feat, fcw_ref[...], preferred_element_type=jnp.float32)
        o_ref[...] = (logits + fcb_ref[...]).reshape(nb, 1, NUM_CLASSES_PAD)

    return kernel


# ---------------------------------------------------------------------------
# Wrapper: one pallas_call for the whole network, gridded over batch
# ---------------------------------------------------------------------------
def vgg_forward(x_nchw, conv_params, fc):
    # NCHW (PyTorch) -> NHWC (lane = channels); activations carried in bf16.
    x = jnp.transpose(x_nchw, (0, 2, 3, 1)).astype(jnp.bfloat16)
    N, H, W, _ = x.shape

    # Parallel batch grid: two programs so v7x's two TensorCores each take half
    # the batch, while keeping as much batch as possible folded into matmul M.
    nb = N // 2 if (N >= 2 and N % 2 == 0) else N
    grid = (N // nb,)

    inputs = [x]
    in_specs = [pl.BlockSpec((nb, H, W, 3), lambda i: (i, 0, 0, 0))]
    scratch = []
    deep_flags = []
    flops = 0
    h, w_sp, in_c = H, W, 3
    for v in CFG:
        if v == "M":
            h //= 2
            w_sp //= 2
            continue
        p = conv_params[len(deep_flags)]
        # TODO(synk): training-mode BatchNorm (batch statistics) not modeled;
        # inference-mode folded affine (running stats) is used instead.
        scale = p["gamma"] / jnp.sqrt(p["var"] + BN_EPS)               # f32
        bias = (p["beta"] - p["mean"] * scale).astype(jnp.float32)
        # Fold BN scale into the conv weights in f32, cast to bf16 exactly once.
        w_fold = p["w"] * scale[None, None, None, :]                   # (3,3,Cin,Cout)
        deep = in_c >= DEEP_K_MIN_CIN
        if deep:
            wk = w_fold.reshape(9 * in_c, v).astype(jnp.bfloat16)      # (ky,kx,cin) rows
        else:
            wk = w_fold.reshape(9, in_c, v).astype(jnp.bfloat16)       # [ky*3+kx, cin, :]
        inputs += [wk, bias.reshape(1, v)]
        in_specs += [pl.BlockSpec(wk.shape, lambda i, _n=wk.ndim: (0,) * _n),
                     pl.BlockSpec((1, v), lambda i: (0, 0))]
        scratch.append(pltpu.VMEM((nb, h + 2, w_sp + 2, in_c), jnp.bfloat16))
        deep_flags.append(deep)
        flops += 2 * N * h * w_sp * 9 * in_c * v
        in_c = v

    fc_w, fc_b = fc   # fc_w: (num_classes, 512), fc_b: (num_classes,)
    feat_dim = fc_w.shape[1]
    fcw = jnp.zeros((feat_dim, NUM_CLASSES_PAD), jnp.float32)
    fcw = fcw.at[:, :NUM_CLASSES].set(fc_w.T).astype(jnp.bfloat16)
    fcb = jnp.zeros((1, NUM_CLASSES_PAD), jnp.float32).at[0, :NUM_CLASSES].set(fc_b)
    inputs += [fcw, fcb]
    in_specs += [pl.BlockSpec(fcw.shape, lambda i: (0, 0)),
                 pl.BlockSpec(fcb.shape, lambda i: (0, 0))]
    flops += 2 * N * feat_dim * NUM_CLASSES_PAD

    bytes_accessed = sum(int(a.size) * a.dtype.itemsize for a in inputs)
    bytes_accessed += N * NUM_CLASSES_PAD * 4

    out = pl.pallas_call(
        _make_vgg_kernel(CFG, tuple(deep_flags)),
        out_shape=jax.ShapeDtypeStruct((N, 1, NUM_CLASSES_PAD), jnp.float32),
        grid=grid,
        in_specs=in_specs,
        out_specs=pl.BlockSpec((nb, 1, NUM_CLASSES_PAD), lambda i: (i, 0, 0)),
        scratch_shapes=scratch,
        compiler_params=pltpu.CompilerParams(
            dimension_semantics=("parallel",),
            vmem_limit_bytes=32 * 1024 * 1024),
        cost_estimate=pl.CostEstimate(flops=flops, transcendentals=0,
                                      bytes_accessed=bytes_accessed),
    )(*inputs)
    return out[:, 0, :NUM_CLASSES]


# ---------------------------------------------------------------------------
# Parameter init (deterministic, synthetic)
# ---------------------------------------------------------------------------
def init_params(key, cfg, num_classes, target_size=512):
    conv_params = []
    in_c = 3
    for v in cfg:
        if v == "M":
            continue
        key, k1, k2, k3, k4, k5 = jax.random.split(key, 6)
        w = jax.random.normal(k1, (3, 3, in_c, v), jnp.float32) / jnp.sqrt(9.0 * in_c)
        gamma = 1.0 + 0.1 * jax.random.normal(k2, (v,), jnp.float32)
        beta = 0.1 * jax.random.normal(k3, (v,), jnp.float32)
        rmean = 0.1 * jax.random.normal(k4, (v,), jnp.float32)
        rvar = jnp.abs(jax.random.normal(k5, (v,), jnp.float32)) + 0.5
        conv_params.append(dict(w=w, gamma=gamma, beta=beta, mean=rmean, var=rvar))
        in_c = v
    key, kw, kb = jax.random.split(key, 3)
    fc_w = 0.05 * jax.random.normal(kw, (num_classes, target_size), jnp.float32)
    fc_b = 0.01 * jax.random.normal(kb, (num_classes,), jnp.float32)
    return conv_params, (fc_w, fc_b)


if __name__ == "__main__":
    key = jax.random.PRNGKey(0)
    key, kx, kp = jax.random.split(key, 3)
    # PyTorch-convention NCHW input; 3 channels required by VGG._make_layers.
    x = jax.random.normal(kx, (2, 3, 16, 16), jnp.float32)
    conv_params, fc = init_params(kp, CFG, NUM_CLASSES, target_size=512)

    out = jax.jit(vgg_forward)(x, conv_params, fc)
    out = jax.block_until_ready(out)
    assert out.shape == (2, NUM_CLASSES)
    assert bool(jnp.all(jnp.isfinite(out)))
    print("KERNEL_OK")
</pallas_src>

<mosaic_0001>
module attributes {stable_mosaic.version = 11 : i64} {
  func.func @kernel(%arg0: i32, %arg1: memref<1x16x16x3xbf16, #tpu.memory_space<vmem>>, %arg2: memref<9x3x32xbf16, #tpu.memory_space<vmem>>, %arg3: memref<1x32xf32, #tpu.memory_space<vmem>>, %arg4: memref<9x32x64xbf16, #tpu.memory_space<vmem>>, %arg5: memref<1x64xf32, #tpu.memory_space<vmem>>, %arg6: memref<576x128xbf16, #tpu.memory_space<vmem>>, %arg7: memref<1x128xf32, #tpu.memory_space<vmem>>, %arg8: memref<1152x512xbf16, #tpu.memory_space<vmem>>, %arg9: memref<1x512xf32, #tpu.memory_space<vmem>>, %arg10: memref<512x128xbf16, #tpu.memory_space<vmem>>, %arg11: memref<1x128xf32, #tpu.memory_space<vmem>>, %arg12: memref<1x1x128xf32, #tpu.memory_space<vmem>>, %arg13: memref<1x18x18x3xbf16, #tpu.memory_space<vmem>>, %arg14: memref<1x10x10x32xbf16, #tpu.memory_space<vmem>>, %arg15: memref<1x6x6x64xbf16, #tpu.memory_space<vmem>>, %arg16: memref<1x4x4x128xbf16, #tpu.memory_space<vmem>>) attributes {dimension_semantics = [#tpu.dimension_semantics<parallel>], iteration_bounds = array<i64: 2>, scalar_prefetch = 0 : i64, scratch_operands = 4 : i64, tpu.core_type = #tpu.core_type<tc>, window_params = [{transform_indices = @transform_0, window_bounds = array<i64: 1, 16, 16, 3>}, {pipeline_mode = #tpu.pipeline_mode<synchronous>, transform_indices = @transform_1, window_bounds = array<i64: 9, 3, 32>}, {pipeline_mode = #tpu.pipeline_mode<synchronous>, transform_indices = @transform_2, window_bounds = array<i64: 1, 32>}, {pipeline_mode = #tpu.pipeline_mode<synchronous>, transform_indices = @transform_3, window_bounds = array<i64: 9, 32, 64>}, {pipeline_mode = #tpu.pipeline_mode<synchronous>, transform_indices = @transform_4, window_bounds = array<i64: 1, 64>}, {pipeline_mode = #tpu.pipeline_mode<synchronous>, transform_indices = @transform_5, window_bounds = array<i64: 576, 128>}, {pipeline_mode = #tpu.pipeline_mode<synchronous>, transform_indices = @transform_6, window_bounds = array<i64: 1, 128>}, {pipeline_mode = #tpu.pipeline_mode<synchronous>, transform_indices = @transform_7, window_bounds = array<i64: 1152, 512>}, {pipeline_mode = #tpu.pipeline_mode<synchronous>, transform_indices = @transform_8, window_bounds = array<i64: 1, 512>}, {pipeline_mode = #tpu.pipeline_mode<synchronous>, transform_indices = @transform_9, window_bounds = array<i64: 512, 128>}, {pipeline_mode = #tpu.pipeline_mode<synchronous>, transform_indices = @transform_10, window_bounds = array<i64: 1, 128>}, {transform_indices = @transform_11, window_bounds = array<i64: 1, 1, 128>}]} {
    %c0 = arith.constant 0 : index
    %c0_0 = arith.constant 0 : index
    %c0_1 = arith.constant 0 : index
    %c0_2 = arith.constant 0 : index
    %0 = vector.load %arg1[%c0, %c0_0, %c0_1, %c0_2] : memref<1x16x16x3xbf16, #tpu.memory_space<vmem>>, vector<1x16x16x3xbf16>
    %cst = arith.constant 0.000000e+00 : bf16
    %1 = vector.broadcast %cst : bf16 to vector<1x16x1x3xbf16>
    %cst_3 = arith.constant 0.000000e+00 : bf16
    %2 = vector.broadcast %cst_3 : bf16 to vector<1x1x18x3xbf16>
    %3 = tpu.concatenate %1, %0, %1 in 2 : vector<1x16x1x3xbf16>, vector<1x16x16x3xbf16>, vector<1x16x1x3xbf16> -> vector<1x16x18x3xbf16>
    %c0_4 = arith.constant 0 : index
    %c1 = arith.constant 1 : index
    %c0_5 = arith.constant 0 : index
    %c0_6 = arith.constant 0 : index
    %4 = vector.load %arg13[%c0_4, %c1, %c0_5, %c0_6] : memref<1x18x18x3xbf16, #tpu.memory_space<vmem>>, vector<1x16x18x3xbf16>
    tpu.vector_store %arg13[%c0_4, %c1, %c0_5, %c0_6], %3 {strides = array<i32>} : memref<1x18x18x3xbf16, #tpu.memory_space<vmem>>, vector<1x16x18x3xbf16>,
    %c0_7 = arith.constant 0 : index
    %c0_8 = arith.constant 0 : index
    %c0_9 = arith.constant 0 : index
    %c0_10 = arith.constant 0 : index
    %5 = vector.load %arg13[%c0_7, %c0_8, %c0_9, %c0_10] : memref<1x18x18x3xbf16, #tpu.memory_space<vmem>>, vector<1x1x18x3xbf16>
    tpu.vector_store %arg13[%c0_7, %c0_8, %c0_9, %c0_10], %2 {strides = array<i32>} : memref<1x18x18x3xbf16, #tpu.memory_space<vmem>>, vector<1x1x18x3xbf16>,
    %c0_11 = arith.constant 0 : index
    %c17 = arith.constant 17 : index
    %c0_12 = arith.constant 0 : index
    %c0_13 = arith.constant 0 : index
    %6 = vector.load %arg13[%c0_11, %c17, %c0_12, %c0_13] : memref<1x18x18x3xbf16, #tpu.memory_space<vmem>>, vector<1x1x18x3xbf16>
    tpu.vector_store %arg13[%c0_11, %c17, %c0_12, %c0_13], %2 {strides = array<i32>} : memref<1x18x18x3xbf16, #tpu.memory_space<vmem>>, vector<1x1x18x3xbf16>,
    %c0_14 = arith.constant 0 : index
    %c0_15 = arith.constant 0 : index
    %c0_16 = arith.constant 0 : index
    %c0_17 = arith.constant 0 : index
    %7 = vector.load %arg13[%c0_14, %c0_15, %c0_16, %c0_17] : memref<1x18x18x3xbf16, #tpu.memory_space<vmem>>, vector<1x16x16x3xbf16>
    %8 = vector.shape_cast %7 : vector<1x16x16x3xbf16> to vector<256x3xbf16>
    %c0_18 = arith.constant 0 : index
    %c0_19 = arith.constant 0 : index
    %c0_20 = arith.constant 0 : index
    %9 = vector.load %arg2[%c0_18, %c0_19, %c0_20] : memref<9x3x32xbf16, #tpu.memory_space<vmem>>, vector<1x3x32xbf16>
    %10 = vector.shape_cast %9 : vector<1x3x32xbf16> to vector<3x32xbf16>
    %cst_21 = arith.constant dense<0.000000e+00> : vector<256x32xf32>
    %11 = tpu.matmul %8, %10, %cst_21 {dimension_numbers = #tpu.dot_dimension_numbers<[1], [0], [0], [1], [0, 0, 1, 1], [], []>} : vector<256x3xbf16>, vector<3x32xbf16>, vector<256x32xf32> -> vector<256x32xf32>
    %c0_22 = arith.constant 0 : index
    %c0_23 = arith.constant 0 : index
    %c1_24 = arith.constant 1 : index
    %c0_25 = arith.constant 0 : index
    %12 = vector.load %arg13[%c0_22, %c0_23, %c1_24, %c0_25] : memref<1x18x18x3xbf16, #tpu.memory_space<vmem>>, vector<1x16x16x3xbf16>
    %13 = vector.shape_cast %12 : vector<1x16x16x3xbf16> to vector<256x3xbf16>
    %c1_26 = arith.constant 1 : index
    %c0_27 = arith.constant 0 : index
    %c0_28 = arith.constant 0 : index
    %14 = vector.load %arg2[%c1_26, %c0_27, %c0_28] : memref<9x3x32xbf16, #tpu.memory_space<vmem>>, vector<1x3x32xbf16>
    %15 = vector.shape_cast %14 : vector<1x3x32xbf16> to vector<3x32xbf16>
    %cst_29 = arith.constant dense<0.000000e+00> : vector<256x32xf32>
    %16 = tpu.matmul %13, %15, %cst_29 {dimension_numbers = #tpu.dot_dimension_numbers<[1], [0], [0], [1], [0, 0, 1, 1], [], []>} : vector<256x3xbf16>, vector<3x32xbf16>, vector<256x32xf32> -> vector<256x32xf32>
    %17 = arith.addf %11, %16 : vector<256x32xf32>
    %c0_30 = arith.constant 0 : index
    %c0_31 = arith.constant 0 : index
    %c2 = arith.constant 2 : index
    %c0_32 = arith.constant 0 : index
    %18 = vector.load %arg13[%c0_30, %c0_31, %c2, %c0_32] : memref<1x18x18x3xbf16, #tpu.memory_space<vmem>>, vector<1x16x16x3xbf16>
    %19 = vector.shape_cast %18 : vector<1x16x16x3xbf16> to vector<256x3xbf16>
    %c2_33 = arith.constant 2 : index
    %c0_34 = arith.constant 0 : index
    %c0_35 = arith.constant 0 : index
    %20 = vector.load %arg2[%c2_33, %c0_34, %c0_35] : memref<9x3x32xbf16, #tpu.memory_space<vmem>>, vector<1x3x32xbf16>
    %21 = vector.shape_cast %20 : vector<1x3x32xbf16> to vector<3x32xbf16>
    %cst_36 = arith.constant dense<0.000000e+00> : vector<256x32xf32>
    %22 = tpu.matmul %19, %21, %cst_36 {dimension_numbers = #tpu.dot_dimension_numbers<[1], [0], [0], [1], [0, 0, 1, 1], [], []>} : vector<256x3xbf16>, vector<3x32xbf16>, vector<256x32xf32> -> vector<256x32xf32>
    %23 = arith.addf %17, %22 : vector<256x32xf32>
    %c0_37 = arith.constant 0 : index
    %c1_38 = arith.constant 1 : index
    %c0_39 = arith.constant 0 : index
    %c0_40 = arith.constant 0 : index
    %24 = vector.load %arg13[%c0_37, %c1_38, %c0_39, %c0_40] : memref<1x18x18x3xbf16, #tpu.memory_space<vmem>>, vector<1x16x16x3xbf16>
    %25 = vector.shape_cast %24 : vector<1x16x16x3xbf16> to vector<256x3xbf16>
    %c3 = arith.constant 3 : index
    %c0_41 = arith.constant 0 : index
    %c0_42 = arith.constant 0 : index
    %26 = vector.load %arg2[%c3, %c0_41, %c0_42] : memref<9x3x32xbf16, #tpu.memory_space<vmem>>, vector<1x3x32xbf16>
    %27 = vector.shape_cast %26 : vector<1x3x32xbf16> to vector<3x32xbf16>
    %cst_43 = arith.constant dense<0.000000e+00> : vector<256x32xf32>
    %28 = tpu.matmul %25, %27, %cst_43 {dimension_numbers = #tpu.dot_dimension_numbers<[1], [0], [0], [1], [0, 0, 1, 1], [], []>} : vector<256x3xbf16>, vector<3x32xbf16>, vector<256x32xf32> -> vector<256x32xf32>
    %29 = arith.addf %23, %28 : vector<256x32xf32>
    %c0_44 = arith.constant 0 : index
    %c1_45 = arith.constant 1 : index
    %c1_46 = arith.constant 1 : index
    %c0_47 = arith.constant 0 : index
    %30 = vector.load %arg13[%c0_44, %c1_45, %c1_46, %c0_47] : memref<1x18x18x3xbf16, #tpu.memory_space<vmem>>, vector<1x16x16x3xbf16>
    %31 = vector.shape_cast %30 : vector<1x16x16x3xbf16> to vector<256x3xbf16>
    %c4 = arith.constant 4 : index
    %c0_48 = arith.constant 0 : index
    %c0_49 = arith.constant 0 : index
    %32 = vector.load %arg2[%c4, %c0_48, %c0_49] : memref<9x3x32xbf16, #tpu.memory_space<vmem>>, vector<1x3x32xbf16>
    %33 = vector.shape_cast %32 : vector<1x3x32xbf16> to vector<3x32xbf16>
    %cst_50 = arith.constant dense<0.000000e+00> : vector<256x32xf32>
    %34 = tpu.matmul %31, %33, %cst_50 {dimension_numbers = #tpu.dot_dimension_numbers<[1], [0], [0], [1], [0, 0, 1, 1], [], []>} : vector<256x3xbf16>, vector<3x32xbf16>, vector<256x32xf32> -> vector<256x32xf32>
    %35 = arith.addf %29, %34 : vector<256x32xf32>
    %c0_51 = arith.constant 0 : index
    %c1_52 = arith.constant 1 : index
    %c2_53 = arith.constant 2 : index
    %c0_54 = arith.constant 0 : index
    %36 = vector.load %arg13[%c0_51, %c1_52, %c2_53, %c0_54] : memref<1x18x18x3xbf16, #tpu.memory_space<vmem>>, vector<1x16x16x3xbf16>
    %37 = vector.shape_cast %36 : vector<1x16x16x3xbf16> to vector<256x3xbf16>
    %c5 = arith.constant 5 : index
    %c0_55 = arith.constant 0 : index
    %c0_56 = arith.constant 0 : index
    %38 = vector.load %arg2[%c5, %c0_55, %c0_56] : memref<9x3x32xbf16, #tpu.memory_space<vmem>>, vector<1x3x32xbf16>
    %39 = vector.shape_cast %38 : vector<1x3x32xbf16> to vector<3x32xbf16>
    %cst_57 = arith.constant dense<0.000000e+00> : vector<256x32xf32>
    %40 = tpu.matmul %37, %39, %cst_57 {dimension_numbers = #tpu.dot_dimension_numbers<[1], [0], [0], [1], [0, 0, 1, 1], [], []>} : vector<256x3xbf16>, vector<3x32xbf16>, vector<256x32xf32> -> vector<256x32xf32>
    %41 = arith.addf %35, %40 : vector<256x32xf32>
    %c0_58 = arith.constant 0 : index
    %c2_59 = arith.constant 2 : index
    %c0_60 = arith.constant 0 : index
    %c0_61 = arith.constant 0 : index
    %42 = vector.load %arg13[%c0_58, %c2_59, %c0_60, %c0_61] : memref<1x18x18x3xbf16, #tpu.memory_space<vmem>>, vector<1x16x16x3xbf16>
    %43 = vector.shape_cast %42 : vector<1x16x16x3xbf16> to vector<256x3xbf16>
    %c6 = arith.constant 6 : index
    %c0_62 = arith.constant 0 : index
    %c0_63 = arith.constant 0 : index
    %44 = vector.load %arg2[%c6, %c0_62, %c0_63] : memref<9x3x32xbf16, #tpu.memory_space<vmem>>, vector<1x3x32xbf16>
    %45 = vector.shape_cast %44 : vector<1x3x32xbf16> to vector<3x32xbf16>
    %cst_64 = arith.constant dense<0.000000e+00> : vector<256x32xf32>
    %46 = tpu.matmul %43, %45, %cst_64 {dimension_numbers = #tpu.dot_dimension_numbers<[1], [0], [0], [1], [0, 0, 1, 1], [], []>} : vector<256x3xbf16>, vector<3x32xbf16>, vector<256x32xf32> -> vector<256x32xf32>
    %47 = arith.addf %41, %46 : vector<256x32xf32>
    %c0_65 = arith.constant 0 : index
    %c2_66 = arith.constant 2 : index
    %c1_67 = arith.constant 1 : index
    %c0_68 = arith.constant 0 : index
    %48 = vector.load %arg13[%c0_65, %c2_66, %c1_67, %c0_68] : memref<1x18x18x3xbf16, #tpu.memory_space<vmem>>, vector<1x16x16x3xbf16>
    %49 = vector.shape_cast %48 : vector<1x16x16x3xbf16> to vector<256x3xbf16>
    %c7 = arith.constant 7 : index
    %c0_69 = arith.constant 0 : index
    %c0_70 = arith.constant 0 : index
    %50 = vector.load %arg2[%c7, %c0_69, %c0_70] : memref<9x3x32xbf16, #tpu.memory_space<vmem>>, vector<1x3x32xbf16>
    %51 = vector.shape_cast %50 : vector<1x3x32xbf16> to vector<3x32xbf16>
    %cst_71 = arith.constant dense<0.000000e+00> : vector<256x32xf32>
    %52 = tpu.matmul %49, %51, %cst_71 {dimension_numbers = #tpu.dot_dimension_numbers<[1], [0], [0], [1], [0, 0, 1, 1], [], []>} : vector<256x3xbf16>, vector<3x32xbf16>, vector<256x32xf32> -> vector<256x32xf32>
    %53 = arith.addf %47, %52 : vector<256x32xf32>
    %c0_72 = arith.constant 0 : index
    %c2_73 = arith.constant 2 : index
    %c2_74 = arith.constant 2 : index
    %c0_75 = arith.constant 0 : index
    %54 = vector.load %arg13[%c0_72, %c2_73, %c2_74, %c0_75] : memref<1x18x18x3xbf16, #tpu.memory_space<vmem>>, vector<1x16x16x3xbf16>
    %55 = vector.shape_cast %54 : vector<1x16x16x3xbf16> to vector<256x3xbf16>
    %c8 = arith.constant 8 : index
    %c0_76 = arith.constant 0 : index
    %c0_77 = arith.constant 0 : index
    %56 = vector.load %arg2[%c8, %c0_76, %c0_77] : memref<9x3x32xbf16, #tpu.memory_space<vmem>>, vector<1x3x32xbf16>
    %57 = vector.shape_cast %56 : vector<1x3x32xbf16> to vector<3x32xbf16>
    %cst_78 = arith.constant dense<0.000000e+00> : vector<256x32xf32>
    %58 = tpu.matmul %55, %57, %cst_78 {dimension_numbers = #tpu.dot_dimension_numbers<[1], [0], [0], [1], [0, 0, 1, 1], [], []>} : vector<256x3xbf16>, vector<3x32xbf16>, vector<256x32xf32> -> vector<256x32xf32>
    %59 = arith.addf %53, %58 : vector<256x32xf32>
    %c0_79 = arith.constant 0 : index
    %c0_80 = arith.constant 0 : index
    %60 = vector.load %arg3[%c0_79, %c0_80] : memref<1x32xf32, #tpu.memory_space<vmem>>, vector<1x32xf32>
    %61 = vector.broadcast %60 : vector<1x32xf32> to vector<256x32xf32>
    %62 = arith.addf %59, %61 : vector<256x32xf32>
    %cst_81 = arith.constant 0.000000e+00 : f32
    %63 = vector.broadcast %cst_81 : f32 to vector<256x32xf32>
    %64 = arith.maximumf %62, %63 : vector<256x32xf32>
    %65 = vector.shape_cast %64 : vector<256x32xf32> to vector<1x16x16x32xf32>
    %66 = arith.truncf %65 : vector<1x16x16x32xf32> to vector<1x16x16x32xbf16>
    %67 = vector.shape_cast %66 : vector<1x16x16x32xbf16> to vector<1x8x2x16x32xbf16>
    %cst_82 = arith.constant dense<0xFF80> : vector<1x8x16x32xbf16>
    %68 = vector.multi_reduction <maximumf>, %67, %cst_82 [2] : vector<1x8x2x16x32xbf16> to vector<1x8x16x32xbf16>
    %69 = vector.shape_cast %68 : vector<1x8x16x32xbf16> to vector<1x8x8x2x32xbf16>
    %cst_83 = arith.constant dense<0xFF80> : vector<1x8x8x32xbf16>
    %70 = vector.multi_reduction <maximumf>, %69, %cst_83 [3] : vector<1x8x8x2x32xbf16> to vector<1x8x8x32xbf16>
    %cst_84 = arith.constant 0.000000e+00 : bf16
    %71 = vector.broadcast %cst_84 : bf16 to vector<1x8x1x32xbf16>
    %cst_85 = arith.constant 0.000000e+00 : bf16
    %72 = vector.broadcast %cst_85 : bf16 to vector<1x1x10x32xbf16>
    %73 = tpu.concatenate %71, %70, %71 in 2 : vector<1x8x1x32xbf16>, vector<1x8x8x32xbf16>, vector<1x8x1x32xbf16> -> vector<1x8x10x32xbf16>
    %c0_86 = arith.constant 0 : index
    %c1_87 = arith.constant 1 : index
    %c0_88 = arith.constant 0 : index
    %c0_89 = arith.constant 0 : index
    %74 = vector.load %arg14[%c0_86, %c1_87, %c0_88, %c0_89] : memref<1x10x10x32xbf16, #tpu.memory_space<vmem>>, vector<1x8x10x32xbf16>
    tpu.vector_store %arg14[%c0_86, %c1_87, %c0_88, %c0_89], %73 {strides = array<i32>} : memref<1x10x10x32xbf16, #tpu.memory_space<vmem>>, vector<1x8x10x32xbf16>,
    %c0_90 = arith.constant 0 : index
    %c0_91 = arith.constant 0 : index
    %c0_92 = arith.constant 0 : index
    %c0_93 = arith.constant 0 : index
    %75 = vector.load %arg14[%c0_90, %c0_91, %c0_92, %c0_93] : memref<1x10x10x32xbf16, #tpu.memory_space<vmem>>, vector<1x1x10x32xbf16>
    tpu.vector_store %arg14[%c0_90, %c0_91, %c0_92, %c0_93], %72 {strides = array<i32>} : memref<1x10x10x32xbf16, #tpu.memory_space<vmem>>, vector<1x1x10x32xbf16>,
    %c0_94 = arith.constant 0 : index
    %c9 = arith.constant 9 : index
    %c0_95 = arith.constant 0 : index
    %c0_96 = arith.constant 0 : index
    %76 = vector.load %arg14[%c0_94, %c9, %c0_95, %c0_96] : memref<1x10x10x32xbf16, #tpu.memory_space<vmem>>, vector<1x1x10x32xbf16>
    tpu.vector_store %arg14[%c0_94, %c9, %c0_95, %c0_96], %72 {strides = array<i32>} : memref<1x10x10x32xbf16, #tpu.memory_space<vmem>>, vector<1x1x10x32xbf16>,
    %c0_97 = arith.constant 0 : index
    %c0_98 = arith.constant 0 : index
    %c0_99 = arith.constant 0 : index
    %c0_100 = arith.constant 0 : index
    %77 = vector.load %arg14[%c0_97, %c0_98, %c0_99, %c0_100] : memref<1x10x10x32xbf16, #tpu.memory_space<vmem>>, vector<1x8x8x32xbf16>
    %78 = vector.shape_cast %77 : vector<1x8x8x32xbf16> to vector<64x32xbf16>
    %c0_101 = arith.constant 0 : index
    %c0_102 = arith.constant 0 : index
    %c0_103 = arith.constant 0 : index
    %79 = vector.load %arg4[%c0_101, %c0_102, %c0_103] : memref<9x32x64xbf16, #tpu.memory_space<vmem>>, vector<1x32x64xbf16>
    %80 = vector.shape_cast %79 : vector<1x32x64xbf16> to vector<32x64xbf16>
    %cst_104 = arith.constant dense<0.000000e+00> : vector<64x64xf32>
    %81 = tpu.matmul %78, %80, %cst_104 {dimension_numbers = #tpu.dot_dimension_numbers<[1], [0], [0], [1], [0, 0, 1, 1], [], []>} : vector<64x32xbf16>, vector<32x64xbf16>, vector<64x64xf32> -> vector<64x64xf32>
    %c0_105 = arith.constant 0 : index
    %c0_106 = arith.constant 0 : index
    %c1_107 = arith.constant 1 : index
    %c0_108 = arith.constant 0 : index
    %82 = vector.load %arg14[%c0_105, %c0_106, %c1_107, %c0_108] : memref<1x10x10x32xbf16, #tpu.memory_space<vmem>>, vector<1x8x8x32xbf16>
    %83 = vector.shape_cast %82 : vector<1x8x8x32xbf16> to vector<64x32xbf16>
    %c1_109 = arith.constant 1 : index
    %c0_110 = arith.constant 0 : index
    %c0_111 = arith.constant 0 : index
    %84 = vector.load %arg4[%c1_109, %c0_110, %c0_111] : memref<9x32x64xbf16, #tpu.memory_space<vmem>>, vector<1x32x64xbf16>
    %85 = vector.shape_cast %84 : vector<1x32x64xbf16> to vector<32x64xbf16>
    %cst_112 = arith.constant dense<0.000000e+00> : vector<64x64xf32>
    %86 = tpu.matmul %83, %85, %cst_112 {dimension_numbers = #tpu.dot_dimension_numbers<[1], [0], [0], [1], [0, 0, 1, 1], [], []>} : vector<64x32xbf16>, vector<32x64xbf16>, vector<64x64xf32> -> vector<64x64xf32>
    %87 = arith.addf %81, %86 : vector<64x64xf32>
    %c0_113 = arith.constant 0 : index
    %c0_114 = arith.constant 0 : index
    %c2_115 = arith.constant 2 : index
    %c0_116 = arith.constant 0 : index
    %88 = vector.load %arg14[%c0_113, %c0_114, %c2_115, %c0_116] : memref<1x10x10x32xbf16, #tpu.memory_space<vmem>>, vector<1x8x8x32xbf16>
    %89 = vector.shape_cast %88 : vector<1x8x8x32xbf16> to vector<64x32xbf16>
    %c2_117 = arith.constant 2 : index
    %c0_118 = arith.constant 0 : index
    %c0_119 = arith.constant 0 : index
    %90 = vector.load %arg4[%c2_117, %c0_118, %c0_119] : memref<9x32x64xbf16, #tpu.memory_space<vmem>>, vector<1x32x64xbf16>
    %91 = vector.shape_cast %90 : vector<1x32x64xbf16> to vector<32x64xbf16>
    %cst_120 = arith.constant dense<0.000000e+00> : vector<64x64xf32>
    %92 = tpu.matmul %89, %91, %cst_120 {dimension_numbers = #tpu.dot_dimension_numbers<[1], [0], [0], [1], [0, 0, 1, 1], [], []>} : vector<64x32xbf16>, vector<32x64xbf16>, vector<64x64xf32> -> vector<64x64xf32>
    %93 = arith.addf %87, %92 : vector<64x64xf32>
    %c0_121 = arith.constant 0 : index
    %c1_122 = arith.constant 1 : index
    %c0_123 = arith.constant 0 : index
    %c0_124 = arith.constant 0 : index
    %94 = vector.load %arg14[%c0_121, %c1_122, %c0_123, %c0_124] : memref<1x10x10x32xbf16, #tpu.memory_space<vmem>>, vector<1x8x8x32xbf16>
    %95 = vector.shape_cast %94 : vector<1x8x8x32xbf16> to vector<64x32xbf16>
    %c3_125 = arith.constant 3 : index
    %c0_126 = arith.constant 0 : index
    %c0_127 = arith.constant 0 : index
    %96 = vector.load %arg4[%c3_125, %c0_126, %c0_127] : memref<9x32x64xbf16, #tpu.memory_space<vmem>>, vector<1x32x64xbf16>
    %97 = vector.shape_cast %96 : vector<1x32x64xbf16> to vector<32x64xbf16>
    %cst_128 = arith.constant dense<0.000000e+00> : vector<64x64xf32>
    %98 = tpu.matmul %95, %97, %cst_128 {dimension_numbers = #tpu.dot_dimension_numbers<[1], [0], [0], [1], [0, 0, 1, 1], [], []>} : vector<64x32xbf16>, vector<32x64xbf16>, vector<64x64xf32> -> vector<64x64xf32>
    %99 = arith.addf %93, %98 : vector<64x64xf32>
    %c0_129 = arith.constant 0 : index
    %c1_130 = arith.constant 1 : index
    %c1_131 = arith.constant 1 : index
    %c0_132 = arith.constant 0 : index
    %100 = vector.load %arg14[%c0_129, %c1_130, %c1_131, %c0_132] : memref<1x10x10x32xbf16, #tpu.memory_space<vmem>>, vector<1x8x8x32xbf16>
    %101 = vector.shape_cast %100 : vector<1x8x8x32xbf16> to vector<64x32xbf16>
    %c4_133 = arith.constant 4 : index
    %c0_134 = arith.constant 0 : index
    %c0_135 = arith.constant 0 : index
    %102 = vector.load %arg4[%c4_133, %c0_134, %c0_135] : memref<9x32x64xbf16, #tpu.memory_space<vmem>>, vector<1x32x64xbf16>
    %103 = vector.shape_cast %102 : vector<1x32x64xbf16> to vector<32x64xbf16>
    %cst_136 = arith.constant dense<0.000000e+00> : vector<64x64xf32>
    %104 = tpu.matmul %101, %103, %cst_136 {dimension_numbers = #tpu.dot_dimension_numbers<[1], [0], [0], [1], [0, 0, 1, 1], [], []>} : vector<64x32xbf16>, vector<32x64xbf16>, vector<64x64xf32> -> vector<64x64xf32>
    %105 = arith.addf %99, %104 : vector<64x64xf32>
    %c0_137 = arith.constant 0 : index
    %c1_138 = arith.constant 1 : index
    %c2_139 = arith.constant 2 : index
    %c0_140 = arith.constant 0 : index
    %106 = vector.load %arg14[%c0_137, %c1_138, %c2_139, %c0_140] : memref<1x10x10x32xbf16, #tpu.memory_space<vmem>>, vector<1x8x8x32xbf16>
    %107 = vector.shape_cast %106 : vector<1x8x8x32xbf16> to vector<64x32xbf16>
    %c5_141 = arith.constant 5 : index
    %c0_142 = arith.constant 0 : index
    %c0_143 = arith.constant 0 : index
    %108 = vector.load %arg4[%c5_141, %c0_142, %c0_143] : memref<9x32x64xbf16, #tpu.memory_space<vmem>>, vector<1x32x64xbf16>
    %109 = vector.shape_cast %108 : vector<1x32x64xbf16> to vector<32x64xbf16>
    %cst_144 = arith.constant dense<0.000000e+00> : vector<64x64xf32>
    %110 = tpu.matmul %107, %109, %cst_144 {dimension_numbers = #tpu.dot_dimension_numbers<[1], [0], [0], [1], [0, 0, 1, 1], [], []>} : vector<64x32xbf16>, vector<32x64xbf16>, vector<64x64xf32> -> vector<64x64xf32>
    %111 = arith.addf %105, %110 : vector<64x64xf32>
    %c0_145 = arith.constant 0 : index
    %c2_146 = arith.constant 2 : index
    %c0_147 = arith.constant 0 : index
    %c0_148 = arith.constant 0 : index
    %112 = vector.load %arg14[%c0_145, %c2_146, %c0_147, %c0_148] : memref<1x10x10x32xbf16, #tpu.memory_space<vmem>>, vector<1x8x8x32xbf16>
    %113 = vector.shape_cast %112 : vector<1x8x8x32xbf16> to vector<64x32xbf16>
    %c6_149 = arith.constant 6 : index
    %c0_150 = arith.constant 0 : index
    %c0_151 = arith.constant 0 : index
    %114 = vector.load %arg4[%c6_149, %c0_150, %c0_151] : memref<9x32x64xbf16, #tpu.memory_space<vmem>>, vector<1x32x64xbf16>
    %115 = vector.shape_cast %114 : vector<1x32x64xbf16> to vector<32x64xbf16>
    %cst_152 = arith.constant dense<0.000000e+00> : vector<64x64xf32>
    %116 = tpu.matmul %113, %115, %cst_152 {dimension_numbers = #tpu.dot_dimension_numbers<[1], [0], [0], [1], [0, 0, 1, 1], [], []>} : vector<64x32xbf16>, vector<32x64xbf16>, vector<64x64xf32> -> vector<64x64xf32>
    %117 = arith.addf %111, %116 : vector<64x64xf32>
    %c0_153 = arith.constant 0 : index
    %c2_154 = arith.constant 2 : index
    %c1_155 = arith.constant 1 : index
    %c0_156 = arith.constant 0 : index
    %118 = vector.load %arg14[%c0_153, %c2_154, %c1_155, %c0_156] : memref<1x10x10x32xbf16, #tpu.memory_space<vmem>>, vector<1x8x8x32xbf16>
    %119 = vector.shape_cast %118 : vector<1x8x8x32xbf16> to vector<64x32xbf16>
    %c7_157 = arith.constant 7 : index
    %c0_158 = arith.constant 0 : index
    %c0_159 = arith.constant 0 : index
    %120 = vector.load %arg4[%c7_157, %c0_158, %c0_159] : memref<9x32x64xbf16, #tpu.memory_space<vmem>>, vector<1x32x64xbf16>
    %121 = vector.shape_cast %120 : vector<1x32x64xbf16> to vector<32x64xbf16>
    %cst_160 = arith.constant dense<0.000000e+00> : vector<64x64xf32>
    %122 = tpu.matmul %119, %121, %cst_160 {dimension_numbers = #tpu.dot_dimension_numbers<[1], [0], [0], [1], [0, 0, 1, 1], [], []>} : vector<64x32xbf16>, vector<32x64xbf16>, vector<64x64xf32> -> vector<64x64xf32>
    %123 = arith.addf %117, %122 : vector<64x64xf32>
    %c0_161 = arith.constant 0 : index
    %c2_162 = arith.constant 2 : index
    %c2_163 = arith.constant 2 : index
    %c0_164 = arith.constant 0 : index
    %124 = vector.load %arg14[%c0_161, %c2_162, %c2_163, %c0_164] : memref<1x10x10x32xbf16, #tpu.memory_space<vmem>>, vector<1x8x8x32xbf16>
    %125 = vector.shape_cast %124 : vector<1x8x8x32xbf16> to vector<64x32xbf16>
    %c8_165 = arith.constant 8 : index
    %c0_166 = arith.constant 0 : index
    %c0_167 = arith.constant 0 : index
    %126 = vector.load %arg4[%c8_165, %c0_166, %c0_167] : memref<9x32x64xbf16, #tpu.memory_space<vmem>>, vector<1x32x64xbf16>
    %127 = vector.shape_cast %126 : vector<1x32x64xbf16> to vector<32x64xbf16>
    %cst_168 = arith.constant dense<0.000000e+00> : vector<64x64xf32>
    %128 = tpu.matmul %125, %127, %cst_168 {dimension_numbers = #tpu.dot_dimension_numbers<[1], [0], [0], [1], [0, 0, 1, 1], [], []>} : vector<64x32xbf16>, vector<32x64xbf16>, vector<64x64xf32> -> vector<64x64xf32>
    %129 = arith.addf %123, %128 : vector<64x64xf32>
    %c0_169 = arith.constant 0 : index
    %c0_170 = arith.constant 0 : index
    %130 = vector.load %arg5[%c0_169, %c0_170] : memref<1x64xf32, #tpu.memory_space<vmem>>, vector<1x64xf32>
    %131 = vector.broadcast %130 : vector<1x64xf32> to vector<64x64xf32>
    %132 = arith.addf %129, %131 : vector<64x64xf32>
    %cst_171 = arith.constant 0.000000e+00 : f32
    %133 = vector.broadcast %cst_171 : f32 to vector<64x64xf32>
    %134 = arith.maximumf %132, %133 : vector<64x64xf32>
    %135 = vector.shape_cast %134 : vector<64x64xf32> to vector<1x8x8x64xf32>
    %136 = arith.truncf %135 : vector<1x8x8x64xf32> to vector<1x8x8x64xbf16>
    %137 = vector.shape_cast %136 : vector<1x8x8x64xbf16> to vector<1x4x2x8x64xbf16>
    %cst_172 = arith.constant dense<0xFF80> : vector<1x4x8x64xbf16>
    %138 = vector.multi_reduction <maximumf>, %137, %cst_172 [2] : vector<1x4x2x8x64xbf16> to vector<1x4x8x64xbf16>
    %139 = vector.shape_cast %138 : vector<1x4x8x64xbf16> to vector<1x4x4x2x64xbf16>
    %cst_173 = arith.constant dense<0xFF80> : vector<1x4x4x64xbf16>
    %140 = vector.multi_reduction <maximumf>, %139, %cst_173 [3] : vector<1x4x4x2x64xbf16> to vector<1x4x4x64xbf16>
    %cst_174 = arith.constant 0.000000e+00 : bf16
    %141 = vector.broadcast %cst_174 : bf16 to vector<1x4x1x64xbf16>
    %cst_175 = arith.constant 0.000000e+00 : bf16
    %142 = vector.broadcast %cst_175 : bf16 to vector<1x1x6x64xbf16>
    %143 = tpu.concatenate %141, %140, %141 in 2 : vector<1x4x1x64xbf16>, vector<1x4x4x64xbf16>, vector<1x4x1x64xbf16> -> vector<1x4x6x64xbf16>
    %c0_176 = arith.constant 0 : index
    %c1_177 = arith.constant 1 : index
    %c0_178 = arith.constant 0 : index
    %c0_179 = arith.constant 0 : index
    %144 = vector.load %arg15[%c0_176, %c1_177, %c0_178, %c0_179] : memref<1x6x6x64xbf16, #tpu.memory_space<vmem>>, vector<1x4x6x64xbf16>
    tpu.vector_store %arg15[%c0_176, %c1_177, %c0_178, %c0_179], %143 {strides = array<i32>} : memref<1x6x6x64xbf16, #tpu.memory_space<vmem>>, vector<1x4x6x64xbf16>,
    %c0_180 = arith.constant 0 : index
    %c0_181 = arith.constant 0 : index
    %c0_182 = arith.constant 0 : index
    %c0_183 = arith.constant 0 : index
    %145 = vector.load %arg15[%c0_180, %c0_181, %c0_182, %c0_183] : memref<1x6x6x64xbf16, #tpu.memory_space<vmem>>, vector<1x1x6x64xbf16>
    tpu.vector_store %arg15[%c0_180, %c0_181, %c0_182, %c0_183], %142 {strides = array<i32>} : memref<1x6x6x64xbf16, #tpu.memory_space<vmem>>, vector<1x1x6x64xbf16>,
    %c0_184 = arith.constant 0 : index
    %c5_185 = arith.constant 5 : index
    %c0_186 = arith.constant 0 : index
    %c0_187 = arith.constant 0 : index
    %146 = vector.load %arg15[%c0_184, %c5_185, %c0_186, %c0_187] : memref<1x6x6x64xbf16, #tpu.memory_space<vmem>>, vector<1x1x6x64xbf16>
    tpu.vector_store %arg15[%c0_184, %c5_185, %c0_186, %c0_187], %142 {strides = array<i32>} : memref<1x6x6x64xbf16, #tpu.memory_space<vmem>>, vector<1x1x6x64xbf16>,
    %c0_188 = arith.constant 0 : index
    %c0_189 = arith.constant 0 : index
    %c0_190 = arith.constant 0 : index
    %c0_191 = arith.constant 0 : index
    %147 = vector.load %arg15[%c0_188, %c0_189, %c0_190, %c0_191] : memref<1x6x6x64xbf16, #tpu.memory_space<vmem>>, vector<1x4x4x64xbf16>
    %c0_192 = arith.constant 0 : index
    %c0_193 = arith.constant 0 : index
    %c1_194 = arith.constant 1 : index
    %c0_195 = arith.constant 0 : index
    %148 = vector.load %arg15[%c0_192, %c0_193, %c1_194, %c0_195] : memref<1x6x6x64xbf16, #tpu.memory_space<vmem>>, vector<1x4x4x64xbf16>
    %c0_196 = arith.constant 0 : index
    %c0_197 = arith.constant 0 : index
    %c2_198 = arith.constant 2 : index
    %c0_199 = arith.constant 0 : index
    %149 = vector.load %arg15[%c0_196, %c0_197, %c2_198, %c0_199] : memref<1x6x6x64xbf16, #tpu.memory_space<vmem>>, vector<1x4x4x64xbf16>
    %c0_200 = arith.constant 0 : index
    %c1_201 = arith.constant 1 : index
    %c0_202 = arith.constant 0 : index
    %c0_203 = arith.constant 0 : index
    %150 = vector.load %arg15[%c0_200, %c1_201, %c0_202, %c0_203] : memref<1x6x6x64xbf16, #tpu.memory_space<vmem>>, vector<1x4x4x64xbf16>
    %c0_204 = arith.constant 0 : index
    %c1_205 = arith.constant 1 : index
    %c1_206 = arith.constant 1 : index
    %c0_207 = arith.constant 0 : index
    %151 = vector.load %arg15[%c0_204, %c1_205, %c1_206, %c0_207] : memref<1x6x6x64xbf16, #tpu.memory_space<vmem>>, vector<1x4x4x64xbf16>
    %c0_208 = arith.constant 0 : index
    %c1_209 = arith.constant 1 : index
    %c2_210 = arith.constant 2 : index
    %c0_211 = arith.constant 0 : index
    %152 = vector.load %arg15[%c0_208, %c1_209, %c2_210, %c0_211] : memref<1x6x6x64xbf16, #tpu.memory_space<vmem>>, vector<1x4x4x64xbf16>
    %c0_212 = arith.constant 0 : index
    %c2_213 = arith.constant 2 : index
    %c0_214 = arith.constant 0 : index
    %c0_215 = arith.constant 0 : index
    %153 = vector.load %arg15[%c0_212, %c2_213, %c0_214, %c0_215] : memref<1x6x6x64xbf16, #tpu.memory_space<vmem>>, vector<1x4x4x64xbf16>
    %c0_216 = arith.constant 0 : index
    %c2_217 = arith.constant 2 : index
    %c1_218 = arith.constant 1 : index
    %c0_219 = arith.constant 0 : index
    %154 = vector.load %arg15[%c0_216, %c2_217, %c1_218, %c0_219] : memref<1x6x6x64xbf16, #tpu.memory_space<vmem>>, vector<1x4x4x64xbf16>
    %c0_220 = arith.constant 0 : index
    %c2_221 = arith.constant 2 : index
    %c2_222 = arith.constant 2 : index
    %c0_223 = arith.constant 0 : index
    %155 = vector.load %arg15[%c0_220, %c2_221, %c2_222, %c0_223] : memref<1x6x6x64xbf16, #tpu.memory_space<vmem>>, vector<1x4x4x64xbf16>
    %156 = tpu.concatenate %147, %148, %149, %150, %151, %152, %153, %154, %155 in 3 : vector<1x4x4x64xbf16>, vector<1x4x4x64xbf16>, vector<1x4x4x64xbf16>, vector<1x4x4x64xbf16>, vector<1x4x4x64xbf16>, vector<1x4x4x64xbf16>, vector<1x4x4x64xbf16>, vector<1x4x4x64xbf16>, vector<1x4x4x64xbf16> -> vector<1x4x4x576xbf16>
    %157 = vector.shape_cast %156 : vector<1x4x4x576xbf16> to vector<16x576xbf16>
    %c0_224 = arith.constant 0 : index
    %c0_225 = arith.constant 0 : index
    %158 = vector.load %arg6[%c0_224, %c0_225] : memref<576x128xbf16, #tpu.memory_space<vmem>>, vector<576x128xbf16>
    %cst_226 = arith.constant dense<0.000000e+00> : vector<16x128xf32>
    %159 = tpu.matmul %157, %158, %cst_226 {dimension_numbers = #tpu.dot_dimension_numbers<[1], [0], [0], [1], [0, 0, 1, 1], [], []>} : vector<16x576xbf16>, vector<576x128xbf16>, vector<16x128xf32> -> vector<16x128xf32>
    %c0_227 = arith.constant 0 : index
    %c0_228 = arith.constant 0 : index
    %160 = vector.load %arg7[%c0_227, %c0_228] : memref<1x128xf32, #tpu.memory_space<vmem>>, vector<1x128xf32>
    %161 = vector.broadcast %160 : vector<1x128xf32> to vector<16x128xf32>
    %162 = arith.addf %159, %161 : vector<16x128xf32>
    %cst_229 = arith.constant 0.000000e+00 : f32
    %163 = vector.broadcast %cst_229 : f32 to vector<16x128xf32>
    %164 = arith.maximumf %162, %163 : vector<16x128xf32>
    %165 = vector.shape_cast %164 : vector<16x128xf32> to vector<1x4x4x128xf32>
    %166 = arith.truncf %165 : vector<1x4x4x128xf32> to vector<1x4x4x128xbf16>
    %167 = vector.shape_cast %166 : vector<1x4x4x128xbf16> to vector<1x2x2x4x128xbf16>
    %cst_230 = arith.constant dense<0xFF80> : vector<1x2x4x128xbf16>
    %168 = vector.multi_reduction <maximumf>, %167, %cst_230 [2] : vector<1x2x2x4x128xbf16> to vector<1x2x4x128xbf16>
    %169 = vector.shape_cast %168 : vector<1x2x4x128xbf16> to vector<1x2x2x2x128xbf16>
    %cst_231 = arith.constant dense<0xFF80> : vector<1x2x2x128xbf16>
    %170 = vector.multi_reduction <maximumf>, %169, %cst_231 [3] : vector<1x2x2x2x128xbf16> to vector<1x2x2x128xbf16>
    %cst_232 = arith.constant 0.000000e+00 : bf16
    %171 = vector.broadcast %cst_232 : bf16 to vector<1x2x1x128xbf16>
    %cst_233 = arith.constant 0.000000e+00 : bf16
    %172 = vector.broadcast %cst_233 : bf16 to vector<1x1x4x128xbf16>
    %173 = tpu.concatenate %171, %170, %171 in 2 : vector<1x2x1x128xbf16>, vector<1x2x2x128xbf16>, vector<1x2x1x128xbf16> -> vector<1x2x4x128xbf16>
    %c0_234 = arith.constant 0 : index
    %c1_235 = arith.constant 1 : index
    %c0_236 = arith.constant 0 : index
    %c0_237 = arith.constant 0 : index
    %174 = vector.load %arg16[%c0_234, %c1_235, %c0_236, %c0_237] : memref<1x4x4x128xbf16, #tpu.memory_space<vmem>>, vector<1x2x4x128xbf16>
    tpu.vector_store %arg16[%c0_234, %c1_235, %c0_236, %c0_237], %173 {strides = array<i32>} : memref<1x4x4x128xbf16, #tpu.memory_space<vmem>>, vector<1x2x4x128xbf16>,
    %c0_238 = arith.constant 0 : index
    %c0_239 = arith.constant 0 : index
    %c0_240 = arith.constant 0 : index
    %c0_241 = arith.constant 0 : index
    %175 = vector.load %arg16[%c0_238, %c0_239, %c0_240, %c0_241] : memref<1x4x4x128xbf16, #tpu.memory_space<vmem>>, vector<1x1x4x128xbf16>
    tpu.vector_store %arg16[%c0_238, %c0_239, %c0_240, %c0_241], %172 {strides = array<i32>} : memref<1x4x4x128xbf16, #tpu.memory_space<vmem>>, vector<1x1x4x128xbf16>,
    %c0_242 = arith.constant 0 : index
    %c3_243 = arith.constant 3 : index
    %c0_244 = arith.constant 0 : index
    %c0_245 = arith.constant 0 : index
    %176 = vector.load %arg16[%c0_242, %c3_243, %c0_244, %c0_245] : memref<1x4x4x128xbf16, #tpu.memory_space<vmem>>, vector<1x1x4x128xbf16>
    tpu.vector_store %arg16[%c0_242, %c3_243, %c0_244, %c0_245], %172 {strides = array<i32>} : memref<1x4x4x128xbf16, #tpu.memory_space<vmem>>, vector<1x1x4x128xbf16>,
    %c0_246 = arith.constant 0 : index
    %c0_247 = arith.constant 0 : index
    %c0_248 = arith.constant 0 : index
    %c0_249 = arith.constant 0 : index
    %177 = vector.load %arg16[%c0_246, %c0_247, %c0_248, %c0_249] : memref<1x4x4x128xbf16, #tpu.memory_space<vmem>>, vector<1x2x2x128xbf16>
    %c0_250 = arith.constant 0 : index
    %c0_251 = arith.constant 0 : index
    %c1_252 = arith.constant 1 : index
    %c0_253 = arith.constant 0 : index
    %178 = vector.load %arg16[%c0_250, %c0_251, %c1_252, %c0_253] : memref<1x4x4x128xbf16, #tpu.memory_space<vmem>>, vector<1x2x2x128xbf16>
    %c0_254 = arith.constant 0 : index
    %c0_255 = arith.constant 0 : index
    %c2_256 = arith.constant 2 : index
    %c0_257 = arith.constant 0 : index
    %179 = vector.load %arg16[%c0_254, %c0_255, %c2_256, %c0_257] : memref<1x4x4x128xbf16, #tpu.memory_space<vmem>>, vector<1x2x2x128xbf16>
    %c0_258 = arith.constant 0 : index
    %c1_259 = arith.constant 1 : index
    %c0_260 = arith.constant 0 : index
    %c0_261 = arith.constant 0 : index
    %180 = vector.load %arg16[%c0_258, %c1_259, %c0_260, %c0_261] : memref<1x4x4x128xbf16, #tpu.memory_space<vmem>>, vector<1x2x2x128xbf16>
    %c0_262 = arith.constant 0 : index
    %c1_263 = arith.constant 1 : index
    %c1_264 = arith.constant 1 : index
    %c0_265 = arith.constant 0 : index
    %181 = vector.load %arg16[%c0_262, %c1_263, %c1_264, %c0_265] : memref<1x4x4x128xbf16, #tpu.memory_space<vmem>>, vector<1x2x2x128xbf16>
    %c0_266 = arith.constant 0 : index
    %c1_267 = arith.constant 1 : index
    %c2_268 = arith.constant 2 : index
    %c0_269 = arith.constant 0 : index
    %182 = vector.load %arg16[%c0_266, %c1_267, %c2_268, %c0_269] : memref<1x4x4x128xbf16, #tpu.memory_space<vmem>>, vector<1x2x2x128xbf16>
    %c0_270 = arith.constant 0 : index
    %c2_271 = arith.constant 2 : index
    %c0_272 = arith.constant 0 : index
    %c0_273 = arith.constant 0 : index
    %183 = vector.load %arg16[%c0_270, %c2_271, %c0_272, %c0_273] : memref<1x4x4x128xbf16, #tpu.memory_space<vmem>>, vector<1x2x2x128xbf16>
    %c0_274 = arith.constant 0 : index
    %c2_275 = arith.constant 2 : index
    %c1_276 = arith.constant 1 : index
    %c0_277 = arith.constant 0 : index
    %184 = vector.load %arg16[%c0_274, %c2_275, %c1_276, %c0_277] : memref<1x4x4x128xbf16, #tpu.memory_space<vmem>>, vector<1x2x2x128xbf16>
    %c0_278 = arith.constant 0 : index
    %c2_279 = arith.constant 2 : index
    %c2_280 = arith.constant 2 : index
    %c0_281 = arith.constant 0 : index
    %185 = vector.load %arg16[%c0_278, %c2_279, %c2_280, %c0_281] : memref<1x4x4x128xbf16, #tpu.memory_space<vmem>>, vector<1x2x2x128xbf16>
    %186 = tpu.concatenate %177, %178, %179, %180, %181, %182, %183, %184, %185 in 3 : vector<1x2x2x128xbf16>, vector<1x2x2x128xbf16>, vector<1x2x2x128xbf16>, vector<1x2x2x128xbf16>, vector<1x2x2x128xbf16>, vector<1x2x2x128xbf16>, vector<1x2x2x128xbf16>, vector<1x2x2x128xbf16>, vector<1x2x2x128xbf16> -> vector<1x2x2x1152xbf16>
    %187 = vector.shape_cast %186 : vector<1x2x2x1152xbf16> to vector<4x1152xbf16>
    %c0_282 = arith.constant 0 : index
    %c0_283 = arith.constant 0 : index
    %188 = vector.load %arg8[%c0_282, %c0_283] : memref<1152x512xbf16, #tpu.memory_space<vmem>>, vector<1152x512xbf16>
    %cst_284 = arith.constant dense<0.000000e+00> : vector<4x512xf32>
    %189 = tpu.matmul %187, %188, %cst_284 {dimension_numbers = #tpu.dot_dimension_numbers<[1], [0], [0], [1], [0, 0, 1, 1], [], []>} : vector<4x1152xbf16>, vector<1152x512xbf16>, vector<4x512xf32> -> vector<4x512xf32>
    %c0_285 = arith.constant 0 : index
    %c0_286 = arith.constant 0 : index
    %190 = vector.load %arg9[%c0_285, %c0_286] : memref<1x512xf32, #tpu.memory_space<vmem>>, vector<1x512xf32>
    %191 = vector.broadcast %190 : vector<1x512xf32> to vector<4x512xf32>
    %192 = arith.addf %189, %191 : vector<4x512xf32>
    %cst_287 = arith.constant 0.000000e+00 : f32
    %193 = vector.broadcast %cst_287 : f32 to vector<4x512xf32>
    %194 = arith.maximumf %192, %193 : vector<4x512xf32>
    %195 = vector.shape_cast %194 : vector<4x512xf32> to vector<1x2x2x512xf32>
    %196 = arith.truncf %195 : vector<1x2x2x512xf32> to vector<1x2x2x512xbf16>
    %197 = vector.shape_cast %196 : vector<1x2x2x512xbf16> to vector<1x1x2x2x512xbf16>
    %cst_288 = arith.constant dense<0xFF80> : vector<1x1x2x512xbf16>
    %198 = vector.multi_reduction <maximumf>, %197, %cst_288 [2] : vector<1x1x2x2x512xbf16> to vector<1x1x2x512xbf16>
    %199 = vector.shape_cast %198 : vector<1x1x2x512xbf16> to vector<1x1x1x2x512xbf16>
    %cst_289 = arith.constant dense<0xFF80> : vector<1x1x1x512xbf16>
    %200 = vector.multi_reduction <maximumf>, %199, %cst_289 [3] : vector<1x1x1x2x512xbf16> to vector<1x1x1x512xbf16>
    %201 = vector.shape_cast %200 : vector<1x1x1x512xbf16> to vector<1x512xbf16>
    %c0_290 = arith.constant 0 : index
    %c0_291 = arith.constant 0 : index
    %202 = vector.load %arg10[%c0_290, %c0_291] : memref<512x128xbf16, #tpu.memory_space<vmem>>, vector<512x128xbf16>
    %cst_292 = arith.constant dense<0.000000e+00> : vector<1x128xf32>
    %203 = tpu.matmul %201, %202, %cst_292 {dimension_numbers = #tpu.dot_dimension_numbers<[1], [0], [0], [1], [0, 0, 1, 1], [], []>} : vector<1x512xbf16>, vector<512x128xbf16>, vector<1x128xf32> -> vector<1x128xf32>
    %c0_293 = arith.constant 0 : index
    %c0_294 = arith.constant 0 : index
    %204 = vector.load %arg11[%c0_293, %c0_294] : memref<1x128xf32, #tpu.memory_space<vmem>>, vector<1x128xf32>
    %205 = arith.addf %203, %204 : vector<1x128xf32>
    %206 = vector.shape_cast %205 : vector<1x128xf32> to vector<1x1x128xf32>
    %c0_295 = arith.constant 0 : index
    %c0_296 = arith.constant 0 : index
    %c0_297 = arith.constant 0 : index
    %207 = vector.load %arg12[%c0_295, %c0_296, %c0_297] : memref<1x1x128xf32, #tpu.memory_space<vmem>>, vector<1x1x128xf32>
    tpu.vector_store %arg12[%c0_295, %c0_296, %c0_297], %206 {strides = array<i32>} : memref<1x1x128xf32, #tpu.memory_space<vmem>>, vector<1x1x128xf32>,
    return
  }
  func.func @transform_0(%arg0: i32) -> (i32, i32, i32, i32) {
    %c0_i32 = arith.constant 0 : i32
    %c0_i32_0 = arith.constant 0 : i32
    %c0_i32_1 = arith.constant 0 : i32
    %c0_i32_2 = arith.constant 0 : i32
    return %arg0, %c0_i32, %c0_i32_0, %c0_i32_1 : i32, i32, i32, i32
  }
  func.func @transform_1(%arg0: i32) -> (i32, i32, i32) {
    %c0_i32 = arith.constant 0 : i32
    %c0_i32_0 = arith.constant 0 : i32
    %c0_i32_1 = arith.constant 0 : i32
    %c0_i32_2 = arith.constant 0 : i32
    return %c0_i32, %c0_i32_0, %c0_i32_1 : i32, i32, i32
  }
  func.func @transform_2(%arg0: i32) -> (i32, i32) {
    %c0_i32 = arith.constant 0 : i32
    %c0_i32_0 = arith.constant 0 : i32
    %c0_i32_1 = arith.constant 0 : i32
    return %c0_i32, %c0_i32_0 : i32, i32
  }
  func.func @transform_3(%arg0: i32) -> (i32, i32, i32) {
    %c0_i32 = arith.constant 0 : i32
    %c0_i32_0 = arith.constant 0 : i32
    %c0_i32_1 = arith.constant 0 : i32
    %c0_i32_2 = arith.constant 0 : i32
    return %c0_i32, %c0_i32_0, %c0_i32_1 : i32, i32, i32
  }
  func.func @transform_4(%arg0: i32) -> (i32, i32) {
    %c0_i32 = arith.constant 0 : i32
    %c0_i32_0 = arith.constant 0 : i32
    %c0_i32_1 = arith.constant 0 : i32
    return %c0_i32, %c0_i32_0 : i32, i32
  }
  func.func @transform_5(%arg0: i32) -> (i32, i32) {
    %c0_i32 = arith.constant 0 : i32
    %c0_i32_0 = arith.constant 0 : i32
    %c0_i32_1 = arith.constant 0 : i32
    return %c0_i32, %c0_i32_0 : i32, i32
  }
  func.func @transform_6(%arg0: i32) -> (i32, i32) {
    %c0_i32 = arith.constant 0 : i32
    %c0_i32_0 = arith.constant 0 : i32
    %c0_i32_1 = arith.constant 0 : i32
    return %c0_i32, %c0_i32_0 : i32, i32
  }
  func.func @transform_7(%arg0: i32) -> (i32, i32) {
    %c0_i32 = arith.constant 0 : i32
    %c0_i32_0 = arith.constant 0 : i32
    %c0_i32_1 = arith.constant 0 : i32
    return %c0_i32, %c0_i32_0 : i32, i32
  }
  func.func @transform_8(%arg0: i32) -> (i32, i32) {
    %c0_i32 = arith.constant 0 : i32
    %c0_i32_0 = arith.constant 0 : i32
    %c0_i32_1 = arith.constant 0 : i32
    return %c0_i32, %c0_i32_0 : i32, i32
  }
  func.func @transform_9(%arg0: i32) -> (i32, i32) {
    %c0_i32 = arith.constant 0 : i32
    %c0_i32_0 = arith.constant 0 : i32
    %c0_i32_1 = arith.constant 0 : i32
    return %c0_i32, %c0_i32_0 : i32, i32
  }
  func.func @transform_10(%arg0: i32) -> (i32, i32) {
    %c0_i32 = arith.constant 0 : i32
    %c0_i32_0 = arith.constant 0 : i32
    %c0_i32_1 = arith.constant 0 : i32
    return %c0_i32, %c0_i32_0 : i32, i32
  }
  func.func @transform_11(%arg0: i32) -> (i32, i32, i32) {
    %c0_i32 = arith.constant 0 : i32
    %c0_i32_0 = arith.constant 0 : i32
    %c0_i32_1 = arith.constant 0 : i32
    return %arg0, %c0_i32, %c0_i32_0 : i32, i32, i32
  }
}

</mosaic_0001>

<bundles_post_ra>
// kernel: vgg_forward.1
= control target key start
LH: loop header
LB: loop body
LE: loop exit
PB: predicated region body
PF: predicated region fallthrough
CT: control target
= control target key end

     0   :  { %s20080_s0 = inlined_call_operand.vmem [shape: bf16[2,16,16,3], index: 0, kind: input, shape index: {}]   ;;  %s20081_s1 = inlined_call_operand.vmem [shape: bf16[9,3,32], index: 1, kind: input, shape index: {}]   ;;  %s20082_s2 = inlined_call_operand.vmem [shape: f32[1,32], index: 2, kind: input, shape index: {}]   ;;  %s20083_s3 = inlined_call_operand.vmem [shape: bf16[9,32,64], index: 3, kind: input, shape index: {}]   ;;  %s20084_s4 = inlined_call_operand.vmem [shape: f32[1,64], index: 4, kind: input, shape index: {}]   ;;  %s20085_s5 = inlined_call_operand.vmem [shape: bf16[576,128], index: 5, kind: input, shape index: {}]   ;;  %s20086_s6 = inlined_call_operand.vmem [shape: f32[1,128], index: 6, kind: input, shape index: {}]   ;;  %s20087_s7 = inlined_call_operand.vmem [shape: bf16[1152,512], index: 7, kind: input, shape index: {}]   ;;  %s20088_s8 = inlined_call_operand.vmem [shape: f32[1,512], index: 8, kind: input, shape index: {}]   ;;  %s20089_s9 = inlined_call_operand.vmem [shape: bf16[512,128], index: 9, kind: input, shape index: {}]   ;;  %s20090_s10 = inlined_call_operand.vmem [shape: f32[1,128], index: 10, kind: input, shape index: {}]   ;;  %s20091_s11 = inlined_call_operand.hbm [shape: f32[2,1,128], index: 11, kind: output, shape index: {}]  }
   0x1   :  { %20114 = sst [smem:[#allocation18_spill]] %s20080_s0 }
   0x2   :  { %16 = vsyncpa [#allocation7], 0 }
   0x3   :  { %18 = vsyncpa [#allocation7 + $0x1], 0  ;;  %s16196_s17 = smov 0   ;;  %s16198_s18 = smov 0  }
   0x4   :  { %s16200_s19 = smov 0   ;;  %s16202_s20 = smov 0  }
   0x5 LB: > { %s16217_s21 = sadd.s32 4294967295, %s16126_s20   ;;  %s13318_s22 = sadd.s32 4294967294, %s16126_s20   ;;  %s16126_s20 = sphi %s16202_s20, %s20202_s20   ;;  %s16122_s19 = sphi %s16200_s19, %s20201_s19   ;;  %s16118_s18 = sphi %s16198_s18, %s20200_s18   ;;  %s16114_s17 = sphi %s16196_s17, %s20199_s17  }
   0x6   : > { %s16221_s23 = sadd.s32 1, %s16126_s20   ;;  %s267_s24 = sadd.s32 1, %s16122_s19 }
   0x7   : > { %s264_s25 = ssub.s32 %s16126_s20, %s16221_s23  ;;  %p277_p0 = scmp.ne.s32.totalorder %s16122_s19, %s16118_s18 }
   0x8   : > { %p265_p1 = scmp.eq.s32.totalorder %s264_s25, 0  ;;  %p278_p2 = scmp.eq.s32.totalorder %s16217_s21, 1 }
   0x9   : > { %p283_p3 = scmp.ne.s32.totalorder %s16118_s18, %s16114_s17  ;;  %p284_p4 = scmp.eq.s32.totalorder %s13318_s22, 1 }
   0xa   : > { %s16232_s26 = scalar_select %p265_p1, %s16122_s19, %s267_s24  }
   0xb   : > { %p16234_p5 = por %p278_p2, %p277_p0  ;;  %p16238_p6 = por %p284_p4, %p283_p3 }
   0xc   : > { %p13321_p7 = scmp.ge.s32.totalorder %s16126_s20, 1  ;;  %p340_p8 = scmp.lt.s32.totalorder %s16126_s20, 3 }
   0xe   : > { %p341_p9 = pnand %p13321_p7, %p340_p8 }
  0x10   : > { %344 = sbr.rel (%p341_p9) target bundleno = 2952 (0xb88), region = 64 }
  0x17   : > { %vm20112_vm0 = vcmask 1040384   ;;  %v13388_v0 = vld [vmem:[%s20081_s1 + $0x2] sm:$0x3]  ;;  %vm20113_vm1 = vcmask 1041408   ;;  %vm854_vm2 = vcmask 19456   ;;  %vm857_vm3 = vcmask 16384  }
  0x18   : > { %v943_v1 = vld [vmem:[%s20081_s1] sm:$0x3]  ;;  %v16128_v2 = vmov 65535   ;;  %v20092_v4 = vmov 0   ;;  %p379_p10 = scmp.lt.s32.totalorder %s16217_s21, 1  ;;  %s20117_s0 = sld [smem:[#allocation18_spill]] }
  0x19   : > { %v1448_v3 = vsel %vm20112_vm0, 4294967295, %v16128_v2  ;;  %904 = vst.msk [vmem:[#allocation2] sm:$0xf] %vm854_vm2, %v20092_v4  ;;  %905 = vst.msk [vmem:[#allocation2 + $0x4] sm:$0xf] %vm854_vm2, %v20092_v4  ;;  %vm1397_vm7 = vcmask 23552  }
  0x1a   : > { %906 = vst.msk [vmem:[#allocation2 + $0x8] sm:$0x1] %vm857_vm3, %v20092_v4  ;;  %910 = vst.msk [vmem:[#allocation2 + $0xd4] sm:$0x1] %vm857_vm3, %v20092_v4  ;;  %v16266_v5 = vsel %vm20113_vm1, %v1448_v3, 0  ;;  %s380_s14 = scalar_select %p379_p10, %s16217_s21, 1 }
  0x1b   : > { %908 = vst.msk [vmem:[#allocation2 + $0xcc] sm:$0xf] %vm854_vm2, %v20092_v4  ;;  %909 = vst.msk [vmem:[#allocation2 + $0xd0] sm:$0xf] %vm854_vm2, %v20092_v4  ;;  %v1451_v6 = vand.u32 %v13388_v0, %v16266_v5  ;;  %vm960_vm4 = vsmask.f32 3328  ;;  %v16271_v7 = vand.u32 %v16266_v5, %v943_v1 }
  0x1c   : > { %10224 = vst [vmem:[#allocation5] sm:$0x3] %v20092_v4  ;;  %10226 = vst [vmem:[#allocation5 + $0x6] sm:$0x3] %v20092_v4  ;;  %vm961_vm5 = vsmask.f32 7440 }
  0x1d   : > { %vm643_vm6 = vsmask.f32 256  ;;  %14606 = vmatprep.subr.bf16.mxu0 %v1451_v6  ;;  %s14305_s15 = sshll.u32 %s380_s14, 7  ;;  %vm16285_vm8 = vmor %vm960_vm4, %vm961_vm5  ;;  %v20120_v33 = vmov 0  ;;  %vm1954_vm10 = vcmask 1042432   ;;  %vm1955_vm11 = vcmask 1046532  }
  0x1e   : > { %14607 = vmatpush3.bf16.msra.mxu0 %v1451_v6  ;;  %s16278_s24 = scalar_lea.vmem %s20117_s0, %s14305_s15  ;;  %vm16291_vm9 = vmand %vm20112_vm0, %vm643_vm6  ;;  %vm6017_vm13 = vcmask 253952   ;;  %vm7124_vm14 = vcmask 257024   ;;  %vm5559_vm15 = vcmask 261120   ;;  %vm6982_vm4 = vcmask 1044484   ;;  %s16131_s15 = smov 64  }
  0x1f   : > { %14640 = vmatprep.subr.bf16.mxu0 %v16271_v7  ;;  %v15430_v16 = vld [vmem:[%s16278_s24] sm:$0xff]   ;;  %v15431_v17 = vld [vmem:[%s16278_s24 + $0x8] sm:$0xff]   ;;  %v15432_v29 = vld [vmem:[%s16278_s24 + $0x10] sm:$0xff]   ;;  %v20121_v33 = vsel %vm16291_vm9, 4294967295, %v20120_v33  ;;  %vm6984_vm5 = vcmask 1045509   ;;  %vm6986_vm6 = vcmask 1046534  }
  0x20   : > { %v911_v8 = vld [vmem:[#allocation2] sm:$0xf]  ;;  %v912_v9 = vld [vmem:[#allocation2 + $0x4] sm:$0xf]  ;;  %v499_v23 = vshrl.u32 %v15430_v16, 16  ;;  %v502_v24 = vshll.u32 %v15430_v16, 16  ;;  %vm16646_vm12 = vmor %vm1954_vm10, %vm1955_vm11 }
  0x21   : > { %v944_v10 = vld [vmem:[#allocation2 + $0x8] sm:$0x1]  ;;  %v964_v11 = vshrl.u32 %v911_v8, 16  ;;  %v967_v12 = vshll.u32 %v911_v8, 16  ;;  %v973_v13 = vshll.u32 %v912_v9, 16  ;;  %v977_v14 = vshrl.u32 %v912_v9, 16 }
  0x22   : > { %v983_v15 = vshll.u32 %v944_v10, 16  ;;  %v506_v25 = vshrl.u32 %v15431_v17, 16  ;;  %v509_v28 = vshll.u32 %v15431_v17, 16  ;;  %v501_v31 = vrot.slane %v499_v23, 7  ;;  %20122 = vst [vmem:[#allocation9_spill] sm:$0xff] %v20121_v33  ;;  %v15433_v38 = vld [vmem:[%s16278_s24 + $0x18] sm:$0xff]  }
  0x23   : > { %v966_v18 = vrot.slane %v964_v11, 4  ;;  %v969_v19 = vrot.slane %v967_v12, 5  ;;  %v975_v20 = vrot.slane %v973_v13, 5  ;;  %v979_v21 = vrot.slane %v977_v14, 4  ;;  %v16297_v39 = vld [vmem:[%s16278_s24 + $0x20] sm:$0xff]   ;;  %v15435_v48 = vld [vmem:[%s16278_s24 + $0x28] sm:$0xff]  }
  0x24   : > { %v985_v22 = vrot.slane %v983_v15, 5  ;;  %v508_v32 = vrot.slane %v506_v25, 7  ;;  %v513_v36 = vshrl.u32 %v15432_v29, 16  ;;  %v516_v37 = vshll.u32 %v15432_v29, 16  ;;  %v15436_v53 = vld [vmem:[%s16278_s24 + $0x30] sm:$0xff]   ;;  %s377_s25 = sand.u32 1, %s16118_s18  }
  0x25   : > { %v970_v26 = vor.u32 %v969_v19, %v966_v18  ;;  %v980_v27 = vor.u32 %v979_v21, %v975_v20  ;;  %v504_v40 = vor.u32 %v502_v24, %v501_v31  ;;  %v661_v41 = vsel %vm16291_vm9, %v501_v31, 0  ;;  %v13469_v13 = vld [vmem:[%s20081_s1 + $0x4] sm:$0x3]  ;;  %s14302_s30 = sshll.u32 %s16217_s21, 4  ;;  %s378_s12 = scalar_lea.vmem [#allocation6], %s377_s25 }
  0x26   : > { %v511_v42 = vor.u32 %v509_v28, %v508_v32  ;;  %v662_v43 = vsel %vm16291_vm9, %v508_v32, 0  ;;  %v13342_v46 = vcombine.low %v661_v41, %v661_v41  ;;  %v515_v52 = vrot.slane %v513_v36, 7  ;;  %s13263_s13 = sshll.u32 %s378_s12, 4  ;;  %s20038_s16 = scalar_lea.hbm %s20091_s11, %s14302_s30  ;;  %s20040_s13 = int_to_ptr.vmem [resolvable:$true] %s13263_s13 }
  0x27   : > { %v971_v34 = vrot.slane %v970_v26, 4  ;;  %v981_v35 = vrot.slane %v980_v27, 4  ;;  %v13345_v47 = vcombine.low %v662_v43, %v662_v43  ;;  %v645_v50 = vsel %vm16291_vm9, 0, %v504_v40  ;;  %s13251_s22 = scalar_lea.sflag [#allocation7], %s377_s25  ;;  %s16064_s21 = scalar_lea.vmem %s20040_s13, 16 }
  0x28   : > { %v646_v51 = vsel %vm16291_vm9, 0, %v511_v42  ;;  %v13340_v54 = vcombine.low %v645_v50, %v645_v50  ;;  %v13341_v55 = vcombine.high %v645_v50, %v645_v50  ;;  %858 = vst.msk [vmem:[#allocation2 + $0x14] sm:$0x1] %vm857_vm3, %v13342_v46  ;;  %v518_v58 = vor.u32 %v516_v37, %v515_v52  ;;  %p16065_p11 = scmp.ne.s32.totalorder %s20040_s13, %s16064_s21 }
  0x29   : > { %v976_v44 = vsel %vm16285_vm8, %v971_v34, %v975_v20  ;;  %v986_v45 = vsel %vm16285_vm8, %v981_v35, %v985_v22  ;;  %v13343_v56 = vcombine.low %v646_v51, %v646_v51  ;;  %v13344_v57 = vcombine.high %v646_v51, %v646_v51  ;;  %861 = vst.msk [vmem:[#allocation2 + $0x20] sm:$0x1] %vm857_vm3, %v13345_v47 }
  0x2a   : > { %v13389_v49 = vcombine.low %v976_v44, %v986_v45  ;;  %v663_v59 = vsel %vm16291_vm9, %v515_v52, 0  ;;  %v520_v60 = vshrl.u32 %v15433_v38, 16  ;;  %v523_v61 = vshll.u32 %v15433_v38, 16  ;;  %855 = vst.msk [vmem:[#allocation2 + $0xc] sm:$0xf] %vm854_vm2, %v13340_v54  ;;  %p16066_p12 = pnand %p16065_p11, %p16234_p5 }
  0x2b   : > { %856 = vst.msk [vmem:[#allocation2 + $0x10] sm:$0xf] %vm854_vm2, %v13341_v55  ;;  %859 = vst.msk [vmem:[#allocation2 + $0x18] sm:$0xf] %vm854_vm2, %v13343_v56  ;;  %v13348_v62 = vcombine.low %v663_v59, %v663_v59  ;;  %v527_v63 = vshrl.u32 %v16297_v39, 16  ;;  %v530_v0 = vshll.u32 %v16297_v39, 16  ;;  %v16345_v25 = vand.u32 %v13469_v13, %v16266_v5 }
  0x2c   : > { %14608 = vmatprep.mubr.msk.bf16.mxu0 %vm1397_vm7, %v13389_v49  ;;  %860 = vst.msk [vmem:[#allocation2 + $0x1c] sm:$0xf] %vm854_vm2, %v13344_v57  ;;  %v534_v1 = vshrl.u32 %v15435_v48, 16  ;;  %v647_v2 = vsel %vm16291_vm9, 0, %v518_v58  ;;  %v522_v3 = vrot.slane %v520_v60, 7  ;;  %v537_v6 = vshll.u32 %v15435_v48, 16  ;;  %p16067_p13 = pneg %p16066_p12 }
  0x2d   : > { %v541_v8 = vshrl.u32 %v15436_v53, 16  ;;  %v13346_v9 = vcombine.low %v647_v2, %v647_v2  ;;  %v13347_v10 = vcombine.high %v647_v2, %v647_v2  ;;  %864 = vst.msk [vmem:[#allocation2 + $0x2c] sm:$0x1] %vm857_vm3, %v13348_v62  ;;  %v529_v11 = vrot.slane %v527_v63, 7 }
  0x2e   : > { %v536_v12 = vrot.slane %v534_v1, 7  ;;  %v525_v14 = vor.u32 %v523_v61, %v522_v3  ;;  %v664_v15 = vsel %vm16291_vm9, %v522_v3, 0  ;;  %v544_v17 = vshll.u32 %v15436_v53, 16 }
  0x2f   : > { %v16332_v16 = vrot.slane %v541_v8, 7  ;;  %862 = vst.msk [vmem:[#allocation2 + $0x24] sm:$0xf] %vm854_vm2, %v13346_v9  ;;  %863 = vst.msk [vmem:[#allocation2 + $0x28] sm:$0xf] %vm854_vm2, %v13347_v10  ;;  %v13351_v18 = vcombine.low %v664_v15, %v664_v15  ;;  %v665_v19 = vsel %vm16291_vm9, %v529_v11, 0  ;;  %v16349_v29 = vor.u32 %v530_v0, %v529_v11 }
  0x30   : > { %v16338_v20 = vld [vmem:[#allocation2 + $0x14] sm:$0x1]  ;;  %v946_v21 = vld [vmem:[#allocation2 + $0x20] sm:$0x1]  ;;  %v648_v22 = vsel %vm16291_vm9, 0, %v525_v14  ;;  %v13354_v23 = vcombine.low %v665_v19, %v665_v19  ;;  %v666_v24 = vsel %vm16291_vm9, %v536_v12, 0  ;;  %v16356_v36 = vor.u32 %v537_v6, %v536_v12 }
  0x31   : > { %v1007_v26 = vshll.u32 %v16338_v20, 16  ;;  %v1031_v27 = vshll.u32 %v946_v21, 16  ;;  %v13349_v28 = vcombine.low %v648_v22, %v648_v22  ;;  %867 = vst.msk [vmem:[#allocation2 + $0x38] sm:$0x1] %vm857_vm3, %v13351_v18  ;;  %v16351_v31 = vld [vmem:[#allocation2 + $0xc] sm:$0xf]  ;;  %v13350_v35 = vcombine.high %v648_v22, %v648_v22 }
  0x32   : > { %v16353_v32 = vld [vmem:[#allocation2 + $0x10] sm:$0xf]  ;;  %v915_v34 = vld [vmem:[#allocation2 + $0x18] sm:$0xf]  ;;  %870 = vst.msk [vmem:[#allocation2 + $0x44] sm:$0x1] %vm857_vm3, %v13354_v23  ;;  %v13357_v37 = vcombine.low %v666_v24, %v666_v24  ;;  %v16359_v38 = vor.u32 %v544_v17, %v16332_v16 }
  0x33   : > { %v988_v39 = vshrl.u32 %v16351_v31, 16  ;;  %v991_v40 = vshll.u32 %v16351_v31, 16  ;;  %v997_v41 = vshll.u32 %v16353_v32, 16  ;;  %v1001_v42 = vshrl.u32 %v16353_v32, 16  ;;  %v916_v43 = vld [vmem:[#allocation2 + $0x1c] sm:$0xf] }
  0x34   : > { %865 = vst.msk [vmem:[#allocation2 + $0x30] sm:$0xf] %vm854_vm2, %v13349_v28  ;;  %v1009_v44 = vrot.slane %v1007_v26, 5  ;;  %v1966_v45 = vrot.slane %v16353_v32, 5  ;;  %v1012_v46 = vshrl.u32 %v915_v34, 16  ;;  %v1015_v47 = vshll.u32 %v915_v34, 16 }
  0x35   : > { %866 = vst.msk [vmem:[#allocation2 + $0x34] sm:$0xf] %vm854_vm2, %v13350_v35  ;;  %v990_v48 = vrot.slane %v988_v39, 4  ;;  %v993_v49 = vrot.slane %v991_v40, 5  ;;  %v999_v50 = vrot.slane %v997_v41, 5  ;;  %v1003_v51 = vrot.slane %v1001_v42, 4 }
  0x36   : > { %873 = vst.msk [vmem:[#allocation2 + $0x50] sm:$0x1] %vm857_vm3, %v13357_v37  ;;  %v1014_v52 = vrot.slane %v1012_v46, 4  ;;  %v1017_v53 = vrot.slane %v1015_v47, 5  ;;  %v1021_v54 = vshll.u32 %v916_v43, 16  ;;  %v1025_v55 = vshrl.u32 %v916_v43, 16 }
  0x37   : > { %v917_v56 = vld [vmem:[#allocation2 + $0x24] sm:$0xf]  ;;  %v994_v57 = vor.u32 %v993_v49, %v990_v48  ;;  %v1004_v58 = vor.u32 %v1003_v51, %v999_v50  ;;  %v1033_v59 = vrot.slane %v1031_v27, 5  ;;  %v918_v60 = vld [vmem:[#allocation2 + $0x28] sm:$0xf]  ;;  %vm7056_vm11 = vcmask 1044480  }
  0x38   : > { %v1036_v61 = vshrl.u32 %v917_v56, 16  ;;  %v1018_v62 = vor.u32 %v1017_v53, %v1014_v52  ;;  %v1023_v63 = vrot.slane %v1021_v54, 5  ;;  %v1027_v0 = vrot.slane %v1025_v55, 4  ;;  %v947_v1 = vld [vmem:[#allocation2 + $0x2c] sm:$0x1] }
  0x39   : > { %v1039_v2 = vshll.u32 %v917_v56, 16  ;;  %v995_v3 = vrot.slane %v994_v57, 4  ;;  %v1005_v6 = vrot.slane %v1004_v58, 4  ;;  %v1045_v9 = vshll.u32 %v918_v60, 16  ;;  %v948_v22 = vld [vmem:[#allocation2 + $0x38] sm:$0x1] }
  0x3a   : > { %v1038_v8 = vrot.slane %v1036_v61, 4  ;;  %v1019_v10 = vrot.slane %v1018_v62, 4  ;;  %v1028_v11 = vor.u32 %v1027_v0, %v1023_v63  ;;  %v1049_v13 = vshrl.u32 %v918_v60, 16  ;;  %v949_v28 = vld [vmem:[#allocation2 + $0x44] sm:$0x1]  ;;  %v15437_v57 = vld [vmem:[%s16278_s24 + $0x38] sm:$0xff]  }
  0x3b   : > { %v1041_v12 = vrot.slane %v1039_v2, 5  ;;  %v919_v14 = vld [vmem:[#allocation2 + $0x30] sm:$0xf]  ;;  %v1000_v15 = vsel %vm16285_vm8, %v995_v3, %v999_v50  ;;  %v1010_v17 = vsel %vm16285_vm8, %v1005_v6, %v1009_v44  ;;  %v1047_v18 = vrot.slane %v1045_v9, 5  ;;  %v15438_v62 = vld [vmem:[%s16278_s24 + $0x40] sm:$0xff]   ;;  %v16402_v6 = vld [vmem:[%s16278_s24 + $0x58] sm:$0xff]  }
  0x3c   : > { %v1055_v19 = vshll.u32 %v947_v1, 16  ;;  %v920_v21 = vld [vmem:[#allocation2 + $0x34] sm:$0xf]  ;;  %v13390_v23 = vcombine.low %v1000_v15, %v1010_v17  ;;  %v1024_v24 = vsel %vm16285_vm8, %v1019_v10, %v1023_v63  ;;  %v1029_v26 = vrot.slane %v1028_v11, 4  ;;  %v16389_v63 = vld [vmem:[%s16278_s24 + $0x48] sm:$0xff]  }
  0x3d   : > { %v1042_v27 = vor.u32 %v1041_v12, %v1038_v8  ;;  %v1051_v34 = vrot.slane %v1049_v13, 4  ;;  %v1060_v37 = vshrl.u32 %v919_v14, 16  ;;  %v1063_v39 = vshll.u32 %v919_v14, 16  ;;  %v950_v53 = vld [vmem:[#allocation2 + $0x50] sm:$0x1]  ;;  %v16407_v12 = vld [vmem:[%s16278_s24 + $0x60] sm:$0xff]  }
  0x3e   : > { %v1057_v35 = vrot.slane %v1055_v19, 5  ;;  %14609 = vmatmul.mubr.msk.bf16.vlgmr.msra.gmra.mrb[0].mxu0 %vm1397_vm7, %v13390_v23  ;;  %v1034_v40 = vsel %vm16285_vm8, %v1029_v26, %v1033_v59  ;;  %v1069_v42 = vshll.u32 %v920_v21, 16  ;;  %v1073_v43 = vshrl.u32 %v920_v21, 16  ;;  %v16399_v3 = vld [vmem:[%s16278_s24 + $0x50] sm:$0xff]  }
  0x3f   : > { %v1043_v41 = vrot.slane %v1042_v27, 4  ;;  %14641 = vmatpush3.bf16.msra.mxu0 %v16271_v7  ;;  %v13391_v44 = vcombine.low %v1024_v24, %v1034_v40  ;;  %v1052_v46 = vor.u32 %v1051_v34, %v1047_v18  ;;  %v1062_v47 = vrot.slane %v1060_v37, 4 }
  0x40   : > { %v1065_v48 = vrot.slane %v1063_v39, 5  ;;  %v1071_v50 = vrot.slane %v1069_v42, 5  ;;  %v1075_v51 = vrot.slane %v1073_v43, 4  ;;  %v1079_v52 = vshll.u32 %v948_v22, 16  ;;  %14674 = vmatprep.subr.bf16.mxu0 %v16345_v25 }
  0x41   : > { %v1048_v49 = vsel %vm16285_vm8, %v1043_v41, %v1047_v18  ;;  %14612 = vmatprep.mubr.msk.bf16.mxu0 %vm1397_vm7, %v13391_v44  ;;  %v1053_v7 = vrot.slane %v1052_v46, 4  ;;  %v649_v55 = vsel %vm16291_vm9, 0, %v16349_v29  ;;  %v1103_v56 = vshll.u32 %v949_v28, 16 }
  0x42   : > { %v1066_v54 = vor.u32 %v1065_v48, %v1062_v47  ;;  %v1076_v58 = vor.u32 %v1075_v51, %v1071_v50  ;;  %v1081_v59 = vrot.slane %v1079_v52, 5  ;;  %v13352_v60 = vcombine.low %v649_v55, %v649_v55 }
  0x43   : > { %v13353_v61 = vcombine.high %v649_v55, %v649_v55  ;;  %v1058_v0 = vsel %vm16285_vm8, %v1053_v7, %v1057_v35  ;;  %v16393_v2 = vrot.slane %v1103_v56, 5  ;;  %v650_v29 = vsel %vm16291_vm9, 0, %v16356_v36 }
  0x44   : > { %v1067_v1 = vrot.slane %v1066_v54, 4  ;;  %v13392_v8 = vcombine.low %v1048_v49, %v1058_v0  ;;  %v1077_v9 = vrot.slane %v1076_v58, 4  ;;  %868 = vst.msk [vmem:[#allocation2 + $0x3c] sm:$0xf] %vm854_vm2, %v13352_v60  ;;  %v13355_v10 = vcombine.low %v650_v29, %v650_v29 }
  0x45   : > { %869 = vst.msk [vmem:[#allocation2 + $0x40] sm:$0xf] %vm854_vm2, %v13353_v61  ;;  %v13356_v11 = vcombine.high %v650_v29, %v650_v29  ;;  %v1127_v14 = vshll.u32 %v950_v53, 16  ;;  %v651_v36 = vsel %vm16291_vm9, 0, %v16359_v38  ;;  %v667_v15 = vsel %vm16291_vm9, %v16332_v16, 0 }
  0x46   : > { %v1072_v13 = vsel %vm16285_vm8, %v1067_v1, %v1071_v50  ;;  %14613 = vmatmul.mubr.msk.bf16.gmra.mrb[4].mxu0 %vm1397_vm7, %v13392_v8  ;;  %v1082_v17 = vsel %vm16285_vm8, %v1077_v9, %v1081_v59  ;;  %871 = vst.msk [vmem:[#allocation2 + $0x48] sm:$0xf] %vm854_vm2, %v13355_v10  ;;  %v13358_v18 = vcombine.low %v651_v36, %v651_v36  ;;  %v548_v38 = vshrl.u32 %v15437_v57, 16 }
  0x47   : > { %872 = vst.msk [vmem:[#allocation2 + $0x4c] sm:$0xf] %vm854_vm2, %v13356_v11  ;;  %v13359_v19 = vcombine.high %v651_v36, %v651_v36  ;;  %v13360_v21 = vcombine.low %v667_v15, %v667_v15  ;;  %v13393_v22 = vcombine.low %v1072_v13, %v1082_v17  ;;  %v16422_v23 = vrot.slane %v1127_v14, 5 }
  0x48   : > { %v551_v24 = vshll.u32 %v15437_v57, 16  ;;  %874 = vst.msk [vmem:[#allocation2 + $0x54] sm:$0xf] %vm854_vm2, %v13358_v18  ;;  %v555_v16 = vshrl.u32 %v15438_v62, 16  ;;  %v558_v26 = vshll.u32 %v15438_v62, 16  ;;  %v562_v27 = vshrl.u32 %v16389_v63, 16 }
  0x49   : > { %875 = vst.msk [vmem:[#allocation2 + $0x58] sm:$0xf] %vm854_vm2, %v13359_v19  ;;  %v565_v28 = vshll.u32 %v16389_v63, 16  ;;  %14616 = vmatprep.mubr.msk.bf16.mxu0 %vm1397_vm7, %v13393_v22  ;;  %v550_v34 = vrot.slane %v548_v38, 7  ;;  %v569_v35 = vshrl.u32 %v16399_v3, 16  ;;  %v572_v37 = vshll.u32 %v16399_v3, 16 }
  0x4a   : > { %876 = vst.msk [vmem:[#allocation2 + $0x5c] sm:$0x1] %vm857_vm3, %v13360_v21  ;;  %v576_v39 = vshrl.u32 %v16402_v6, 16  ;;  %v557_v40 = vrot.slane %v555_v16, 7  ;;  %v16433_v41 = vrot.slane %v562_v27, 7  ;;  %v579_v42 = vshll.u32 %v16402_v6, 16 }
  0x4b   : > { %v583_v43 = vshrl.u32 %v16407_v12, 16  ;;  %v921_v44 = vld [vmem:[#allocation2 + $0x3c] sm:$0xf]  ;;  %v553_v47 = vor.u32 %v551_v24, %v550_v34  ;;  %v668_v48 = vsel %vm16291_vm9, %v550_v34, 0  ;;  %v16439_v49 = vrot.slane %v569_v35, 7 }
  0x4c   : > { %v922_v46 = vld [vmem:[#allocation2 + $0x40] sm:$0xf]  ;;  %v13422_v50 = vcombine.low %v16351_v31, %v16353_v32  ;;  %v1084_v51 = vshrl.u32 %v921_v44, 16  ;;  %v1087_v52 = vshll.u32 %v921_v44, 16  ;;  %v13363_v57 = vcombine.low %v668_v48, %v668_v48 }
  0x4d   : > { %v1093_v53 = vshll.u32 %v922_v46, 16  ;;  %v1097_v7 = vshrl.u32 %v922_v46, 16  ;;  %v923_v54 = vld [vmem:[#allocation2 + $0x48] sm:$0xf]  ;;  %v652_v56 = vsel %vm16291_vm9, 0, %v553_v47  ;;  %v560_v58 = vor.u32 %v558_v26, %v557_v40 }
  0x4e   : > { %v924_v55 = vld [vmem:[#allocation2 + $0x4c] sm:$0xf]  ;;  %v16447_v59 = vsel %vm16291_vm9, %v557_v40, 0  ;;  %v1086_v60 = vrot.slane %v1084_v51, 4  ;;  %v1089_v61 = vrot.slane %v1087_v52, 5  ;;  %v1108_v1 = vshrl.u32 %v923_v54, 16 }
  0x4f   : > { %v1095_v62 = vrot.slane %v1093_v53, 5  ;;  %v1099_v0 = vrot.slane %v1097_v7, 4  ;;  %v1111_v29 = vshll.u32 %v923_v54, 16  ;;  %v1117_v8 = vshll.u32 %v924_v55, 16  ;;  %v925_v10 = vld [vmem:[#allocation2 + $0x54] sm:$0xf] }
  0x50   : > { %v1121_v9 = vshrl.u32 %v924_v55, 16  ;;  %879 = vst.msk [vmem:[#allocation2 + $0x68] sm:$0x1] %vm857_vm3, %v13363_v57  ;;  %v1090_v11 = vor.u32 %v1089_v61, %v1086_v60  ;;  %v926_v14 = vld [vmem:[#allocation2 + $0x58] sm:$0xf]  ;;  %v1132_v15 = vshrl.u32 %v925_v10, 16  ;;  %v13361_v60 = vcombine.low %v652_v56, %v652_v56 }
  0x51   : > { %v1100_v13 = vor.u32 %v1099_v0, %v1095_v62  ;;  %v951_v36 = vld [vmem:[#allocation2 + $0x5c] sm:$0x1]  ;;  %v1135_v17 = vshll.u32 %v925_v10, 16  ;;  %v1110_v18 = vrot.slane %v1108_v1, 4  ;;  %v1113_v19 = vrot.slane %v1111_v29, 5 }
  0x52   : > { %v1119_v21 = vrot.slane %v1117_v8, 5  ;;  %v1123_v22 = vrot.slane %v1121_v9, 4  ;;  %v1091_v38 = vrot.slane %v1090_v11, 4  ;;  %v1134_v16 = vrot.slane %v1132_v15, 4  ;;  %877 = vst.msk [vmem:[#allocation2 + $0x60] sm:$0xf] %vm854_vm2, %v13361_v60 }
  0x53   : > { %v1101_v24 = vrot.slane %v1100_v13, 4  ;;  %v1137_v26 = vrot.slane %v1135_v17, 5  ;;  %v1114_v27 = vor.u32 %v1113_v19, %v1110_v18  ;;  %v1141_v35 = vshll.u32 %v926_v14, 16  ;;  %v17144_v33 = vld [vmem:[#allocation2 + $0x58] sm:$0xf] }
  0x54   : > { %v1124_v34 = vor.u32 %v1123_v22, %v1119_v21  ;;  %v1145_v40 = vshrl.u32 %v926_v14, 16  ;;  %v1096_v44 = vsel %vm16285_vm8, %v1091_v38, %v1095_v62  ;;  %v1151_v48 = vshll.u32 %v951_v36, 16 }
  0x55   : > { %v1106_v46 = vsel %vm16285_vm8, %v1101_v24, %v16393_v2  ;;  %v1138_v47 = vor.u32 %v1137_v26, %v1134_v16  ;;  %v1115_v52 = vrot.slane %v1114_v27, 4  ;;  %v1143_v7 = vrot.slane %v1141_v35, 5 }
  0x56   : > { %v13394_v51 = vcombine.low %v1096_v44, %v1106_v46  ;;  %v1125_v53 = vrot.slane %v1124_v34, 4  ;;  %v1147_v55 = vrot.slane %v1145_v40, 4  ;;  %v1153_v57 = vrot.slane %v1151_v48, 5 }
  0x57   : > { %v1139_v54 = vrot.slane %v1138_v47, 4  ;;  %v952_v61 = vld [vmem:[#allocation2 + $0x68] sm:$0x1]  ;;  %v1120_v62 = vsel %vm16285_vm8, %v1115_v52, %v1119_v21  ;;  %v13362_v0 = vcombine.high %v652_v56, %v652_v56  ;;  %v653_v9 = vsel %vm16291_vm9, 0, %v560_v58 }
  0x58   : > { %14617 = vmatmul.mubr.msk.bf16.gmra.mrb[8].mxu0 %vm1397_vm7, %v13394_v51  ;;  %v1130_v2 = vsel %vm16285_vm8, %v1125_v53, %v16422_v23  ;;  %v1175_v1 = vshll.u32 %v952_v61, 16  ;;  %v1148_v8 = vor.u32 %v1147_v55, %v1143_v7  ;;  %v13364_v11 = vcombine.low %v653_v9, %v653_v9  ;;  %v16470_v23 = vld [vmem:[%s16278_s24 + $0x68] sm:$0xff]  }
  0x59   : > { %v13395_v29 = vcombine.low %v1120_v62, %v1130_v2  ;;  %v1144_v10 = vsel %vm16285_vm8, %v1139_v54, %v1143_v7  ;;  %878 = vst.msk [vmem:[#allocation2 + $0x64] sm:$0xf] %vm854_vm2, %v13362_v0  ;;  %v13365_v13 = vcombine.high %v653_v9, %v653_v9  ;;  %v13366_v14 = vcombine.low %v16447_v59, %v16447_v59  ;;  %v16506_v16 = vld [vmem:[#allocation2 + $0x60] sm:$0xf] }
  0x5a   : > { %v1149_v56 = vrot.slane %v1148_v8, 4  ;;  %v567_v36 = vor.u32 %v565_v28, %v16433_v41  ;;  %v670_v58 = vsel %vm16291_vm9, %v16433_v41, 0  ;;  %v574_v15 = vor.u32 %v572_v37, %v16439_v49  ;;  %880 = vst.msk [vmem:[#allocation2 + $0x6c] sm:$0xf] %vm854_vm2, %v13364_v11 }
  0x5b   : > { %14620 = vmatprep.mubr.msk.bf16.mxu0 %vm1397_vm7, %v13395_v29  ;;  %881 = vst.msk [vmem:[#allocation2 + $0x70] sm:$0xf] %vm854_vm2, %v13365_v13  ;;  %v13369_v59 = vcombine.low %v670_v58, %v670_v58  ;;  %v671_v63 = vsel %vm16291_vm9, %v16439_v49, 0  ;;  %v578_v28 = vrot.slane %v576_v39, 7  ;;  %v585_v41 = vrot.slane %v583_v43, 7 }
  0x5c   : > { %882 = vst.msk [vmem:[#allocation2 + $0x74] sm:$0x1] %vm857_vm3, %v13366_v14  ;;  %v1154_v3 = vsel %vm16285_vm8, %v1149_v56, %v1153_v57  ;;  %v654_v37 = vsel %vm16291_vm9, 0, %v567_v36  ;;  %v655_v17 = vsel %vm16291_vm9, 0, %v574_v15  ;;  %v13372_v18 = vcombine.low %v671_v63, %v671_v63 }
  0x5d   : > { %v13396_v19 = vcombine.low %v1144_v10, %v1154_v3  ;;  %v13367_v21 = vcombine.low %v654_v37, %v654_v37  ;;  %v13368_v22 = vcombine.high %v654_v37, %v654_v37  ;;  %885 = vst.msk [vmem:[#allocation2 + $0x80] sm:$0x1] %vm857_vm3, %v13369_v59  ;;  %v13370_v49 = vcombine.low %v655_v17, %v655_v17 }
  0x5e   : > { %v13371_v39 = vcombine.high %v655_v17, %v655_v17  ;;  %888 = vst.msk [vmem:[#allocation2 + $0x8c] sm:$0x1] %vm857_vm3, %v13372_v18  ;;  %v581_v43 = vor.u32 %v579_v42, %v578_v28  ;;  %v672_v38 = vsel %vm16291_vm9, %v578_v28, 0  ;;  %v586_v24 = vshll.u32 %v16407_v12, 16 }
  0x5f   : > { %v1177_v26 = vrot.slane %v1175_v1, 5  ;;  %883 = vst.msk [vmem:[#allocation2 + $0x78] sm:$0xf] %vm854_vm2, %v13367_v21  ;;  %884 = vst.msk [vmem:[#allocation2 + $0x7c] sm:$0xf] %vm854_vm2, %v13368_v22  ;;  %v13375_v27 = vcombine.low %v672_v38, %v672_v38  ;;  %v673_v6 = vsel %vm16291_vm9, %v585_v41, 0 }
  0x60   : > { %14621 = vmatmul.mubr.msk.bf16.gmra.mrb[12].mxu0 %vm1397_vm7, %v13396_v19  ;;  %886 = vst.msk [vmem:[#allocation2 + $0x84] sm:$0xf] %vm854_vm2, %v13370_v49  ;;  %v590_v42 = vshrl.u32 %v16470_v23, 16  ;;  %v16514_v34 = vld [vmem:[#allocation2 + $0x64] sm:$0xf]  ;;  %v1156_v12 = vshrl.u32 %v16506_v16, 16  ;;  %v16528_v54 = vor.u32 %v586_v24, %v585_v41  ;;  %v13378_v55 = vcombine.low %v673_v6, %v673_v6 }
  0x61   : > { %v1159_v35 = vshll.u32 %v16506_v16, 16  ;;  %887 = vst.msk [vmem:[#allocation2 + $0x88] sm:$0xf] %vm854_vm2, %v13371_v39  ;;  %v656_v40 = vsel %vm16291_vm9, 0, %v581_v43  ;;  %v1165_v44 = vshll.u32 %v16514_v34, 16  ;;  %v1169_v46 = vshrl.u32 %v16514_v34, 16 }
  0x62   : > { %v13373_v47 = vcombine.low %v656_v40, %v656_v40  ;;  %v13374_v48 = vcombine.high %v656_v40, %v656_v40  ;;  %891 = vst.msk [vmem:[#allocation2 + $0x98] sm:$0x1] %vm857_vm3, %v13375_v27  ;;  %v1158_v51 = vrot.slane %v1156_v12, 4  ;;  %v16524_v53 = vld [vmem:[#allocation2 + $0x6c] sm:$0xf] }
  0x63   : > { %v1161_v52 = vrot.slane %v1159_v35, 5  ;;  %v16526_v7 = vld [vmem:[#allocation2 + $0x70] sm:$0xf]  ;;  %v1167_v57 = vrot.slane %v1165_v44, 5  ;;  %v1171_v60 = vrot.slane %v1169_v46, 4  ;;  %v1180_v62 = vshrl.u32 %v16524_v53, 16 }
  0x64   : > { %v16530_v61 = vld [vmem:[#allocation2 + $0x74] sm:$0x1]  ;;  %v1183_v2 = vshll.u32 %v16524_v53, 16  ;;  %889 = vst.msk [vmem:[#allocation2 + $0x90] sm:$0xf] %vm854_vm2, %v13373_v47  ;;  %v1189_v1 = vshll.u32 %v16526_v7, 16 }
  0x65   : > { %890 = vst.msk [vmem:[#allocation2 + $0x94] sm:$0xf] %vm854_vm2, %v13374_v48  ;;  %v1162_v0 = vor.u32 %v1161_v52, %v1158_v51  ;;  %v1193_v29 = vshrl.u32 %v16526_v7, 16  ;;  %v1199_v8 = vshll.u32 %v16530_v61, 16  ;;  %v16539_v9 = vld [vmem:[#allocation2 + $0x80] sm:$0x1]  ;;  %v1172_v10 = vor.u32 %v1171_v60, %v1167_v57 }
  0x66   : > { %894 = vst.msk [vmem:[#allocation2 + $0xa4] sm:$0x1] %vm857_vm3, %v13378_v55  ;;  %v1182_v11 = vrot.slane %v1180_v62, 4  ;;  %v1185_v13 = vrot.slane %v1183_v2, 5  ;;  %v1223_v14 = vshll.u32 %v16539_v9, 16  ;;  %v1191_v36 = vrot.slane %v1189_v1, 5 }
  0x67   : > { %v1163_v56 = vrot.slane %v1162_v0, 4  ;;  %v1195_v58 = vrot.slane %v1193_v29, 4  ;;  %v1201_v15 = vrot.slane %v1199_v8, 5  ;;  %v16543_v59 = vld [vmem:[#allocation2 + $0x78] sm:$0xf]  ;;  %v1173_v63 = vrot.slane %v1172_v10, 4 }
  0x68   : > { %v1186_v28 = vor.u32 %v1185_v13, %v1182_v11  ;;  %v16545_v41 = vld [vmem:[#allocation2 + $0x7c] sm:$0xf]  ;;  %v1204_v3 = vshrl.u32 %v16543_v59, 16  ;;  %v1207_v37 = vshll.u32 %v16543_v59, 16  ;;  %v16553_v22 = vld [vmem:[#allocation2 + $0x84] sm:$0xf] }
  0x69   : > { %v1168_v17 = vsel %vm16285_vm8, %v1163_v56, %v1167_v57  ;;  %v1196_v18 = vor.u32 %v1195_v58, %v1191_v36  ;;  %v1213_v19 = vshll.u32 %v16545_v41, 16  ;;  %v1217_v21 = vshrl.u32 %v16545_v41, 16  ;;  %v16557_v24 = vld [vmem:[#allocation2 + $0x88] sm:$0xf]  ;;  %v16561_v47 = vld [vmem:[#allocation2 + $0x8c] sm:$0x1] }
  0x6a   : > { %v1178_v49 = vsel %vm16285_vm8, %v1173_v63, %v1177_v26  ;;  %v1187_v39 = vrot.slane %v1186_v28, 4  ;;  %v1206_v43 = vrot.slane %v1204_v3, 4  ;;  %v1209_v38 = vrot.slane %v1207_v37, 5  ;;  %v16575_v13 = vld [vmem:[#allocation2 + $0x98] sm:$0x1] }
  0x6b   : > { %v13397_v27 = vcombine.low %v1168_v17, %v1178_v49  ;;  %v1197_v6 = vrot.slane %v1196_v18, 4  ;;  %v1215_v12 = vrot.slane %v1213_v19, 5  ;;  %v1219_v35 = vrot.slane %v1217_v21, 4  ;;  %v16569_v57 = vld [vmem:[#allocation2 + $0x90] sm:$0xf] }
  0x6c   : > { %v1192_v40 = vsel %vm16285_vm8, %v1187_v39, %v1191_v36  ;;  %v1210_v44 = vor.u32 %v1209_v38, %v1206_v43  ;;  %v1225_v46 = vrot.slane %v1223_v14, 5  ;;  %v1228_v48 = vshrl.u32 %v16553_v22, 16  ;;  %v16572_v1 = vld [vmem:[#allocation2 + $0x94] sm:$0xf] }
  0x6d   : > { %14624 = vmatprep.mubr.msk.bf16.mxu0 %vm1397_vm7, %v13397_v27  ;;  %v1202_v26 = vsel %vm16285_vm8, %v1197_v6, %v1201_v15  ;;  %v1220_v51 = vor.u32 %v1219_v35, %v1215_v12  ;;  %v1231_v52 = vshll.u32 %v16553_v22, 16  ;;  %v1237_v55 = vshll.u32 %v16557_v24, 16  ;;  %v16582_v15 = vld [vmem:[#allocation2 + $0xa4] sm:$0x1]  ;;  %v15444_v17 = vld [vmem:[%s16278_s24 + $0x70] sm:$0xff]  }
  0x6e   : > { %v13398_v60 = vcombine.low %v1192_v40, %v1202_v26  ;;  %v1211_v62 = vrot.slane %v1210_v44, 4  ;;  %v1230_v2 = vrot.slane %v1228_v48, 4  ;;  %v1241_v0 = vshrl.u32 %v16557_v24, 16 }
  0x6f   : > { %v1221_v29 = vrot.slane %v1220_v51, 4  ;;  %v1233_v8 = vrot.slane %v1231_v52, 5  ;;  %v1239_v10 = vrot.slane %v1237_v55, 5  ;;  %v1247_v11 = vshll.u32 %v16561_v47, 16 }
  0x70   : > { %14625 = vmatmul.mubr.msk.bf16.gmra.mrb[16].mxu0 %vm1397_vm7, %v13398_v60  ;;  %v1216_v14 = vsel %vm16285_vm8, %v1211_v62, %v1215_v12  ;;  %v1243_v56 = vrot.slane %v1241_v0, 4  ;;  %v1252_v36 = vshrl.u32 %v16569_v57, 16  ;;  %v1255_v58 = vshll.u32 %v16569_v57, 16 }
  0x71   : > { %v1226_v63 = vsel %vm16285_vm8, %v1221_v29, %v1225_v46  ;;  %v1234_v28 = vor.u32 %v1233_v8, %v1230_v2  ;;  %v1249_v3 = vrot.slane %v1247_v11, 5  ;;  %v1261_v37 = vshll.u32 %v16572_v1, 16 }
  0x72   : > { %v13399_v18 = vcombine.low %v1216_v14, %v1226_v63  ;;  %v1244_v19 = vor.u32 %v1243_v56, %v1239_v10  ;;  %v1254_v21 = vrot.slane %v1252_v36, 4  ;;  %v1257_v49 = vrot.slane %v1255_v58, 5 }
  0x73   : > { %v1235_v39 = vrot.slane %v1234_v28, 4  ;;  %v1263_v43 = vrot.slane %v1261_v37, 5  ;;  %v1265_v38 = vshrl.u32 %v16572_v1, 16  ;;  %v1271_v27 = vshll.u32 %v16575_v13, 16 }
  0x74   : > { %14628 = vmatprep.mubr.msk.bf16.mxu0 %vm1397_vm7, %v13399_v18  ;;  %v1245_v6 = vrot.slane %v1244_v19, 4  ;;  %v1258_v12 = vor.u32 %v1257_v49, %v1254_v21  ;;  %v657_v35 = vsel %vm16291_vm9, 0, %v16528_v54  ;;  %v593_v40 = vshll.u32 %v16470_v23, 16 }
  0x75   : > { %v1240_v44 = vsel %vm16285_vm8, %v1235_v39, %v1239_v10  ;;  %v1267_v46 = vrot.slane %v1265_v38, 4  ;;  %v13376_v48 = vcombine.low %v657_v35, %v657_v35  ;;  %v1295_v26 = vshll.u32 %v16582_v15, 16 }
  0x76   : > { %v1250_v51 = vsel %vm16285_vm8, %v1245_v6, %v1249_v3  ;;  %v1259_v52 = vrot.slane %v1258_v12, 4  ;;  %v1273_v55 = vrot.slane %v1271_v27, 5  ;;  %v13377_v60 = vcombine.high %v657_v35, %v657_v35  ;;  %v1907_v12 = vld [vmem:[#allocation2 + $0xc] sm:$0xe] }
  0x77   : > { %v13400_v62 = vcombine.low %v1240_v44, %v1250_v51  ;;  %v1268_v2 = vor.u32 %v1267_v46, %v1263_v43  ;;  %892 = vst.msk [vmem:[#allocation2 + $0x9c] sm:$0xf] %vm854_vm2, %v13376_v48  ;;  %v592_v54 = vrot.slane %v590_v42, 7  ;;  %v597_v0 = vshrl.u32 %v15444_v17, 16 }
  0x78   : > { %v1264_v29 = vsel %vm16285_vm8, %v1259_v52, %v1263_v43  ;;  %893 = vst.msk [vmem:[#allocation2 + $0xa0] sm:$0xf] %vm854_vm2, %v13377_v60  ;;  %v600_v8 = vshll.u32 %v15444_v17, 16  ;;  %v13429_v19 = vcombine.low %v16506_v16, %v16514_v34  ;;  %v13430_v21 = vcombine.low %v16524_v53, %v16526_v7  ;;  %v1906_v53 = vld [vmem:[#allocation2] sm:$0xe] }
  0x79   : > { %14629 = vmatmul.mubr.msk.bf16.gmra.mrb[20].mxu0 %vm1397_vm7, %v13400_v62  ;;  %v1269_v10 = vrot.slane %v1268_v2, 4  ;;  %v595_v11 = vor.u32 %v593_v40, %v592_v54  ;;  %v674_v14 = vsel %vm16291_vm9, %v592_v54, 0  ;;  %v599_v56 = vrot.slane %v597_v0, 7  ;;  %v13895_v62 = vld [vmem:[%s20084_s4] ss:$0 sm:$0xff] }
  0x7a   : > { %v13381_v36 = vcombine.low %v674_v14, %v674_v14  ;;  %v13431_v49 = vcombine.low %v16543_v59, %v16545_v41  ;;  %v13432_v27 = vcombine.low %v16553_v22, %v16557_v24  ;;  %v13433_v6 = vcombine.low %v16569_v57, %v16572_v1  ;;  %v1908_v57 = vld [vmem:[#allocation2 + $0x18] sm:$0xe] }
  0x7b   : > { %v1274_v23 = vsel %vm16285_vm8, %v1269_v10, %v1273_v55  ;;  %v658_v42 = vsel %vm16291_vm9, 0, %v595_v11  ;;  %v602_v58 = vor.u32 %v600_v8, %v599_v56  ;;  %v675_v63 = vsel %vm16291_vm9, %v599_v56, 0 }
  0x7c   : > { %v13401_v28 = vcombine.low %v1264_v29, %v1274_v23  ;;  %v13379_v3 = vcombine.low %v658_v42, %v658_v42  ;;  %v13380_v37 = vcombine.high %v658_v42, %v658_v42  ;;  %897 = vst.msk [vmem:[#allocation2 + $0xb0] sm:$0x1] %vm857_vm3, %v13381_v36  ;;  %v13384_v17 = vcombine.low %v675_v63, %v675_v63 }
  0x7d   : > { %v659_v18 = vsel %vm16291_vm9, 0, %v602_v58  ;;  %v1969_v46 = vrot.slane %v16338_v20, 5  ;;  %v13454_v54 = vrot.slane %v1907_v12, 9  ;;  %v1968_v0 = vrot.slane %v1966_v45, 4 }
  0x7e   : > { %14632 = vmatprep.mubr.msk.bf16.mxu0 %vm1397_vm7, %v13401_v28  ;;  %v16625_v39 = vld [vmem:[#allocation2 + $0x9c] sm:$0xf]  ;;  %895 = vst.msk [vmem:[#allocation2 + $0xa8] sm:$0xf] %vm854_vm2, %v13379_v3  ;;  %896 = vst.msk [vmem:[#allocation2 + $0xac] sm:$0xf] %vm854_vm2, %v13380_v37  ;;  %v13382_v43 = vcombine.low %v659_v18, %v659_v18  ;;  %v13383_v38 = vcombine.high %v659_v18, %v659_v18 }
  0x7f   : > { %900 = vst.msk [vmem:[#allocation2 + $0xbc] sm:$0x1] %vm857_vm3, %v13384_v17  ;;  %v16634_v35 = vld [vmem:[#allocation2 + $0xa0] sm:$0xf]  ;;  %v1276_v40 = vshrl.u32 %v16625_v39, 16  ;;  %v1279_v44 = vshll.u32 %v16625_v39, 16  ;;  %v16659_v56 = vsel %vm16646_vm12, %v13454_v54, %v1966_v45  ;;  %v16663_v36 = vsel %vm16646_vm12, %v1968_v0, %v1969_v46 }
  0x80   : > { %v1285_v48 = vshll.u32 %v16634_v35, 16  ;;  %v1289_v51 = vshrl.u32 %v16634_v35, 16  ;;  %898 = vst.msk [vmem:[#allocation2 + $0xb4] sm:$0xf] %vm854_vm2, %v13382_v43  ;;  %899 = vst.msk [vmem:[#allocation2 + $0xb8] sm:$0xf] %vm854_vm2, %v13383_v38  ;;  %v13434_v52 = vcombine.low %v16625_v39, %v16634_v35 }
  0x81   : > { %v1278_v55 = vrot.slane %v1276_v40, 4  ;;  %v1281_v60 = vrot.slane %v1279_v44, 5  ;;  %v1297_v8 = vrot.slane %v1295_v26, 5  ;;  %v13471_v26 = vcombine.low %v16659_v56, %v16663_v36  ;;  %v16052_v39 = vld [vmem:[#allocation2 + $0x20] sm:$0x1] }
  0x82   : > { %v1287_v2 = vrot.slane %v1285_v48, 5  ;;  %v1291_v20 = vrot.slane %v1289_v51, 4  ;;  %vm7057_vm0 = vsmask.f32 4352 }
  0x83   : > { %v1282_v29 = vor.u32 %v1281_v60, %v1278_v55  ;;  %v16652_v10 = vld [vmem:[#allocation2 + $0xb0] sm:$0x1]  ;;  %vm17987_vm1 = vmand %vm7056_vm11, %vm7057_vm0  ;;  %vm9180_vm0 = vcmask 518144  }
  0x84   : > { %v1292_v11 = vor.u32 %v1291_v20, %v1287_v2  ;;  %v1319_v14 = vshll.u32 %v16652_v10, 16 }
  0x85   : > { %v1283_v23 = vrot.slane %v1282_v29, 4  ;;  %v16665_v42 = vld [vmem:[#allocation2 + $0xa8] sm:$0xf]  ;;  %v16667_v58 = vld [vmem:[#allocation2 + $0xac] sm:$0xf] }
  0x86   : > { %v1293_v63 = vrot.slane %v1292_v11, 4  ;;  %v1300_v28 = vshrl.u32 %v16665_v42, 16  ;;  %v1303_v3 = vshll.u32 %v16665_v42, 16  ;;  %v1309_v45 = vshll.u32 %v16667_v58, 16  ;;  %v16674_v37 = vld [vmem:[#allocation2 + $0xbc] sm:$0x1] }
  0x87   : > { %v1288_v17 = vsel %vm16285_vm8, %v1283_v23, %v1287_v2  ;;  %v1313_v18 = vshrl.u32 %v16667_v58, 16  ;;  %v1321_v43 = vrot.slane %v1319_v14, 5  ;;  %v16679_v38 = vld [vmem:[#allocation2 + $0xb4] sm:$0xf]  ;;  %v16681_v12 = vld [vmem:[#allocation2 + $0xb8] sm:$0xf]  ;;  %v13435_v40 = vcombine.low %v16665_v42, %v16667_v58 }
  0x88   : > { %v1298_v44 = vsel %vm16285_vm8, %v1293_v63, %v1297_v8  ;;  %v1302_v46 = vrot.slane %v1300_v28, 4  ;;  %v1305_v48 = vrot.slane %v1303_v3, 5  ;;  %v1311_v51 = vrot.slane %v1309_v45, 5 }
  0x89   : > { %v13402_v55 = vcombine.low %v1288_v17, %v1298_v44  ;;  %v1315_v60 = vrot.slane %v1313_v18, 4  ;;  %v1324_v2 = vshrl.u32 %v16679_v38, 16  ;;  %v1327_v20 = vshll.u32 %v16679_v38, 16 }
  0x8a   : > { %v1306_v54 = vor.u32 %v1305_v48, %v1302_v46  ;;  %v1333_v0 = vshll.u32 %v16681_v12, 16  ;;  %v1337_v29 = vshrl.u32 %v16681_v12, 16  ;;  %v1343_v11 = vshll.u32 %v16674_v37, 16 }
  0x8b   : > { %14633 = vmatmul.mubr.msk.bf16.gmra.mrb[24].mxu0 %vm1397_vm7, %v13402_v55  ;;  %v1316_v14 = vor.u32 %v1315_v60, %v1311_v51  ;;  %v1326_v8 = vrot.slane %v1324_v2, 4  ;;  %v1329_v23 = vrot.slane %v1327_v20, 5  ;;  %v13436_v63 = vcombine.low %v16679_v38, %v16681_v12  ;;  %v13535_v38 = vld [vmem:[%s20081_s1 + $0x8] sm:$0x3] }
  0x8c   : > { %v1307_v28 = vrot.slane %v1306_v54, 4  ;;  %v1335_v3 = vrot.slane %v1333_v0, 5  ;;  %v1339_v45 = vrot.slane %v1337_v29, 4  ;;  %v1345_v48 = vrot.slane %v1343_v11, 5  ;;  %v16037_v0 = vld [vmem:[#allocation2] sm:$0xf] }
  0x8d   : > { %v1317_v17 = vrot.slane %v1316_v14, 4  ;;  %v1330_v18 = vor.u32 %v1329_v23, %v1326_v8  ;;  %v16704_v29 = vld [vmem:[#allocation2 + $0x4] sm:$0xf]  ;;  %v1916_v14 = vld [vmem:[#allocation2 + $0x78] sm:$0xe] }
  0x8e   : > { %v1312_v44 = vsel %vm16285_vm8, %v1307_v28, %v1311_v51  ;;  %v1340_v46 = vor.u32 %v1339_v45, %v1335_v3  ;;  %v13421_v51 = vcombine.low %v16037_v0, %v16704_v29  ;;  %v1917_v8 = vld [vmem:[#allocation2 + $0x84] sm:$0xe]  ;;  %v16039_v23 = vld [vmem:[#allocation2 + $0x18] sm:$0xf]  ;;  %v16712_v28 = vld [vmem:[#allocation2 + $0x1c] sm:$0xf] }
  0x8f   : > { %v1322_v4 = vsel %vm16285_vm8, %v1317_v17, %v1321_v43  ;;  %v1331_v55 = vrot.slane %v1330_v18, 4  ;;  %v1915_v43 = vld [vmem:[#allocation2 + $0x6c] sm:$0xe]  ;;  %v2022_v17 = vrot.slane %v16526_v7, 5  ;;  %v16729_v0 = vld [vmem:[#allocation2 + $0x28] sm:$0xf] }
  0x90   : > { %v13403_v60 = vcombine.low %v1312_v44, %v1322_v4  ;;  %v1341_v2 = vrot.slane %v1340_v46, 4  ;;  %v13502_v4 = vld [vmem:[%s20081_s1 + $0x6] sm:$0x3]  ;;  %v13462_v45 = vrot.slane %v1915_v43, 9  ;;  %v2025_v44 = vrot.slane %v16530_v61, 5 }
  0x91   : > { %v1336_v20 = vsel %vm16285_vm8, %v1331_v55, %v1335_v3  ;;  %v13423_v3 = vcombine.low %v16039_v23, %v16712_v28  ;;  %v16717_v18 = vand.u32 %v13502_v4, %v16266_v5  ;;  %v1918_v46 = vld [vmem:[#allocation2 + $0x90] sm:$0xe]  ;;  %v2024_v55 = vrot.slane %v2022_v17, 4 }
  0x92   : > { %14636 = vmatprep.mubr.msk.bf16.mxu0 %vm1397_vm7, %v13403_v60  ;;  %v1346_v54 = vsel %vm16285_vm8, %v1341_v2, %v1345_v48  ;;  %v16722_v48 = vsel %vm16646_vm12, %v13462_v45, %v2022_v17  ;;  %v13463_v60 = vrot.slane %v1916_v14, 9  ;;  %v2029_v2 = vrot.slane %v16545_v41, 5  ;;  %v16043_v43 = vld [vmem:[#allocation2 + $0x30] sm:$0xf]  ;;  %v16736_v14 = vld [vmem:[#allocation2 + $0x34] sm:$0xf] }
  0x93   : > { %v13404_v11 = vcombine.low %v1336_v20, %v1346_v54  ;;  %v1919_v20 = vld [vmem:[#allocation2 + $0x9c] sm:$0xe]  ;;  %v16041_v54 = vld [vmem:[#allocation2 + $0x24] sm:$0xf]  ;;  %v2036_v4 = vrot.slane %v16557_v24, 5  ;;  %v13425_v31 = vcombine.low %v16043_v43, %v16736_v14  ;;  %v16741_v32 = vsel %vm16646_vm12, %v2024_v55, %v2025_v44 }
  0x94   : > { %v13424_v61 = vcombine.low %v16041_v54, %v16729_v0  ;;  %v2039_v45 = vrot.slane %v16561_v47, 5  ;;  %v1921_v17 = vld [vmem:[#allocation2 + $0xb4] sm:$0xe]  ;;  %v13465_v55 = vrot.slane %v1918_v46, 9  ;;  %v2050_v47 = vrot.slane %v16634_v35, 5 }
  0x95   : > { %14637 = vmatmul.mubr.msk.bf16.gmra.mrb[28].mxu0 %vm1397_vm7, %v13404_v11  ;;  %v13464_v11 = vrot.slane %v1917_v8, 9  ;;  %v1920_v8 = vld [vmem:[#allocation2 + $0xa8] sm:$0xe]  ;;  %v2060_v43 = vrot.slane %v16652_v10, 5  ;;  %v1959_v7 = vrot.slane %v16704_v29, 5  ;;  %v1973_v29 = vrot.slane %v16712_v28, 5 }
  0x96   : > { %14642 = vmatprep.mubr.msk.bf16.mxu0 %vm1397_vm7, %v13421_v51  ;;  %v2032_v51 = vrot.slane %v16539_v9, 5  ;;  %v2031_v9 = vrot.slane %v2029_v2, 4  ;;  %v2052_v54 = vrot.slane %v2050_v47, 4  ;;  %v16051_v24 = vld [vmem:[#allocation2 + $0x8] sm:$0x1]  ;;  %v1976_v35 = vrot.slane %v16052_v39, 5 }
  0x97   : > { %v16752_v23 = vsel %vm16646_vm12, %v13464_v11, %v2036_v4  ;;  %v1980_v42 = vrot.slane %v16729_v0, 5  ;;  %v1987_v28 = vrot.slane %v16736_v14, 5  ;;  %v1911_v14 = vld [vmem:[#allocation2 + $0x3c] sm:$0xe] }
  0x98   : > { %v16757_v44 = vsel %vm16646_vm12, %v2031_v9, %v2032_v51 }
  0x99   : > { %v1989_v0 = vrot.slane %v1987_v28, 4 }
  0x9d   : > { %14643 = vmatmul.mubr.msk.bf16.vlgmr.msra.gmra.mrb[0].mxu0 %vm1397_vm7, %v13422_v50  ;;  %v16745_v50 = vsel %vm16646_vm12, %v13463_v60, %v2029_v2  ;;  %v2043_v60 = vrot.slane %v16572_v1, 5  ;;  %v2046_v2 = vrot.slane %v16575_v13, 5  ;;  %v2053_v13 = vrot.slane %v16582_v15, 5 }
  0x9e   : > { %14675 = vmatpush3.bf16.msra.mxu0 %v16345_v25  ;;  %14646 = vmatprep.mubr.msk.bf16.mxu0 %vm1397_vm7, %v13423_v3  ;;  %v2038_v3 = vrot.slane %v2036_v4, 4  ;;  %v13466_v4 = vrot.slane %v1919_v20, 9  ;;  %v2057_v20 = vrot.slane %v16667_v58, 5  ;;  %v13468_v25 = vrot.slane %v1921_v17, 9 }
  0x9f   : > { %14708 = vmatprep.subr.bf16.mxu0 %v16717_v18  ;;  %v16772_v46 = vsel %vm16646_vm12, %v13465_v55, %v2043_v60  ;;  %v2045_v51 = vrot.slane %v2043_v60, 4  ;;  %v2064_v55 = vrot.slane %v16681_v12, 5  ;;  %v16791_v60 = vsel %vm16646_vm12, %v2052_v54, %v2053_v13  ;;  %v16815_v13 = vld [vmem:[#allocation2 + $0x40] sm:$0xf] }
  0xa0   : > { %v16765_v11 = vsel %vm16646_vm12, %v2038_v3, %v2039_v45  ;;  %v16777_v9 = vsel %vm16646_vm12, %v13466_v4, %v2050_v47  ;;  %v13467_v3 = vrot.slane %v1920_v8, 9  ;;  %v2067_v4 = vrot.slane %v16674_v37, 5 }
  0xa1   : > { %v16782_v45 = vsel %vm16646_vm12, %v2045_v51, %v2046_v2  ;;  %v2059_v2 = vrot.slane %v2057_v20, 4  ;;  %v13483_v10 = vcombine.low %v16777_v9, %v16791_v60  ;;  %v2066_v17 = vrot.slane %v2064_v55, 4  ;;  %v16045_v51 = vld [vmem:[#allocation2 + $0x3c] sm:$0xf]  ;;  %v2722_v9 = vld [vmem:[#allocation2 + $0x10] sm:$0xf] }
  0xa2   : > { %v13482_v15 = vcombine.low %v16772_v46, %v16782_v45  ;;  %v16795_v8 = vsel %vm16646_vm12, %v13467_v3, %v2057_v20  ;;  %v16047_v3 = vld [vmem:[#allocation2 + $0x48] sm:$0xf]  ;;  %v16820_v20 = vld [vmem:[#allocation2 + $0x4c] sm:$0xf]  ;;  %v2724_v45 = vld [vmem:[#allocation2 + $0x18] sm:$0xf] }
  0xa3   : > { %v16807_v54 = vsel %vm16646_vm12, %v2059_v2, %v2060_v43  ;;  %v13427_v43 = vcombine.low %v16047_v3, %v16820_v20  ;;  %v16825_v2 = vld [vmem:[#allocation2 + $0x58] sm:$0xf]  ;;  %v13455_v3 = vrot.slane %v1908_v57, 9  ;;  %v2001_v36 = vrot.slane %v16820_v20, 5  ;;  %v16055_v57 = vld [vmem:[#allocation2 + $0x44] sm:$0x1] }
  0xa4   : > { %v13484_v47 = vcombine.low %v16795_v8, %v16807_v54  ;;  %v2008_v39 = vrot.slane %v16825_v2, 5  ;;  %v2721_v46 = vld [vmem:[#allocation2 + $0xc] sm:$0xf]  ;;  %v2725_v60 = vld [vmem:[#allocation2 + $0x1c] sm:$0xf]  ;;  %v2783_v54 = vshrl.u32 %v2722_v9, 16 }
  0xa5   : > { %14647 = vmatmul.mubr.msk.bf16.gmra.mrb[4].mxu0 %vm1397_vm7, %v13424_v61  ;;  %v16802_v61 = vsel %vm16646_vm12, %v13468_v25, %v2064_v55  ;;  %v13426_v25 = vcombine.low %v16045_v51, %v16815_v13  ;;  %v16049_v55 = vld [vmem:[#allocation2 + $0x54] sm:$0xf]  ;;  %v1974_v58 = vsel %vm16646_vm12, %v13455_v3, %v1973_v29  ;;  %v2770_v8 = vshrl.u32 %v2721_v46, 16 }
  0xa6   : > { %14650 = vmatprep.mubr.msk.bf16.mxu0 %vm1397_vm7, %v13425_v31  ;;  %v16813_v31 = vsel %vm16646_vm12, %v2066_v17, %v2067_v4  ;;  %v13428_v17 = vcombine.low %v16049_v55, %v16825_v2  ;;  %v15461_v4 = vld [vmem:[%s16278_s24 + $0x78] sm:$0xff]   ;;  %v1910_v55 = vld [vmem:[#allocation2 + $0x30] sm:$0xe]  ;;  %v1913_v3 = vld [vmem:[#allocation2 + $0x54] sm:$0xe]  ;;  %s16135_s24 = smov [#allocation6]  }
  0xa7   : > { %v13485_v37 = vcombine.low %v16802_v61, %v16813_v31  ;;  %v604_v51 = vshrl.u32 %v15461_v4, 16  ;;  %v607_v34 = vshll.u32 %v15461_v4, 16  ;;  %v16053_v4 = vld [vmem:[#allocation2 + $0x2c] sm:$0x1]  ;;  %v2779_v61 = vshll.u32 %v2722_v9, 16  ;;  %s16068_s29 = sshll.u32 %s16135_s24, 4  ;;  %s16069_s29 = int_to_ptr.vmem [resolvable:$false] %s16068_s29 }
  0xa8   : > { %v2794_v31 = vshrl.u32 %v2724_v45, 16  ;;  %v17024_v9 = vld [vmem:[#allocation2 + $0x64] sm:$0xf]  ;;  %s16070_s0 = scalar_lea.vmem %s16069_s29, 32  ;;  %p16071_p0 = scmp.lt.s32.totalorder %s20040_s13, %s16069_s29 }
  0xa9   : > { %v16846_v16 = vrot.slane %v604_v51, 7  ;;  %v1983_v51 = vrot.slane %v16053_v4, 5  ;;  %p16072_p1 = scmp.lt.s32.totalorder %s16070_s0, %s16064_s21 }
  0xab   : > { %v609_v59 = vor.u32 %v607_v34, %v16846_v16  ;;  %v13457_v34 = vrot.slane %v1910_v55, 9  ;;  %p16073_p2 = por %p16072_p1, %p16071_p0 }
  0xad   : > { %14651 = vmatmul.mubr.msk.bf16.gmra.mrb[8].mxu0 %vm1397_vm7, %v13426_v25  ;;  %v660_v41 = vsel %vm16291_vm9, 0, %v609_v59  ;;  %v16886_v59 = vand.u32 %v13535_v38, %v16266_v5  ;;  %v13460_v38 = vrot.slane %v1913_v3, 9  ;;  %p16074_p3 = pnand %p16073_p2, %p16067_p13 }
  0xae   : > { %14654 = vmatprep.mubr.msk.bf16.mxu0 %vm1397_vm7, %v13427_v43  ;;  %v13386_v22 = vcombine.high %v660_v41, %v660_v41  ;;  %v1975_v43 = vrot.slane %v1973_v29, 4  ;;  %v2003_v29 = vrot.slane %v2001_v36, 4 }
  0xaf   : > { %v2009_v2 = vsel %vm16646_vm12, %v13460_v38, %v2008_v39 }
  0xb0   : > { %902 = vst.msk [vmem:[#allocation2 + $0xc4] sm:$0xf] %vm854_vm2, %v13386_v22  ;;  %v1994_v22 = vrot.slane %v16815_v13, 5  ;;  %v16056_v13 = vld [vmem:[#allocation2 + $0x50] sm:$0x1] }
  0xb5   : > { %14655 = vmatmul.mubr.msk.bf16.gmra.mrb[12].mxu0 %vm1397_vm7, %v13428_v17  ;;  %v1982_v17 = vrot.slane %v1980_v42, 4 }
  0xb6   : > { %14658 = vmatprep.mubr.msk.bf16.mxu0 %vm1397_vm7, %v13429_v19  ;;  %v13385_v19 = vcombine.low %v660_v41, %v660_v41 }
  0xb8   : > { %901 = vst.msk [vmem:[#allocation2 + $0xc0] sm:$0xf] %vm854_vm2, %v13385_v19  ;;  %v1984_v19 = vsel %vm16646_vm12, %v1982_v17, %v1983_v51  ;;  %vm6978_vm2 = vcmask 1042434  }
  0xbd   : > { %14659 = vmatmul.mubr.msk.bf16.gmra.mrb[16].mxu0 %vm1397_vm7, %v13430_v21  ;;  %v1962_v21 = vrot.slane %v16051_v24, 5  ;;  %v1988_v24 = vsel %vm16646_vm12, %v13457_v34, %v1987_v28  ;;  %v16059_v34 = vld [vmem:[#allocation2 + $0x68] sm:$0x1] }
  0xbe   : > { %14662 = vmatprep.mubr.msk.bf16.mxu0 %vm1397_vm7, %v13431_v49  ;;  %v13453_v49 = vrot.slane %v1906_v53, 9  ;;  %v16054_v53 = vld [vmem:[#allocation2 + $0x38] sm:$0x1] }
  0xc0   : > { %v1960_v1 = vsel %vm16646_vm12, %v13453_v49, %v1959_v7  ;;  %v13458_v49 = vrot.slane %v1911_v14, 9 }
  0xc2   : > { %v1995_v20 = vsel %vm16646_vm12, %v13458_v49, %v1994_v22 }
  0xc5   : > { %14663 = vmatmul.mubr.msk.bf16.gmra.mrb[20].mxu0 %vm1397_vm7, %v13432_v27  ;;  %v1961_v27 = vrot.slane %v1959_v7, 4  ;;  %v1990_v7 = vrot.slane %v16054_v53, 5 }
  0xc6   : > { %14666 = vmatprep.mubr.msk.bf16.mxu0 %vm1397_vm7, %v13433_v6 }
  0xc7   : > { %v1963_v6 = vsel %vm16646_vm12, %v1961_v27, %v1962_v21  ;;  %v1991_v56 = vsel %vm16646_vm12, %v1989_v0, %v1990_v7  ;;  %v1996_v27 = vrot.slane %v1994_v22, 4  ;;  %v2018_v0 = vrot.slane %v16059_v34, 5 }
  0xc8   : > { %v13470_v25 = vcombine.low %v1960_v1, %v1963_v6  ;;  %v13474_v21 = vcombine.low %v1988_v24, %v1991_v56  ;;  %v1997_v1 = vrot.slane %v16055_v57, 5  ;;  %v20125_v22 = vcombine.low %v16722_v48, %v16741_v32  ;;  %v15446_v32 = vld [vmem:[#allocation2 + $0xc] sm:$0xff]  }
  0xc9   : > { %v20126_v24 = vcombine.low %v16745_v50, %v16757_v44  ;;  %v20127_v56 = vcombine.low %v16752_v23, %v16765_v11  ;;  %v676_v48 = vsel %vm16291_vm9, %v16846_v16, 0  ;;  %v13584_v23 = vld [vmem:[%s20081_s1 + $0xa] sm:$0x3]  ;;  %v15447_v44 = vld [vmem:[#allocation2 + $0x18] sm:$0xff]   ;;  %v16975_v57 = vrot.slane %v2779_v61, 5 }
  0xca   : > { %v13387_v50 = vcombine.low %v676_v48, %v676_v48  ;;  %v15448_v11 = vld [vmem:[#allocation2 + $0x24] sm:$0xff]   ;;  %v15450_v16 = vld [vmem:[#allocation2 + $0x3c] sm:$0xff]   ;;  %v3562_v61 = vrot.slane %v17024_v9, 5 }
  0xcc   : > { %903 = vst.msk [vmem:[#allocation2 + $0xc8] sm:$0x1] %vm857_vm3, %v13387_v50  ;;  %v17014_v50 = vld [vmem:[#allocation2 + $0x34] sm:$0xf]  ;;  %vm6980_vm3 = vcmask 1043459  }
  0xcd   : > { %14667 = vmatmul.mubr.msk.bf16.gmra.mrb[24].mxu0 %vm1397_vm7, %v13434_v52  ;;  %v1909_v52 = vld [vmem:[#allocation2 + $0x24] sm:$0xe] }
  0xce   : > { %14670 = vmatprep.mubr.msk.bf16.mxu0 %vm1397_vm7, %v13435_v40  ;;  %v1977_v40 = vsel %vm16646_vm12, %v1975_v43, %v1976_v35  ;;  %v1998_v43 = vsel %vm16646_vm12, %v1996_v27, %v1997_v1  ;;  %v16973_v27 = vld [vmem:[#allocation2 + $0x20] sm:$0x1]  ;;  %v2727_v1 = vld [vmem:[#allocation2 + $0x24] sm:$0xf] }
  0xcf   : > { %v13472_v12 = vcombine.low %v1974_v58, %v1977_v40  ;;  %v1914_v40 = vld [vmem:[#allocation2 + $0x60] sm:$0xe]  ;;  %v13475_v28 = vcombine.low %v1995_v20, %v1998_v43 }
  0xd0   : > { %v13461_v4 = vrot.slane %v1914_v40, 9 }
  0xd5   : > { %14671 = vmatmul.mubr.msk.bf16.gmra.mrb[28].mxu0 %vm1397_vm7, %v13436_v63  ;;  %v13456_v63 = vrot.slane %v1909_v52, 9 }
  0xd6   : > { %14676 = vmatprep.mubr.msk.bf16.mxu0 %vm1397_vm7, %v13470_v25  ;;  %v2004_v25 = vrot.slane %v16056_v13, 5  ;;  %v16977_v13 = vld [vmem:[#allocation2 + $0x28] sm:$0xf] }
  0xd7   : > { %v1981_v41 = vsel %vm16646_vm12, %v13456_v63, %v1980_v42  ;;  %v16057_v42 = vld [vmem:[#allocation2 + $0x64] sm:$0xf]  ;;  %v16058_v63 = vld [vmem:[#allocation2 + $0x5c] sm:$0x1]  ;;  %v2827_v34 = vshll.u32 %v16977_v13, 16 }
  0xd8   : > { %v2005_v52 = vsel %vm16646_vm12, %v2003_v29, %v2004_v25  ;;  %v2015_v58 = vrot.slane %v16057_v42, 5  ;;  %v2011_v17 = vrot.slane %v16058_v63, 5  ;;  %v16979_v25 = vld [vmem:[#allocation2 + $0x4c] sm:$0xf]  ;;  %v2813_v42 = vshll.u32 %v16973_v27, 16 }
  0xd9   : > { %v3548_v40 = vrot.slane %v16979_v25, 5  ;;  %v2821_v63 = vshll.u32 %v2727_v1, 16 }
  0xda   : > { %v2017_v51 = vrot.slane %v2015_v58, 4  ;;  %v2016_v7 = vsel %vm16646_vm12, %v13461_v4, %v2015_v58  ;;  %v3452_v58 = vld [vmem:[#allocation2 + $0x48] sm:$0xe]  ;;  %v15452_v4 = vld [vmem:[#allocation2 + $0x54] sm:$0xff]  }
  0xdc   : > { %v2019_v14 = vsel %vm16646_vm12, %v2017_v51, %v2018_v0  ;;  %v3550_v0 = vrot.slane %v3548_v40, 4 }
  0xdd   : > { %14677 = vmatmul.mubr.msk.bf16.vlgmr.msra.gmra.mrb[0].mxu0 %vm1397_vm7, %v13471_v26  ;;  %v1912_v26 = vld [vmem:[#allocation2 + $0x48] sm:$0xe] }
  0xde   : > { %14709 = vmatpush3.bf16.msra.mxu0 %v16717_v18  ;;  %14680 = vmatprep.mubr.msk.bf16.mxu0 %vm1397_vm7, %v13472_v12  ;;  %v13473_v18 = vcombine.low %v1981_v41, %v1984_v19  ;;  %v13459_v6 = vrot.slane %v1912_v26, 9  ;;  %v2010_v12 = vrot.slane %v2008_v39, 4  ;;  %v13478_v19 = vcombine.low %v2016_v7, %v2019_v14  ;;  %v2730_v7 = vld [vmem:[#allocation2 + $0x30] sm:$0xf] }
  0xdf   : > { %14742 = vmatprep.subr.bf16.mxu0 %v16886_v59  ;;  %v2803_v26 = vshll.u32 %v2725_v60, 16 }
  0xe0   : > { %v2002_v35 = vsel %vm16646_vm12, %v13459_v6, %v2001_v36  ;;  %v2012_v53 = vsel %vm16646_vm12, %v2010_v12, %v2011_v17  ;;  %v16971_v36 = vld [vmem:[#allocation2 + $0x14] sm:$0x1]  ;;  %v2796_v6 = vrot.slane %v2794_v31, 4  ;;  %v2818_v12 = vshrl.u32 %v2727_v1, 16 }
  0xe1   : > { %v13476_v55 = vcombine.low %v2002_v35, %v2005_v52  ;;  %v13477_v41 = vcombine.low %v2009_v2, %v2012_v53  ;;  %v16981_v3 = vrot.slane %v2803_v26, 5  ;;  %v2789_v39 = vshll.u32 %v16971_v36, 16  ;;  %v16985_v35 = vld [vmem:[#allocation2 + $0x50] sm:$0x1]  ;;  %v16996_v53 = vld [vmem:[#allocation2 + $0x2c] sm:$0x1] }
  0xe2   : > { %v13573_v17 = vrot.slane %v3452_v58, 9  ;;  %v2820_v48 = vrot.slane %v2818_v12, 4  ;;  %v2845_v31 = vshll.u32 %v2730_v7, 16  ;;  %v2851_v26 = vshll.u32 %v17014_v50, 16  ;;  %v15455_v58 = vld [vmem:[#allocation2 + $0x78] sm:$0xff]  }
  0xe3   : > { %v16994_v2 = vrot.slane %v2789_v39, 5  ;;  %v3456_v39 = vld [vmem:[#allocation2 + $0x78] sm:$0xe] }
  0xe4   : > { %v17000_v14 = vsel %vm16646_vm12, %v13573_v17, %v3548_v40  ;;  %v2855_v40 = vshrl.u32 %v17014_v50, 16 }
  0xe5   : > { %14681 = vmatmul.mubr.msk.bf16.gmra.mrb[4].mxu0 %vm1397_vm7, %v13473_v18  ;;  %v2807_v18 = vshrl.u32 %v2725_v60, 16  ;;  %v2837_v60 = vshll.u32 %v16996_v53, 16 }
  0xe6   : > { %14684 = vmatprep.mubr.msk.bf16.mxu0 %vm1397_vm7, %v13474_v21  ;;  %v2772_v21 = vrot.slane %v2770_v8, 4  ;;  %v2842_v8 = vshrl.u32 %v2730_v7, 16  ;;  %v2847_v7 = vrot.slane %v2845_v31, 5 }
  0xe7   : > { %v2809_v20 = vrot.slane %v2807_v18, 4  ;;  %v3564_v18 = vrot.slane %v3562_v61, 4 }
  0xe9   : > { %v2810_v51 = vor.u32 %v2809_v20, %v16981_v3 }
  0xed   : > { %14685 = vmatmul.mubr.msk.bf16.gmra.mrb[8].mxu0 %vm1397_vm7, %v13475_v28  ;;  %v3551_v28 = vrot.slane %v16985_v35, 5 }
  0xee   : > { %14688 = vmatprep.mubr.msk.bf16.mxu0 %vm1397_vm7, %v13476_v55  ;;  %v15451_v55 = vld [vmem:[#allocation2 + $0x48] sm:$0xff]  }
  0xf5   : > { %14689 = vmatmul.mubr.msk.bf16.gmra.mrb[12].mxu0 %vm1397_vm7, %v13477_v41 }
  0xf6   : > { %14692 = vmatprep.mubr.msk.bf16.mxu0 %vm1397_vm7, %v13478_v19 }
  0xfd   : > { %14693 = vmatmul.mubr.msk.bf16.gmra.mrb[16].mxu0 %vm1397_vm7, %v20125_v22  ;;  %v17006_v22 = vrot.slane %v2813_v42, 5 }
  0xfe   : > { %14696 = vmatprep.mubr.msk.bf16.mxu0 %vm1397_vm7, %v20126_v24  ;;  %v17010_v24 = vsel %vm16646_vm12, %v3550_v0, %v3551_v28  ;;  %v13577_v28 = vrot.slane %v3456_v39, 9  ;;  %v17072_v0 = vrot.slane %v2837_v60, 5  ;;  %v17093_v39 = vld [vmem:[#allocation2 + $0xac] sm:$0xf] }
 0x105   : > { %14697 = vmatmul.mubr.msk.bf16.gmra.mrb[20].mxu0 %vm1397_vm7, %v20127_v56 }
 0x106   : > { %14700 = vmatprep.mubr.msk.bf16.mxu0 %vm1397_vm7, %v13482_v15  ;;  %v16965_v15 = vand.u32 %v13584_v23, %v16266_v5 }
 0x10d   : > { %14701 = vmatmul.mubr.msk.bf16.gmra.mrb[24].mxu0 %vm1397_vm7, %v13483_v10  ;;  %v2773_v10 = vshll.u32 %v2721_v46, 16  ;;  %v2831_v46 = vshrl.u32 %v16977_v13, 16 }
 0x10e   : > { %14704 = vmatprep.mubr.msk.bf16.mxu0 %vm1397_vm7, %v13484_v47  ;;  %v15449_v47 = vld [vmem:[#allocation2 + $0x30] sm:$0xff]  }
 0x10f   : > { %v2775_v49 = vrot.slane %v2773_v10, 5  ;;  %v3454_v10 = vld [vmem:[#allocation2 + $0x60] sm:$0xe]  ;;  %v2833_v20 = vrot.slane %v2831_v46, 4 }
 0x111   : > { %v2776_v43 = vor.u32 %v2775_v49, %v2772_v21 }
 0x113   : > { %v17002_v41 = vrot.slane %v2776_v43, 4  ;;  %v17049_v43 = vrot.slane %v2842_v8, 4  ;;  %v15457_v8 = vld [vmem:[#allocation2 + $0x90] sm:$0xff]  }
 0x115   : > { %14705 = vmatmul.mubr.msk.bf16.gmra.mrb[28].mxu0 %vm1397_vm7, %v13485_v37  ;;  %v2797_v37 = vshll.u32 %v2724_v45, 16  ;;  %v17026_v45 = vld [vmem:[#allocation2 + $0x68] sm:$0x1] }
 0x116   : > { %14710 = vmatprep.mubr.msk.bf16.mxu0 %vm1397_vm7, %v15446_v32  ;;  %v2823_v32 = vrot.slane %v2821_v63, 5 }
 0x117   : > { %v2799_v29 = vrot.slane %v2797_v37, 5  ;;  %v13575_v37 = vrot.slane %v3454_v10, 9  ;;  %v17076_v10 = vrot.slane %v2851_v26, 5  ;;  %v2848_v26 = vor.u32 %v2847_v7, %v17049_v43 }
 0x118   : > { %v2824_v1 = vor.u32 %v2823_v32, %v2820_v48  ;;  %v3458_v48 = vld [vmem:[#allocation2 + $0x90] sm:$0xe] }
 0x119   : > { %v2800_v38 = vor.u32 %v2799_v29, %v2796_v6  ;;  %v17035_v21 = vsel %vm16646_vm12, %v13575_v37, %v3562_v61  ;;  %v17044_v6 = vld [vmem:[#allocation2 + $0x7c] sm:$0xf]  ;;  %v17046_v29 = vld [vmem:[#allocation2 + $0x80] sm:$0x1]  ;;  %v13579_v61 = vrot.slane %v3458_v48, 9 }
 0x11a   : > { %v3579_v42 = vrot.slane %v17046_v29, 5 }
 0x11b   : > { %v17012_v56 = vrot.slane %v2800_v38, 4  ;;  %v17054_v38 = vrot.slane %v2824_v1, 4  ;;  %v17088_v1 = vld [vmem:[#allocation2 + $0x40] sm:$0xf] }
 0x11c   : > { %v2879_v7 = vshrl.u32 %v17088_v1, 16 }
 0x11d   : > { %14711 = vmatmul.mubr.msk.bf16.vlgmr.msra.gmra.mrb[0].mxu0 %vm1397_vm7, %v15447_v44  ;;  %v17018_v44 = vrot.slane %v2810_v51, 4  ;;  %v17067_v51 = vld [vmem:[#allocation2 + $0x94] sm:$0xf] }
 0x11e   : > { %14743 = vmatpush3.bf16.msra.mxu0 %v16886_v59  ;;  %14714 = vmatprep.mubr.msk.bf16.mxu0 %vm1397_vm7, %v15448_v11  ;;  %v2785_v59 = vrot.slane %v2783_v54, 4  ;;  %v17020_v11 = vrot.slane %v2827_v34, 5  ;;  %v3565_v54 = vrot.slane %v17026_v45, 5  ;;  %v17069_v34 = vld [vmem:[#allocation2 + $0x98] sm:$0x1]  ;;  %v3590_v32 = vrot.slane %v17067_v51, 5 }
 0x11f   : > { %14776 = vmatprep.subr.bf16.mxu0 %v16965_v15  ;;  %v3593_v46 = vrot.slane %v17069_v34, 5 }
 0x120   : > { %v2786_v52 = vor.u32 %v2785_v59, %v16975_v57  ;;  %v17039_v49 = vsel %vm16646_vm12, %v3564_v18, %v3565_v54  ;;  %v15458_v54 = vld [vmem:[#allocation2 + $0x9c] sm:$0xff]   ;;  %v3592_v37 = vrot.slane %v3590_v32, 4  ;;  %v17082_v60 = vsel %vm16646_vm12, %v13579_v61, %v3590_v32  ;;  %v2736_v59 = vld [vmem:[#allocation2 + $0x48] sm:$0xf] }
 0x121   : > { %v2733_v18 = vld [vmem:[#allocation2 + $0x3c] sm:$0xf]  ;;  %20130 = vst [vmem:[#allocation12_spill] sm:$0xff] %v17082_v60  ;;  %v2834_v48 = vor.u32 %v2833_v20, %v17020_v11  ;;  %v2875_v61 = vshll.u32 %v17088_v1, 16 }
 0x122   : > { %v17004_v19 = vrot.slane %v2786_v52, 4  ;;  %v3576_v52 = vrot.slane %v17044_v6, 5  ;;  %v17086_v31 = vsel %vm16646_vm12, %v3592_v37, %v3593_v46  ;;  %v2869_v32 = vshll.u32 %v2733_v18, 16 }
 0x123   : > { %20131 = vst [vmem:[#allocation13_spill] sm:$0xff] %v17086_v31  ;;  %v17120_v43 = vrot.slane %v2834_v48, 4  ;;  %v17131_v23 = vrot.slane %v2875_v61, 5  ;;  %v2890_v61 = vshrl.u32 %v2736_v59, 16  ;;  %v15462_v31 = vld [vmem:[#allocation2 + $0xc0] sm:$0xff]  }
 0x124   : > { %v3578_v12 = vrot.slane %v3576_v52, 4  ;;  %v17058_v63 = vsel %vm16646_vm12, %v13577_v28, %v3576_v52  ;;  %v17095_v52 = vld [vmem:[#allocation2 + $0xb0] sm:$0x1]  ;;  %v3604_v28 = vrot.slane %v17093_v39, 5 }
 0x125   : > { %14715 = vmatmul.mubr.msk.bf16.gmra.mrb[4].mxu0 %vm1397_vm7, %v15449_v47  ;;  %v15453_v47 = vld [vmem:[#allocation2 + $0x60] sm:$0xff]   ;;  %20128 = vst [vmem:[#allocation10_spill] sm:$0xff] %v17058_v63 }
 0x126   : > { %14718 = vmatprep.mubr.msk.bf16.mxu0 %vm1397_vm7, %v15450_v16  ;;  %v15454_v16 = vld [vmem:[#allocation2 + $0x6c] sm:$0xff]   ;;  %v17062_v17 = vsel %vm16646_vm12, %v3578_v12, %v3579_v42  ;;  %v3606_v37 = vrot.slane %v3604_v28, 4 }
 0x127   : > { %20129 = vst [vmem:[#allocation11_spill] sm:$0xff] %v17062_v17  ;;  %v15459_v12 = vld [vmem:[#allocation2 + $0xa8] sm:$0xff]  }
 0x12d   : > { %14719 = vmatmul.mubr.msk.bf16.gmra.mrb[8].mxu0 %vm1397_vm7, %v15451_v55  ;;  %v15456_v55 = vld [vmem:[#allocation2 + $0x84] sm:$0xff]  }
 0x12e   : > { %14722 = vmatprep.mubr.msk.bf16.mxu0 %vm1397_vm7, %v15452_v4  ;;  %v2782_v4 = vsel %vm16285_vm8, %v17002_v41, %v16975_v57  ;;  %v17128_v41 = vld [vmem:[#allocation2 + $0x44] sm:$0x1] }
 0x135   : > { %14723 = vmatmul.mubr.msk.bf16.gmra.mrb[12].mxu0 %vm1397_vm7, %v15453_v47  ;;  %v2857_v47 = vrot.slane %v2855_v40, 4  ;;  %v3460_v40 = vld [vmem:[#allocation2 + $0xa8] sm:$0xe] }
 0x136   : > { %14726 = vmatprep.mubr.msk.bf16.mxu0 %vm1397_vm7, %v15454_v16  ;;  %v17078_v16 = vld [vmem:[#allocation2 + $0x38] sm:$0x1]  ;;  %v13581_v46 = vrot.slane %v3460_v40, 9  ;;  %v2893_v40 = vshll.u32 %v2736_v59, 16  ;;  %v2923_v59 = vshll.u32 %v17144_v33, 16 }
 0x137   : > { %v2861_v42 = vshll.u32 %v17078_v16, 16 }
 0x138   : > { %v2895_v63 = vrot.slane %v2893_v40, 5 }
 0x139   : > { %v17126_v57 = vrot.slane %v2861_v42, 5  ;;  %v2739_v42 = vld [vmem:[#allocation2 + $0x54] sm:$0xf] }
 0x13a   : > { %v2914_v60 = vshrl.u32 %v2739_v42, 16 }
 0x13d   : > { %14727 = vmatmul.mubr.msk.bf16.gmra.mrb[16].mxu0 %vm1397_vm7, %v15455_v58  ;;  %v2866_v58 = vshrl.u32 %v2733_v18, 16  ;;  %v2792_v18 = vsel %vm16285_vm8, %v17004_v19, %v16994_v2  ;;  %v17133_v2 = vld [vmem:[#allocation2 + $0xc4] sm:$0xf]  ;;  %v17135_v19 = vld [vmem:[#allocation2 + $0xc8] sm:$0x1] }
 0x13e   : > { %14730 = vmatprep.mubr.msk.bf16.mxu0 %vm1397_vm7, %v15456_v55  ;;  %v3607_v55 = vrot.slane %v17095_v52, 5  ;;  %v13536_v48 = vcombine.low %v2782_v4, %v2792_v18  ;;  %v2885_v4 = vshll.u32 %v17128_v41, 16 }
 0x140   : > { %v17114_v20 = vsel %vm16646_vm12, %v3606_v37, %v3607_v55  ;;  %v2868_v55 = vrot.slane %v2866_v58, 4  ;;  %v2849_v37 = vrot.slane %v2848_v26, 4  ;;  %v3462_v58 = vld [vmem:[#allocation2 + $0xc0] sm:$0xe]  ;;  %v3621_v26 = vrot.slane %v17135_v19, 5 }
 0x141   : > { %20133 = vst [vmem:[#allocation15_spill] sm:$0xff] %v17114_v20  ;;  %v13583_v20 = vrot.slane %v3462_v58, 9  ;;  %v2927_v58 = vshrl.u32 %v17144_v33, 16 }
 0x142   : > { %v2854_v40 = vsel %vm16285_vm8, %v2849_v37, %v17076_v10 }
 0x145   : > { %14731 = vmatmul.mubr.msk.bf16.gmra.mrb[20].mxu0 %vm1397_vm7, %v15457_v8  ;;  %v15460_v8 = vld [vmem:[#allocation2 + $0xb4] sm:$0xff]  }
 0x146   : > { %14734 = vmatprep.mubr.msk.bf16.mxu0 %vm1397_vm7, %v15458_v54  ;;  %v17106_v54 = vsel %vm16646_vm12, %v13581_v46, %v3604_v28  ;;  %v2858_v28 = vor.u32 %v2857_v47, %v17076_v10  ;;  %v2871_v46 = vrot.slane %v2869_v32, 5  ;;  %v2806_v47 = vsel %vm16285_vm8, %v17012_v56, %v16981_v3 }
 0x147   : > { %20132 = vst [vmem:[#allocation14_spill] sm:$0xff] %v17106_v54  ;;  %v3618_v32 = vrot.slane %v17133_v2, 5  ;;  %v2899_v3 = vshll.u32 %v16979_v25, 16  ;;  %v2903_v56 = vshrl.u32 %v16979_v25, 16  ;;  %v2887_v10 = vrot.slane %v2885_v4, 5 }
 0x148   : > { %v2859_v54 = vrot.slane %v2858_v28, 4  ;;  %v17187_v25 = vld [vmem:[#allocation2 + $0x5c] sm:$0x1] }
 0x149   : > { %v3620_v18 = vrot.slane %v3618_v32, 4  ;;  %v17151_v17 = vsel %vm16646_vm12, %v13583_v20, %v3618_v32  ;;  %v2816_v20 = vsel %vm16285_vm8, %v17018_v44, %v17006_v22  ;;  %v2840_v32 = vsel %vm16285_vm8, %v17120_v43, %v17072_v0 }
 0x14a   : > { %20134 = vst [vmem:[#allocation16_spill] sm:$0xff] %v17151_v17  ;;  %v2864_v22 = vsel %vm16285_vm8, %v2859_v54, %v17126_v57  ;;  %v17184_v0 = vrot.slane %v2923_v59, 5  ;;  %v2929_v43 = vrot.slane %v2927_v58, 4  ;;  %v2933_v58 = vshll.u32 %v17187_v25, 16 }
 0x14b   : > { %v17157_v28 = vsel %vm16646_vm12, %v3620_v18, %v3621_v26  ;;  %v17181_v26 = vrot.slane %v2899_v3, 5  ;;  %v2951_v3 = vshrl.u32 %v17024_v9, 16 }
 0x14c   : > { %20135 = vst [vmem:[#allocation17_spill] sm:$0xff] %v17157_v28  ;;  %v2930_v59 = vor.u32 %v2929_v43, %v17184_v0 }
 0x14d   : > { %14735 = vmatmul.mubr.msk.bf16.gmra.mrb[24].mxu0 %vm1397_vm7, %v15459_v12  ;;  %v2881_v12 = vrot.slane %v2879_v7, 4  ;;  %v2917_v7 = vshll.u32 %v2739_v42, 16  ;;  %v2830_v42 = vsel %vm16285_vm8, %v17054_v38, %v17020_v11  ;;  %v2742_v11 = vld [vmem:[#allocation2 + $0x60] sm:$0xf]  ;;  %v2916_v38 = vrot.slane %v2914_v60, 4 }
 0x14e   : > { %14738 = vmatprep.mubr.msk.bf16.mxu0 %vm1397_vm7, %v15460_v8  ;;  %v2872_v8 = vor.u32 %v2871_v46, %v2868_v55  ;;  %v2892_v46 = vrot.slane %v2890_v61, 4  ;;  %v2938_v54 = vshrl.u32 %v2742_v11, 16  ;;  %v2941_v57 = vshll.u32 %v2742_v11, 16  ;;  %v13617_v60 = vld [vmem:[%s20081_s1 + $0xc] sm:$0x3] }
 0x14f   : > { %v2882_v55 = vor.u32 %v2881_v12, %v17131_v23  ;;  %v2905_v12 = vrot.slane %v2903_v56, 4  ;;  %v2919_v61 = vrot.slane %v2917_v7, 5  ;;  %v13538_v56 = vcombine.low %v2830_v42, %v2840_v32 }
 0x150   : > { %v2873_v44 = vrot.slane %v2872_v8, 4  ;;  %v2896_v37 = vor.u32 %v2895_v63, %v2892_v46  ;;  %v2947_v8 = vshll.u32 %v17024_v9, 16  ;;  %v13539_v7 = vcombine.low %v2854_v40, %v2864_v22  ;;  %v17200_v9 = vld [vmem:[#allocation2 + $0x70] sm:$0xf] }
 0x151   : > { %v2883_v18 = vrot.slane %v2882_v55, 4  ;;  %v2920_v4 = vor.u32 %v2919_v61, %v2916_v38  ;;  %v2745_v55 = vld [vmem:[#allocation2 + $0x6c] sm:$0xf]  ;;  %v17205_v42 = vand.u32 %v13617_v60, %v16266_v5  ;;  %v2940_v32 = vrot.slane %v2938_v54, 4 }
 0x152   : > { %v2878_v63 = vsel %vm16285_vm8, %v2873_v44, %v17131_v23  ;;  %v2943_v23 = vrot.slane %v2941_v57, 5  ;;  %v17207_v40 = vrot.slane %v2947_v8, 5  ;;  %v2953_v22 = vrot.slane %v2951_v3, 4  ;;  %v2748_v44 = vld [vmem:[#allocation2 + $0x78] sm:$0xf] }
 0x153   : > { %v2888_v46 = vsel %vm16285_vm8, %v2883_v18, %v2887_v10  ;;  %v2965_v11 = vshll.u32 %v2745_v55, 16  ;;  %v2971_v38 = vshll.u32 %v17200_v9, 16  ;;  %v2975_v61 = vshrl.u32 %v17200_v9, 16 }
 0x154   : > { %v2921_v18 = vrot.slane %v2920_v4, 4  ;;  %v2931_v10 = vrot.slane %v2930_v59, 4  ;;  %v2989_v54 = vshll.u32 %v2748_v44, 16  ;;  %v2995_v57 = vshll.u32 %v17044_v6, 16 }
 0x155   : > { %14739 = vmatmul.mubr.msk.bf16.gmra.mrb[28].mxu0 %vm1397_vm7, %v15462_v31  ;;  %v2909_v31 = vshll.u32 %v16985_v35, 16  ;;  %v2906_v35 = vor.u32 %v2905_v12, %v17181_v26  ;;  %v2962_v12 = vshrl.u32 %v2745_v55, 16  ;;  %v2999_v8 = vshrl.u32 %v17044_v6, 16  ;;  %v17219_v55 = vld [vmem:[#allocation2 + $0x74] sm:$0x1] }
 0x156   : > { %14744 = vmatprep.mubr.msk.bf16.mxu0 %vm1397_vm7, %v13536_v48  ;;  %v13537_v48 = vcombine.low %v2806_v47, %v2816_v20  ;;  %v2897_v47 = vrot.slane %v2896_v37, 4  ;;  %v2935_v37 = vrot.slane %v2933_v58, 5  ;;  %v13540_v3 = vcombine.low %v2878_v63, %v2888_v46  ;;  %v2751_v46 = vld [vmem:[#allocation2 + $0x84] sm:$0xf] }
 0x157   : > { %v2911_v20 = vrot.slane %v2909_v31, 5  ;;  %v2907_v43 = vrot.slane %v2906_v35, 4  ;;  %v2986_v31 = vshrl.u32 %v2748_v44, 16  ;;  %v2944_v60 = vor.u32 %v2943_v23, %v2940_v32 }
 0x158   : > { %v2967_v35 = vrot.slane %v2965_v11, 5  ;;  %v17221_v4 = vrot.slane %v2971_v38, 5  ;;  %v2977_v59 = vrot.slane %v2975_v61, 4  ;;  %v2902_v58 = vsel %vm16285_vm8, %v2897_v47, %v17181_v26 }
 0x159   : > { %v2912_v6 = vsel %vm16285_vm8, %v2907_v43, %v2911_v20  ;;  %v2926_v63 = vsel %vm16285_vm8, %v2921_v18, %v17184_v0  ;;  %v2988_v32 = vrot.slane %v2986_v31, 4  ;;  %v2991_v23 = vrot.slane %v2989_v54, 5 }
 0x15a   : > { %v3001_v44 = vrot.slane %v2999_v8, 4  ;;  %v2945_v11 = vrot.slane %v2944_v60, 4  ;;  %v2981_v20 = vshll.u32 %v17219_v55, 16  ;;  %v2978_v0 = vor.u32 %v2977_v59, %v17221_v4  ;;  %v2754_v8 = vld [vmem:[#allocation2 + $0x90] sm:$0xf] }
 0x15b   : > { %v3010_v61 = vshrl.u32 %v2751_v46, 16  ;;  %v3013_v43 = vshll.u32 %v2751_v46, 16  ;;  %v2992_v31 = vor.u32 %v2991_v23, %v2988_v32  ;;  %v3034_v32 = vshrl.u32 %v2754_v8, 16 }
 0x15d   : > { %14745 = vmatmul.mubr.msk.bf16.vlgmr.msra.gmra.mrb[0].mxu0 %vm1397_vm7, %v13537_v48  ;;  %v2954_v48 = vor.u32 %v2953_v22, %v17207_v40  ;;  %v17233_v22 = vrot.slane %v2995_v57, 5  ;;  %v3005_v57 = vshll.u32 %v17046_v29, 16  ;;  %v3012_v59 = vrot.slane %v3010_v61, 4 }
 0x15e   : > { %14777 = vmatpush3.bf16.msra.mxu0 %v16965_v15  ;;  %14748 = vmatprep.mubr.msk.bf16.mxu0 %vm1397_vm7, %v13538_v56  ;;  %v2957_v15 = vshll.u32 %v17026_v45, 16  ;;  %v2964_v56 = vrot.slane %v2962_v12, 4  ;;  %v2936_v45 = vsel %vm16285_vm8, %v2931_v10, %v2935_v37  ;;  %v17235_v12 = vld [vmem:[#allocation2 + $0x88] sm:$0xf]  ;;  %v13541_v37 = vcombine.low %v2902_v58, %v2912_v6  ;;  %v2757_v6 = vld [vmem:[#allocation2 + $0x9c] sm:$0xf] }
 0x15f   : > { %14810 = vmatprep.subr.bf16.mxu0 %v17205_v42  ;;  %v2955_v26 = vrot.slane %v2954_v48, 4  ;;  %v3019_v18 = vshll.u32 %v17235_v12, 16  ;;  %v3023_v10 = vshrl.u32 %v17235_v12, 16  ;;  %v3002_v54 = vor.u32 %v3001_v44, %v17233_v22 }
 0x160   : > { %v2959_v47 = vrot.slane %v2957_v15, 5  ;;  %v2968_v38 = vor.u32 %v2967_v35, %v2964_v56  ;;  %v13542_v60 = vcombine.low %v2926_v63, %v2936_v45  ;;  %v17250_v15 = vld [vmem:[#allocation2 + $0x8c] sm:$0x1]  ;;  %v2979_v35 = vrot.slane %v2978_v0, 4  ;;  %v17254_v45 = vld [vmem:[#allocation2 + $0xa0] sm:$0xf] }
 0x161   : > { %v3015_v58 = vrot.slane %v3013_v43, 5  ;;  %v17252_v46 = vrot.slane %v3019_v18, 5  ;;  %v3025_v29 = vrot.slane %v3023_v10, 4  ;;  %v3037_v63 = vshll.u32 %v2754_v8, 16 }
 0x162   : > { %v2960_v48 = vsel %vm16285_vm8, %v2955_v26, %v2959_v47  ;;  %v2969_v56 = vrot.slane %v2968_v38, 4  ;;  %v2993_v23 = vrot.slane %v2992_v31, 4  ;;  %v3007_v44 = vrot.slane %v3005_v57, 5 }
 0x163   : > { %v3043_v26 = vshll.u32 %v17067_v51, 16  ;;  %v3047_v47 = vshrl.u32 %v17067_v51, 16  ;;  %v3061_v38 = vshll.u32 %v2757_v6, 16  ;;  %v3067_v43 = vshll.u32 %v17254_v45, 16 }
 0x164   : > { %v2974_v0 = vsel %vm16285_vm8, %v2969_v56, %v17221_v4  ;;  %v3071_v18 = vshrl.u32 %v17254_v45, 16  ;;  %v3016_v10 = vor.u32 %v3015_v58, %v3012_v59  ;;  %v3026_v51 = vor.u32 %v3025_v29, %v17252_v46  ;;  %v17276_v59 = vld [vmem:[#allocation2 + $0xa4] sm:$0x1] }
 0x165   : > { %14749 = vmatmul.mubr.msk.bf16.gmra.mrb[4].mxu0 %vm1397_vm7, %v13539_v7  ;;  %v2950_v7 = vsel %vm16285_vm8, %v2945_v11, %v17207_v40  ;;  %v3003_v40 = vrot.slane %v3002_v54, 4  ;;  %v3029_v11 = vshll.u32 %v17250_v15, 16  ;;  %v3036_v31 = vrot.slane %v3034_v32, 4  ;;  %v2760_v32 = vld [vmem:[#allocation2 + $0xa8] sm:$0xf] }
 0x166   : > { %14752 = vmatprep.mubr.msk.bf16.mxu0 %vm1397_vm7, %v13540_v3  ;;  %v2983_v3 = vrot.slane %v2981_v20, 5  ;;  %v3058_v20 = vshrl.u32 %v2757_v6, 16  ;;  %v3039_v54 = vrot.slane %v3037_v63, 5  ;;  %v17274_v8 = vrot.slane %v3043_v26, 5 }
 0x167   : > { %v3008_v4 = vsel %vm16285_vm8, %v3003_v40, %v3007_v44  ;;  %v3031_v57 = vrot.slane %v3029_v11, 5  ;;  %v13543_v6 = vcombine.low %v2950_v7, %v2960_v48  ;;  %v3069_v58 = vrot.slane %v3067_v43, 5  ;;  %v17281_v7 = vld [vmem:[#allocation2 + $0xb8] sm:$0xf] }
 0x168   : > { %v2984_v61 = vsel %vm16285_vm8, %v2979_v35, %v2983_v3  ;;  %v3049_v3 = vrot.slane %v3047_v47, 4  ;;  %v3060_v56 = vrot.slane %v3058_v20, 4  ;;  %v3063_v35 = vrot.slane %v3061_v38, 5  ;;  %v2763_v47 = vld [vmem:[#allocation2 + $0xb4] sm:$0xf] }
 0x169   : > { %v3073_v29 = vrot.slane %v3071_v18, 4  ;;  %v3017_v63 = vrot.slane %v3016_v10, 4  ;;  %v3027_v28 = vrot.slane %v3026_v51, 4  ;;  %v3040_v17 = vor.u32 %v3039_v54, %v3036_v31 }
 0x16a   : > { %v3050_v40 = vor.u32 %v3049_v3, %v17274_v8  ;;  %v3064_v44 = vor.u32 %v3063_v35, %v3060_v56  ;;  %v3077_v11 = vshll.u32 %v17276_v59, 16  ;;  %v3082_v26 = vshrl.u32 %v2760_v32, 16 }
 0x16b   : > { %v3074_v48 = vor.u32 %v3073_v29, %v3069_v58  ;;  %v3085_v20 = vshll.u32 %v2760_v32, 16  ;;  %v3091_v38 = vshll.u32 %v17093_v39, 16  ;;  %v3041_v43 = vrot.slane %v3040_v17, 4 }
 0x16c   : > { %v3106_v10 = vshrl.u32 %v2763_v47, 16  ;;  %v3109_v51 = vshll.u32 %v2763_v47, 16  ;;  %v3115_v31 = vshll.u32 %v17281_v7, 16  ;;  %v3119_v54 = vshrl.u32 %v17281_v7, 16 }
 0x16d   : > { %14753 = vmatmul.mubr.msk.bf16.gmra.mrb[8].mxu0 %vm1397_vm7, %v13541_v37  ;;  %v2998_v37 = vsel %vm16285_vm8, %v2993_v23, %v17233_v22  ;;  %v3053_v22 = vshll.u32 %v17069_v34, 16  ;;  %v3022_v34 = vsel %vm16285_vm8, %v3017_v63, %v17252_v46  ;;  %v3084_v3 = vrot.slane %v3082_v26, 4 }
 0x16e   : > { %14756 = vmatprep.mubr.msk.bf16.mxu0 %vm1397_vm7, %v13542_v60  ;;  %v13544_v60 = vcombine.low %v2974_v0, %v2984_v61  ;;  %v13545_v23 = vcombine.low %v2998_v37, %v3008_v4  ;;  %v3095_v0 = vshrl.u32 %v17093_v39, 16  ;;  %v3032_v61 = vsel %vm16285_vm8, %v3027_v28, %v3031_v57  ;;  %v2766_v57 = vld [vmem:[#allocation2 + $0xc0] sm:$0xf] }
 0x16f   : > { %v3055_v18 = vrot.slane %v3053_v22, 5  ;;  %v3051_v37 = vrot.slane %v3050_v40, 4  ;;  %v3065_v4 = vrot.slane %v3064_v44, 4  ;;  %v3079_v39 = vrot.slane %v3077_v11, 5  ;;  %v17301_v44 = vld [vmem:[#allocation2 + $0xbc] sm:$0x1] }
 0x170   : > { %v3075_v56 = vrot.slane %v3074_v48, 4  ;;  %v3087_v35 = vrot.slane %v3085_v20, 5  ;;  %v13546_v46 = vcombine.low %v3022_v34, %v3032_v61  ;;  %v3108_v29 = vrot.slane %v3106_v10, 4 }
 0x171   : > { %v3111_v32 = vrot.slane %v3109_v51, 5  ;;  %v3117_v28 = vrot.slane %v3115_v31, 5  ;;  %v3121_v17 = vrot.slane %v3119_v54, 4  ;;  %v3046_v63 = vsel %vm16285_vm8, %v3041_v43, %v17274_v8 }
 0x172   : > { %v3056_v22 = vsel %vm16285_vm8, %v3051_v37, %v3055_v18  ;;  %v3070_v40 = vsel %vm16285_vm8, %v3065_v4, %v3069_v58  ;;  %v3080_v11 = vsel %vm16285_vm8, %v3075_v56, %v3079_v39  ;;  %v3088_v26 = vor.u32 %v3087_v35, %v3084_v3 }
 0x173   : > { %v3101_v48 = vshll.u32 %v17095_v52, 16  ;;  %v3130_v8 = vshrl.u32 %v2766_v57, 16  ;;  %v3133_v20 = vshll.u32 %v2766_v57, 16  ;;  %v3112_v58 = vor.u32 %v3111_v32, %v3108_v29 }
 0x174   : > { %v3122_v34 = vor.u32 %v3121_v17, %v3117_v28  ;;  %v3125_v61 = vshll.u32 %v17301_v44, 16  ;;  %v13548_v43 = vcombine.low %v3070_v40, %v3080_v11  ;;  %v3089_v18 = vrot.slane %v3088_v26, 4  ;;  %v16060_v17 = vld [vmem:[#allocation2 + $0x10] sm:$0xf] }
 0x175   : > { %14757 = vmatmul.mubr.msk.bf16.gmra.mrb[12].mxu0 %vm1397_vm7, %v13543_v6  ;;  %v3093_v6 = vrot.slane %v3091_v38, 5  ;;  %v3139_v38 = vshll.u32 %v17133_v2, 16  ;;  %v3103_v51 = vrot.slane %v3101_v48, 5  ;;  %v3132_v31 = vrot.slane %v3130_v8, 4 }
 0x176   : > { %14760 = vmatprep.mubr.msk.bf16.mxu0 %vm1397_vm7, %v13544_v60  ;;  %v3097_v60 = vrot.slane %v3095_v0, 4  ;;  %v3143_v0 = vshrl.u32 %v17133_v2, 16  ;;  %v3135_v54 = vrot.slane %v3133_v20, 5  ;;  %v3113_v4 = vrot.slane %v3112_v58, 4  ;;  %v16061_v20 = vld [vmem:[#allocation2 + $0x1c] sm:$0xf] }
 0x177   : > { %v3141_v52 = vrot.slane %v3139_v38, 5  ;;  %v3123_v39 = vrot.slane %v3122_v34, 4  ;;  %v3127_v3 = vrot.slane %v3125_v61, 5  ;;  %v3094_v2 = vsel %vm16285_vm8, %v3089_v18, %v3093_v6  ;;  %v3448_v34 = vld [vmem:[#allocation2 + $0x18] sm:$0xe] }
 0x178   : > { %v3098_v47 = vor.u32 %v3097_v60, %v3093_v6  ;;  %v3145_v37 = vrot.slane %v3143_v0, 4  ;;  %v3136_v35 = vor.u32 %v3135_v54, %v3132_v31  ;;  %v3118_v29 = vsel %vm16285_vm8, %v3113_v4, %v3117_v28  ;;  %v3449_v61 = vld [vmem:[#allocation2 + $0x24] sm:$0xe] }
 0x179   : > { %v3128_v32 = vsel %vm16285_vm8, %v3123_v39, %v3127_v3  ;;  %v3513_v57 = vrot.slane %v16060_v17, 5  ;;  %v3516_v8 = vrot.slane %v16971_v36, 5  ;;  %v3520_v38 = vrot.slane %v16061_v20, 5  ;;  %v3450_v3 = vld [vmem:[#allocation2 + $0x30] sm:$0xe] }
 0x17a   : > { %v3099_v10 = vrot.slane %v3098_v47, 4  ;;  %v3146_v60 = vor.u32 %v3145_v37, %v3141_v52  ;;  %v13550_v6 = vcombine.low %v3118_v29, %v3128_v32  ;;  %v3137_v40 = vrot.slane %v3136_v35, 4 }
 0x17b   : > { %v3515_v48 = vrot.slane %v3513_v57, 4  ;;  %v3527_v36 = vrot.slane %v16977_v13, 5  ;;  %v13569_v18 = vrot.slane %v3448_v34, 9  ;;  %v13570_v31 = vrot.slane %v3449_v61, 9  ;;  %v3457_v61 = vld [vmem:[#allocation2 + $0x84] sm:$0xe] }
 0x17c   : > { %v3104_v56 = vsel %vm16285_vm8, %v3099_v10, %v3103_v51  ;;  %v3147_v11 = vrot.slane %v3146_v60, 4  ;;  %v3522_v10 = vrot.slane %v3520_v38, 4  ;;  %v3523_v51 = vrot.slane %v16973_v27, 5 }
 0x17d   : > { %14761 = vmatmul.mubr.msk.bf16.gmra.mrb[16].mxu0 %vm1397_vm7, %v13545_v23  ;;  %v13547_v23 = vcombine.low %v3046_v63, %v3056_v22  ;;  %v3447_v63 = vld [vmem:[#allocation2 + $0xc] sm:$0xe]  ;;  %v13549_v22 = vcombine.low %v3094_v2, %v3104_v56  ;;  %v3517_v58 = vsel %vm16646_vm12, %v3515_v48, %v3516_v8  ;;  %v3529_v54 = vrot.slane %v3527_v36, 4  ;;  %v3451_v2 = vld [vmem:[#allocation2 + $0x3c] sm:$0xe] }
 0x17e   : > { %14764 = vmatprep.mubr.msk.bf16.mxu0 %vm1397_vm7, %v13546_v46  ;;  %v3149_v46 = vshll.u32 %v17135_v19, 16  ;;  %v13568_v47 = vrot.slane %v3447_v63, 9  ;;  %v3142_v19 = vsel %vm16285_vm8, %v3137_v40, %v3141_v52  ;;  %v3530_v52 = vrot.slane %v16996_v53, 5  ;;  %v13650_v56 = vld [vmem:[%s20081_s1 + $0xe] sm:$0x3] }
 0x17f   : > { %v3521_v37 = vsel %vm16646_vm12, %v13569_v18, %v3520_v38  ;;  %v3524_v13 = vsel %vm16646_vm12, %v3522_v10, %v3523_v51  ;;  %v3534_v4 = vrot.slane %v17014_v50, 5  ;;  %v3528_v39 = vsel %vm16646_vm12, %v13570_v31, %v3527_v36  ;;  %v3453_v40 = vld [vmem:[#allocation2 + $0x54] sm:$0xe]  ;;  %v3459_v51 = vld [vmem:[#allocation2 + $0x9c] sm:$0xe] }
 0x180   : > { %v3151_v26 = vrot.slane %v3149_v46, 5  ;;  %v3514_v0 = vsel %vm16646_vm12, %v13568_v47, %v3513_v57  ;;  %v3531_v27 = vsel %vm16646_vm12, %v3529_v54, %v3530_v52  ;;  %v3541_v53 = vrot.slane %v17088_v1, 5 }
 0x181   : > { %v13586_v35 = vcombine.low %v3521_v37, %v3524_v13  ;;  %v13587_v60 = vcombine.low %v3528_v39, %v3531_v27  ;;  %v13571_v46 = vrot.slane %v3450_v3, 9  ;;  %v3536_v29 = vrot.slane %v3534_v4, 4  ;;  %v20138_v37 = vld [vmem:[#allocation10_spill] sm:$0xff] }
 0x182   : > { %v3152_v28 = vsel %vm16285_vm8, %v3147_v11, %v3151_v26  ;;  %v3537_v50 = vrot.slane %v17078_v16, 5  ;;  %v13572_v32 = vrot.slane %v3451_v2, 9  ;;  %v3543_v17 = vrot.slane %v3541_v53, 4  ;;  %v3461_v39 = vld [vmem:[#allocation2 + $0xb4] sm:$0xe]  ;;  %v20141_v2 = vld [vmem:[#allocation12_spill] sm:$0xff] }
 0x183   : > { %v3544_v57 = vrot.slane %v17128_v41, 5  ;;  %v17354_v63 = vand.u32 %v13650_v56, %v16266_v5  ;;  %v3535_v1 = vsel %vm16646_vm12, %v13571_v46, %v3534_v4  ;;  %v13574_v26 = vrot.slane %v3453_v40, 9  ;;  %v20142_v56 = vld [vmem:[#allocation13_spill] sm:$0xff]  ;;  %v15466_v40 = vld [vmem:[#allocation2 + $0x3c] sm:$0xff]  }
 0x184   : > { %v3542_v16 = vsel %vm16646_vm12, %v13572_v32, %v3541_v53  ;;  %v3558_v48 = vrot.slane %v17187_v25, 5  ;;  %v20136_v25 = vcombine.low %v17000_v14, %v17010_v24  ;;  %v20137_v14 = vcombine.low %v17035_v21, %v17039_v49  ;;  %v20139_v21 = vld [vmem:[#allocation11_spill] sm:$0xff] }
 0x185   : > { %14765 = vmatmul.mubr.msk.bf16.gmra.mrb[20].mxu0 %vm1397_vm7, %v13547_v23  ;;  %v13551_v23 = vcombine.low %v3142_v19, %v3152_v28  ;;  %v3545_v41 = vsel %vm16646_vm12, %v3543_v17, %v3544_v57  ;;  %v3455_v28 = vld [vmem:[#allocation2 + $0x6c] sm:$0xe]  ;;  %v13580_v54 = vrot.slane %v3459_v51, 9  ;;  %v20140_v49 = vcombine.low %v20138_v37, %v20139_v21  ;;  %v20147_v17 = vld [vmem:[#allocation16_spill] sm:$0xff] }
 0x186   : > { %14768 = vmatprep.mubr.msk.bf16.mxu0 %vm1397_vm7, %v13548_v43  ;;  %v13585_v43 = vcombine.low %v3514_v0, %v3517_v58  ;;  %v13589_v11 = vcombine.low %v3542_v16, %v3545_v41  ;;  %v13576_v38 = vrot.slane %v3455_v28, 9  ;;  %v3572_v58 = vrot.slane %v17219_v55, 5  ;;  %v20148_v57 = vld [vmem:[#allocation17_spill] sm:$0xff]  ;;  %v15469_v28 = vld [vmem:[#allocation2 + $0x60] sm:$0xff]  }
 0x187   : > { %v3586_v55 = vrot.slane %v17250_v15, 5  ;;  %v3600_v15 = vrot.slane %v17276_v59, 5  ;;  %v13582_v3 = vrot.slane %v3461_v39, 9  ;;  %v3614_v59 = vrot.slane %v17301_v44, 5  ;;  %v15463_v44 = vld [vmem:[#allocation2 + $0x18] sm:$0xff]   ;;  %v15464_v16 = vld [vmem:[#allocation2 + $0x24] sm:$0xff]  }
 0x188   : > { %v15465_v41 = vld [vmem:[#allocation2 + $0x30] sm:$0xff]   ;;  %v17481_v21 = vld [vmem:[#allocation2 + $0x88] sm:$0xf] }
 0x18d   : > { %14769 = vmatmul.mubr.msk.bf16.gmra.mrb[24].mxu0 %vm1397_vm7, %v13549_v22  ;;  %v3538_v22 = vsel %vm16646_vm12, %v3536_v29, %v3537_v50  ;;  %v20144_v29 = vld [vmem:[#allocation14_spill] sm:$0xff]  ;;  %v20145_v50 = vld [vmem:[#allocation15_spill] sm:$0xff] }
 0x18e   : > { %14772 = vmatprep.mubr.msk.bf16.mxu0 %vm1397_vm7, %v13550_v6  ;;  %v3555_v6 = vrot.slane %v17144_v33, 5  ;;  %v3569_v33 = vrot.slane %v17200_v9, 5  ;;  %v3583_v9 = vrot.slane %v17235_v12, 5  ;;  %v3597_v12 = vrot.slane %v17254_v45, 5 }
 0x18f   : > { %v3611_v45 = vrot.slane %v17281_v7, 5  ;;  %v20146_v32 = vcombine.low %v20144_v29, %v20145_v50  ;;  %v15473_v50 = vld [vmem:[#allocation2 + $0x90] sm:$0xff]  }
 0x190   : > { %v3557_v47 = vrot.slane %v3555_v6, 4  ;;  %v3556_v8 = vsel %vm16646_vm12, %v13574_v26, %v3555_v6  ;;  %v3571_v0 = vrot.slane %v3569_v33, 4  ;;  %v3570_v34 = vsel %vm16646_vm12, %v13576_v38, %v3569_v33  ;;  %v17443_v26 = vld [vmem:[#allocation2 + $0x5c] sm:$0x1]  ;;  %v17594_v38 = vld [vmem:[#allocation2 + $0xd4] sm:$0x1] }
 0x191   : > { %v3585_v18 = vrot.slane %v3583_v9, 4  ;;  %v3599_v52 = vrot.slane %v3597_v12, 4  ;;  %v3598_v13 = vsel %vm16646_vm12, %v13580_v54, %v3597_v12  ;;  %v3613_v53 = vrot.slane %v3611_v45, 4 }
 0x192   : > { %v3559_v19 = vsel %vm16646_vm12, %v3557_v47, %v3558_v48  ;;  %v3573_v36 = vsel %vm16646_vm12, %v3571_v0, %v3572_v58  ;;  %v5106_v48 = vrot.slane %v17443_v26, 5  ;;  %v17459_v0 = vld [vmem:[#allocation2 + $0x70] sm:$0xf]  ;;  %v17461_v58 = vld [vmem:[#allocation2 + $0x74] sm:$0x1] }
 0x193   : > { %v13591_v20 = vcombine.low %v3556_v8, %v3559_v19  ;;  %v3587_v10 = vsel %vm16646_vm12, %v3585_v18, %v3586_v55  ;;  %v3601_v4 = vsel %vm16646_vm12, %v3599_v52, %v3600_v15  ;;  %v3615_v46 = vsel %vm16646_vm12, %v3613_v53, %v3614_v59  ;;  %v15468_v19 = vld [vmem:[#allocation2 + $0x54] sm:$0xff]   ;;  %v17466_v18 = vld [vmem:[#allocation2 + $0x1c] sm:$0xf]  ;;  %v17490_v59 = vld [vmem:[#allocation2 + $0x28] sm:$0xf] }
 0x194   : > { %v13597_v27 = vcombine.low %v3598_v13, %v3601_v4  ;;  %v4334_v54 = vshll.u32 %v17466_v18, 16  ;;  %v4338_v52 = vshrl.u32 %v17466_v18, 16  ;;  %v5011_v13 = vld [vmem:[#allocation2 + $0x84] sm:$0xe]  ;;  %v5131_v4 = vrot.slane %v17481_v21, 5 }
 0x195   : > { %14773 = vmatmul.mubr.msk.bf16.gmra.mrb[28].mxu0 %vm1397_vm7, %v13551_v23  ;;  %v13593_v23 = vcombine.low %v3570_v34, %v3573_v36  ;;  %v5117_v34 = vrot.slane %v17459_v0, 5  ;;  %v5120_v36 = vrot.slane %v17461_v58, 5  ;;  %v13692_v39 = vrot.slane %v5011_v13, 9  ;;  %v15475_v13 = vld [vmem:[#allocation2 + $0xa8] sm:$0xff]  }
 0x196   : > { %14778 = vmatprep.mubr.msk.bf16.mxu0 %vm1397_vm7, %v13585_v43  ;;  %v13578_v43 = vrot.slane %v3457_v61, 9  ;;  %v17488_v53 = vrot.slane %v4334_v54, 5 }
 0x197   : > { %v5119_v61 = vrot.slane %v5117_v34, 4  ;;  %v17496_v29 = vsel %vm16646_vm12, %v13692_v39, %v5131_v4 }
 0x198   : > { %v3584_v24 = vsel %vm16646_vm12, %v13578_v43, %v3583_v9  ;;  %v4276_v43 = vld [vmem:[#allocation2 + $0x18] sm:$0xf]  ;;  %20150 = vst [vmem:[#allocation10_spill] sm:$0xff] %v17496_v29 }
 0x199   : > { %v13595_v31 = vcombine.low %v3584_v24, %v3587_v10  ;;  %v4279_v24 = vld [vmem:[#allocation2 + $0x24] sm:$0xf]  ;;  %v17474_v10 = vsel %vm16646_vm12, %v5119_v61, %v5120_v36  ;;  %v4325_v51 = vshrl.u32 %v4276_v43, 16 }
 0x19a   : > { %v4349_v15 = vshrl.u32 %v4279_v24, 16  ;;  %v4352_v37 = vshll.u32 %v4279_v24, 16  ;;  %v17525_v24 = vld [vmem:[#allocation2 + $0x40] sm:$0xf] }
 0x19d   : > { %14779 = vmatmul.mubr.msk.bf16.vlgmr.msra.gmra.mrb[0].mxu0 %vm1397_vm7, %v13586_v35  ;;  %v20143_v35 = vcombine.low %v20141_v2, %v20142_v56  ;;  %v5133_v2 = vrot.slane %v5131_v4, 4  ;;  %v15472_v56 = vld [vmem:[#allocation2 + $0x84] sm:$0xff]  }
 0x19e   : > { %14811 = vmatpush3.bf16.msra.mxu0 %v17205_v42  ;;  %14782 = vmatprep.mubr.msk.bf16.mxu0 %vm1397_vm7, %v13587_v60  ;;  %v13588_v42 = vcombine.low %v3535_v1, %v3538_v22  ;;  %v3612_v60 = vsel %vm16646_vm12, %v13582_v3, %v3611_v45  ;;  %v20149_v1 = vcombine.low %v20147_v17, %v20148_v57  ;;  %v13699_v22 = vld [vmem:[%s20081_s1 + $0x10] sm:$0x3]  ;;  %v4362_v17 = vshrl.u32 %v17490_v59, 16 }
 0x19f   : > { %14844 = vmatprep.subr.bf16.mxu0 %v17354_v63  ;;  %v13599_v7 = vcombine.low %v3612_v60, %v3615_v46  ;;  %v17434_v6 = vand.u32 %v13699_v22, %v16266_v5  ;;  %v5007_v5 = vld [vmem:[#allocation2 + $0x54] sm:$0xe]  ;;  %v4340_v60 = vrot.slane %v4338_v52, 4  ;;  %v4351_v46 = vrot.slane %v4349_v15, 4  ;;  %v4282_v57 = vld [vmem:[#allocation2 + $0x30] sm:$0xf] }
 0x1a0   : > { %v4364_v36 = vrot.slane %v4362_v17, 4  ;;  %v4410_v17 = vshrl.u32 %v17525_v24, 16 }
 0x1a5   : > { %14783 = vmatmul.mubr.msk.bf16.gmra.mrb[4].mxu0 %vm1397_vm7, %v13588_v42  ;;  %v15467_v42 = vld [vmem:[#allocation2 + $0x48] sm:$0xff]  }
 0x1a6   : > { %14786 = vmatprep.mubr.msk.bf16.mxu0 %vm1397_vm7, %v13589_v11  ;;  %v17441_v11 = vld [vmem:[#allocation2 + $0x58] sm:$0xf] }
 0x1a7   : > { %v5103_v47 = vrot.slane %v17441_v11, 5 }
 0x1a9   : > { %v5105_v8 = vrot.slane %v5103_v47, 4 }
 0x1ad   : > { %14787 = vmatmul.mubr.msk.bf16.gmra.mrb[8].mxu0 %vm1397_vm7, %v20136_v25  ;;  %v5009_v25 = vld [vmem:[#allocation2 + $0x6c] sm:$0xe] }
 0x1ae   : > { %14790 = vmatprep.mubr.msk.bf16.mxu0 %vm1397_vm7, %v13591_v20  ;;  %v17454_v20 = vsel %vm16646_vm12, %v5105_v8, %v5106_v48  ;;  %v13690_v9 = vrot.slane %v5009_v25, 9  ;;  %v17515_v48 = vld [vmem:[#allocation2 + $0xa4] sm:$0x1]  ;;  %v4376_v8 = vshll.u32 %v4282_v57, 16 }
 0x1af   : > { %v5148_v25 = vrot.slane %v17515_v48, 5 }
 0x1b0   : > { %v17470_v55 = vsel %vm16646_vm12, %v13690_v9, %v5117_v34  ;;  %v4285_v9 = vld [vmem:[#allocation2 + $0x3c] sm:$0xf]  ;;  %v4378_v39 = vrot.slane %v4376_v8, 5  ;;  %v5015_v8 = vld [vmem:[#allocation2 + $0xb4] sm:$0xe] }
 0x1b5   : > { %14791 = vmatmul.mubr.msk.bf16.gmra.mrb[12].mxu0 %vm1397_vm7, %v20137_v14  ;;  %v15471_v14 = vld [vmem:[#allocation2 + $0x78] sm:$0xff]  }
 0x1b6   : > { %14794 = vmatprep.mubr.msk.bf16.mxu0 %vm1397_vm7, %v13593_v23  ;;  %v15470_v23 = vld [vmem:[#allocation2 + $0x6c] sm:$0xff]  }
 0x1bd   : > { %14795 = vmatmul.mubr.msk.bf16.gmra.mrb[16].mxu0 %vm1397_vm7, %v20140_v49  ;;  %v17483_v49 = vld [vmem:[#allocation2 + $0x8c] sm:$0x1] }
 0x1be   : > { %14798 = vmatprep.mubr.msk.bf16.mxu0 %vm1397_vm7, %v13595_v31  ;;  %v4328_v31 = vshll.u32 %v4276_v43, 16  ;;  %v5134_v45 = vrot.slane %v17483_v49, 5 }
 0x1c0   : > { %v4330_v3 = vrot.slane %v4328_v31, 5  ;;  %v15474_v31 = vld [vmem:[#allocation2 + $0x9c] sm:$0xff]  }
 0x1c5   : > { %14799 = vmatmul.mubr.msk.bf16.gmra.mrb[20].mxu0 %vm1397_vm7, %v20143_v35  ;;  %v17492_v35 = vld [vmem:[#allocation2 + $0x20] sm:$0x1] }
 0x1c6   : > { %14802 = vmatprep.mubr.msk.bf16.mxu0 %vm1397_vm7, %v13597_v27  ;;  %v4327_v27 = vrot.slane %v4325_v51, 4  ;;  %v4344_v22 = vshll.u32 %v17492_v35, 16 }
 0x1c8   : > { %v4346_v15 = vrot.slane %v4344_v22, 5  ;;  %v4288_v22 = vld [vmem:[#allocation2 + $0x48] sm:$0xf] }
 0x1cd   : > { %14803 = vmatmul.mubr.msk.bf16.gmra.mrb[24].mxu0 %vm1397_vm7, %v20146_v32  ;;  %v17500_v32 = vsel %vm16646_vm12, %v5133_v2, %v5134_v45  ;;  %v4397_v2 = vshrl.u32 %v4285_v9, 16 }
 0x1ce   : > { %14806 = vmatprep.mubr.msk.bf16.mxu0 %vm1397_vm7, %v13599_v7  ;;  %v4354_v7 = vrot.slane %v4352_v37, 5  ;;  %20151 = vst [vmem:[#allocation11_spill] sm:$0xff] %v17500_v32  ;;  %v17613_v32 = vld [vmem:[#allocation2 + $0x64] sm:$0xf] }
 0x1d5   : > { %14807 = vmatmul.mubr.msk.bf16.gmra.mrb[28].mxu0 %vm1397_vm7, %v20149_v1  ;;  %v4291_v1 = vld [vmem:[#allocation2 + $0x54] sm:$0xf] }
 0x1d6   : > { %14812 = vmatprep.mubr.msk.bf16.mxu0 %vm1397_vm7, %v15463_v44  ;;  %v4358_v44 = vshll.u32 %v17490_v59, 16 }
 0x1d8   : > { %v17520_v34 = vrot.slane %v4358_v44, 5 }
 0x1dd   : > { %14813 = vmatmul.mubr.msk.bf16.vlgmr.msra.gmra.mrb[0].mxu0 %vm1397_vm7, %v15464_v16  ;;  %v17507_v16 = vld [vmem:[#allocation2 + $0x2c] sm:$0x1] }
 0x1de   : > { %14845 = vmatpush3.bf16.msra.mxu0 %v17354_v63  ;;  %14816 = vmatprep.mubr.msk.bf16.mxu0 %vm1397_vm7, %v15465_v41  ;;  %v13688_v63 = vrot.slane %v5007_v5, 9  ;;  %v4331_v41 = vor.u32 %v4330_v3, %v4327_v27  ;;  %v17511_v5 = vld [vmem:[#allocation2 + $0x34] sm:$0xf]  ;;  %v17537_v3 = vld [vmem:[#allocation2 + $0x38] sm:$0x1] }
 0x1df   : > { %14878 = vmatprep.subr.bf16.mxu0 %v17434_v6  ;;  %v4382_v43 = vshll.u32 %v17511_v5, 16 }
 0x1e0   : > { %v17450_v33 = vsel %vm16646_vm12, %v13688_v63, %v5103_v47  ;;  %v17513_v47 = vld [vmem:[#allocation2 + $0xa0] sm:$0xf]  ;;  %v4373_v63 = vshrl.u32 %v4282_v57, 16  ;;  %v4332_v54 = vrot.slane %v4331_v41, 4  ;;  %v4365_v57 = vor.u32 %v4364_v36, %v17520_v34  ;;  %v17549_v41 = vld [vmem:[#allocation2 + $0xb8] sm:$0xf] }
 0x1e2   : > { %v4375_v45 = vrot.slane %v4373_v63, 4  ;;  %v4392_v63 = vshll.u32 %v17537_v3, 16 }
 0x1e5   : > { %14817 = vmatmul.mubr.msk.bf16.gmra.mrb[4].mxu0 %vm1397_vm7, %v15466_v40  ;;  %v4341_v40 = vor.u32 %v4340_v60, %v17488_v53  ;;  %v4406_v60 = vshll.u32 %v17525_v24, 16 }
 0x1e6   : > { %14820 = vmatprep.mubr.msk.bf16.mxu0 %vm1397_vm7, %v15467_v42  ;;  %v4355_v42 = vor.u32 %v4354_v7, %v4351_v46 }
 0x1e7   : > { %v4342_v52 = vrot.slane %v4341_v40, 4  ;;  %v17551_v40 = vld [vmem:[#allocation2 + $0xbc] sm:$0x1]  ;;  %v17559_v36 = vrot.slane %v4406_v60, 5  ;;  %v15477_v60 = vld [vmem:[#allocation2 + $0xc0] sm:$0xff]  }
 0x1e8   : > { %v17531_v4 = vrot.slane %v4355_v42, 4  ;;  %v4379_v42 = vor.u32 %v4378_v39, %v4375_v45  ;;  %v15476_v45 = vld [vmem:[#allocation2 + $0xb4] sm:$0xff]   ;;  %v4337_v39 = vsel %vm16285_vm8, %v4332_v54, %v17488_v53 }
 0x1e9   : > { %v4347_v46 = vsel %vm16285_vm8, %v4342_v52, %v4346_v15 }
 0x1ed   : > { %14821 = vmatmul.mubr.msk.bf16.gmra.mrb[8].mxu0 %vm1397_vm7, %v15468_v19  ;;  %v5013_v19 = vld [vmem:[#allocation2 + $0x9c] sm:$0xe] }
 0x1ee   : > { %14824 = vmatprep.mubr.msk.bf16.mxu0 %vm1397_vm7, %v15469_v28  ;;  %v5145_v28 = vrot.slane %v17513_v47, 5  ;;  %v13694_v61 = vrot.slane %v5013_v19, 9  ;;  %v5159_v19 = vrot.slane %v17549_v41, 5 }
 0x1f0   : > { %v5147_v51 = vrot.slane %v5145_v28, 4  ;;  %v17529_v37 = vsel %vm16646_vm12, %v13694_v61, %v5145_v28  ;;  %v5162_v28 = vrot.slane %v17551_v40, 5 }
 0x1f1   : > { %20152 = vst [vmem:[#allocation12_spill] sm:$0xff] %v17529_v37 }
 0x1f2   : > { %v17535_v27 = vsel %vm16646_vm12, %v5147_v51, %v5148_v25  ;;  %v17557_v25 = vld [vmem:[#allocation2 + $0x44] sm:$0x1]  ;;  %v17562_v51 = vld [vmem:[#allocation2 + $0x4c] sm:$0xf] }
 0x1f3   : > { %20153 = vst [vmem:[#allocation13_spill] sm:$0xff] %v17535_v27  ;;  %v4416_v53 = vshll.u32 %v17557_v25, 16  ;;  %v4430_v54 = vshll.u32 %v17562_v51, 16  ;;  %v4434_v52 = vshrl.u32 %v17562_v51, 16  ;;  %v15478_v27 = vld [vmem:[#allocation2 + $0xcc] sm:$0xff]  }
 0x1f5   : > { %14825 = vmatmul.mubr.msk.bf16.gmra.mrb[12].mxu0 %vm1397_vm7, %v15470_v23  ;;  %v4368_v23 = vshll.u32 %v17507_v16, 16 }
 0x1f6   : > { %14828 = vmatprep.mubr.msk.bf16.mxu0 %vm1397_vm7, %v15471_v14  ;;  %v4386_v14 = vshrl.u32 %v17511_v5, 16 }
 0x1f7   : > { %v17542_v7 = vrot.slane %v4368_v23, 5  ;;  %v13696_v23 = vrot.slane %v5015_v8, 9  ;;  %v17577_v8 = vrot.slane %v4392_v63, 5 }
 0x1f8   : > { %v4388_v44 = vrot.slane %v4386_v14, 4  ;;  %v4412_v14 = vrot.slane %v4410_v17, 4  ;;  %v17575_v17 = vrot.slane %v4379_v42, 4 }
 0x1fa   : > { %v4413_v42 = vor.u32 %v4412_v14, %v17559_v36 }
 0x1fd   : > { %14829 = vmatmul.mubr.msk.bf16.gmra.mrb[16].mxu0 %vm1397_vm7, %v15472_v56  ;;  %v4400_v56 = vshll.u32 %v4285_v9, 16  ;;  %v4399_v9 = vrot.slane %v4397_v2, 4  ;;  %v4424_v2 = vshll.u32 %v4288_v22, 16 }
 0x1fe   : > { %14832 = vmatprep.mubr.msk.bf16.mxu0 %vm1397_vm7, %v15473_v50  ;;  %v17544_v50 = vrot.slane %v4382_v43, 5 }
 0x1ff   : > { %v4402_v61 = vrot.slane %v4400_v56, 5  ;;  %v17571_v56 = vsel %vm16646_vm12, %v13696_v23, %v5159_v19  ;;  %v4445_v23 = vshrl.u32 %v4291_v1, 16 }
 0x200   : > { %v4389_v43 = vor.u32 %v4388_v44, %v17544_v50  ;;  %20154 = vst [vmem:[#allocation14_spill] sm:$0xff] %v17571_v56  ;;  %v17573_v44 = vrot.slane %v4365_v57, 4 }
 0x202   : > { %v17588_v57 = vrot.slane %v4389_v43, 4  ;;  %v4361_v43 = vsel %vm16285_vm8, %v17531_v4, %v17520_v34  ;;  %v4414_v34 = vrot.slane %v4413_v42, 4  ;;  %v4418_v4 = vrot.slane %v4416_v53, 5 }
 0x203   : > { %v4447_v42 = vrot.slane %v4445_v23, 4 }
 0x205   : > { %14833 = vmatmul.mubr.msk.bf16.gmra.mrb[20].mxu0 %vm1397_vm7, %v15474_v31  ;;  %v4421_v31 = vshrl.u32 %v4288_v22, 16  ;;  %v4403_v22 = vor.u32 %v4402_v61, %v4399_v9  ;;  %v4371_v9 = vsel %vm16285_vm8, %v17573_v44, %v17542_v7  ;;  %v17605_v61 = vld [vmem:[#allocation2 + $0x50] sm:$0x1]  ;;  %v4454_v44 = vshll.u32 %v17441_v11, 16 }
 0x206   : > { %14836 = vmatprep.mubr.msk.bf16.mxu0 %vm1397_vm7, %v15475_v13  ;;  %v5161_v13 = vrot.slane %v5159_v19, 4  ;;  %v13651_v19 = vcombine.low %v4337_v39, %v4347_v46  ;;  %v5017_v46 = vld [vmem:[#allocation2 + $0xcc] sm:$0xe]  ;;  %v4436_v39 = vrot.slane %v4434_v52, 4  ;;  %v4440_v7 = vshll.u32 %v17605_v61, 16 }
 0x207   : > { %v4423_v63 = vrot.slane %v4421_v31, 4  ;;  %v5176_v31 = vrot.slane %v17594_v38, 5  ;;  %v13698_v15 = vrot.slane %v5017_v46, 9 }
 0x208   : > { %v17581_v12 = vsel %vm16646_vm12, %v5161_v13, %v5162_v28  ;;  %v4426_v28 = vrot.slane %v4424_v2, 5  ;;  %v17592_v13 = vld [vmem:[#allocation2 + $0xd0] sm:$0xf]  ;;  %v4448_v2 = vshll.u32 %v4291_v1, 16  ;;  %v4458_v1 = vshrl.u32 %v17441_v11, 16 }
 0x209   : > { %20155 = vst [vmem:[#allocation15_spill] sm:$0xff] %v17581_v12  ;;  %v5173_v14 = vrot.slane %v17592_v13, 5  ;;  %v4404_v12 = vrot.slane %v4403_v22, 4  ;;  %v4395_v11 = vsel %vm16285_vm8, %v17588_v57, %v17577_v8 }
 0x20a   : > { %v4427_v37 = vor.u32 %v4426_v28, %v4423_v63  ;;  %v4450_v63 = vrot.slane %v4448_v2, 5  ;;  %v17644_v2 = vrot.slane %v4454_v44, 5  ;;  %v4460_v8 = vrot.slane %v4458_v1, 4  ;;  %v4300_v1 = vld [vmem:[#allocation2 + $0x78] sm:$0xf] }
 0x20b   : > { %v5175_v56 = vrot.slane %v5173_v14, 4  ;;  %v4409_v23 = vsel %vm16285_vm8, %v4404_v12, %v17559_v36  ;;  %v13652_v12 = vcombine.low %v4361_v43, %v4371_v9  ;;  %v4506_v44 = vshrl.u32 %v17459_v0, 16  ;;  %v17658_v9 = vld [vmem:[#allocation2 + $0x7c] sm:$0xf] }
 0x20d   : > { %14837 = vmatmul.mubr.msk.bf16.gmra.mrb[24].mxu0 %vm1397_vm7, %v15476_v45  ;;  %v17609_v45 = vrot.slane %v4430_v54, 5  ;;  %v17617_v54 = vsel %vm16646_vm12, %v13698_v15, %v5173_v14  ;;  %v17622_v53 = vsel %vm16646_vm12, %v5175_v56, %v5176_v31  ;;  %v4385_v15 = vsel %vm16285_vm8, %v17575_v17, %v17544_v50  ;;  %v4297_v31 = vld [vmem:[#allocation2 + $0x6c] sm:$0xf] }
 0x20e   : > { %14840 = vmatprep.mubr.msk.bf16.mxu0 %vm1397_vm7, %v15477_v60  ;;  %v4294_v60 = vld [vmem:[#allocation2 + $0x60] sm:$0xf]  ;;  %20156 = vst [vmem:[#allocation16_spill] sm:$0xff] %v17617_v54  ;;  %20157 = vst [vmem:[#allocation17_spill] sm:$0xff] %v17622_v53  ;;  %v4478_v56 = vshll.u32 %v17613_v32, 16  ;;  %v4482_v14 = vshrl.u32 %v17613_v32, 16  ;;  %v4451_v53 = vor.u32 %v4450_v63, %v4447_v42 }
 0x20f   : > { %v4469_v52 = vshrl.u32 %v4294_v60, 16  ;;  %v4472_v46 = vshll.u32 %v4294_v60, 16  ;;  %v4437_v22 = vor.u32 %v4436_v39, %v17609_v45  ;;  %v4419_v39 = vsel %vm16285_vm8, %v4414_v34, %v4418_v4  ;;  %v17647_v54 = vld [vmem:[#allocation2 + $0x68] sm:$0x1] }
 0x210   : > { %v4428_v50 = vrot.slane %v4427_v37, 4  ;;  %v4442_v17 = vrot.slane %v4440_v7, 5  ;;  %v4493_v29 = vshrl.u32 %v4297_v31, 16  ;;  %v17649_v36 = vrot.slane %v4478_v56, 5 }
 0x211   : > { %v4471_v57 = vrot.slane %v4469_v52, 4  ;;  %v4474_v60 = vrot.slane %v4472_v46, 5  ;;  %v4438_v28 = vrot.slane %v4437_v22, 4  ;;  %v4484_v34 = vrot.slane %v4482_v14, 4 }
 0x212   : > { %v4496_v37 = vshll.u32 %v4297_v31, 16  ;;  %v13653_v4 = vcombine.low %v4385_v15, %v4395_v11  ;;  %v13654_v7 = vcombine.low %v4409_v23, %v4419_v39  ;;  %v4433_v52 = vsel %vm16285_vm8, %v4428_v50, %v17609_v45  ;;  %v4303_v31 = vld [vmem:[#allocation2 + $0x84] sm:$0xf] }
 0x213   : > { %v4475_v46 = vor.u32 %v4474_v60, %v4471_v57  ;;  %v4488_v43 = vshll.u32 %v17647_v54, 16  ;;  %v4443_v22 = vsel %vm16285_vm8, %v4438_v28, %v4442_v17  ;;  %v4452_v42 = vrot.slane %v4451_v53, 4 }
 0x214   : > { %v4495_v15 = vrot.slane %v4493_v29, 4  ;;  %v4498_v11 = vrot.slane %v4496_v37, 5  ;;  %v4517_v56 = vshrl.u32 %v4300_v1, 16  ;;  %v4520_v14 = vshll.u32 %v4300_v1, 16  ;;  %v17674_v1 = vld [vmem:[#allocation2 + $0x80] sm:$0x1] }
 0x215   : > { %14841 = vmatmul.mubr.msk.bf16.gmra.mrb[28].mxu0 %vm1397_vm7, %v15478_v27  ;;  %v4464_v27 = vshll.u32 %v17443_v26, 16  ;;  %v4461_v26 = vor.u32 %v4460_v8, %v17644_v2  ;;  %v4508_v23 = vrot.slane %v4506_v44, 4  ;;  %v4526_v39 = vshll.u32 %v17658_v9, 16 }
 0x216   : > { %14846 = vmatprep.mubr.msk.bf16.mxu0 %vm1397_vm7, %v13651_v19  ;;  %v4502_v19 = vshll.u32 %v17459_v0, 16  ;;  %v4485_v0 = vor.u32 %v4484_v34, %v17649_v36  ;;  %v4530_v50 = vshrl.u32 %v17658_v9, 16  ;;  %v4476_v53 = vrot.slane %v4475_v46, 4 }
 0x217   : > { %v4466_v63 = vrot.slane %v4464_v27, 5  ;;  %v4462_v29 = vrot.slane %v4461_v26, 4  ;;  %v4490_v28 = vrot.slane %v4488_v43, 5  ;;  %v4512_v17 = vshll.u32 %v17461_v58, 16 }
 0x218   : > { %v17664_v45 = vrot.slane %v4502_v19, 5  ;;  %v4541_v8 = vshrl.u32 %v4303_v31, 16  ;;  %v4544_v57 = vshll.u32 %v4303_v31, 16  ;;  %v4550_v60 = vshll.u32 %v17481_v21, 16 }
 0x219   : > { %v4554_v27 = vshrl.u32 %v17481_v21, 16  ;;  %v4499_v34 = vor.u32 %v4498_v11, %v4495_v15  ;;  %v4519_v37 = vrot.slane %v4517_v56, 4  ;;  %v4522_v19 = vrot.slane %v4520_v14, 5  ;;  %v17690_v56 = vld [vmem:[#allocation2 + $0x94] sm:$0xf] }
 0x21a   : > { %v13655_v44 = vcombine.low %v4433_v52, %v4443_v22  ;;  %v4532_v26 = vrot.slane %v4530_v50, 4  ;;  %v4457_v58 = vsel %vm16285_vm8, %v4452_v42, %v17644_v2  ;;  %v4467_v46 = vsel %vm16285_vm8, %v4462_v29, %v4466_v63  ;;  %v4306_v52 = vld [vmem:[#allocation2 + $0x90] sm:$0xf] }
 0x21b   : > { %v4481_v21 = vsel %vm16285_vm8, %v4476_v53, %v17649_v36  ;;  %v17686_v43 = vrot.slane %v4512_v17, 5  ;;  %v4543_v22 = vrot.slane %v4541_v8, 4  ;;  %v4546_v15 = vrot.slane %v4544_v57, 5  ;;  %v4309_v57 = vld [vmem:[#allocation2 + $0x9c] sm:$0xf] }
 0x21c   : > { %v4556_v11 = vrot.slane %v4554_v27, 4  ;;  %v4500_v42 = vrot.slane %v4499_v34, 4  ;;  %v4523_v14 = vor.u32 %v4522_v19, %v4519_v37  ;;  %v4536_v63 = vshll.u32 %v17674_v1, 16  ;;  %v17705_v34 = vld [vmem:[#allocation2 + $0x98] sm:$0x1] }
 0x21d   : > { %14847 = vmatmul.mubr.msk.bf16.vlgmr.msra.gmra.mrb[0].mxu0 %vm1397_vm7, %v13652_v12  ;;  %v4486_v12 = vrot.slane %v4485_v0, 4  ;;  %v17688_v0 = vrot.slane %v4550_v60, 5  ;;  %v4574_v50 = vshll.u32 %v17690_v56, 16  ;;  %v4578_v29 = vshrl.u32 %v17690_v56, 16 }
 0x21e   : > { %14879 = vmatpush3.bf16.msra.mxu0 %v17434_v6  ;;  %14850 = vmatprep.mubr.msk.bf16.mxu0 %vm1397_vm7, %v13653_v4  ;;  %v4509_v6 = vor.u32 %v4508_v23, %v17664_v45  ;;  %v17676_v4 = vrot.slane %v4526_v39, 5  ;;  %v4565_v23 = vshrl.u32 %v4306_v52, 16  ;;  %v4568_v39 = vshll.u32 %v4306_v52, 16  ;;  %v17712_v52 = vld [vmem:[#allocation2 + $0xac] sm:$0xf] }
 0x21f   : > { %v4491_v2 = vsel %vm16285_vm8, %v4486_v12, %v4490_v28  ;;  %v13656_v53 = vcombine.low %v4457_v58, %v4467_v46  ;;  %v4547_v17 = vor.u32 %v4546_v15, %v4543_v22  ;;  %v4557_v28 = vor.u32 %v4556_v11, %v17688_v0 }
 0x220   : > { %v4510_v36 = vrot.slane %v4509_v6, 4  ;;  %v4533_v31 = vor.u32 %v4532_v26, %v17676_v4  ;;  %v4560_v8 = vshll.u32 %v17483_v49, 16  ;;  %v13657_v60 = vcombine.low %v4481_v21, %v4491_v2  ;;  %v4312_v26 = vld [vmem:[#allocation2 + $0xa8] sm:$0xf] }
 0x221   : > { %v4524_v27 = vrot.slane %v4523_v14, 4  ;;  %v4538_v12 = vrot.slane %v4536_v63, 5  ;;  %v4570_v6 = vrot.slane %v4568_v39, 5  ;;  %v17710_v58 = vrot.slane %v4574_v50, 5 }
 0x222   : > { %v4515_v37 = vsel %vm16285_vm8, %v4510_v36, %v17686_v43  ;;  %v4534_v19 = vrot.slane %v4533_v31, 4  ;;  %v4580_v49 = vrot.slane %v4578_v29, 4  ;;  %v4589_v46 = vshrl.u32 %v4309_v57, 16 }
 0x223   : > { %v4592_v21 = vshll.u32 %v4309_v57, 16  ;;  %v4558_v22 = vrot.slane %v4557_v28, 4  ;;  %v4562_v15 = vrot.slane %v4560_v8, 5  ;;  %v4584_v11 = vshll.u32 %v17705_v34, 16 }
 0x224   : > { %v4598_v2 = vshll.u32 %v17513_v47, 16  ;;  %v4602_v43 = vshrl.u32 %v17513_v47, 16  ;;  %v4616_v14 = vshll.u32 %v4312_v26, 16  ;;  %v4529_v63 = vsel %vm16285_vm8, %v4524_v27, %v17676_v4 }
 0x225   : > { %14851 = vmatmul.mubr.msk.bf16.gmra.mrb[4].mxu0 %vm1397_vm7, %v13654_v7  ;;  %v4505_v7 = vsel %vm16285_vm8, %v4500_v42, %v17664_v45  ;;  %v4548_v45 = vrot.slane %v4547_v17, 4  ;;  %v4613_v42 = vshrl.u32 %v4312_v26, 16  ;;  %v4539_v36 = vsel %vm16285_vm8, %v4534_v19, %v4538_v12  ;;  %v17734_v19 = vld [vmem:[#allocation2 + $0xb0] sm:$0x1]  ;;  %v4315_v26 = vld [vmem:[#allocation2 + $0xb4] sm:$0xf] }
 0x226   : > { %14854 = vmatprep.mubr.msk.bf16.mxu0 %vm1397_vm7, %v13655_v44  ;;  %v4567_v44 = vrot.slane %v4565_v23, 4  ;;  %v4622_v31 = vshll.u32 %v17712_v52, 16  ;;  %v4626_v23 = vshrl.u32 %v17712_v52, 16  ;;  %v4581_v47 = vor.u32 %v4580_v49, %v17710_v58 }
 0x227   : > { %v4591_v50 = vrot.slane %v4589_v46, 4  ;;  %v4594_v29 = vrot.slane %v4592_v21, 5  ;;  %v4563_v4 = vsel %vm16285_vm8, %v4558_v22, %v4562_v15  ;;  %v4586_v17 = vrot.slane %v4584_v11, 5 }
 0x228   : > { %v4571_v39 = vor.u32 %v4570_v6, %v4567_v44  ;;  %v17732_v28 = vrot.slane %v4598_v2, 5  ;;  %v4604_v8 = vrot.slane %v4602_v43, 4  ;;  %v4615_v57 = vrot.slane %v4613_v42, 4  ;;  %v4318_v43 = vld [vmem:[#allocation2 + $0xc0] sm:$0xf] }
 0x229   : > { %v4618_v27 = vrot.slane %v4616_v14, 5  ;;  %v13658_v12 = vcombine.low %v4505_v7, %v4515_v37  ;;  %v4624_v44 = vrot.slane %v4622_v31, 5  ;;  %v4628_v6 = vrot.slane %v4626_v23, 4  ;;  %v17739_v7 = vld [vmem:[#allocation2 + $0xc4] sm:$0xf] }
 0x22a   : > { %v4572_v49 = vrot.slane %v4571_v39, 4  ;;  %v4582_v46 = vrot.slane %v4581_v47, 4  ;;  %v4595_v21 = vor.u32 %v4594_v29, %v4591_v50  ;;  %v4605_v22 = vor.u32 %v4604_v8, %v17732_v28 }
 0x22b   : > { %v4619_v15 = vor.u32 %v4618_v27, %v4615_v57  ;;  %v4632_v11 = vshll.u32 %v17734_v19, 16  ;;  %v4637_v2 = vshrl.u32 %v4315_v26, 16  ;;  %v4629_v37 = vor.u32 %v4628_v6, %v4624_v44 }
 0x22c   : > { %v4640_v42 = vshll.u32 %v4315_v26, 16  ;;  %v4646_v14 = vshll.u32 %v17549_v41, 16  ;;  %v4596_v31 = vrot.slane %v4595_v21, 4  ;;  %v4661_v39 = vshrl.u32 %v4318_v43, 16 }
 0x22d   : > { %14855 = vmatmul.mubr.msk.bf16.gmra.mrb[8].mxu0 %vm1397_vm7, %v13656_v53  ;;  %v4553_v53 = vsel %vm16285_vm8, %v4548_v45, %v17688_v0  ;;  %v4608_v0 = vshll.u32 %v17515_v48, 16  ;;  %v4577_v48 = vsel %vm16285_vm8, %v4572_v49, %v17710_v58  ;;  %v4664_v47 = vshll.u32 %v4318_v43, 16 }
 0x22e   : > { %14858 = vmatprep.mubr.msk.bf16.mxu0 %vm1397_vm7, %v13657_v60  ;;  %v13659_v60 = vcombine.low %v4529_v63, %v4539_v36  ;;  %v13660_v45 = vcombine.low %v4553_v53, %v4563_v4  ;;  %v4650_v63 = vshrl.u32 %v17549_v41, 16  ;;  %v4587_v36 = vsel %vm16285_vm8, %v4582_v46, %v4586_v17  ;;  %v4321_v46 = vld [vmem:[#allocation2 + $0xcc] sm:$0xf] }
 0x22f   : > { %v4610_v23 = vrot.slane %v4608_v0, 5  ;;  %v4670_v50 = vshll.u32 %v17739_v7, 16  ;;  %v4674_v29 = vshrl.u32 %v17739_v7, 16  ;;  %v4606_v53 = vrot.slane %v4605_v22, 4 }
 0x230   : > { %v4620_v4 = vrot.slane %v4619_v15, 4  ;;  %v4634_v41 = vrot.slane %v4632_v11, 5  ;;  %v4639_v8 = vrot.slane %v4637_v2, 4  ;;  %v4630_v57 = vrot.slane %v4629_v37, 4  ;;  %v17758_v15 = vld [vmem:[#allocation2 + $0xc8] sm:$0x1] }
 0x231   : > { %v4642_v27 = vrot.slane %v4640_v42, 5  ;;  %v13661_v58 = vcombine.low %v4577_v48, %v4587_v36  ;;  %v4663_v6 = vrot.slane %v4661_v39, 4  ;;  %v4666_v26 = vrot.slane %v4664_v47, 5 }
 0x232   : > { %v4672_v17 = vrot.slane %v4670_v50, 5  ;;  %v4676_v49 = vrot.slane %v4674_v29, 4  ;;  %v4601_v21 = vsel %vm16285_vm8, %v4596_v31, %v17732_v28  ;;  %v4611_v0 = vsel %vm16285_vm8, %v4606_v53, %v4610_v23 }
 0x233   : > { %v4656_v22 = vshll.u32 %v17551_v40, 16  ;;  %v4625_v11 = vsel %vm16285_vm8, %v4620_v4, %v4624_v44  ;;  %v4635_v2 = vsel %vm16285_vm8, %v4630_v57, %v4634_v41  ;;  %v4643_v43 = vor.u32 %v4642_v27, %v4639_v8 }
 0x234   : > { %v4685_v28 = vshrl.u32 %v4321_v46, 16  ;;  %v4688_v42 = vshll.u32 %v4321_v46, 16  ;;  %v4698_v40 = vshrl.u32 %v17592_v13, 16  ;;  %v4677_v48 = vor.u32 %v4676_v49, %v4672_v17  ;;  %v5002_v46 = vld [vmem:[#allocation2 + $0x18] sm:$0xe] }
 0x235   : > { %14859 = vmatmul.mubr.msk.bf16.gmra.mrb[12].mxu0 %vm1397_vm7, %v13658_v12  ;;  %v4648_v12 = vrot.slane %v4646_v14, 5  ;;  %v4694_v14 = vshll.u32 %v17592_v13, 16  ;;  %v13662_v36 = vcombine.low %v4601_v21, %v4611_v0  ;;  %v13663_v31 = vcombine.low %v4625_v11, %v4635_v2 }
 0x236   : > { %14862 = vmatprep.mubr.msk.bf16.mxu0 %vm1397_vm7, %v13659_v60  ;;  %v4652_v60 = vrot.slane %v4650_v63, 4  ;;  %v4667_v63 = vor.u32 %v4666_v26, %v4663_v6  ;;  %v4644_v44 = vrot.slane %v4643_v43, 4  ;;  %v4658_v39 = vrot.slane %v4656_v22, 5 }
 0x237   : > { %v4687_v47 = vrot.slane %v4685_v28, 4  ;;  %v4690_v50 = vrot.slane %v4688_v42, 5  ;;  %v4696_v29 = vrot.slane %v4694_v14, 5  ;;  %v4700_v53 = vrot.slane %v4698_v40, 4  ;;  %v5003_v14 = vld [vmem:[#allocation2 + $0x24] sm:$0xe] }
 0x238   : > { %v4653_v37 = vor.u32 %v4652_v60, %v4648_v12  ;;  %v4668_v4 = vrot.slane %v4667_v63, 4  ;;  %v4678_v41 = vrot.slane %v4677_v48, 4  ;;  %v4649_v13 = vsel %vm16285_vm8, %v4644_v44, %v4648_v12  ;;  %v5004_v40 = vld [vmem:[#allocation2 + $0x30] sm:$0xe] }
 0x239   : > { %v4691_v27 = vor.u32 %v4690_v50, %v4687_v47  ;;  %v4701_v60 = vor.u32 %v4700_v53, %v4696_v29  ;;  %v5068_v49 = vrot.slane %v17466_v18, 5  ;;  %v13683_v2 = vrot.slane %v5002_v46, 9  ;;  %v5006_v53 = vld [vmem:[#allocation2 + $0x48] sm:$0xe] }
 0x23a   : > { %v4654_v23 = vrot.slane %v4653_v37, 4  ;;  %v4673_v6 = vsel %vm16285_vm8, %v4668_v4, %v4672_v17  ;;  %v5071_v37 = vrot.slane %v17492_v35, 5  ;;  %v5075_v17 = vrot.slane %v17490_v59, 5 }
 0x23b   : > { %v4692_v0 = vrot.slane %v4691_v27, 4  ;;  %v4702_v22 = vrot.slane %v4701_v60, 4  ;;  %v5070_v43 = vrot.slane %v5068_v49, 4  ;;  %v5069_v28 = vsel %vm16646_vm12, %v13683_v2, %v5068_v49  ;;  %v5008_v49 = vld [vmem:[#allocation2 + $0x60] sm:$0xe] }
 0x23c   : > { %v4659_v57 = vsel %vm16285_vm8, %v4654_v23, %v4658_v39  ;;  %v5082_v35 = vrot.slane %v17511_v5, 5  ;;  %v13685_v44 = vrot.slane %v5004_v40, 9  ;;  %v5085_v59 = vrot.slane %v17537_v3, 5 }
 0x23d   : > { %14863 = vmatmul.mubr.msk.bf16.gmra.mrb[16].mxu0 %vm1397_vm7, %v13660_v45  ;;  %v4680_v45 = vshll.u32 %v17758_v15, 16  ;;  %v13664_v21 = vcombine.low %v4649_v13, %v4659_v57  ;;  %v5072_v42 = vsel %vm16646_vm12, %v5070_v43, %v5071_v37  ;;  %v5089_v47 = vrot.slane %v17525_v24, 5 }
 0x23e   : > { %14866 = vmatprep.mubr.msk.bf16.mxu0 %vm1397_vm7, %v13661_v58  ;;  %v4704_v58 = vshll.u32 %v17594_v38, 16  ;;  %v4697_v38 = vsel %vm16285_vm8, %v4692_v0, %v4696_v29  ;;  %v13700_v48 = vcombine.low %v5069_v28, %v5072_v42  ;;  %v5084_v23 = vrot.slane %v5082_v35, 4  ;;  %v5005_v29 = vld [vmem:[#allocation2 + $0x3c] sm:$0xe]  ;;  %v5012_v42 = vld [vmem:[#allocation2 + $0x90] sm:$0xe] }
 0x23f   : > { %v4682_v8 = vrot.slane %v4680_v45, 5  ;;  %v13684_v45 = vrot.slane %v5003_v14, 9  ;;  %v5083_v50 = vsel %vm16646_vm12, %v13685_v44, %v5082_v35  ;;  %v5096_v3 = vrot.slane %v17562_v51, 5  ;;  %v20160_v44 = vld [vmem:[#allocation10_spill] sm:$0xff] }
 0x240   : > { %v4706_v11 = vrot.slane %v4704_v58, 5  ;;  %v5091_v13 = vrot.slane %v5089_v47, 4  ;;  %v5092_v57 = vrot.slane %v17557_v25, 5  ;;  %v13687_v27 = vrot.slane %v5006_v53, 9 }
 0x241   : > { %v4683_v26 = vsel %vm16285_vm8, %v4678_v41, %v4682_v8  ;;  %v5076_v39 = vsel %vm16646_vm12, %v13684_v45, %v5075_v17  ;;  %v13686_v8 = vrot.slane %v5005_v29, 9  ;;  %v5098_v60 = vrot.slane %v5096_v3, 4  ;;  %v20164_v29 = vld [vmem:[#allocation13_spill] sm:$0xff] }
 0x242   : > { %v13665_v12 = vcombine.low %v4673_v6, %v4683_v26  ;;  %v4707_v18 = vsel %vm16285_vm8, %v4702_v22, %v4706_v11  ;;  %v5099_v24 = vrot.slane %v17605_v61, 5  ;;  %v5093_v51 = vsel %vm16646_vm12, %v5091_v13, %v5092_v57  ;;  %v20170_v57 = vld [vmem:[#allocation17_spill] sm:$0xff] }
 0x243   : > { %v13666_v63 = vcombine.low %v4697_v38, %v4707_v18  ;;  %v5090_v58 = vsel %vm16646_vm12, %v13686_v8, %v5089_v47  ;;  %v5097_v6 = vsel %vm16646_vm12, %v13687_v27, %v5096_v3  ;;  %v5110_v26 = vrot.slane %v17613_v32, 5  ;;  %v5010_v32 = vld [vmem:[#allocation2 + $0x78] sm:$0xe] }
 0x244   : > { %v5100_v25 = vsel %vm16646_vm12, %v5098_v60, %v5099_v24  ;;  %v13703_v61 = vcombine.low %v5090_v58, %v5093_v51  ;;  %v5113_v0 = vrot.slane %v17647_v54, 5  ;;  %v5124_v2 = vrot.slane %v17658_v9, 5  ;;  %v20167_v8 = vld [vmem:[#allocation15_spill] sm:$0xff] }
 0x245   : > { %14867 = vmatmul.mubr.msk.bf16.gmra.mrb[20].mxu0 %vm1397_vm7, %v13662_v36  ;;  %v5077_v36 = vrot.slane %v5075_v17, 4  ;;  %v13704_v46 = vcombine.low %v5097_v6, %v5100_v25  ;;  %v13691_v37 = vrot.slane %v5010_v32, 9  ;;  %v5127_v18 = vrot.slane %v17674_v1, 5  ;;  %v17892_v24 = vld [vmem:[%s20082_s2] ss:$0 sm:$0xff] }
 0x246   : > { %14870 = vmatprep.mubr.msk.bf16.mxu0 %vm1397_vm7, %v13663_v31  ;;  %v5078_v31 = vrot.slane %v17507_v16, 5  ;;  %v5086_v16 = vsel %vm16646_vm12, %v5084_v23, %v5085_v59  ;;  %v5126_v38 = vrot.slane %v5124_v2, 4  ;;  %v20158_v54 = vcombine.low %v17450_v33, %v17454_v20 }
 0x247   : > { %v13702_v41 = vcombine.low %v5083_v50, %v5086_v16  ;;  %v5125_v17 = vsel %vm16646_vm12, %v13691_v37, %v5124_v2  ;;  %v5138_v9 = vrot.slane %v17690_v56, 5  ;;  %v13693_v35 = vrot.slane %v5012_v42, 9  ;;  %v20163_v16 = vld [vmem:[#allocation12_spill] sm:$0xff] }
 0x248   : > { %v5079_v5 = vsel %vm16646_vm12, %v5077_v36, %v5078_v31  ;;  %v5128_v28 = vsel %vm16646_vm12, %v5126_v38, %v5127_v18  ;;  %v5141_v1 = vrot.slane %v17705_v34, 5  ;;  %v20159_v33 = vcombine.low %v17470_v55, %v17474_v10  ;;  %v20161_v55 = vld [vmem:[#allocation11_spill] sm:$0xff] }
 0x249   : > { %v13701_v4 = vcombine.low %v5076_v39, %v5079_v5  ;;  %v13708_v14 = vcombine.low %v5125_v17, %v5128_v28  ;;  %v5140_v40 = vrot.slane %v5138_v9, 4  ;;  %v5139_v20 = vsel %vm16646_vm12, %v13693_v35, %v5138_v9  ;;  %v5016_v39 = vld [vmem:[#allocation2 + $0xc0] sm:$0xe] }
 0x24a   : > { %v5152_v56 = vrot.slane %v17712_v52, 5  ;;  %v5155_v34 = vrot.slane %v17734_v19, 5  ;;  %v20162_v10 = vcombine.low %v20160_v44, %v20161_v55  ;;  %v5166_v52 = vrot.slane %v17739_v7, 5 }
 0x24b   : > { %v13697_v47 = vrot.slane %v5016_v39, 9  ;;  %v5169_v19 = vrot.slane %v17758_v15, 5  ;;  %v20165_v3 = vcombine.low %v20163_v16, %v20164_v29  ;;  %v20169_v15 = vld [vmem:[#allocation16_spill] sm:$0xff]  ;;  %v20172_v60 = vmov 0  }
 0x24c   : > { %v5154_v31 = vrot.slane %v5152_v56, 4  ;;  %v5168_v50 = vrot.slane %v5166_v52, 4  ;;  %v20171_v27 = vcombine.low %v20169_v15, %v20170_v57  ;;  %7142 = vst.msk [vmem:[#allocation3 + $0x4] sm:$0x1] %vm6017_vm13, %v20172_v60  ;;  %7145 = vst.msk [vmem:[#allocation3 + $0x4c] sm:$0x1] %vm6017_vm13, %v20172_v60 }
 0x24d   : > { %14871 = vmatmul.mubr.msk.bf16.gmra.mrb[24].mxu0 %vm1397_vm7, %v13664_v21  ;;  %v13689_v21 = vrot.slane %v5008_v49, 9  ;;  %v5167_v53 = vsel %vm16646_vm12, %v13697_v47, %v5166_v52  ;;  %7141 = vst.msk [vmem:[#allocation3] sm:$0xf] %vm7124_vm14, %v20172_v60  ;;  %7144 = vst.msk [vmem:[#allocation3 + $0x48] sm:$0xf] %vm7124_vm14, %v20172_v60  ;;  %v5629_v49 = vlaneseq }
 0x24e   : > { %14874 = vmatprep.mubr.msk.bf16.mxu0 %vm1397_vm7, %v13665_v12  ;;  %v5112_v12 = vrot.slane %v5110_v26, 4  ;;  %v5156_v59 = vsel %vm16646_vm12, %v5154_v31, %v5155_v34  ;;  %v16130_v25 = vmov 1966171168   ;;  %9185 = vst.msk [vmem:[#allocation4] sm:$0x7] %vm9180_vm0, %v20172_v60 }
 0x24f   : > { %v5111_v22 = vsel %vm16646_vm12, %v13689_v21, %v5110_v26  ;;  %v5627_v26 = vunpack.c.l.s4 %v16130_v25  ;;  %v17898_v32 = vshrl.u32 %v5629_v49, 7  ;;  %9187 = vst.msk [vmem:[#allocation4 + $0x14] sm:$0x7] %vm9180_vm0, %v20172_v60 }
 0x250   : > { %v5114_v11 = vsel %vm16646_vm12, %v5112_v12, %v5113_v0 }
 0x251   : > { %v13706_v43 = vcombine.low %v5111_v22, %v5114_v11  ;;  %v5628_v2 = vunpack.c.0.s8 %v5627_v26 }
 0x253   : > { %v17902_v28 = vsub.s32 %v5628_v2, %v17898_v32 }
 0x255   : > { %14875 = vmatmul.mubr.msk.bf16.gmra.mrb[28].mxu0 %vm1397_vm7, %v13666_v63  ;;  %v5142_v63 = vsel %vm16646_vm12, %v5140_v40, %v5141_v1 }
 0x256   : > { %14880 = vmatprep.mubr.msk.bf16.mxu0 %vm1397_vm7, %v13700_v48  ;;  %v5014_v48 = vld [vmem:[#allocation2 + $0xa8] sm:$0xe]  ;;  %v13710_v45 = vcombine.low %v5139_v20, %v5142_v63 }
 0x257   : > { %v13695_v36 = vrot.slane %v5014_v48, 9 }
 0x259   : > { %v5153_v23 = vsel %vm16646_vm12, %v13695_v36, %v5152_v56 }
 0x25a   : > { %v13712_v5 = vcombine.low %v5153_v23, %v5156_v59 }
 0x25d   : > { %14881 = vmatmul.mubr.msk.bf16.vlgmr.msra.gmra.mrb[0].mxu0 %vm1397_vm7, %v13701_v4  ;;  %v5170_v4 = vsel %vm16646_vm12, %v5168_v50, %v5169_v19 }
 0x25e   : > { %14884 = vmatprep.mubr.msk.bf16.mxu0 %vm1397_vm7, %v13702_v41  ;;  %v13714_v7 = vcombine.low %v5167_v53, %v5170_v4  ;;  %v20166_v41 = vld [vmem:[#allocation14_spill] sm:$0xff] }
 0x25f   : > { %v20168_v13 = vcombine.low %v20166_v41, %v20167_v8 }
 0x265   : > { %14885 = vmatmul.mubr.msk.bf16.gmra.mrb[4].mxu0 %vm1397_vm7, %v13703_v61 }
 0x266   : > { %14888 = vmatprep.mubr.msk.bf16.mxu0 %vm1397_vm7, %v13704_v46 }
 0x26d   : > { %14889 = vmatmul.mubr.msk.bf16.gmra.mrb[8].mxu0 %vm1397_vm7, %v20158_v54 }
 0x26e   : > { %14892 = vmatprep.mubr.msk.bf16.mxu0 %vm1397_vm7, %v13706_v43 }
 0x275   : > { %14893 = vmatmul.mubr.msk.bf16.gmra.mrb[12].mxu0 %vm1397_vm7, %v20159_v33 }
 0x276   : > { %14896 = vmatprep.mubr.msk.bf16.mxu0 %vm1397_vm7, %v13708_v14 }
 0x27d   : > { %14897 = vmatmul.mubr.msk.bf16.gmra.mrb[16].mxu0 %vm1397_vm7, %v20162_v10 }
 0x27e   : > { %14900 = vmatprep.mubr.msk.bf16.mxu0 %vm1397_vm7, %v13710_v45 }
 0x285   : > { %14901 = vmatmul.mubr.msk.bf16.gmra.mrb[20].mxu0 %vm1397_vm7, %v20165_v3 }
 0x286   : > { %14904 = vmatprep.mubr.msk.bf16.mxu0 %vm1397_vm7, %v13712_v5 }
 0x28d   : > { %14905 = vmatmul.mubr.msk.bf16.gmra.mrb[24].mxu0 %vm1397_vm7, %v20168_v13 }
 0x28e   : > { %14908 = vmatprep.mubr.msk.bf16.mxu0 %vm1397_vm7, %v13714_v7 }
 0x295   : > { %14909 = vmatmul.mubr.msk.bf16.gmra.mrb[28].mxu0 %vm1397_vm7, %v20171_v27  ;;  %vm6988_vm7 = vcmask 1047559  }
 0x330   : > { %v14882_v58 = vpop.f32.mrb[0].mxu0 }
 0x331   : > { %v5481_v51 = vadd.f32 %v14882_v58, %v17892_v24  ;;  %v5313_v6 = vpop.f32.mrb[1].mxu0 }
 0x332   : > { %v5479_v61 = vadd.f32 %v17892_v24, %v5313_v6  ;;  %v14883_v46 = vpop.f32.mrb[2].mxu0 }
 0x333   : > { %v5482_v21 = vadd.f32 %v14883_v46, %v17892_v24  ;;  %v5316_v12 = vpop.f32.mrb[3].mxu0  ;;  %v5513_v22 = vmax.f32 %v5481_v51, 0.0 }
 0x334   : > { %v5480_v0 = vadd.f32 %v17892_v24, %v5316_v12  ;;  %v5511_v43 = vmax.f32 %v5479_v61, 0.0 }
 0x335   : > { %v5514_v11 = vmax.f32 %v5482_v21, 0.0 }
 0x336   : > { %v5512_v37 = vmax.f32 %v5480_v0, 0.0 }
 0x337   : > { %v5544_v38 = vpack.c.bf16 %v5514_v11, %v5513_v22 }
 0x338   : > { %v5543_v18 = vpack.c.bf16 %v5512_v37, %v5511_v43  ;;  %v14886_v54 = vpop.f32.mrb[4].mxu0 }
 0x339   : > { %v5565_v17 = vsel %vm5559_vm15, %v5544_v38, 4286644096  ;;  %v5485_v9 = vadd.f32 %v14886_v54, %v17892_v24  ;;  %v5329_v42 = vpop.f32.mrb[5].mxu0 }
 0x33a   : > { %v5562_v14 = vsel %vm5559_vm15, %v5543_v18, 4286644096  ;;  %v5483_v35 = vadd.f32 %v17892_v24, %v5329_v42  ;;  %v14887_v40 = vpop.f32.mrb[6].mxu0 }
 0x33b   : > { %v5567_v1 = vmax.bf16 %v5565_v17, %v5562_v14  ;;  %v5486_v33 = vadd.f32 %v14887_v40, %v17892_v24  ;;  %v5332_v20 = vpop.f32.mrb[7].mxu0  ;;  %v5517_v45 = vmax.f32 %v5485_v9, 0.0 }
 0x33c   : > { %v5484_v63 = vadd.f32 %v17892_v24, %v5332_v20  ;;  %v5515_v31 = vmax.f32 %v5483_v35, 0.0 }
 0x33d   : > { %v5625_v56 = vcombine.high %v5567_v1, %v5567_v1  ;;  %v5632_v48 = vrot.slane %v5567_v1, %v17902_v28  ;;  %v5518_v36 = vmax.f32 %v5486_v33, 0.0 }
 0x33e   : > { %v5516_v34 = vmax.f32 %v5484_v63, 0.0 }
 0x33f   : > { %v5639_v44 = vrot.slane %v5625_v56, %v17902_v28  ;;  %v5640_v55 = vcombine.high %v5632_v48, %v5632_v48  ;;  %v5648_v10 = vrot.slane %v5632_v48, %v17902_v28  ;;  %v5546_v23 = vpack.c.bf16 %v5518_v36, %v5517_v45 }
 0x340   : > { %v5545_v59 = vpack.c.bf16 %v5516_v34, %v5515_v31  ;;  %v14890_v52 = vpop.f32.mrb[8].mxu0 }
 0x341   : > { %v5641_v39 = vcombine.high %v5639_v44, %v5639_v44  ;;  %v5655_v5 = vrot.slane %v5639_v44, %v17902_v28  ;;  %v5662_v47 = vrot.slane %v5640_v55, %v17902_v28  ;;  %v5670_v50 = vcombine.high %v5648_v10, %v5648_v10  ;;  %v17914_v19 = vpop.f32.mrb[9].mxu0 }
 0x342   : > { %v6019_v16 = vsel %vm6017_vm13, %v5648_v10, 4286644096  ;;  %v17918_v29 = vsel %vm5559_vm15, %v5546_v23, 4286644096  ;;  %v17921_v3 = vsel %vm5559_vm15, %v5545_v59, 4286644096  ;;  %v17924_v53 = vadd.f32 %v14890_v52, %v17892_v24 }
 0x343   : > { %v5669_v4 = vrot.slane %v5641_v39, %v17902_v28  ;;  %v5671_v7 = vcombine.high %v5655_v5, %v5655_v5  ;;  %v5672_v41 = vcombine.high %v5662_v47, %v5662_v47  ;;  %v6021_v8 = vunpack.i.l.bf16 %v6019_v16  ;;  %v17927_v13 = vpop.f32.mrb[10].mxu0 }
 0x344   : > { %v6022_v15 = vunpack.i.h.bf16 %v6019_v16  ;;  %v6032_v57 = vsel %vm6017_vm13, %v5662_v47, 4286644096  ;;  %v6045_v27 = vsel %vm6017_vm13, %v5670_v50, 4286644096  ;;  %v6071_v58 = vsel %vm6017_vm13, %v5655_v5, 4286644096 }
 0x345   : > { %v5673_v51 = vcombine.high %v5669_v4, %v5669_v4  ;;  %v6034_v6 = vunpack.i.l.bf16 %v6032_v57  ;;  %v6035_v25 = vunpack.i.h.bf16 %v6032_v57  ;;  %v6047_v26 = vunpack.i.l.bf16 %v6045_v27  ;;  %v17932_v49 = vpop.f32.mrb[11].mxu0 }
 0x346   : > { %v6023_v61 = vmax.f32 %v6021_v8, %v6022_v15  ;;  %v6048_v46 = vunpack.i.h.bf16 %v6045_v27  ;;  %v6058_v21 = vsel %vm6017_vm13, %v5672_v41, 4286644096  ;;  %v6073_v12 = vunpack.i.l.bf16 %v6071_v58 }
 0x347   : > { %v6036_v0 = vmax.f32 %v6034_v6, %v6035_v25  ;;  %v6060_v22 = vunpack.i.l.bf16 %v6058_v21  ;;  %v6061_v11 = vunpack.i.h.bf16 %v6058_v21  ;;  %v6074_v2 = vunpack.i.h.bf16 %v6071_v58 }
 0x348   : > { %v6024_v43 = vrot.slane %v6023_v61, 4  ;;  %v6049_v37 = vmax.f32 %v6047_v26, %v6048_v46  ;;  %v6084_v38 = vsel %vm6017_vm13, %v5669_v4, 4286644096  ;;  %v6097_v18 = vsel %vm6017_vm13, %v5671_v7, 4286644096  ;;  %v17937_v54 = vpop.f32.mrb[12].mxu0 }
 0x349   : > { %v6037_v17 = vrot.slane %v6036_v0, 4  ;;  %v6062_v9 = vmax.f32 %v6060_v22, %v6061_v11  ;;  %v6075_v42 = vmax.f32 %v6073_v12, %v6074_v2  ;;  %v6086_v14 = vunpack.i.l.bf16 %v6084_v38  ;;  %v17939_v35 = vpop.f32.mrb[13].mxu0 }
 0x34a   : > { %v6025_v40 = vmax.f32 %v6023_v61, %v6024_v43  ;;  %v6050_v1 = vrot.slane %v6049_v37, 4  ;;  %v6087_v33 = vunpack.i.h.bf16 %v6084_v38  ;;  %v6099_v20 = vunpack.i.l.bf16 %v6097_v18  ;;  %v17941_v63 = vpop.f32.mrb[14].mxu0 }
 0x34b   : > { %v6038_v56 = vmax.f32 %v6036_v0, %v6037_v17  ;;  %v6063_v48 = vrot.slane %v6062_v9, 4  ;;  %v6076_v45 = vrot.slane %v6075_v42, 4  ;;  %v6100_v36 = vunpack.i.h.bf16 %v6097_v18  ;;  %v17943_v31 = vpop.f32.mrb[15].mxu0 }
 0x34c   : > { %v6026_v34 = vrot.slane %v6025_v40, 2  ;;  %v6051_v44 = vmax.f32 %v6049_v37, %v6050_v1  ;;  %v6088_v55 = vmax.f32 %v6086_v14, %v6087_v33  ;;  %v6110_v10 = vsel %vm6017_vm13, %v5673_v51, 4286644096 }
 0x34d   : > { %v6039_v23 = vrot.slane %v6038_v56, 2  ;;  %v6064_v59 = vmax.f32 %v6062_v9, %v6063_v48  ;;  %v6077_v52 = vmax.f32 %v6075_v42, %v6076_v45  ;;  %v6101_v39 = vmax.f32 %v6099_v20, %v6100_v36 }
 0x34e   : > { %v6027_v5 = vmax.f32 %v6025_v40, %v6026_v34  ;;  %v6052_v47 = vrot.slane %v6051_v44, 2  ;;  %v6089_v50 = vrot.slane %v6088_v55, 4  ;;  %v6112_v16 = vunpack.i.l.bf16 %v6110_v10 }
 0x34f   : > { %v6040_v4 = vmax.f32 %v6038_v56, %v6039_v23  ;;  %v6065_v7 = vrot.slane %v6064_v59, 2  ;;  %v6078_v41 = vrot.slane %v6077_v52, 2  ;;  %v6102_v8 = vrot.slane %v6101_v39, 4 }
 0x350   : > { %v6028_v15 = vrot.slane %v6027_v5, 1  ;;  %v6053_v57 = vmax.f32 %v6051_v44, %v6052_v47  ;;  %v6090_v27 = vmax.f32 %v6088_v55, %v6089_v50  ;;  %v6113_v58 = vunpack.i.h.bf16 %v6110_v10  ;;  %v17946_v51 = vpop.f32.mrb[16].mxu0 }
 0x351   : > { %v6041_v6 = vrot.slane %v6040_v4, 1  ;;  %v6066_v25 = vmax.f32 %v6064_v59, %v6065_v7  ;;  %v6079_v26 = vmax.f32 %v6077_v52, %v6078_v41  ;;  %v6103_v61 = vmax.f32 %v6101_v39, %v6102_v8  ;;  %v17948_v46 = vpop.f32.mrb[17].mxu0 }
 0x352   : > { %v6029_v21 = vmax.f32 %v6027_v5, %v6028_v15  ;;  %v6054_v12 = vrot.slane %v6053_v57, 1  ;;  %v6091_v0 = vrot.slane %v6090_v27, 2  ;;  %v6114_v22 = vmax.f32 %v6112_v16, %v6113_v58  ;;  %v17950_v11 = vpop.f32.mrb[18].mxu0 }
 0x353   : > { %v6042_v2 = vmax.f32 %v6040_v4, %v6041_v6  ;;  %v6067_v43 = vrot.slane %v6066_v25, 1  ;;  %v6080_v37 = vrot.slane %v6079_v26, 1  ;;  %v6104_v38 = vrot.slane %v6103_v61, 2  ;;  %v17952_v18 = vpop.f32.mrb[19].mxu0 }
 0x354   : > { %v6030_v17 = vpack.i.bf16 %v6029_v21, %v6029_v21  ;;  %v6055_v9 = vmax.f32 %v6053_v57, %v6054_v12  ;;  %v6092_v42 = vmax.f32 %v6090_v27, %v6091_v0  ;;  %v6115_v14 = vrot.slane %v6114_v22, 4 }
 0x355   : > { %v6043_v40 = vpack.i.bf16 %v6042_v2, %v6042_v2  ;;  %v6068_v1 = vmax.f32 %v6066_v25, %v6067_v43  ;;  %v6081_v33 = vmax.f32 %v6079_v26, %v6080_v37  ;;  %v6105_v20 = vmax.f32 %v6103_v61, %v6104_v38 }
 0x356   : > { %v6056_v56 = vpack.i.bf16 %v6055_v9, %v6055_v9  ;;  %v6093_v48 = vrot.slane %v6092_v42, 1  ;;  %v6116_v45 = vmax.f32 %v6114_v22, %v6115_v14  ;;  %v6914_v36 = vunpack.c.l.b16 %v6030_v17 }
 0x357   : > { %v6069_v34 = vpack.i.bf16 %v6068_v1, %v6068_v1  ;;  %v6082_v44 = vpack.i.bf16 %v6081_v33, %v6081_v33  ;;  %v6106_v55 = vrot.slane %v6105_v20, 1  ;;  %v6915_v10 = vunpack.c.l.b16 %v6043_v40 }
 0x358   : > { %v6094_v23 = vmax.f32 %v6092_v42, %v6093_v48  ;;  %v6117_v59 = vrot.slane %v6116_v45, 2  ;;  %v6916_v52 = vunpack.c.l.b16 %v6056_v56  ;;  %v5574_v39 = vmax.bf16 %v17918_v29, %v17921_v3  ;;  %v17956_v5 = vpop.f32.mrb[20].mxu0 }
 0x359   : > { %v6107_v47 = vmax.f32 %v6105_v20, %v6106_v55  ;;  %v6917_v50 = vunpack.c.l.b16 %v6069_v34  ;;  %v6918_v16 = vunpack.c.l.b16 %v6082_v44  ;;  %v6979_v4 = vsel %vm6978_vm2, %v6915_v10, %v6914_v36  ;;  %v17959_v7 = vpop.f32.mrb[21].mxu0 }
 0x35a   : > { %v6095_v41 = vpack.i.bf16 %v6094_v23, %v6094_v23  ;;  %v6118_v8 = vmax.f32 %v6116_v45, %v6117_v59  ;;  %v6981_v15 = vsel %vm6980_vm3, %v6916_v52, %v6979_v4  ;;  %v5674_v57 = vcombine.high %v5574_v39, %v5574_v39  ;;  %v17962_v27 = vpop.f32.mrb[22].mxu0 }
 0x35b   : > { %v6108_v58 = vpack.i.bf16 %v6107_v47, %v6107_v47  ;;  %v6983_v29 = vsel %vm6982_vm4, %v6917_v50, %v6981_v15  ;;  %v5681_v3 = vrot.slane %v5574_v39, %v17902_v28  ;;  %v5521_v6 = vmax.f32 %v17924_v53, 0.0  ;;  %v17967_v25 = vpop.f32.mrb[23].mxu0 }
 0x35c   : > { %v6119_v26 = vrot.slane %v6118_v8, 1  ;;  %v6919_v61 = vunpack.c.l.b16 %v6095_v41  ;;  %v6985_v21 = vsel %vm6984_vm5, %v6918_v16, %v6983_v29  ;;  %v5688_v12 = vrot.slane %v5674_v57, %v17902_v28  ;;  %v15484_v16 = vld [vmem:[%s20083_s3 + $0x20] sm:$0xff]  }
 0x35d   : > { %v6920_v0 = vunpack.c.l.b16 %v6108_v58  ;;  %v5689_v22 = vcombine.high %v5681_v3, %v5681_v3  ;;  %v5697_v2 = vrot.slane %v5681_v3, %v17902_v28  ;;  %v17974_v43 = vadd.f32 %v17892_v24, %v17914_v19 }
 0x35e   : > { %v6120_v37 = vmax.f32 %v6118_v8, %v6119_v26  ;;  %v6987_v38 = vsel %vm6986_vm6, %v6919_v61, %v6985_v21  ;;  %v5690_v17 = vcombine.high %v5688_v12, %v5688_v12  ;;  %v5704_v9 = vrot.slane %v5688_v12, %v17902_v28 }
 0x35f   : > { %v6989_v42 = vsel %vm6988_vm7, %v6920_v0, %v6987_v38  ;;  %v5711_v14 = vrot.slane %v5689_v22, %v17902_v28  ;;  %v5719_v40 = vcombine.high %v5697_v2, %v5697_v2  ;;  %v6123_v1 = vsel %vm6017_vm13, %v5697_v2, 4286644096 }
 0x360   : > { %v6121_v33 = vpack.i.bf16 %v6120_v37, %v6120_v37  ;;  %v5718_v20 = vrot.slane %v5690_v17, %v17902_v28  ;;  %v5720_v56 = vcombine.high %v5704_v9, %v5704_v9  ;;  %v6125_v48 = vunpack.i.l.bf16 %v6123_v1 }
 0x361   : > { %v5721_v19 = vcombine.high %v5711_v14, %v5711_v14  ;;  %v6126_v45 = vunpack.i.h.bf16 %v6123_v1  ;;  %v6136_v36 = vsel %vm6017_vm13, %v5711_v14, 4286644096  ;;  %v6149_v34 = vsel %vm6017_vm13, %v5719_v40, 4286644096 }
 0x362   : > { %v6921_v44 = vunpack.c.l.b16 %v6121_v33  ;;  %v5722_v55 = vcombine.high %v5718_v20, %v5718_v20  ;;  %v6138_v10 = vunpack.i.l.bf16 %v6136_v36  ;;  %v6139_v23 = vunpack.i.h.bf16 %v6136_v36  ;;  %v18000_v36 = vpop.f32.mrb[24].mxu0 }
 0x363   : > { %v6127_v59 = vmax.f32 %v6125_v48, %v6126_v45  ;;  %v6151_v52 = vunpack.i.l.bf16 %v6149_v34  ;;  %v6152_v39 = vunpack.i.h.bf16 %v6149_v34  ;;  %v6162_v47 = vsel %vm6017_vm13, %v5721_v19, 4286644096 }
 0x364   : > { %v7032_v50 = vpack.c.b16 %v6921_v44, %v6989_v42  ;;  %v6140_v4 = vmax.f32 %v6138_v10, %v6139_v23  ;;  %v6164_v41 = vunpack.i.l.bf16 %v6162_v47  ;;  %v6165_v8 = vunpack.i.h.bf16 %v6162_v47 }
 0x365   : > { %v6128_v15 = vrot.slane %v6127_v59, 4  ;;  %v6153_v57 = vmax.f32 %v6151_v52, %v6152_v39  ;;  %v6175_v58 = vsel %vm6017_vm13, %v5704_v9, 4286644096  ;;  %v6188_v29 = vsel %vm6017_vm13, %v5718_v20, 4286644096 }
 0x366   : > { %v7048_v26 = vsel %vm16291_vm9, 0, %v7032_v50  ;;  %v6141_v61 = vrot.slane %v6140_v4, 4  ;;  %v6166_v21 = vmax.f32 %v6164_v41, %v6165_v8  ;;  %v6177_v12 = vunpack.i.l.bf16 %v6175_v58 }
 0x367   : > { %v7059_v0 = vsel %vm17987_vm1, %v7048_v26, 0  ;;  %v6129_v22 = vmax.f32 %v6127_v59, %v6128_v15  ;;  %v6154_v2 = vrot.slane %v6153_v57, 4  ;;  %v6178_v37 = vunpack.i.h.bf16 %v6175_v58  ;;  %v18002_v59 = vpop.f32.mrb[25].mxu0 }
 0x368   : > { %v13733_v38 = vcombine.low %v7059_v0, %v7059_v0  ;;  %v13734_v17 = vcombine.high %v7059_v0, %v7059_v0  ;;  %v6142_v42 = vmax.f32 %v6140_v4, %v6141_v61  ;;  %v6167_v14 = vrot.slane %v6166_v21, 4  ;;  %v18004_v4 = vpop.f32.mrb[26].mxu0 }
 0x369   : > { %v6130_v40 = vrot.slane %v6129_v22, 2  ;;  %v6155_v9 = vmax.f32 %v6153_v57, %v6154_v2  ;;  %v6179_v1 = vmax.f32 %v6177_v12, %v6178_v37  ;;  %v6190_v33 = vunpack.i.l.bf16 %v6188_v29 }
 0x36a   : > { %7125 = vst.msk [vmem:[#allocation3 + $0x8] sm:$0xf] %vm7124_vm14, %v13733_v38  ;;  %v6143_v20 = vrot.slane %v6142_v42, 2  ;;  %v6168_v48 = vmax.f32 %v6166_v21, %v6167_v14  ;;  %v6191_v19 = vunpack.i.h.bf16 %v6188_v29  ;;  %v6201_v45 = vsel %vm6017_vm13, %v5720_v56, 4286644096  ;;  %v18007_v56 = vpop.f32.mrb[27].mxu0 }
 0x36b   : > { %7126 = vst.msk [vmem:[#allocation3 + $0xc] sm:$0x1] %vm6017_vm13, %v13734_v17  ;;  %v6131_v34 = vmax.f32 %v6129_v22, %v6130_v40  ;;  %v6156_v44 = vrot.slane %v6155_v9, 2  ;;  %v6180_v10 = vrot.slane %v6179_v1, 4  ;;  %v6203_v23 = vunpack.i.l.bf16 %v6201_v45 }
 0x36c   : > { %v6144_v52 = vmax.f32 %v6142_v42, %v6143_v20  ;;  %v6169_v39 = vrot.slane %v6168_v48, 2  ;;  %v6192_v47 = vmax.f32 %v6190_v33, %v6191_v19  ;;  %v6204_v50 = vunpack.i.h.bf16 %v6201_v45 }
 0x36d   : > { %v6132_v41 = vrot.slane %v6131_v34, 1  ;;  %v6157_v8 = vmax.f32 %v6155_v9, %v6156_v44  ;;  %v6181_v15 = vmax.f32 %v6179_v1, %v6180_v10  ;;  %v6214_v57 = vsel %vm6017_vm13, %v5722_v55, 4286644096 }
 0x36e   : > { %v6145_v58 = vrot.slane %v6144_v52, 1  ;;  %v6170_v29 = vmax.f32 %v6168_v48, %v6169_v39  ;;  %v6193_v26 = vrot.slane %v6192_v47, 4  ;;  %v6205_v61 = vmax.f32 %v6203_v23, %v6204_v50 }
 0x36f   : > { %v6133_v21 = vmax.f32 %v6131_v34, %v6132_v41  ;;  %v6158_v12 = vrot.slane %v6157_v8, 1  ;;  %v6182_v0 = vrot.slane %v6181_v15, 2  ;;  %v6216_v22 = vunpack.i.l.bf16 %v6214_v57 }
 0x370   : > { %v6146_v2 = vmax.f32 %v6144_v52, %v6145_v58  ;;  %v6171_v37 = vrot.slane %v6170_v29, 1  ;;  %v6194_v38 = vmax.f32 %v6192_v47, %v6193_v26  ;;  %v6206_v17 = vrot.slane %v6205_v61, 4 }
 0x371   : > { %v6134_v42 = vpack.i.bf16 %v6133_v21, %v6133_v21  ;;  %v6159_v14 = vmax.f32 %v6157_v8, %v6158_v12  ;;  %v6183_v40 = vmax.f32 %v6181_v15, %v6182_v0  ;;  %v6217_v9 = vunpack.i.h.bf16 %v6214_v57 }
 0x372   : > { %v6147_v1 = vpack.i.bf16 %v6146_v2, %v6146_v2  ;;  %v6172_v55 = vmax.f32 %v6170_v29, %v6171_v37  ;;  %v6195_v33 = vrot.slane %v6194_v38, 2  ;;  %v6207_v20 = vmax.f32 %v6205_v61, %v6206_v17 }
 0x373   : > { %v6160_v19 = vpack.i.bf16 %v6159_v14, %v6159_v14  ;;  %v6184_v48 = vrot.slane %v6183_v40, 1  ;;  %v6218_v45 = vmax.f32 %v6216_v22, %v6217_v9  ;;  %v6922_v44 = vunpack.c.l.b16 %v6134_v42 }
 0x374   : > { %v6173_v34 = vpack.i.bf16 %v6172_v55, %v6172_v55  ;;  %v6196_v10 = vmax.f32 %v6194_v38, %v6195_v33  ;;  %v6208_v23 = vrot.slane %v6207_v20, 2  ;;  %v6923_v39 = vunpack.c.l.b16 %v6147_v1 }
 0x375   : > { %v6185_v52 = vmax.f32 %v6183_v40, %v6184_v48  ;;  %v6219_v50 = vrot.slane %v6218_v45, 4  ;;  %v6924_v47 = vunpack.c.l.b16 %v6160_v19  ;;  %v5519_v41 = vmax.f32 %v17974_v43, 0.0 }
 0x376   : > { %v6197_v8 = vrot.slane %v6196_v10, 1  ;;  %v6209_v15 = vmax.f32 %v6207_v20, %v6208_v23  ;;  %v6925_v57 = vunpack.c.l.b16 %v6173_v34  ;;  %v6990_v58 = vsel %vm6978_vm2, %v6923_v39, %v6922_v44 }
 0x377   : > { %v6186_v29 = vpack.i.bf16 %v6185_v52, %v6185_v52  ;;  %v6220_v26 = vmax.f32 %v6218_v45, %v6219_v50  ;;  %v6991_v61 = vsel %vm6980_vm3, %v6924_v47, %v6990_v58  ;;  %v5490_v21 = vadd.f32 %v17927_v13, %v17892_v24 }
 0x378   : > { %v6198_v12 = vmax.f32 %v6196_v10, %v6197_v8  ;;  %v6210_v0 = vrot.slane %v6209_v15, 1  ;;  %v6992_v22 = vsel %vm6982_vm4, %v6925_v57, %v6991_v61  ;;  %v5488_v2 = vadd.f32 %v17892_v24, %v17932_v49 }
 0x379   : > { %v6221_v43 = vrot.slane %v6220_v26, 2  ;;  %v6926_v37 = vunpack.c.l.b16 %v6186_v29  ;;  %v5522_v38 = vmax.f32 %v5490_v21, 0.0  ;;  %v5493_v17 = vadd.f32 %v17937_v54, %v17892_v24 }
 0x37a   : > { %v6199_v42 = vpack.i.bf16 %v6198_v12, %v6198_v12  ;;  %v6211_v14 = vmax.f32 %v6209_v15, %v6210_v0  ;;  %v5520_v40 = vmax.f32 %v5488_v2, 0.0  ;;  %v5491_v9 = vadd.f32 %v17892_v24, %v17939_v35 }
 0x37b   : > { %v6222_v13 = vmax.f32 %v6220_v26, %v6221_v43  ;;  %v6993_v1 = vsel %vm6984_vm5, %v6926_v37, %v6992_v22  ;;  %v5548_v55 = vpack.c.bf16 %v5522_v38, %v5521_v6  ;;  %v5525_v33 = vmax.f32 %v5493_v17, 0.0 }
 0x37c   : > { %v6212_v49 = vpack.i.bf16 %v6211_v14, %v6211_v14  ;;  %v6927_v20 = vunpack.c.l.b16 %v6199_v42  ;;  %v5547_v19 = vpack.c.bf16 %v5520_v40, %v5519_v41  ;;  %v5523_v48 = vmax.f32 %v5491_v9, 0.0 }
 0x37d   : > { %v6223_v45 = vrot.slane %v6222_v13, 1  ;;  %v5579_v54 = vsel %vm5559_vm15, %v5548_v55, 4286644096  ;;  %v5494_v44 = vadd.f32 %v17941_v63, %v17892_v24  ;;  %v5492_v35 = vadd.f32 %v17892_v24, %v17943_v31 }
 0x37e   : > { %v6928_v34 = vunpack.c.l.b16 %v6212_v49  ;;  %v6994_v10 = vsel %vm6986_vm6, %v6927_v20, %v6993_v1  ;;  %v5576_v53 = vsel %vm5559_vm15, %v5547_v19, 4286644096  ;;  %v5497_v6 = vadd.f32 %v17946_v51, %v17892_v24 }
 0x37f   : > { %v6224_v23 = vmax.f32 %v6222_v13, %v6223_v45  ;;  %v5581_v39 = vmax.bf16 %v5579_v54, %v5576_v53  ;;  %v5526_v52 = vmax.f32 %v5494_v44, 0.0  ;;  %v5524_v50 = vmax.f32 %v5492_v35, 0.0 }
 0x380   : > { %v6995_v47 = vsel %vm6988_vm7, %v6928_v34, %v6994_v10  ;;  %v5529_v41 = vmax.f32 %v5497_v6, 0.0  ;;  %v18036_v63 = vadd.f32 %v17892_v24, %v17948_v46  ;;  %v5498_v31 = vadd.f32 %v17950_v11, %v17892_v24  ;;  %v18067_v6 = vpop.f32.mrb[28].mxu0 }
 0x381   : > { %v6225_v8 = vpack.i.bf16 %v6224_v23, %v6224_v23  ;;  %v5723_v15 = vcombine.high %v5581_v39, %v5581_v39  ;;  %v5730_v57 = vrot.slane %v5581_v39, %v17902_v28  ;;  %v5550_v58 = vpack.c.bf16 %v5526_v52, %v5525_v33 }
 0x382   : > { %v5549_v51 = vpack.c.bf16 %v5524_v50, %v5523_v48  ;;  %v5527_v29 = vmax.f32 %v18036_v63, 0.0  ;;  %v5530_v26 = vmax.f32 %v5498_v31, 0.0  ;;  %v18044_v61 = vadd.f32 %v17892_v24, %v17952_v18 }
 0x383   : > { %v6929_v21 = vunpack.c.l.b16 %v6225_v8  ;;  %v5737_v46 = vrot.slane %v5723_v15, %v17902_v28  ;;  %v5738_v12 = vcombine.high %v5730_v57, %v5730_v57  ;;  %v5746_v0 = vrot.slane %v5730_v57, %v17902_v28 }
 0x384   : > { %v5586_v11 = vsel %vm5559_vm15, %v5550_v58, 4286644096  ;;  %v5583_v22 = vsel %vm5559_vm15, %v5549_v51, 4286644096  ;;  %v5552_v2 = vpack.c.bf16 %v5530_v26, %v5529_v41  ;;  %v5528_v43 = vmax.f32 %v18044_v61, 0.0 }
 0x385   : > { %v7033_v37 = vpack.c.b16 %v6929_v21, %v6995_v47  ;;  %v5739_v38 = vcombine.high %v5737_v46, %v5737_v46  ;;  %v5753_v17 = vrot.slane %v5737_v46, %v17902_v28  ;;  %v5760_v24 = vrot.slane %v5738_v12, %v17902_v28  ;;  %v18071_v47 = vpop.f32.mrb[29].mxu0 }
 0x386   : > { %v5768_v18 = vcombine.high %v5746_v0, %v5746_v0  ;;  %v6227_v42 = vsel %vm6017_vm13, %v5746_v0, 4286644096  ;;  %v18054_v14 = vmax.bf16 %v5586_v11, %v5583_v22  ;;  %v18057_v40 = vsel %vm5559_vm15, %v5552_v2, 4286644096  ;;  %v18075_v57 = vpop.f32.mrb[30].mxu0 }
 0x387   : > { %v7049_v9 = vsel %vm16291_vm9, 0, %v7033_v37  ;;  %v5767_v13 = vrot.slane %v5739_v38, %v17902_v28  ;;  %v5769_v1 = vcombine.high %v5753_v17, %v5753_v17  ;;  %v5770_v55 = vcombine.high %v5760_v24, %v5760_v24 }
 0x388   : > { %v7060_v33 = vsel %vm17987_vm1, %v7049_v9, 0  ;;  %v6229_v49 = vunpack.i.l.bf16 %v6227_v42  ;;  %v6230_v20 = vunpack.i.h.bf16 %v6227_v42  ;;  %v6240_v19 = vsel %vm6017_vm13, %v5760_v24, 4286644096 }
 0x389   : > { %v13735_v48 = vcombine.low %v7060_v33, %v7060_v33  ;;  %v13736_v45 = vcombine.high %v7060_v33, %v7060_v33  ;;  %v5771_v54 = vcombine.high %v5767_v13, %v5767_v13  ;;  %v6242_v44 = vunpack.i.l.bf16 %v6240_v19 }
 0x38a   : > { %v6231_v35 = vmax.f32 %v6229_v49, %v6230_v20  ;;  %v6243_v34 = vunpack.i.h.bf16 %v6240_v19  ;;  %v6253_v10 = vsel %vm6017_vm13, %v5768_v18, 4286644096  ;;  %v6266_v53 = vsel %vm6017_vm13, %v5770_v55, 4286644096 }
 0x38b   : > { %7127 = vst.msk [vmem:[#allocation3 + $0x10] sm:$0xf] %vm7124_vm14, %v13735_v48  ;;  %v6255_v23 = vunpack.i.l.bf16 %v6253_v10  ;;  %v6256_v39 = vunpack.i.h.bf16 %v6253_v10  ;;  %v6268_v52 = vunpack.i.l.bf16 %v6266_v53  ;;  %v6269_v50 = vunpack.i.h.bf16 %v6266_v53 }
 0x38c   : > { %7128 = vst.msk [vmem:[#allocation3 + $0x14] sm:$0x1] %vm6017_vm13, %v13736_v45  ;;  %v6232_v41 = vrot.slane %v6231_v35, 4  ;;  %v6244_v31 = vmax.f32 %v6242_v44, %v6243_v34  ;;  %v6279_v8 = vsel %vm6017_vm13, %v5753_v17, 4286644096 }
 0x38d   : > { %v6292_v15 = vsel %vm6017_vm13, %v5767_v13, 4286644096  ;;  %v6257_v58 = vmax.f32 %v6255_v23, %v6256_v39  ;;  %v6270_v51 = vmax.f32 %v6268_v52, %v6269_v50  ;;  %v6281_v26 = vunpack.i.l.bf16 %v6279_v8 }
 0x38e   : > { %v6282_v21 = vunpack.i.h.bf16 %v6279_v8  ;;  %v6233_v46 = vmax.f32 %v6231_v35, %v6232_v41  ;;  %v6245_v12 = vrot.slane %v6244_v31, 4  ;;  %v6294_v0 = vunpack.i.l.bf16 %v6292_v15 }
 0x38f   : > { %v6295_v11 = vunpack.i.h.bf16 %v6292_v15  ;;  %v6258_v22 = vrot.slane %v6257_v58, 4  ;;  %v6271_v2 = vrot.slane %v6270_v51, 4  ;;  %v6305_v38 = vsel %vm6017_vm13, %v5769_v1, 4286644096 }
 0x390   : > { %v6283_v37 = vmax.f32 %v6281_v26, %v6282_v21  ;;  %v6234_v24 = vrot.slane %v6233_v46, 2  ;;  %v6246_v18 = vmax.f32 %v6244_v31, %v6245_v12  ;;  %v6307_v42 = vunpack.i.l.bf16 %v6305_v38 }
 0x391   : > { %v6296_v17 = vmax.f32 %v6294_v0, %v6295_v11  ;;  %v6259_v9 = vmax.f32 %v6257_v58, %v6258_v22  ;;  %v6272_v13 = vmax.f32 %v6270_v51, %v6271_v2  ;;  %v6308_v33 = vunpack.i.h.bf16 %v6305_v38  ;;  %v18079_v51 = vpop.f32.mrb[31].mxu0 }
 0x392   : > { %v6284_v55 = vrot.slane %v6283_v37, 4  ;;  %v6235_v49 = vmax.f32 %v6233_v46, %v6234_v24  ;;  %v6247_v20 = vrot.slane %v6246_v18, 2  ;;  %v6318_v48 = vsel %vm6017_vm13, %v5771_v54, 4286644096 }
 0x393   : > { %v6297_v19 = vrot.slane %v6296_v17, 4  ;;  %v6260_v45 = vrot.slane %v6259_v9, 2  ;;  %v6273_v44 = vrot.slane %v6272_v13, 2  ;;  %v6309_v34 = vmax.f32 %v6307_v42, %v6308_v33 }
 0x394   : > { %v6285_v35 = vmax.f32 %v6283_v37, %v6284_v55  ;;  %v6236_v10 = vrot.slane %v6235_v49, 1  ;;  %v6248_v53 = vmax.f32 %v6246_v18, %v6247_v20  ;;  %v6320_v23 = vunpack.i.l.bf16 %v6318_v48 }
 0x395   : > { %v6298_v1 = vmax.f32 %v6296_v17, %v6297_v19  ;;  %v6261_v39 = vmax.f32 %v6259_v9, %v6260_v45  ;;  %v6274_v52 = vmax.f32 %v6272_v13, %v6273_v44  ;;  %v6310_v41 = vrot.slane %v6309_v34, 4 }
 0x396   : > { %v6286_v50 = vrot.slane %v6285_v35, 2  ;;  %v6237_v31 = vmax.f32 %v6235_v49, %v6236_v10  ;;  %v6249_v8 = vrot.slane %v6248_v53, 1  ;;  %v6321_v58 = vunpack.i.h.bf16 %v6318_v48 }
 0x397   : > { %v6299_v15 = vrot.slane %v6298_v1, 2  ;;  %v6262_v26 = vrot.slane %v6261_v39, 1  ;;  %v6275_v54 = vrot.slane %v6274_v52, 1  ;;  %v6311_v46 = vmax.f32 %v6309_v34, %v6310_v41 }
 0x398   : > { %v6287_v21 = vmax.f32 %v6285_v35, %v6286_v50  ;;  %v6238_v12 = vpack.i.bf16 %v6237_v31, %v6237_v31  ;;  %v6250_v0 = vmax.f32 %v6248_v53, %v6249_v8  ;;  %v6322_v22 = vmax.f32 %v6320_v23, %v6321_v58 }
 0x399   : > { %v6300_v11 = vmax.f32 %v6298_v1, %v6299_v15  ;;  %v6263_v2 = vmax.f32 %v6261_v39, %v6262_v26  ;;  %v6276_v37 = vmax.f32 %v6274_v52, %v6275_v54  ;;  %v6312_v24 = vrot.slane %v6311_v46, 2 }
 0x39a   : > { %v6288_v38 = vrot.slane %v6287_v21, 1  ;;  %v6251_v18 = vpack.i.bf16 %v6250_v0, %v6250_v0  ;;  %v6323_v42 = vrot.slane %v6322_v22, 4  ;;  %v6930_v9 = vunpack.c.l.b16 %v6238_v12 }
 0x39b   : > { %v6301_v17 = vrot.slane %v6300_v11, 1  ;;  %v6264_v13 = vpack.i.bf16 %v6263_v2, %v6263_v2  ;;  %v6277_v55 = vpack.i.bf16 %v6276_v37, %v6276_v37  ;;  %v6313_v49 = vmax.f32 %v6311_v46, %v6312_v24 }
 0x39c   : > { %v6289_v33 = vmax.f32 %v6287_v21, %v6288_v38  ;;  %v6324_v19 = vmax.f32 %v6322_v22, %v6323_v42  ;;  %v6931_v48 = vunpack.c.l.b16 %v6251_v18  ;;  %v5772_v45 = vcombine.high %v18054_v14, %v18054_v14 }
 0x39d   : > { %v6302_v20 = vmax.f32 %v6300_v11, %v6301_v17  ;;  %v6314_v35 = vrot.slane %v6313_v49, 1  ;;  %v6932_v34 = vunpack.c.l.b16 %v6264_v13  ;;  %v6933_v10 = vunpack.c.l.b16 %v6277_v55 }
 0x39e   : > { %v6290_v44 = vpack.i.bf16 %v6289_v33, %v6289_v33  ;;  %v6325_v1 = vrot.slane %v6324_v19, 2  ;;  %v6996_v23 = vsel %vm6978_vm2, %v6931_v48, %v6930_v9  ;;  %v5779_v39 = vrot.slane %v18054_v14, %v17902_v28 }
 0x39f   : > { %v6303_v53 = vpack.i.bf16 %v6302_v20, %v6302_v20  ;;  %v6315_v52 = vmax.f32 %v6313_v49, %v6314_v35  ;;  %v6997_v41 = vsel %vm6980_vm3, %v6932_v34, %v6996_v23  ;;  %v5786_v31 = vrot.slane %v5772_v45, %v17902_v28 }
 0x3a0   : > { %v6934_v50 = vunpack.c.l.b16 %v6290_v44  ;;  %v6326_v8 = vmax.f32 %v6324_v19, %v6325_v1  ;;  %v6998_v58 = vsel %vm6982_vm4, %v6933_v10, %v6997_v41  ;;  %v5787_v26 = vcombine.high %v5779_v39, %v5779_v39 }
 0x3a1   : > { %v6935_v15 = vunpack.c.l.b16 %v6303_v53  ;;  %v6316_v54 = vpack.i.bf16 %v6315_v52, %v6315_v52  ;;  %v5788_v46 = vcombine.high %v5786_v31, %v5786_v31  ;;  %v5795_v12 = vrot.slane %v5779_v39, %v17902_v28 }
 0x3a2   : > { %v6999_v21 = vsel %vm6984_vm5, %v6934_v50, %v6998_v58  ;;  %v6327_v0 = vrot.slane %v6326_v8, 1  ;;  %v5802_v11 = vrot.slane %v5786_v31, %v17902_v28  ;;  %v5809_v22 = vrot.slane %v5787_v26, %v17902_v28 }
 0x3a3   : > { %v7000_v14 = vsel %vm6986_vm6, %v6935_v15, %v6999_v21  ;;  %v6936_v2 = vunpack.c.l.b16 %v6316_v54  ;;  %v5816_v37 = vrot.slane %v5788_v46, %v17902_v28  ;;  %v5817_v38 = vcombine.high %v5795_v12, %v5795_v12 }
 0x3a4   : > { %v6331_v24 = vsel %vm6017_vm13, %v5795_v12, 4286644096  ;;  %v6328_v18 = vmax.f32 %v6326_v8, %v6327_v0  ;;  %v5818_v17 = vcombine.high %v5802_v11, %v5802_v11  ;;  %v5819_v42 = vcombine.high %v5809_v22, %v5809_v22 }
 0x3a5   : > { %v6333_v9 = vunpack.i.l.bf16 %v6331_v24  ;;  %v7001_v13 = vsel %vm6988_vm7, %v6936_v2, %v7000_v14  ;;  %v5820_v55 = vcombine.high %v5816_v37, %v5816_v37  ;;  %v6334_v33 = vunpack.i.h.bf16 %v6331_v24 }
 0x3a6   : > { %v6344_v49 = vsel %vm6017_vm13, %v5809_v22, 4286644096  ;;  %v6329_v20 = vpack.i.bf16 %v6328_v18, %v6328_v18  ;;  %v6357_v45 = vsel %vm6017_vm13, %v5817_v38, 4286644096  ;;  %v6370_v10 = vsel %vm6017_vm13, %v5819_v42, 4286644096 }
 0x3a7   : > { %v6346_v19 = vunpack.i.l.bf16 %v6344_v49  ;;  %v6347_v48 = vunpack.i.h.bf16 %v6344_v49  ;;  %v6335_v44 = vmax.f32 %v6333_v9, %v6334_v33  ;;  %v6359_v35 = vunpack.i.l.bf16 %v6357_v45 }
 0x3a8   : > { %v6360_v34 = vunpack.i.h.bf16 %v6357_v45  ;;  %v6937_v53 = vunpack.c.l.b16 %v6329_v20  ;;  %v6372_v23 = vunpack.i.l.bf16 %v6370_v10  ;;  %v6373_v39 = vunpack.i.h.bf16 %v6370_v10 }
 0x3a9   : > { %v6348_v1 = vmax.f32 %v6346_v19, %v6347_v48  ;;  %v6336_v52 = vrot.slane %v6335_v44, 4  ;;  %v6383_v41 = vsel %vm6017_vm13, %v5802_v11, 4286644096  ;;  %v6396_v31 = vsel %vm6017_vm13, %v5816_v37, 4286644096 }
 0x3aa   : > { %v6361_v50 = vmax.f32 %v6359_v35, %v6360_v34  ;;  %v7034_v8 = vpack.c.b16 %v6937_v53, %v7001_v13  ;;  %v6374_v58 = vmax.f32 %v6372_v23, %v6373_v39  ;;  %v6385_v26 = vunpack.i.l.bf16 %v6383_v41 }
 0x3ab   : > { %v6349_v15 = vrot.slane %v6348_v1, 4  ;;  %v6337_v54 = vmax.f32 %v6335_v44, %v6336_v52  ;;  %v6386_v46 = vunpack.i.h.bf16 %v6383_v41  ;;  %v6398_v12 = vunpack.i.l.bf16 %v6396_v31 }
 0x3ac   : > { %v6362_v21 = vrot.slane %v6361_v50, 4  ;;  %v7050_v0 = vsel %vm16291_vm9, 0, %v7034_v8  ;;  %v6375_v22 = vrot.slane %v6374_v58, 4  ;;  %v6399_v2 = vunpack.i.h.bf16 %v6396_v31 }
 0x3ad   : > { %v6350_v14 = vmax.f32 %v6348_v1, %v6349_v15  ;;  %v7061_v38 = vsel %vm17987_vm1, %v7050_v0, 0  ;;  %v6338_v11 = vrot.slane %v6337_v54, 2  ;;  %v6387_v37 = vmax.f32 %v6385_v26, %v6386_v46 }
 0x3ae   : > { %v6363_v24 = vmax.f32 %v6361_v50, %v6362_v21  ;;  %v13737_v18 = vcombine.low %v7061_v38, %v7061_v38  ;;  %v13738_v42 = vcombine.high %v7061_v38, %v7061_v38  ;;  %v6376_v13 = vmax.f32 %v6374_v58, %v6375_v22 }
 0x3af   : > { %v6351_v9 = vrot.slane %v6350_v14, 2  ;;  %v6339_v33 = vmax.f32 %v6337_v54, %v6338_v11  ;;  %v6388_v20 = vrot.slane %v6387_v37, 4  ;;  %v6400_v19 = vmax.f32 %v6398_v12, %v6399_v2 }
 0x3b0   : > { %v6364_v49 = vrot.slane %v6363_v24, 2  ;;  %7129 = vst.msk [vmem:[#allocation3 + $0x18] sm:$0xf] %vm7124_vm14, %v13737_v18  ;;  %v6377_v45 = vrot.slane %v6376_v13, 2  ;;  %v6409_v44 = vsel %vm6017_vm13, %v5818_v17, 4286644096 }
 0x3b1   : > { %7130 = vst.msk [vmem:[#allocation3 + $0x1c] sm:$0x1] %vm6017_vm13, %v13738_v42  ;;  %v6352_v48 = vmax.f32 %v6350_v14, %v6351_v9  ;;  %v6422_v35 = vsel %vm6017_vm13, %v5820_v55, 4286644096  ;;  %v6340_v34 = vrot.slane %v6339_v33, 1  ;;  %v6389_v53 = vmax.f32 %v6387_v37, %v6388_v20 }
 0x3b2   : > { %v6365_v10 = vmax.f32 %v6363_v24, %v6364_v49  ;;  %v6401_v1 = vrot.slane %v6400_v19, 4  ;;  %v6378_v39 = vmax.f32 %v6376_v13, %v6377_v45  ;;  %v6411_v52 = vunpack.i.l.bf16 %v6409_v44 }
 0x3b3   : > { %v6353_v23 = vrot.slane %v6352_v48, 1  ;;  %v6412_v50 = vunpack.i.h.bf16 %v6409_v44  ;;  %v6341_v41 = vmax.f32 %v6339_v33, %v6340_v34  ;;  %v6390_v8 = vrot.slane %v6389_v53, 2 }
 0x3b4   : > { %v6366_v31 = vrot.slane %v6365_v10, 1  ;;  %v6402_v15 = vmax.f32 %v6400_v19, %v6401_v1  ;;  %v6379_v26 = vrot.slane %v6378_v39, 1  ;;  %v6424_v21 = vunpack.i.l.bf16 %v6422_v35 }
 0x3b5   : > { %v6354_v58 = vmax.f32 %v6352_v48, %v6353_v23  ;;  %v6413_v54 = vmax.f32 %v6411_v52, %v6412_v50  ;;  %v6342_v46 = vpack.i.bf16 %v6341_v41, %v6341_v41  ;;  %v6391_v12 = vmax.f32 %v6389_v53, %v6390_v8 }
 0x3b6   : > { %v6367_v17 = vmax.f32 %v6365_v10, %v6366_v31  ;;  %v6403_v55 = vrot.slane %v6402_v15, 2  ;;  %v6380_v14 = vmax.f32 %v6378_v39, %v6379_v26  ;;  %v6425_v2 = vunpack.i.h.bf16 %v6422_v35 }
 0x3b7   : > { %v6355_v0 = vpack.i.bf16 %v6354_v58, %v6354_v58  ;;  %v6414_v22 = vrot.slane %v6413_v54, 4  ;;  %v6392_v11 = vrot.slane %v6391_v12, 1  ;;  %v6938_v37 = vunpack.c.l.b16 %v6342_v46 }
 0x3b8   : > { %v6368_v38 = vpack.i.bf16 %v6367_v17, %v6367_v17  ;;  %v6404_v24 = vmax.f32 %v6402_v15, %v6403_v55  ;;  %v6381_v18 = vpack.i.bf16 %v6380_v14, %v6380_v14  ;;  %v6426_v9 = vmax.f32 %v6424_v21, %v6425_v2 }
 0x3b9   : > { %v6415_v42 = vmax.f32 %v6413_v54, %v6414_v22  ;;  %v6939_v13 = vunpack.c.l.b16 %v6355_v0  ;;  %v6393_v33 = vmax.f32 %v6391_v12, %v6392_v11  ;;  %v5551_v19 = vpack.c.bf16 %v5528_v43, %v5527_v29  ;;  %v18122_v29 = vld [vmem:[%s20082_s2] ss:$0 sm:$0xff] }
 0x3ba   : > { %v6405_v49 = vrot.slane %v6404_v24, 1  ;;  %v6940_v20 = vunpack.c.l.b16 %v6368_v38  ;;  %v6427_v45 = vrot.slane %v6426_v9, 4  ;;  %v6941_v44 = vunpack.c.l.b16 %v6381_v18 }
 0x3bb   : > { %v6416_v48 = vrot.slane %v6415_v42, 2  ;;  %v7002_v35 = vsel %vm6978_vm2, %v6939_v13, %v6938_v37  ;;  %v6394_v34 = vpack.i.bf16 %v6393_v33, %v6393_v33  ;;  %v5590_v1 = vsel %vm5559_vm15, %v5551_v19, 4286644096 }
 0x3bc   : > { %v6406_v10 = vmax.f32 %v6404_v24, %v6405_v49  ;;  %v7003_v53 = vsel %vm6980_vm3, %v6940_v20, %v7002_v35  ;;  %v6428_v39 = vmax.f32 %v6426_v9, %v6427_v45  ;;  %v5595_v63 = vmax.bf16 %v18057_v40, %v5590_v1 }
 0x3bd   : > { %v6417_v23 = vmax.f32 %v6415_v42, %v6416_v48  ;;  %v7004_v52 = vsel %vm6982_vm4, %v6941_v44, %v7003_v53  ;;  %v6942_v61 = vunpack.c.l.b16 %v6394_v34  ;;  %v18126_v43 = vadd.f32 %v18122_v29, %v17956_v5 }
 0x3be   : > { %v6407_v50 = vpack.i.bf16 %v6406_v10, %v6406_v10  ;;  %v18130_v41 = vadd.f32 %v18122_v29, %v17959_v7  ;;  %v6429_v8 = vrot.slane %v6428_v39, 2  ;;  %v5821_v15 = vcombine.high %v5595_v63, %v5595_v63 }
 0x3bf   : > { %v6418_v31 = vrot.slane %v6417_v23, 1  ;;  %v5828_v40 = vrot.slane %v5595_v63, %v17902_v28  ;;  %v7005_v26 = vsel %vm6984_vm5, %v6942_v61, %v7004_v52  ;;  %v5533_v54 = vmax.f32 %v18126_v43, 0.0 }
 0x3c0   : > { %v6943_v58 = vunpack.c.l.b16 %v6407_v50  ;;  %v5531_v21 = vmax.f32 %v18130_v41, 0.0  ;;  %v6430_v17 = vmax.f32 %v6428_v39, %v6429_v8  ;;  %v5835_v5 = vrot.slane %v5821_v15, %v17902_v28 }
 0x3c1   : > { %v6419_v46 = vmax.f32 %v6417_v23, %v6418_v31  ;;  %v5836_v12 = vcombine.high %v5828_v40, %v5828_v40  ;;  %v5844_v55 = vrot.slane %v5828_v40, %v17902_v28  ;;  %v18141_v0 = vadd.f32 %v18122_v29, %v17962_v27 }
 0x3c2   : > { %v7006_v7 = vsel %vm6986_vm6, %v6943_v58, %v7005_v26  ;;  %v18145_v14 = vadd.f32 %v18122_v29, %v17967_v25  ;;  %v6431_v2 = vrot.slane %v6430_v17, 1  ;;  %v5837_v38 = vcombine.high %v5835_v5, %v5835_v5 }
 0x3c3   : > { %v6420_v22 = vpack.i.bf16 %v6419_v46, %v6419_v46  ;;  %v5851_v11 = vrot.slane %v5835_v5, %v17902_v28  ;;  %v5858_v24 = vrot.slane %v5836_v12, %v17902_v28  ;;  %v5866_v37 = vcombine.high %v5844_v55, %v5844_v55 }
 0x3c4   : > { %v6435_v18 = vsel %vm6017_vm13, %v5844_v55, 4286644096  ;;  %v5534_v42 = vmax.f32 %v18141_v0, 0.0  ;;  %v6432_v9 = vmax.f32 %v6430_v17, %v6431_v2  ;;  %v5865_v27 = vrot.slane %v5837_v38, %v17902_v28 }
 0x3c5   : > { %v6944_v13 = vunpack.c.l.b16 %v6420_v22  ;;  %v5867_v33 = vcombine.high %v5851_v11, %v5851_v11  ;;  %v5868_v49 = vcombine.high %v5858_v24, %v5858_v24  ;;  %v6437_v25 = vunpack.i.l.bf16 %v6435_v18 }
 0x3c6   : > { %v6438_v20 = vunpack.i.h.bf16 %v6435_v18  ;;  %v6448_v19 = vsel %vm6017_vm13, %v5858_v24, 4286644096  ;;  %v6433_v48 = vpack.i.bf16 %v6432_v9, %v6432_v9  ;;  %v5869_v44 = vcombine.high %v5865_v27, %v5865_v27 }
 0x3c7   : > { %v7007_v45 = vsel %vm6988_vm7, %v6944_v13, %v7006_v7  ;;  %v6450_v35 = vunpack.i.l.bf16 %v6448_v19  ;;  %v6451_v10 = vunpack.i.h.bf16 %v6448_v19  ;;  %v6461_v53 = vsel %vm6017_vm13, %v5866_v37, 4286644096 }
 0x3c8   : > { %v6439_v34 = vmax.f32 %v6437_v25, %v6438_v20  ;;  %v6474_v1 = vsel %vm6017_vm13, %v5868_v49, 4286644096  ;;  %v6945_v23 = vunpack.c.l.b16 %v6433_v48  ;;  %v6463_v39 = vunpack.i.l.bf16 %v6461_v53 }
 0x3c9   : > { %v6464_v52 = vunpack.i.h.bf16 %v6461_v53  ;;  %v6476_v63 = vunpack.i.l.bf16 %v6474_v1  ;;  %v6452_v61 = vmax.f32 %v6450_v35, %v6451_v10  ;;  %v6477_v31 = vunpack.i.h.bf16 %v6474_v1 }
 0x3ca   : > { %v6440_v50 = vrot.slane %v6439_v34, 4  ;;  %v6487_v8 = vsel %vm6017_vm13, %v5851_v11, 4286644096  ;;  %v7035_v15 = vpack.c.b16 %v6945_v23, %v7007_v45  ;;  %v6500_v12 = vsel %vm6017_vm13, %v5865_v27, 4286644096 }
 0x3cb   : > { %v6465_v40 = vmax.f32 %v6463_v39, %v6464_v52  ;;  %v6489_v58 = vunpack.i.l.bf16 %v6487_v8  ;;  %v6490_v26 = vunpack.i.h.bf16 %v6487_v8  ;;  %v6453_v17 = vrot.slane %v6452_v61, 4 }
 0x3cc   : > { %v6441_v46 = vmax.f32 %v6439_v34, %v6440_v50  ;;  %v6478_v5 = vmax.f32 %v6476_v63, %v6477_v31  ;;  %v7051_v7 = vsel %vm16291_vm9, 0, %v7035_v15  ;;  %v6502_v2 = vunpack.i.l.bf16 %v6500_v12 }
 0x3cd   : > { %v6466_v55 = vrot.slane %v6465_v40, 4  ;;  %v6491_v22 = vmax.f32 %v6489_v58, %v6490_v26  ;;  %v7062_v38 = vsel %vm17987_vm1, %v7051_v7, 0  ;;  %v6454_v11 = vmax.f32 %v6452_v61, %v6453_v17 }
 0x3ce   : > { %v6442_v24 = vrot.slane %v6441_v46, 2  ;;  %v6479_v37 = vrot.slane %v6478_v5, 4  ;;  %v13739_v18 = vcombine.low %v7062_v38, %v7062_v38  ;;  %v13740_v9 = vcombine.high %v7062_v38, %v7062_v38  ;;  %v15480_v38 = vld [vmem:[%s20083_s3 + $0x18] sm:$0xff]  }
 0x3cf   : > { %v6467_v13 = vmax.f32 %v6465_v40, %v6466_v55  ;;  %v6492_v49 = vrot.slane %v6491_v22, 4  ;;  %v6455_v20 = vrot.slane %v6454_v11, 2  ;;  %v6503_v27 = vunpack.i.h.bf16 %v6500_v12  ;;  %v15479_v12 = vld [vmem:[%s20083_s3 + $0x10] sm:$0xff]  }
 0x3d0   : > { %v6443_v25 = vmax.f32 %v6441_v46, %v6442_v24  ;;  %v6480_v19 = vmax.f32 %v6478_v5, %v6479_v37  ;;  %7131 = vst.msk [vmem:[#allocation3 + $0x20] sm:$0xf] %vm7124_vm14, %v13739_v18  ;;  %v6513_v35 = vsel %vm6017_vm13, %v5867_v33, 4286644096  ;;  %v6526_v34 = vsel %vm6017_vm13, %v5869_v44, 4286644096  ;;  %14912 = vmatprep.subr.bf16.mxu1 %v15479_v12 }
 0x3d1   : > { %7132 = vst.msk [vmem:[#allocation3 + $0x24] sm:$0x1] %vm6017_vm13, %v13740_v9  ;;  %v6468_v48 = vrot.slane %v6467_v13, 2  ;;  %v6493_v45 = vmax.f32 %v6491_v22, %v6492_v49  ;;  %v6456_v53 = vmax.f32 %v6454_v11, %v6455_v20  ;;  %v6504_v23 = vmax.f32 %v6502_v2, %v6503_v27  ;;  %14913 = vmatpush3.bf16.msra.mxu1 %v15479_v12 }
 0x3d2   : > { %v6444_v10 = vrot.slane %v6443_v25, 1  ;;  %v6481_v1 = vrot.slane %v6480_v19, 2  ;;  %v6515_v63 = vunpack.i.l.bf16 %v6513_v35  ;;  %v6516_v50 = vunpack.i.h.bf16 %v6513_v35  ;;  %14914 = vmatprep.subr.bf16.mxu1 %v15480_v38 }
 0x3d3   : > { %v6469_v39 = vmax.f32 %v6467_v13, %v6468_v48  ;;  %v6494_v52 = vrot.slane %v6493_v45, 2  ;;  %v6457_v31 = vrot.slane %v6456_v53, 1  ;;  %v6505_v15 = vrot.slane %v6504_v23, 4 }
 0x3d4   : > { %v6445_v61 = vmax.f32 %v6443_v25, %v6444_v10  ;;  %v6482_v8 = vmax.f32 %v6480_v19, %v6481_v1  ;;  %v6517_v26 = vmax.f32 %v6515_v63, %v6516_v50  ;;  %v6528_v46 = vunpack.i.l.bf16 %v6526_v34 }
 0x3d5   : > { %v6470_v40 = vrot.slane %v6469_v39, 1  ;;  %v6495_v58 = vmax.f32 %v6493_v45, %v6494_v52  ;;  %v6458_v33 = vmax.f32 %v6456_v53, %v6457_v31  ;;  %v6506_v44 = vmax.f32 %v6504_v23, %v6505_v15  ;;  %v15481_v45 = vld [vmem:[%s20083_s3] sm:$0xff]   ;;  %14915 = vmatpush3.bf16.msra.mxu1 %v15480_v38 }
 0x3d6   : > { %v6446_v17 = vpack.i.bf16 %v6445_v61, %v6445_v61  ;;  %v6483_v5 = vrot.slane %v6482_v8, 1  ;;  %v6518_v22 = vrot.slane %v6517_v26, 4  ;;  %v6529_v2 = vunpack.i.h.bf16 %v6526_v34  ;;  %14924 = vmatprep.subr.bf16.mxu1 %v15481_v45 }
 0x3d7   : > { %v6471_v7 = vmax.f32 %v6469_v39, %v6470_v40  ;;  %v6496_v55 = vrot.slane %v6495_v58, 1  ;;  %v6459_v24 = vpack.i.bf16 %v6458_v33, %v6458_v33  ;;  %v6507_v37 = vrot.slane %v6506_v44, 2 }
 0x3d8   : > { %v6484_v11 = vmax.f32 %v6482_v8, %v6483_v5  ;;  %v6946_v18 = vunpack.c.l.b16 %v6446_v17  ;;  %v6519_v49 = vmax.f32 %v6517_v26, %v6518_v22  ;;  %v6530_v25 = vmax.f32 %v6528_v46, %v6529_v2 }
 0x3d9   : > { %v6472_v9 = vpack.i.bf16 %v6471_v7, %v6471_v7  ;;  %v6497_v13 = vmax.f32 %v6495_v58, %v6496_v55  ;;  %v6508_v19 = vmax.f32 %v6506_v44, %v6507_v37  ;;  %v6947_v27 = vunpack.c.l.b16 %v6459_v24 }
 0x3da   : > { %v6485_v20 = vpack.i.bf16 %v6484_v11, %v6484_v11  ;;  %v5554_v48 = vpack.c.bf16 %v5534_v42, %v5533_v54  ;;  %v6520_v34 = vrot.slane %v6519_v49, 2  ;;  %v6531_v10 = vrot.slane %v6530_v25, 4 }
 0x3db   : > { %v6498_v35 = vpack.i.bf16 %v6497_v13, %v6497_v13  ;;  %v6948_v53 = vunpack.c.l.b16 %v6472_v9  ;;  %v6509_v1 = vrot.slane %v6508_v19, 1  ;;  %v7008_v39 = vsel %vm6978_vm2, %v6947_v27, %v6946_v18 }
 0x3dc   : > { %v6949_v23 = vunpack.c.l.b16 %v6485_v20  ;;  %v5600_v52 = vsel %vm5559_vm15, %v5554_v48, 4286644096  ;;  %v6521_v63 = vmax.f32 %v6519_v49, %v6520_v34  ;;  %v6532_v43 = vmax.f32 %v6530_v25, %v6531_v10 }
 0x3dd   : > { %v6950_v50 = vunpack.c.l.b16 %v6498_v35  ;;  %v7009_v54 = vsel %vm6980_vm3, %v6948_v53, %v7008_v39  ;;  %v6510_v0 = vmax.f32 %v6508_v19, %v6509_v1  ;;  %v5532_v61 = vmax.f32 %v18145_v14, 0.0 }
 0x3de   : > { %v7010_v42 = vsel %vm6982_vm4, %v6949_v23, %v7009_v54  ;;  %v5505_v31 = vadd.f32 %v18122_v29, %v18000_v36  ;;  %v6522_v8 = vrot.slane %v6521_v63, 1  ;;  %v6533_v15 = vrot.slane %v6532_v43, 2 }
 0x3df   : > { %v7011_v40 = vsel %vm6984_vm5, %v6950_v50, %v7010_v42  ;;  %v5503_v58 = vadd.f32 %v18122_v29, %v18002_v59  ;;  %v6511_v26 = vpack.i.bf16 %v6510_v0, %v6510_v0  ;;  %v5553_v46 = vpack.c.bf16 %v5532_v61, %v5531_v21 }
 0x3e0   : > { %v5537_v17 = vmax.f32 %v5505_v31, 0.0  ;;  %v5506_v33 = vadd.f32 %v18122_v29, %v18004_v4  ;;  %v6523_v14 = vmax.f32 %v6521_v63, %v6522_v8  ;;  %v6534_v5 = vmax.f32 %v6532_v43, %v6533_v15 }
 0x3e1   : > { %v5535_v44 = vmax.f32 %v5503_v58, 0.0  ;;  %v5504_v36 = vadd.f32 %v18122_v29, %v18007_v56  ;;  %v6951_v12 = vunpack.c.l.b16 %v6511_v26  ;;  %v5597_v7 = vsel %vm5559_vm15, %v5553_v46, 4286644096 }
 0x3e2   : > { %v5538_v55 = vmax.f32 %v5506_v33, 0.0  ;;  %v5509_v59 = vadd.f32 %v18122_v29, %v18067_v6  ;;  %v6524_v22 = vpack.i.bf16 %v6523_v14, %v6523_v14  ;;  %v6535_v41 = vrot.slane %v6534_v5, 1 }
 0x3e3   : > { %v5602_v21 = vmax.bf16 %v5600_v52, %v5597_v7  ;;  %v5536_v2 = vmax.f32 %v5504_v36, 0.0  ;;  %v7012_v38 = vsel %vm6986_vm6, %v6951_v12, %v7011_v40  ;;  %v18201_v11 = vadd.f32 %v18122_v29, %v18071_v47 }
 0x3e4   : > { %v5556_v4 = vpack.c.bf16 %v5538_v55, %v5537_v17  ;;  %v5541_v24 = vmax.f32 %v5509_v59, 0.0  ;;  %v6536_v56 = vmax.f32 %v6534_v5, %v6535_v41  ;;  %v6952_v37 = vunpack.c.l.b16 %v6524_v22 }
 0x3e5   : > { %v5870_v18 = vcombine.high %v5602_v21, %v5602_v21  ;;  %v5877_v9 = vrot.slane %v5602_v21, %v17902_v28  ;;  %v5555_v6 = vpack.c.bf16 %v5536_v2, %v5535_v44  ;;  %v5539_v49 = vmax.f32 %v18201_v11, 0.0 }
 0x3e6   : > { %v5607_v13 = vsel %vm5559_vm15, %v5556_v4, 4286644096  ;;  %v5510_v25 = vadd.f32 %v18122_v29, %v18075_v57  ;;  %v6537_v20 = vpack.i.bf16 %v6536_v56, %v6536_v56  ;;  %v7013_v19 = vsel %vm6988_vm7, %v6952_v37, %v7012_v38 }
 0x3e7   : > { %v5884_v27 = vrot.slane %v5870_v18, %v17902_v28  ;;  %v5885_v47 = vcombine.high %v5877_v9, %v5877_v9  ;;  %v5893_v48 = vrot.slane %v5877_v9, %v17902_v28  ;;  %v5604_v45 = vsel %vm5559_vm15, %v5555_v6, 4286644096 }
 0x3e8   : > { %v5542_v35 = vmax.f32 %v5510_v25, 0.0  ;;  %v18214_v34 = vadd.f32 %v18122_v29, %v18079_v51  ;;  %v6953_v10 = vunpack.c.l.b16 %v6537_v20  ;;  %v18219_v52 = vmax.bf16 %v5607_v13, %v5604_v45 }
 0x3e9   : > { %v5886_v53 = vcombine.high %v5884_v27, %v5884_v27  ;;  %v5900_v1 = vrot.slane %v5884_v27, %v17902_v28  ;;  %v5907_v57 = vrot.slane %v5885_v47, %v17902_v28  ;;  %v5915_v23 = vcombine.high %v5893_v48, %v5893_v48 }
 0x3ea   : > { %v6539_v39 = vsel %vm6017_vm13, %v5893_v48, 4286644096  ;;  %v18221_v63 = vpack.c.bf16 %v5542_v35, %v5541_v24  ;;  %v7036_v43 = vpack.c.b16 %v6953_v10, %v7013_v19  ;;  %v5919_v21 = vcombine.high %v18219_v52, %v18219_v52 }
 0x3eb   : > { %v5914_v50 = vrot.slane %v5886_v53, %v17902_v28  ;;  %v5916_v54 = vcombine.high %v5900_v1, %v5900_v1  ;;  %v5917_v0 = vcombine.high %v5907_v57, %v5907_v57  ;;  %v6541_v51 = vunpack.i.l.bf16 %v6539_v39 }
 0x3ec   : > { %v6542_v29 = vunpack.i.h.bf16 %v6539_v39  ;;  %v6552_v42 = vsel %vm6017_vm13, %v5907_v57, 4286644096  ;;  %v6565_v61 = vsel %vm6017_vm13, %v5915_v23, 4286644096  ;;  %v7052_v31 = vsel %vm16291_vm9, 0, %v7036_v43 }
 0x3ed   : > { %v5918_v8 = vcombine.high %v5914_v50, %v5914_v50  ;;  %v6554_v15 = vunpack.i.l.bf16 %v6552_v42  ;;  %v6555_v40 = vunpack.i.h.bf16 %v6552_v42  ;;  %v7063_v58 = vsel %vm17987_vm1, %v7052_v31, 0 }
 0x3ee   : > { %v6543_v26 = vmax.f32 %v6541_v51, %v6542_v29  ;;  %v6567_v46 = vunpack.i.l.bf16 %v6565_v61  ;;  %v6568_v17 = vunpack.i.h.bf16 %v6565_v61  ;;  %v13741_v33 = vcombine.low %v7063_v58, %v7063_v58 }
 0x3ef   : > { %v13742_v14 = vcombine.high %v7063_v58, %v7063_v58  ;;  %v6556_v5 = vmax.f32 %v6554_v15, %v6555_v40  ;;  %v6578_v44 = vsel %vm6017_vm13, %v5917_v0, 4286644096  ;;  %v6591_v22 = vsel %vm6017_vm13, %v5900_v1, 4286644096 }
 0x3f0   : > { %v6544_v36 = vrot.slane %v6543_v26, 4  ;;  %v6569_v12 = vmax.f32 %v6567_v46, %v6568_v17  ;;  %v6580_v7 = vunpack.i.l.bf16 %v6578_v44  ;;  %v6581_v55 = vunpack.i.h.bf16 %v6578_v44  ;;  %7133 = vst.msk [vmem:[#allocation3 + $0x28] sm:$0xf] %vm7124_vm14, %v13741_v33 }
 0x3f1   : > { %7134 = vst.msk [vmem:[#allocation3 + $0x2c] sm:$0x1] %vm6017_vm13, %v13742_v14  ;;  %v6557_v59 = vrot.slane %v6556_v5, 4  ;;  %v6604_v41 = vsel %vm6017_vm13, %v5914_v50, 4286644096  ;;  %v6593_v24 = vunpack.i.l.bf16 %v6591_v22  ;;  %v6594_v37 = vunpack.i.h.bf16 %v6591_v22 }
 0x3f2   : > { %v6545_v2 = vmax.f32 %v6543_v26, %v6544_v36  ;;  %v6570_v38 = vrot.slane %v6569_v12, 4  ;;  %v6582_v4 = vmax.f32 %v6580_v7, %v6581_v55  ;;  %v6606_v18 = vunpack.i.l.bf16 %v6604_v41 }
 0x3f3   : > { %v6558_v56 = vmax.f32 %v6556_v5, %v6557_v59  ;;  %v6607_v9 = vunpack.i.h.bf16 %v6604_v41  ;;  %v6617_v20 = vsel %vm6017_vm13, %v5916_v54, 4286644096  ;;  %v6595_v27 = vmax.f32 %v6593_v24, %v6594_v37 }
 0x3f4   : > { %v6546_v13 = vrot.slane %v6545_v2, 2  ;;  %v6571_v6 = vmax.f32 %v6569_v12, %v6570_v38  ;;  %v6583_v25 = vrot.slane %v6582_v4, 4  ;;  %v6619_v48 = vunpack.i.l.bf16 %v6617_v20 }
 0x3f5   : > { %v6559_v19 = vrot.slane %v6558_v56, 2  ;;  %v6608_v47 = vmax.f32 %v6606_v18, %v6607_v9  ;;  %v6620_v53 = vunpack.i.h.bf16 %v6617_v20  ;;  %v6596_v57 = vrot.slane %v6595_v27, 4 }
 0x3f6   : > { %v6547_v45 = vmax.f32 %v6545_v2, %v6546_v13  ;;  %v6572_v35 = vrot.slane %v6571_v6, 2  ;;  %v6584_v10 = vmax.f32 %v6582_v4, %v6583_v25  ;;  %v6630_v39 = vsel %vm6017_vm13, %v5918_v8, 4286644096 }
 0x3f7   : > { %v6560_v1 = vmax.f32 %v6558_v56, %v6559_v19  ;;  %v6609_v23 = vrot.slane %v6608_v47, 4  ;;  %v6621_v51 = vmax.f32 %v6619_v48, %v6620_v53  ;;  %v6597_v42 = vmax.f32 %v6595_v27, %v6596_v57 }
 0x3f8   : > { %v6548_v43 = vrot.slane %v6547_v45, 1  ;;  %v6573_v50 = vmax.f32 %v6571_v6, %v6572_v35  ;;  %v6585_v0 = vrot.slane %v6584_v10, 2  ;;  %v6632_v61 = vunpack.i.l.bf16 %v6630_v39 }
 0x3f9   : > { %v6561_v29 = vrot.slane %v6560_v1, 1  ;;  %v6610_v54 = vmax.f32 %v6608_v47, %v6609_v23  ;;  %v6622_v58 = vrot.slane %v6621_v51, 4  ;;  %v6598_v46 = vrot.slane %v6597_v42, 2 }
 0x3fa   : > { %v6549_v31 = vmax.f32 %v6547_v45, %v6548_v43  ;;  %v6574_v15 = vrot.slane %v6573_v50, 1  ;;  %v6586_v40 = vmax.f32 %v6584_v10, %v6585_v0  ;;  %v6633_v33 = vunpack.i.h.bf16 %v6630_v39 }
 0x3fb   : > { %v6562_v26 = vmax.f32 %v6560_v1, %v6561_v29  ;;  %v6611_v17 = vrot.slane %v6610_v54, 2  ;;  %v6623_v8 = vmax.f32 %v6621_v51, %v6622_v58  ;;  %v6599_v12 = vmax.f32 %v6597_v42, %v6598_v46 }
 0x3fc   : > { %v6550_v14 = vpack.i.bf16 %v6549_v31, %v6549_v31  ;;  %v6575_v5 = vmax.f32 %v6573_v50, %v6574_v15  ;;  %v6587_v44 = vrot.slane %v6586_v40, 1  ;;  %v6634_v55 = vmax.f32 %v6632_v61, %v6633_v33 }
 0x3fd   : > { %v6563_v36 = vpack.i.bf16 %v6562_v26, %v6562_v26  ;;  %v6612_v7 = vmax.f32 %v6610_v54, %v6611_v17  ;;  %v6624_v41 = vrot.slane %v6623_v8, 2  ;;  %v6600_v38 = vrot.slane %v6599_v12, 1 }
 0x3fe   : > { %v6576_v59 = vpack.i.bf16 %v6575_v5, %v6575_v5  ;;  %v6588_v22 = vmax.f32 %v6586_v40, %v6587_v44  ;;  %v6954_v2 = vunpack.c.l.b16 %v6550_v14  ;;  %v6635_v24 = vrot.slane %v6634_v55, 4 }
 0x3ff   : > { %v6613_v4 = vrot.slane %v6612_v7, 1  ;;  %v6955_v56 = vunpack.c.l.b16 %v6563_v36  ;;  %v6625_v18 = vmax.f32 %v6623_v8, %v6624_v41  ;;  %v5926_v13 = vrot.slane %v18219_v52, %v17902_v28 }
 0x400   : > { %v6589_v37 = vpack.i.bf16 %v6588_v22, %v6588_v22  ;;  %v6956_v9 = vunpack.c.l.b16 %v6576_v59  ;;  %v6601_v6 = vmax.f32 %v6599_v12, %v6600_v38  ;;  %v6636_v20 = vmax.f32 %v6634_v55, %v6635_v24 }
 0x401   : > { %v6614_v25 = vmax.f32 %v6612_v7, %v6613_v4  ;;  %v7014_v19 = vsel %vm6978_vm2, %v6955_v56, %v6954_v2  ;;  %v6626_v27 = vrot.slane %v6625_v18, 1  ;;  %v5933_v45 = vrot.slane %v5919_v21, %v17902_v28 }
 0x402   : > { %v6957_v47 = vunpack.c.l.b16 %v6589_v37  ;;  %v7015_v48 = vsel %vm6980_vm3, %v6956_v9, %v7014_v19  ;;  %v6602_v35 = vpack.i.bf16 %v6601_v6, %v6601_v6  ;;  %v6637_v53 = vrot.slane %v6636_v20, 2 }
 0x403   : > { %v6615_v10 = vpack.i.bf16 %v6614_v25, %v6614_v25  ;;  %v5934_v1 = vcombine.high %v5926_v13, %v5926_v13  ;;  %v6627_v57 = vmax.f32 %v6625_v18, %v6626_v27  ;;  %v5935_v39 = vcombine.high %v5933_v45, %v5933_v45 }
 0x404   : > { %v7016_v23 = vsel %vm6982_vm4, %v6957_v47, %v7015_v48  ;;  %v5942_v43 = vrot.slane %v5926_v13, %v17902_v28  ;;  %v6638_v50 = vmax.f32 %v6636_v20, %v6637_v53  ;;  %v6958_v0 = vunpack.c.l.b16 %v6602_v35 }
 0x405   : > { %v6959_v51 = vunpack.c.l.b16 %v6615_v10  ;;  %v5949_v29 = vrot.slane %v5933_v45, %v17902_v28  ;;  %v6628_v42 = vpack.i.bf16 %v6627_v57, %v6627_v57  ;;  %v5956_v54 = vrot.slane %v5934_v1, %v17902_v28 }
 0x406   : > { %v18252_v52 = vrot.slane %v5935_v39, %v17902_v28  ;;  %v5964_v21 = vcombine.high %v5942_v43, %v5942_v43  ;;  %v6639_v61 = vrot.slane %v6638_v50, 1  ;;  %v7017_v31 = vsel %vm6984_vm5, %v6958_v0, %v7016_v23 }
 0x407   : > { %v5965_v15 = vcombine.high %v5949_v29, %v5949_v29  ;;  %v6643_v40 = vsel %vm6017_vm13, %v5942_v43, 4286644096  ;;  %v6960_v58 = vunpack.c.l.b16 %v6628_v42  ;;  %v7018_v26 = vsel %vm6986_vm6, %v6959_v51, %v7017_v31 }
 0x408   : > { %v5966_v46 = vcombine.high %v5956_v54, %v5956_v54  ;;  %v5967_v17 = vcombine.high %v18252_v52, %v18252_v52  ;;  %v6640_v33 = vmax.f32 %v6638_v50, %v6639_v61  ;;  %v6645_v14 = vunpack.i.l.bf16 %v6643_v40 }
 0x409   : > { %v6646_v5 = vunpack.i.h.bf16 %v6643_v40  ;;  %v6656_v44 = vsel %vm6017_vm13, %v5956_v54, 4286644096  ;;  %v7019_v8 = vsel %vm6988_vm7, %v6960_v58, %v7018_v26  ;;  %v6669_v7 = vsel %vm6017_vm13, %v5964_v21, 4286644096 }
 0x40a   : > { %v6658_v36 = vunpack.i.l.bf16 %v6656_v44  ;;  %v6659_v12 = vunpack.i.h.bf16 %v6656_v44  ;;  %v6641_v55 = vpack.i.bf16 %v6640_v33, %v6640_v33  ;;  %v6671_v22 = vunpack.i.l.bf16 %v6669_v7 }
 0x40b   : > { %v6647_v59 = vmax.f32 %v6645_v14, %v6646_v5  ;;  %v6672_v41 = vunpack.i.h.bf16 %v6669_v7  ;;  %v6682_v38 = vsel %vm6017_vm13, %v5966_v46, 4286644096  ;;  %v6695_v4 = vsel %vm6017_vm13, %v5949_v29, 4286644096 }
 0x40c   : > { %v6660_v2 = vmax.f32 %v6658_v36, %v6659_v12  ;;  %v6708_v24 = vsel %vm6017_vm13, %v18252_v52, 4286644096  ;;  %v6961_v56 = vunpack.c.l.b16 %v6641_v55  ;;  %v6684_v9 = vunpack.i.l.bf16 %v6682_v38 }
 0x40d   : > { %v6648_v37 = vrot.slane %v6647_v59, 4  ;;  %v6673_v18 = vmax.f32 %v6671_v22, %v6672_v41  ;;  %v6685_v6 = vunpack.i.h.bf16 %v6682_v38  ;;  %v6697_v25 = vunpack.i.l.bf16 %v6695_v4 }
 0x40e   : > { %v6661_v13 = vrot.slane %v6660_v2, 4  ;;  %v6698_v20 = vunpack.i.h.bf16 %v6695_v4  ;;  %v7037_v19 = vpack.c.b16 %v6961_v56, %v7019_v8  ;;  %v6710_v48 = vunpack.i.l.bf16 %v6708_v24 }
 0x40f   : > { %v6649_v27 = vmax.f32 %v6647_v59, %v6648_v37  ;;  %v6674_v47 = vrot.slane %v6673_v18, 4  ;;  %v6686_v35 = vmax.f32 %v6684_v9, %v6685_v6  ;;  %v6711_v53 = vunpack.i.h.bf16 %v6708_v24 }
 0x410   : > { %v6662_v45 = vmax.f32 %v6660_v2, %v6661_v13  ;;  %v6699_v10 = vmax.f32 %v6697_v25, %v6698_v20  ;;  %v7053_v1 = vsel %vm16291_vm9, 0, %v7037_v19  ;;  %v6721_v39 = vsel %vm6017_vm13, %v5965_v15, 4286644096 }
 0x411   : > { %v6650_v57 = vrot.slane %v6649_v27, 2  ;;  %v6675_v23 = vmax.f32 %v6673_v18, %v6674_v47  ;;  %v7064_v43 = vsel %vm17987_vm1, %v7053_v1, 0  ;;  %v6687_v0 = vrot.slane %v6686_v35, 4 }
 0x412   : > { %v6663_v50 = vrot.slane %v6662_v45, 2  ;;  %v6700_v51 = vrot.slane %v6699_v10, 4  ;;  %v13743_v29 = vcombine.low %v7064_v43, %v7064_v43  ;;  %v13744_v42 = vcombine.high %v7064_v43, %v7064_v43 }
 0x413   : > { %v6651_v54 = vmax.f32 %v6649_v27, %v6650_v57  ;;  %v6676_v52 = vrot.slane %v6675_v23, 2  ;;  %v6688_v61 = vmax.f32 %v6686_v35, %v6687_v0  ;;  %v6712_v40 = vmax.f32 %v6710_v48, %v6711_v53  ;;  %v18274_v48 = vld [vmem:[#allocation3] sm:$0xf] }
 0x414   : > { %v6664_v21 = vmax.f32 %v6662_v45, %v6663_v50  ;;  %v6701_v31 = vmax.f32 %v6699_v10, %v6700_v51  ;;  %7135 = vst.msk [vmem:[#allocation3 + $0x30] sm:$0xf] %vm7124_vm14, %v13743_v29  ;;  %v6723_v26 = vunpack.i.l.bf16 %v6721_v39  ;;  %v6724_v46 = vunpack.i.h.bf16 %v6721_v39 }
 0x415   : > { %7136 = vst.msk [vmem:[#allocation3 + $0x34] sm:$0x1] %vm6017_vm13, %v13744_v42  ;;  %v6652_v58 = vrot.slane %v6651_v54, 1  ;;  %v6677_v15 = vmax.f32 %v6675_v23, %v6676_v52  ;;  %v6689_v14 = vrot.slane %v6688_v61, 2  ;;  %v6713_v44 = vrot.slane %v6712_v40, 4 }
 0x416   : > { %v6665_v33 = vrot.slane %v6664_v21, 1  ;;  %v6702_v5 = vrot.slane %v6701_v31, 2  ;;  %v6725_v12 = vmax.f32 %v6723_v26, %v6724_v46  ;;  %v6734_v7 = vsel %vm6017_vm13, %v5967_v17, 4286644096  ;;  %v18288_v26 = vld [vmem:[#allocation3 + $0x8] sm:$0xf] }
 0x417   : > { %v6653_v8 = vmax.f32 %v6651_v54, %v6652_v58  ;;  %v6678_v36 = vrot.slane %v6677_v15, 1  ;;  %v6690_v59 = vmax.f32 %v6688_v61, %v6689_v14  ;;  %v6714_v41 = vmax.f32 %v6712_v40, %v6713_v44 }
 0x418   : > { %v6666_v55 = vmax.f32 %v6664_v21, %v6665_v33  ;;  %v6703_v22 = vmax.f32 %v6701_v31, %v6702_v5  ;;  %v6726_v4 = vrot.slane %v6725_v12, 4  ;;  %v6736_v24 = vunpack.i.l.bf16 %v6734_v7  ;;  %v18284_v31 = vld [vmem:[#allocation3 + $0x4] sm:$0x1] }
 0x419   : > { %v6654_v2 = vpack.i.bf16 %v6653_v8, %v6653_v8  ;;  %v6679_v38 = vmax.f32 %v6677_v15, %v6678_v36  ;;  %v6691_v37 = vrot.slane %v6690_v59, 1  ;;  %v6715_v9 = vrot.slane %v6714_v41, 2 }
 0x41a   : > { %v6667_v56 = vpack.i.bf16 %v6666_v55, %v6666_v55  ;;  %v6704_v18 = vrot.slane %v6703_v22, 1  ;;  %v6727_v6 = vmax.f32 %v6725_v12, %v6726_v4  ;;  %v6737_v25 = vunpack.i.h.bf16 %v6734_v7 }
 0x41b   : > { %v6680_v13 = vpack.i.bf16 %v6679_v38, %v6679_v38  ;;  %v6962_v20 = vunpack.c.l.b16 %v6654_v2  ;;  %v6692_v19 = vmax.f32 %v6690_v59, %v6691_v37  ;;  %v6716_v47 = vmax.f32 %v6714_v41, %v6715_v9  ;;  %v18299_v38 = vld [vmem:[#allocation3 + $0xc] sm:$0x1] }
 0x41c   : > { %v6705_v27 = vmax.f32 %v6703_v22, %v6704_v18  ;;  %v6963_v17 = vunpack.c.l.b16 %v6667_v56  ;;  %v6728_v45 = vrot.slane %v6727_v6, 2  ;;  %v6738_v35 = vmax.f32 %v6736_v24, %v6737_v25 }
 0x41d   : > { %v6964_v10 = vunpack.c.l.b16 %v6680_v13  ;;  %v5614_v53 = vsel %vm5559_vm15, %v18221_v63, 4286644096  ;;  %v6693_v1 = vpack.i.bf16 %v6692_v19, %v6692_v19  ;;  %v6717_v23 = vrot.slane %v6716_v47, 1 }
 0x41e   : > { %v6706_v57 = vpack.i.bf16 %v6705_v27, %v6705_v27  ;;  %v7020_v39 = vsel %vm6978_vm2, %v6963_v17, %v6962_v20  ;;  %v6729_v43 = vmax.f32 %v6727_v6, %v6728_v45  ;;  %v6739_v50 = vrot.slane %v6738_v35, 4 }
 0x41f   : > { %v7021_v0 = vsel %vm6980_vm3, %v6964_v10, %v7020_v39  ;;  %v5540_v51 = vmax.f32 %v18214_v34, 0.0  ;;  %v6718_v29 = vmax.f32 %v6716_v47, %v6717_v23  ;;  %v6965_v42 = vunpack.c.l.b16 %v6693_v1 }
 0x420   : > { %v6966_v54 = vunpack.c.l.b16 %v6706_v57  ;;  %v7167_v52 = vshrl.u32 %v18274_v48, 16  ;;  %v6730_v21 = vrot.slane %v6729_v43, 1  ;;  %v6740_v61 = vmax.f32 %v6738_v35, %v6739_v50 }
 0x421   : > { %v5557_v63 = vpack.c.bf16 %v5540_v51, %v5539_v49  ;;  %v7170_v40 = vshll.u32 %v18274_v48, 16  ;;  %v6719_v58 = vpack.i.bf16 %v6718_v29, %v6718_v29  ;;  %v7022_v15 = vsel %vm6982_vm4, %v6965_v42, %v7021_v0 }
 0x422   : > { %v7169_v34 = vrot.slane %v7167_v52, 4  ;;  %v7176_v46 = vshll.u32 %v18284_v31, 16  ;;  %v6731_v33 = vmax.f32 %v6729_v43, %v6730_v21  ;;  %v6741_v14 = vrot.slane %v6740_v61, 2 }
 0x423   : > { %v7023_v5 = vsel %vm6984_vm5, %v6966_v54, %v7022_v15  ;;  %v5611_v44 = vsel %vm5559_vm15, %v5557_v63, 4286644096  ;;  %v6967_v11 = vunpack.c.l.b16 %v6719_v58  ;;  %v7172_v8 = vrot.slane %v7170_v40, 5 }
 0x424   : > { %v5616_v49 = vmax.bf16 %v5614_v53, %v5611_v44  ;;  %v18293_v36 = vrot.slane %v7176_v46, 5  ;;  %v6732_v12 = vpack.i.bf16 %v6731_v33, %v6731_v33  ;;  %v6742_v7 = vmax.f32 %v6740_v61, %v6741_v14 }
 0x425   : > { %v7181_v55 = vshrl.u32 %v18288_v26, 16  ;;  %v7184_v59 = vshll.u32 %v18288_v26, 16  ;;  %v7024_v22 = vsel %vm6986_vm6, %v6967_v11, %v7023_v5  ;;  %v7173_v4 = vor.u32 %v7172_v8, %v7169_v34 }
 0x426   : > { %v5968_v41 = vcombine.high %v5616_v49, %v5616_v49  ;;  %v5975_v2 = vrot.slane %v5616_v49, %v17902_v28  ;;  %v6743_v24 = vrot.slane %v6742_v7, 1  ;;  %v6968_v56 = vunpack.c.l.b16 %v6732_v12 }
 0x427   : > { %v7183_v37 = vrot.slane %v7181_v55, 4  ;;  %v7186_v18 = vrot.slane %v7184_v59, 5  ;;  %v18303_v25 = vrot.slane %v7173_v4, 4  ;;  %v7190_v47 = vshll.u32 %v18299_v38, 16 }
 0x428   : > { %v5982_v9 = vrot.slane %v5968_v41, %v17902_v28  ;;  %v5983_v13 = vcombine.high %v5975_v2, %v5975_v2  ;;  %v5991_v6 = vrot.slane %v5975_v2, %v17902_v28  ;;  %v6744_v20 = vmax.f32 %v6742_v7, %v6743_v24 }
 0x429   : > { %v7025_v19 = vsel %vm6988_vm7, %v6968_v56, %v7024_v22  ;;  %v7187_v27 = vor.u32 %v7186_v18, %v7183_v37  ;;  %v7179_v57 = vsel %vm16285_vm8, %v18303_v25, %v18293_v36 }
 0x42a   : > { %v5984_v17 = vcombine.high %v5982_v9, %v5982_v9  ;;  %v5998_v45 = vrot.slane %v5982_v9, %v17902_v28  ;;  %v6005_v35 = vrot.slane %v5983_v13, %v17902_v28  ;;  %v6013_v10 = vcombine.high %v5991_v6, %v5991_v6 }
 0x42b   : > { %v6745_v53 = vpack.i.bf16 %v6744_v20, %v6744_v20  ;;  %v6747_v1 = vsel %vm6017_vm13, %v5991_v6, 4286644096  ;;  %v18314_v23 = vrot.slane %v7187_v27, 4 }
 0x42c   : > { %v6012_v39 = vrot.slane %v5984_v17, %v17902_v28  ;;  %v6014_v43 = vcombine.high %v5998_v45, %v5998_v45  ;;  %v6015_v50 = vcombine.high %v6005_v35, %v6005_v35  ;;  %v6749_v0 = vunpack.i.l.bf16 %v6747_v1 }
 0x42d   : > { %v6969_v51 = vunpack.c.l.b16 %v6745_v53  ;;  %v6750_v29 = vunpack.i.h.bf16 %v6747_v1  ;;  %v6760_v42 = vsel %vm6017_vm13, %v6005_v35, 4286644096  ;;  %v6773_v54 = vsel %vm6017_vm13, %v6013_v10, 4286644096 }
 0x42e   : > { %v6016_v52 = vcombine.high %v6012_v39, %v6012_v39  ;;  %v6762_v21 = vunpack.i.l.bf16 %v6760_v42  ;;  %v6763_v61 = vunpack.i.h.bf16 %v6760_v42  ;;  %v6775_v63 = vunpack.i.l.bf16 %v6773_v54 }
 0x42f   : > { %v7038_v40 = vpack.c.b16 %v6969_v51, %v7025_v19  ;;  %v6751_v58 = vmax.f32 %v6749_v0, %v6750_v29  ;;  %v6776_v15 = vunpack.i.h.bf16 %v6773_v54  ;;  %v6786_v34 = vsel %vm6017_vm13, %v6015_v50, 4286644096 }
 0x430   : > { %v6764_v46 = vmax.f32 %v6762_v21, %v6763_v61  ;;  %v6788_v33 = vunpack.i.l.bf16 %v6786_v34  ;;  %v6789_v14 = vunpack.i.h.bf16 %v6786_v34  ;;  %v6799_v5 = vsel %vm6017_vm13, %v5998_v45, 4286644096 }
 0x431   : > { %v7054_v44 = vsel %vm16291_vm9, 0, %v7038_v40  ;;  %v6752_v11 = vrot.slane %v6751_v58, 4  ;;  %v6777_v49 = vmax.f32 %v6775_v63, %v6776_v15  ;;  %v6801_v8 = vunpack.i.l.bf16 %v6799_v5 }
 0x432   : > { %v7065_v12 = vsel %vm17987_vm1, %v7054_v44, 0  ;;  %v6765_v7 = vrot.slane %v6764_v46, 4  ;;  %v6790_v55 = vmax.f32 %v6788_v33, %v6789_v14  ;;  %v6802_v59 = vunpack.i.h.bf16 %v6799_v5 }
 0x433   : > { %v13745_v22 = vcombine.low %v7065_v12, %v7065_v12  ;;  %v13746_v41 = vcombine.high %v7065_v12, %v7065_v12  ;;  %v6753_v2 = vmax.f32 %v6751_v58, %v6752_v11  ;;  %v6778_v4 = vrot.slane %v6777_v49, 4 }
 0x434   : > { %v6766_v24 = vmax.f32 %v6764_v46, %v6765_v7  ;;  %v6791_v56 = vrot.slane %v6790_v55, 4  ;;  %v6803_v37 = vmax.f32 %v6801_v8, %v6802_v59  ;;  %v6812_v18 = vsel %vm6017_vm13, %v6012_v39, 4286644096 }
 0x435   : > { %7137 = vst.msk [vmem:[#allocation3 + $0x38] sm:$0xf] %vm7124_vm14, %v13745_v22  ;;  %v6754_v9 = vrot.slane %v6753_v2, 2  ;;  %v6779_v13 = vmax.f32 %v6777_v49, %v6778_v4  ;;  %v6814_v6 = vunpack.i.l.bf16 %v6812_v18  ;;  %v6815_v20 = vunpack.i.h.bf16 %v6812_v18 }
 0x436   : > { %7138 = vst.msk [vmem:[#allocation3 + $0x3c] sm:$0x1] %vm6017_vm13, %v13746_v41  ;;  %v6767_v19 = vrot.slane %v6766_v24, 2  ;;  %v6792_v27 = vmax.f32 %v6790_v55, %v6791_v56  ;;  %v6804_v17 = vrot.slane %v6803_v37, 4  ;;  %v6825_v45 = vsel %vm6017_vm13, %v6014_v43, 4286644096 }
 0x437   : > { %v6755_v35 = vmax.f32 %v6753_v2, %v6754_v9  ;;  %v6780_v10 = vrot.slane %v6779_v13, 2  ;;  %v6816_v53 = vmax.f32 %v6814_v6, %v6815_v20  ;;  %v6827_v1 = vunpack.i.l.bf16 %v6825_v45 }
 0x438   : > { %v6768_v50 = vmax.f32 %v6766_v24, %v6767_v19  ;;  %v6793_v0 = vrot.slane %v6792_v27, 2  ;;  %v6805_v39 = vmax.f32 %v6803_v37, %v6804_v17  ;;  %v6828_v51 = vunpack.i.h.bf16 %v6825_v45 }
 0x439   : > { %v6756_v29 = vrot.slane %v6755_v35, 1  ;;  %v6781_v42 = vmax.f32 %v6779_v13, %v6780_v10  ;;  %v6817_v54 = vrot.slane %v6816_v53, 4  ;;  %v6838_v21 = vsel %vm6017_vm13, %v6016_v52, 4286644096 }
 0x43a   : > { %v6769_v61 = vrot.slane %v6768_v50, 1  ;;  %v6794_v63 = vmax.f32 %v6792_v27, %v6793_v0  ;;  %v6806_v40 = vrot.slane %v6805_v39, 2  ;;  %v6829_v58 = vmax.f32 %v6827_v1, %v6828_v51 }
 0x43b   : > { %v6757_v15 = vmax.f32 %v6755_v35, %v6756_v29  ;;  %v6782_v34 = vrot.slane %v6781_v42, 1  ;;  %v6818_v43 = vmax.f32 %v6816_v53, %v6817_v54  ;;  %v6840_v46 = vunpack.i.l.bf16 %v6838_v21  ;;  %v18345_v29 = vld [vmem:[#allocation3 + $0x18] sm:$0xf] }
 0x43c   : > { %v6770_v33 = vmax.f32 %v6768_v50, %v6769_v61  ;;  %v6795_v14 = vrot.slane %v6794_v63, 1  ;;  %v6807_v5 = vmax.f32 %v6805_v39, %v6806_v40  ;;  %v6830_v44 = vrot.slane %v6829_v58, 4  ;;  %v18337_v50 = vld [vmem:[#allocation3 + $0x10] sm:$0xf] }
 0x43d   : > { %v6758_v11 = vpack.i.bf16 %v6757_v15, %v6757_v15  ;;  %v6783_v49 = vmax.f32 %v6781_v42, %v6782_v34  ;;  %v6819_v8 = vrot.slane %v6818_v43, 2  ;;  %v6841_v12 = vunpack.i.h.bf16 %v6838_v21  ;;  %v18347_v42 = vld [vmem:[#allocation3 + $0x14] sm:$0x1]  ;;  %v18353_v34 = vld [vmem:[#allocation3 + $0x1c] sm:$0x1] }
 0x43e   : > { %v6771_v7 = vpack.i.bf16 %v6770_v33, %v6770_v33  ;;  %v6796_v55 = vmax.f32 %v6794_v63, %v6795_v14  ;;  %v6808_v59 = vrot.slane %v6807_v5, 1  ;;  %v6831_v52 = vmax.f32 %v6829_v58, %v6830_v44  ;;  %v18358_v14 = vld [vmem:[#allocation3 + $0x20] sm:$0xf] }
 0x43f   : > { %v6784_v22 = vpack.i.bf16 %v6783_v49, %v6783_v49  ;;  %v6820_v41 = vmax.f32 %v6818_v43, %v6819_v8  ;;  %v6842_v2 = vmax.f32 %v6840_v46, %v6841_v12  ;;  %v6970_v4 = vunpack.c.l.b16 %v6758_v11 }
 0x440   : > { %v6797_v24 = vpack.i.bf16 %v6796_v55, %v6796_v55  ;;  %v6809_v56 = vmax.f32 %v6807_v5, %v6808_v59  ;;  %v6832_v37 = vrot.slane %v6831_v52, 2  ;;  %v6971_v18 = vunpack.c.l.b16 %v6771_v7  ;;  %v18362_v55 = vld [vmem:[#allocation3 + $0x24] sm:$0x1] }
 0x441   : > { %v6821_v9 = vrot.slane %v6820_v41, 1  ;;  %v6843_v13 = vrot.slane %v6842_v2, 4  ;;  %v6972_v6 = vunpack.c.l.b16 %v6784_v22  ;;  %v7192_v20 = vrot.slane %v7190_v47, 5 }
 0x442   : > { %v6810_v19 = vpack.i.bf16 %v6809_v56, %v6809_v56  ;;  %v6833_v27 = vmax.f32 %v6831_v52, %v6832_v37  ;;  %v6973_v17 = vunpack.c.l.b16 %v6797_v24  ;;  %v7026_v45 = vsel %vm6978_vm2, %v6971_v18, %v6970_v4  ;;  %v18364_v52 = vld [vmem:[#allocation3 + $0x28] sm:$0xf]  ;;  %v18368_v56 = vld [vmem:[#allocation3 + $0x2c] sm:$0x1] }
 0x443   : > { %v6822_v35 = vmax.f32 %v6820_v41, %v6821_v9  ;;  %v6844_v10 = vmax.f32 %v6842_v2, %v6843_v13  ;;  %v7027_v53 = vsel %vm6980_vm3, %v6972_v6, %v7026_v45  ;;  %v7193_v1 = vsel %vm16285_vm8, %v18314_v23, %v7192_v20  ;;  %v18372_v6 = vld [vmem:[#allocation3 + $0x30] sm:$0xf] }
 0x444   : > { %v6834_v0 = vrot.slane %v6833_v27, 1  ;;  %v6974_v39 = vunpack.c.l.b16 %v6810_v19  ;;  %v7028_v51 = vsel %vm6982_vm4, %v6973_v17, %v7027_v53  ;;  %v13753_v47 = vcombine.low %v7179_v57, %v7193_v1 }
 0x445   : > { %v6823_v54 = vpack.i.bf16 %v6822_v35, %v6822_v35  ;;  %v6845_v21 = vrot.slane %v6844_v10, 2  ;;  %v7195_v63 = vshrl.u32 %v18337_v50, 16  ;;  %v7198_v40 = vshll.u32 %v18337_v50, 16 }
 0x446   : > { %v6835_v61 = vmax.f32 %v6833_v27, %v6834_v0  ;;  %v7029_v23 = vsel %vm6984_vm5, %v6974_v39, %v7028_v51  ;;  %14916 = vmatprep.mubr.msk.bf16.mxu1 %vm5559_vm15, %v13753_v47  ;;  %v7204_v36 = vshll.u32 %v18347_v42, 16  ;;  %v7209_v25 = vshrl.u32 %v18345_v29, 16  ;;  %v18381_v51 = vld [vmem:[#allocation3 + $0x38] sm:$0xf] }
 0x447   : > { %v6846_v58 = vmax.f32 %v6844_v10, %v6845_v21  ;;  %v6975_v15 = vunpack.c.l.b16 %v6823_v54  ;;  %v7197_v43 = vrot.slane %v7195_v63, 4  ;;  %v7200_v46 = vrot.slane %v7198_v40, 5  ;;  %v15482_v63 = vld [vmem:[%s20083_s3 + $0x8] sm:$0xff]  }
 0x448   : > { %v6836_v57 = vpack.i.bf16 %v6835_v61, %v6835_v61  ;;  %v7212_v33 = vshll.u32 %v18345_v29, 16  ;;  %v7211_v11 = vrot.slane %v7209_v25, 4  ;;  %v7218_v7 = vshll.u32 %v18353_v34, 16  ;;  %v18387_v40 = vld [vmem:[#allocation3 + $0x34] sm:$0x1] }
 0x449   : > { %v6847_v5 = vrot.slane %v6846_v58, 1  ;;  %v7030_v44 = vsel %vm6986_vm6, %v6975_v15, %v7029_v23  ;;  %v7201_v8 = vor.u32 %v7200_v46, %v7197_v43  ;;  %v7223_v22 = vshrl.u32 %v18358_v14, 16  ;;  %v18393_v46 = vld [vmem:[#allocation3 + $0x3c] sm:$0x1] }
 0x44a   : > { %v6976_v49 = vunpack.c.l.b16 %v6836_v57  ;;  %v7214_v12 = vrot.slane %v7212_v33, 5  ;;  %v7206_v4 = vrot.slane %v7204_v36, 5  ;;  %v7226_v9 = vshll.u32 %v18358_v14, 16 }
 0x44b   : > { %v6848_v59 = vmax.f32 %v6846_v58, %v6847_v5  ;;  %v7202_v2 = vrot.slane %v7201_v8, 4  ;;  %v7225_v18 = vrot.slane %v7223_v22, 4  ;;  %v7232_v13 = vshll.u32 %v18362_v55, 16 }
 0x44c   : > { %v7031_v41 = vsel %vm6988_vm7, %v6976_v49, %v7030_v44  ;;  %v7215_v24 = vor.u32 %v7214_v12, %v7211_v11  ;;  %v7220_v19 = vrot.slane %v7218_v7, 5  ;;  %v7237_v27 = vshrl.u32 %v18364_v52, 16  ;;  %v16063_v49 = vld [vmem:[%s20083_s3] sm:$0xff]  }
 0x44d   : > { %v6849_v37 = vpack.i.bf16 %v6848_v59, %v6848_v59  ;;  %v7240_v17 = vshll.u32 %v18364_v52, 16  ;;  %v7207_v35 = vsel %vm16285_vm8, %v7202_v2, %v7206_v4  ;;  %v7228_v10 = vrot.slane %v7226_v9, 5 }
 0x44e   : > { %v7216_v20 = vrot.slane %v7215_v24, 4  ;;  %v7246_v53 = vshll.u32 %v18368_v56, 16  ;;  %v7239_v0 = vrot.slane %v7237_v27, 4  ;;  %v7251_v47 = vshrl.u32 %v18372_v6, 16 }
 0x44f   : > { %v6977_v45 = vunpack.c.l.b16 %v6849_v37  ;;  %v7242_v39 = vrot.slane %v7240_v17, 5  ;;  %v7229_v61 = vor.u32 %v7228_v10, %v7225_v18  ;;  %v7234_v23 = vrot.slane %v7232_v13, 5 }
 0x450   : > { %v7221_v1 = vsel %vm16285_vm8, %v7216_v20, %v7220_v19  ;;  %v7248_v15 = vrot.slane %v7246_v53, 5  ;;  %v7253_v36 = vrot.slane %v7251_v47, 4  ;;  %v7254_v25 = vshll.u32 %v18372_v6, 16  ;;  %v7493_v53 = vld [vmem:[#allocation3] sm:$0xe] }
 0x451   : > { %v7039_v54 = vpack.c.b16 %v6977_v45, %v7031_v41  ;;  %v13754_v21 = vcombine.low %v7207_v35, %v7221_v1  ;;  %v7243_v58 = vor.u32 %v7242_v39, %v7239_v0  ;;  %v7230_v43 = vrot.slane %v7229_v61, 4  ;;  %v7494_v1 = vld [vmem:[#allocation3 + $0x8] sm:$0xe]  ;;  %v15487_v39 = vld [vmem:[%s20083_s3 + $0x28] sm:$0xff]  }
 0x452   : > { %v7265_v33 = vshrl.u32 %v18381_v51, 16  ;;  %v7268_v5 = vshll.u32 %v18381_v51, 16  ;;  %v7256_v8 = vrot.slane %v7254_v25, 5  ;;  %v7260_v12 = vshll.u32 %v18387_v40, 16  ;;  %v7495_v61 = vld [vmem:[#allocation3 + $0x10] sm:$0xe] }
 0x453   : > { %v7055_v57 = vsel %vm16291_vm9, 0, %v7039_v54  ;;  %14917 = vmatmul.mubr.msk.bf16.vlgmr.msra.gmra.mrb[0].mxu1 %vm5559_vm15, %v13754_v21  ;;  %v7244_v11 = vrot.slane %v7243_v58, 4  ;;  %v7235_v22 = vsel %vm16285_vm8, %v7230_v43, %v7234_v23  ;;  %v7274_v37 = vshll.u32 %v18393_v46, 16 }
 0x454   : > { %v7066_v44 = vsel %vm17987_vm1, %v7055_v57, 0  ;;  %14925 = vmatpush3.bf16.msra.mxu1 %v16063_v49  ;;  %v7267_v41 = vrot.slane %v7265_v33, 4  ;;  %v7257_v4 = vor.u32 %v7256_v8, %v7253_v36  ;;  %v7270_v24 = vrot.slane %v7268_v5, 5  ;;  %v7500_v5 = vld [vmem:[#allocation3 + $0x38] sm:$0xe] }
 0x455   : > { %v13747_v7 = vcombine.low %v7066_v44, %v7066_v44  ;;  %v13748_v59 = vcombine.high %v7066_v44, %v7066_v44  ;;  %14926 = vmatprep.subr.bf16.mxu1 %v15482_v63  ;;  %v7249_v2 = vsel %vm16285_vm8, %v7244_v11, %v7248_v15  ;;  %v7262_v20 = vrot.slane %v7260_v12, 5  ;;  %v7497_v15 = vld [vmem:[#allocation3 + $0x20] sm:$0xe]  ;;  %v7499_v49 = vld [vmem:[#allocation3 + $0x30] sm:$0xe] }
 0x456   : > { %v13755_v18 = vcombine.low %v7235_v22, %v7249_v2  ;;  %v7258_v9 = vrot.slane %v7257_v4, 4  ;;  %v7271_v13 = vor.u32 %v7270_v24, %v7267_v41  ;;  %v7276_v27 = vrot.slane %v7274_v37, 5  ;;  %v7795_v22 = vld [vmem:[#allocation3 + $0x10] sm:$0xf]  ;;  %v15492_v41 = vld [vmem:[%s20083_s3 + $0x40] sm:$0xff]  }
 0x457   : > { %7139 = vst.msk [vmem:[#allocation3 + $0x40] sm:$0xf] %vm7124_vm14, %v13747_v7  ;;  %v13763_v10 = vcombine.low %v18274_v48, %v18288_v26  ;;  %v13764_v0 = vcombine.low %v18337_v50, %v18345_v29  ;;  %v13765_v47 = vcombine.low %v18358_v14, %v18364_v52  ;;  %v7519_v54 = vrot.slane %v18284_v31, 5  ;;  %v15489_v50 = vld [vmem:[%s20083_s3 + $0x30] sm:$0xff]   ;;  %v7793_v2 = vld [vmem:[#allocation3 + $0x8] sm:$0xf] }
 0x458   : > { %7140 = vst.msk [vmem:[#allocation3 + $0x44] sm:$0x1] %vm6017_vm13, %v13748_v59  ;;  %14927 = vmatpush3.bf16.msra.mxu1 %v15482_v63  ;;  %14920 = vmatprep.mubr.msk.bf16.mxu1 %vm5559_vm15, %v13755_v18  ;;  %v7272_v19 = vrot.slane %v7271_v13, 4  ;;  %v7263_v17 = vsel %vm16285_vm8, %v7258_v9, %v7262_v20  ;;  %v7523_v48 = vrot.slane %v18299_v38, 5  ;;  %v13773_v26 = vrot.slane %v7493_v53, 9 }
 0x459   : > { %14936 = vmatprep.subr.bf16.mxu1 %v15484_v16  ;;  %v13774_v21 = vrot.slane %v7494_v1, 9  ;;  %v7496_v14 = vld [vmem:[#allocation3 + $0x18] sm:$0xe]  ;;  %v7498_v38 = vld [vmem:[#allocation3 + $0x28] sm:$0xe]  ;;  %v13766_v52 = vcombine.low %v18372_v6, %v18381_v51  ;;  %v7531_v23 = vrot.slane %v18353_v34, 5 }
 0x45a   : > { %v7277_v45 = vsel %vm16285_vm8, %v7272_v19, %v7276_v27  ;;  %v7520_v29 = vsel %vm16646_vm12, %v13773_v26, %v7519_v54  ;;  %v13776_v58 = vrot.slane %v7496_v14, 9  ;;  %v13778_v36 = vrot.slane %v7498_v38, 9  ;;  %v15491_v9 = vld [vmem:[#allocation3 + $0x8] ss:$8 sps:$4 sm:$0xff]   ;;  %v7799_v19 = vld [vmem:[#allocation3 + $0x20] sm:$0xf] }
 0x45b   : > { %v13756_v35 = vcombine.low %v7263_v17, %v7277_v45  ;;  %v7524_v31 = vsel %vm16646_vm12, %v13774_v21, %v7523_v48  ;;  %v7539_v25 = vrot.slane %v18368_v56, 5  ;;  %v7527_v57 = vrot.slane %v18347_v42, 5  ;;  %v15490_v56 = vld [vmem:[%s20083_s3 + $0x38] sm:$0xff]   ;;  %v7803_v27 = vld [vmem:[#allocation3 + $0x30] sm:$0xf] }
 0x45c   : > { %v13785_v63 = vcombine.low %v7520_v29, %v7524_v31  ;;  %v13775_v43 = vrot.slane %v7495_v61, 9  ;;  %v13777_v33 = vrot.slane %v7497_v15, 9  ;;  %v7535_v6 = vrot.slane %v18362_v55, 5  ;;  %v18474_v48 = vld [vmem:[#allocation3 + $0xc] sm:$0x1]  ;;  %v15495_v29 = vld [vmem:[%s20083_s3 + $0x48] sm:$0xff]  }
 0x45d   : > { %14921 = vmatmul.mubr.msk.bf16.gmra.mrb[4].mxu1 %vm5559_vm15, %v13756_v35  ;;  %v7532_v51 = vsel %vm16646_vm12, %v13776_v58, %v7531_v23  ;;  %v7540_v34 = vsel %vm16646_vm12, %v13778_v36, %v7539_v25  ;;  %v13780_v8 = vrot.slane %v7500_v5, 9  ;;  %v7547_v12 = vrot.slane %v18393_v46, 5  ;;  %v7797_v35 = vld [vmem:[#allocation3 + $0x18] sm:$0xf]  ;;  %v15494_v61 = vld [vmem:[#allocation3 + $0x28] ss:$8 sps:$4 sm:$0xff]  }
 0x45e   : > { %14928 = vmatprep.mubr.msk.bf16.mxu1 %vm5559_vm15, %v13763_v10  ;;  %v7528_v44 = vsel %vm16646_vm12, %v13775_v43, %v7527_v57  ;;  %v7536_v42 = vsel %vm16646_vm12, %v13777_v33, %v7535_v6  ;;  %v13779_v7 = vrot.slane %v7499_v49, 9  ;;  %v7543_v59 = vrot.slane %v18387_v40, 5  ;;  %v18472_v10 = vld [vmem:[#allocation3 + $0x14] sm:$0x1]  ;;  %v7807_v57 = vld [vmem:[#allocation3 + $0x40] sm:$0xf] }
 0x45f   : > { %v13786_v11 = vcombine.low %v7528_v44, %v7532_v51  ;;  %v13787_v55 = vcombine.low %v7536_v42, %v7540_v34  ;;  %v7824_v4 = vshrl.u32 %v7795_v22, 16  ;;  %v7827_v46 = vshll.u32 %v7795_v22, 16  ;;  %v18486_v43 = vld [vmem:[%s20083_s3 + $0x50] sm:$0xff]   ;;  %v18488_v33 = vld [vmem:[#allocation3 + $0x24] sm:$0x1] }
 0x460   : > { %v7544_v24 = vsel %vm16646_vm12, %v13779_v7, %v7543_v59  ;;  %v7810_v18 = vshrl.u32 %v7793_v2, 16  ;;  %v7813_v40 = vshll.u32 %v7793_v2, 16  ;;  %v7852_v53 = vshrl.u32 %v7799_v19, 16  ;;  %v7805_v42 = vld [vmem:[#allocation3 + $0x38] sm:$0xf] }
 0x461   : > { %v7826_v13 = vrot.slane %v7824_v4, 4  ;;  %v7829_v20 = vrot.slane %v7827_v46, 5  ;;  %v7855_v1 = vshll.u32 %v7799_v19, 16  ;;  %v7883_v54 = vshll.u32 %v7803_v27, 16  ;;  %v18497_v2 = vld [vmem:[#allocation3 + $0x2c] sm:$0x1] }
 0x462   : > { %v7812_v17 = vrot.slane %v7810_v18, 4  ;;  %v7815_v45 = vrot.slane %v7813_v40, 5  ;;  %v7838_v26 = vshrl.u32 %v7797_v35, 16  ;;  %v7841_v21 = vshll.u32 %v7797_v35, 16 }
 0x463   : > { %v7833_v14 = vshll.u32 %v18472_v10, 16  ;;  %v7854_v23 = vrot.slane %v7852_v53, 4  ;;  %v7819_v58 = vshll.u32 %v18474_v48, 16  ;;  %v7885_v25 = vrot.slane %v7883_v54, 5  ;;  %v18507_v54 = vld [vmem:[#allocation3 + $0x44] sm:$0x1] }
 0x464   : > { %v7816_v31 = vor.u32 %v7815_v45, %v7812_v17  ;;  %v7840_v6 = vrot.slane %v7838_v26, 4  ;;  %v7843_v51 = vrot.slane %v7841_v21, 5  ;;  %v7894_v4 = vshrl.u32 %v7805_v42, 16 }
 0x465   : > { %14929 = vmatmul.mubr.msk.bf16.vlgmr.msra.gmra.mrb[0].mxu1 %vm5559_vm15, %v13764_v0  ;;  %v7801_v0 = vld [vmem:[#allocation3 + $0x28] sm:$0xf]  ;;  %v7835_v5 = vrot.slane %v7833_v14, 5  ;;  %v7821_v7 = vrot.slane %v7819_v58, 5  ;;  %v7897_v46 = vshll.u32 %v7805_v42, 16  ;;  %v7875_v17 = vshll.u32 %v18497_v2, 16 }
 0x466   : > { %14937 = vmatpush3.bf16.msra.mxu1 %v15484_v16  ;;  %14932 = vmatprep.mubr.msk.bf16.mxu1 %vm5559_vm15, %v13765_v47  ;;  %v7548_v16 = vsel %vm16646_vm12, %v13780_v8, %v7547_v12  ;;  %v7880_v47 = vshrl.u32 %v7803_v27, 16  ;;  %v7866_v38 = vshrl.u32 %v7801_v0, 16  ;;  %v7817_v34 = vrot.slane %v7816_v31, 4  ;;  %v18513_v14 = vld [vmem:[#allocation3 + $0x3c] sm:$0x1] }
 0x467   : > { %14938 = vmatprep.subr.bf16.mxu1 %v15487_v39  ;;  %v13788_v37 = vcombine.low %v7544_v24, %v7548_v16  ;;  %v7908_v8 = vshrl.u32 %v7807_v57, 16  ;;  %v7911_v12 = vshll.u32 %v7807_v57, 16  ;;  %v7861_v16 = vshll.u32 %v18488_v33, 16  ;;  %v15496_v24 = vld [vmem:[#allocation3 + $0x38] ss:$8 sps:$4 sm:$0xff]  }
 0x468   : > { %v7882_v36 = vrot.slane %v7880_v47, 4  ;;  %v7868_v44 = vrot.slane %v7866_v38, 4  ;;  %v8061_v42 = vrot.slane %v18474_v48, 5  ;;  %vm8779_vm1 = vcmask 519168  }
 0x469   : > { %v7910_v19 = vrot.slane %v7908_v8, 4  ;;  %v7913_v27 = vrot.slane %v7911_v12, 5  ;;  %v7863_v53 = vrot.slane %v7861_v16, 5  ;;  %vm16134_vm14 = vmmov 0  }
 0x46a   : > { %14939 = vmatpush3.bf16.msra.mxu1 %v15487_v39  ;;  %v7830_v39 = vor.u32 %v7829_v20, %v7826_v13  ;;  %v7886_v22 = vor.u32 %v7885_v25, %v7882_v36  ;;  %v7903_v25 = vshll.u32 %v18513_v14, 16  ;;  %vm20182_vm6 = vcmask 1040384  }
 0x46b   : > { %14948 = vmatprep.subr.bf16.mxu1 %v15489_v50  ;;  %vm20183_vm7 = vmmov %vm20182_vm6 }
 0x46c   : > { %v7831_v15 = vrot.slane %v7830_v39, 4  ;;  %v7887_v45 = vrot.slane %v7886_v22, 4  ;;  %v7905_v8 = vrot.slane %v7903_v25, 5  ;;  %vm20184_vm11 = vmmov %vm20182_vm6 }
 0x46d   : > { %14933 = vmatmul.mubr.msk.bf16.gmra.mrb[4].mxu1 %vm5559_vm15, %v13766_v52  ;;  %v7869_v52 = vshll.u32 %v7801_v0, 16  ;;  %v7899_v0 = vrot.slane %v7897_v46, 5  ;;  %v8073_v46 = vrot.slane %v18488_v33, 5 }
 0x46e   : > { %14940 = vmatprep.mubr.msk.bf16.mxu1 %vm5559_vm15, %v13785_v63  ;;  %v7857_v63 = vrot.slane %v7855_v1, 5  ;;  %v7836_v59 = vsel %vm16285_vm8, %v7831_v15, %v7835_v5  ;;  %v7896_v1 = vrot.slane %v7894_v4, 4  ;;  %v15498_v15 = vld [vmem:[%s20083_s3 + $0x58] sm:$0xff]  }
 0x470   : > { %v7858_v49 = vor.u32 %v7857_v63, %v7854_v23  ;;  %v8036_v23 = vld [vmem:[#allocation3 + $0x10] sm:$0xe] }
 0x472   : > { %v7859_v20 = vrot.slane %v7858_v49, 4  ;;  %v15499_v49 = vld [vmem:[%s20083_s3 + $0x60] sm:$0xff]  }
 0x474   : > { %v7864_v21 = vsel %vm16285_vm8, %v7859_v20, %v7863_v53  ;;  %v8077_v20 = vrot.slane %v18497_v2, 5  ;;  %v8338_v2 = vld [vmem:[#allocation3 + $0x18] sm:$0xf] }
 0x475   : > { %14941 = vmatmul.mubr.msk.bf16.vlgmr.msra.gmra.mrb[0].mxu1 %vm5559_vm15, %v13786_v11  ;;  %v7871_v11 = vrot.slane %v7869_v52, 5  ;;  %v7900_v52 = vor.u32 %v7899_v0, %v7896_v1  ;;  %v8089_v0 = vrot.slane %v18507_v54, 5 }
 0x476   : > { %14949 = vmatpush3.bf16.msra.mxu1 %v15489_v50  ;;  %14944 = vmatprep.mubr.msk.bf16.mxu1 %vm5559_vm15, %v13787_v55  ;;  %v15493_v50 = vld [vmem:[#allocation3 + $0x18] ss:$8 sps:$4 sm:$0xff]   ;;  %v18492_v55 = vld [vmem:[#allocation3 + $0x34] sm:$0x1] }
 0x477   : > { %14950 = vmatprep.subr.bf16.mxu1 %v15490_v56  ;;  %v7872_v40 = vor.u32 %v7871_v11, %v7868_v44  ;;  %v7901_v5 = vrot.slane %v7900_v52, 4 }
 0x479   : > { %v7873_v39 = vrot.slane %v7872_v40, 4 }
 0x47a   : > { %14951 = vmatpush3.bf16.msra.mxu1 %v15490_v56  ;;  %v18490_v56 = vld [vmem:[#allocation3 + $0x1c] sm:$0x1] }
 0x47b   : > { %14960 = vmatprep.subr.bf16.mxu1 %v15492_v41  ;;  %v7847_v18 = vshll.u32 %v18490_v56, 16 }
 0x47d   : > { %14945 = vmatmul.mubr.msk.bf16.gmra.mrb[4].mxu1 %vm5559_vm15, %v13788_v37  ;;  %v7822_v37 = vsel %vm16285_vm8, %v7817_v34, %v7821_v7  ;;  %v7849_v26 = vrot.slane %v7847_v18, 5  ;;  %v8065_v34 = vrot.slane %v18472_v10, 5  ;;  %v7906_v7 = vsel %vm16285_vm8, %v7901_v5, %v7905_v8 }
 0x47e   : > { %14952 = vmatprep.mubr.msk.bf16.mxu1 %vm5559_vm15, %v15491_v9  ;;  %v7889_v9 = vshll.u32 %v18492_v55, 16  ;;  %v13813_v13 = vcombine.low %v7822_v37, %v7836_v59  ;;  %v8040_v59 = vld [vmem:[#allocation3 + $0x30] sm:$0xe]  ;;  %v8081_v18 = vrot.slane %v18492_v55, 5 }
 0x47f   : > { %v13828_v37 = vrot.slane %v8040_v59, 9 }
 0x480   : > { %v7891_v47 = vrot.slane %v7889_v9, 5  ;;  %v8069_v9 = vrot.slane %v18490_v56, 5  ;;  %v15500_v56 = vld [vmem:[%s20083_s3 + $0x68] sm:$0xff]  }
 0x481   : > { %v8082_v33 = vsel %vm16646_vm12, %v13828_v37, %v8081_v18  ;;  %v8350_v37 = vld [vmem:[#allocation3 + $0x48] sm:$0xf] }
 0x482   : > { %v7892_v31 = vsel %vm16285_vm8, %v7887_v45, %v7891_v47  ;;  %v8041_v45 = vld [vmem:[#allocation3 + $0x38] sm:$0xe]  ;;  %v8085_v47 = vrot.slane %v18513_v14, 5 }
 0x485   : > { %14953 = vmatmul.mubr.msk.bf16.vlgmr.msra.gmra.mrb[0].mxu1 %vm5559_vm15, %v15493_v50  ;;  %v7914_v50 = vor.u32 %v7913_v27, %v7910_v19  ;;  %v8042_v27 = vld [vmem:[#allocation3 + $0x40] sm:$0xe] }
 0x486   : > { %14961 = vmatpush3.bf16.msra.mxu1 %v15492_v41  ;;  %14956 = vmatprep.mubr.msk.bf16.mxu1 %vm5559_vm15, %v15494_v61  ;;  %v7844_v41 = vor.u32 %v7843_v51, %v7840_v6  ;;  %v7917_v61 = vshll.u32 %v18507_v54, 16  ;;  %v8035_v6 = vld [vmem:[#allocation3 + $0x8] sm:$0xe]  ;;  %v13824_v51 = vrot.slane %v8036_v23, 9  ;;  %v13830_v1 = vrot.slane %v8042_v27, 9 }
 0x487   : > { %14962 = vmatprep.subr.bf16.mxu1 %v15495_v29  ;;  %v7915_v57 = vrot.slane %v7914_v50, 4  ;;  %v13823_v11 = vrot.slane %v8035_v6, 9  ;;  %v15502_v50 = vld [vmem:[%s20083_s3 + $0x70] sm:$0xff]  }
 0x488   : > { %v7845_v35 = vrot.slane %v7844_v41, 4  ;;  %v7919_v44 = vrot.slane %v7917_v61, 5  ;;  %v8066_v10 = vsel %vm16646_vm12, %v13824_v51, %v8065_v34  ;;  %v8037_v41 = vld [vmem:[#allocation3 + $0x18] sm:$0xe]  ;;  %v8340_v34 = vld [vmem:[#allocation3 + $0x20] sm:$0xf] }
 0x489   : > { %v8062_v48 = vsel %vm16646_vm12, %v13823_v11, %v8061_v42  ;;  %v13825_v40 = vrot.slane %v8037_v41, 9  ;;  %v8346_v51 = vld [vmem:[#allocation3 + $0x38] sm:$0xf]  ;;  %v8344_v11 = vld [vmem:[#allocation3 + $0x30] sm:$0xf]  ;;  %v8381_v59 = vshrl.u32 %v8340_v34, 16 }
 0x48a   : > { %14963 = vmatpush3.bf16.msra.mxu1 %v15495_v29  ;;  %v7877_v29 = vrot.slane %v7875_v17, 5  ;;  %v7850_v38 = vsel %vm16285_vm8, %v7845_v35, %v7849_v26  ;;  %v7920_v12 = vsel %vm16285_vm8, %v7915_v57, %v7919_v44  ;;  %v13835_v16 = vcombine.low %v8062_v48, %v8066_v10  ;;  %v15503_v10 = vld [vmem:[#allocation3 + $0x20] ss:$8 sps:$4 sm:$0xff]  }
 0x48b   : > { %14972 = vmatprep.subr.bf16.mxu1 %v18486_v43  ;;  %v13814_v63 = vcombine.low %v7850_v38, %v7864_v21  ;;  %v13816_v22 = vcombine.low %v7906_v7, %v7920_v12  ;;  %v8070_v17 = vsel %vm16646_vm12, %v13825_v40, %v8069_v9  ;;  %v8367_v26 = vshrl.u32 %v8338_v2, 16  ;;  %v15505_v48 = vld [vmem:[%s20083_s3 + $0x78] sm:$0xff]  }
 0x48c   : > { %v7878_v58 = vsel %vm16285_vm8, %v7873_v39, %v7877_v29  ;;  %v13829_v39 = vrot.slane %v8041_v45, 9  ;;  %v8370_v21 = vshll.u32 %v8338_v2, 16  ;;  %v8336_v29 = vld [vmem:[#allocation3 + $0x10] sm:$0xf]  ;;  %v8423_v8 = vshrl.u32 %v8346_v51, 16 }
 0x48d   : > { %14957 = vmatmul.mubr.msk.bf16.gmra.mrb[4].mxu1 %vm5559_vm15, %v15496_v24  ;;  %v13815_v36 = vcombine.low %v7878_v58, %v7892_v31  ;;  %v8039_v24 = vld [vmem:[#allocation3 + $0x28] sm:$0xe]  ;;  %v8090_v31 = vsel %vm16646_vm12, %v13830_v1, %v8089_v0  ;;  %v8353_v38 = vshrl.u32 %v8336_v29, 16  ;;  %v8356_v14 = vshll.u32 %v8336_v29, 16  ;;  %v18590_v1 = vld [vmem:[#allocation3 + $0x3c] sm:$0x1] }
 0x48e   : > { %14964 = vmatprep.mubr.msk.bf16.mxu1 %vm5559_vm15, %v13813_v13  ;;  %v13827_v13 = vrot.slane %v8039_v24, 9  ;;  %v8086_v54 = vsel %vm16646_vm12, %v13829_v39, %v8085_v47  ;;  %v8369_v52 = vrot.slane %v8367_v26, 4  ;;  %v8372_v61 = vrot.slane %v8370_v21, 5  ;;  %v8342_v58 = vld [vmem:[#allocation3 + $0x28] sm:$0xf] }
 0x48f   : > { %v13838_v23 = vcombine.low %v8086_v54, %v8090_v31  ;;  %v8355_v25 = vrot.slane %v8353_v38, 4  ;;  %v8358_v57 = vrot.slane %v8356_v14, 5  ;;  %v8395_v5 = vshrl.u32 %v8342_v58, 16  ;;  %v15504_v24 = vld [vmem:[#allocation3 + $0x30] ss:$8 sps:$4 sm:$0xff]  }
 0x490   : > { %v8078_v35 = vsel %vm16646_vm12, %v13827_v13, %v8077_v20  ;;  %v8373_v6 = vor.u32 %v8372_v61, %v8369_v52  ;;  %v8398_v44 = vshll.u32 %v8342_v58, 16  ;;  %v8426_v12 = vshll.u32 %v8346_v51, 16  ;;  %v8348_v13 = vld [vmem:[#allocation3 + $0x40] sm:$0xf]  ;;  %v18596_v38 = vld [vmem:[#allocation3 + $0x34] sm:$0x1] }
 0x491   : > { %v13837_v53 = vcombine.low %v8078_v35, %v8082_v33  ;;  %v8397_v41 = vrot.slane %v8395_v5, 4  ;;  %v8425_v40 = vrot.slane %v8423_v8, 4  ;;  %v18581_v33 = vld [vmem:[#allocation3 + $0x24] sm:$0x1]  ;;  %v8383_v27 = vrot.slane %v8381_v59, 4 }
 0x492   : > { %v8374_v7 = vrot.slane %v8373_v6, 4  ;;  %v8428_v9 = vrot.slane %v8426_v12, 5  ;;  %v18588_v35 = vld [vmem:[#allocation3 + $0x2c] sm:$0x1]  ;;  %v8437_v0 = vshrl.u32 %v8348_v13, 16  ;;  %v8440_v39 = vshll.u32 %v8348_v13, 16 }
 0x493   : > { %v8451_v47 = vshrl.u32 %v8350_v37, 16  ;;  %v8454_v26 = vshll.u32 %v8350_v37, 16  ;;  %v8390_v31 = vshll.u32 %v18581_v33, 16  ;;  %v8404_v54 = vshll.u32 %v18588_v35, 16  ;;  %v15506_v14 = vld [vmem:[#allocation3 + $0x40] ss:$8 sps:$4 sm:$0xff]  }
 0x494   : > { %v8429_v21 = vor.u32 %v8428_v9, %v8425_v40  ;;  %v8439_v58 = vrot.slane %v8437_v0, 4  ;;  %v8418_v51 = vshll.u32 %v18596_v38, 16  ;;  %v18604_v12 = vld [vmem:[#allocation3 + $0x44] sm:$0x1]  ;;  %v15508_v37 = vld [vmem:[%s20083_s3 + $0x88] sm:$0xff]  }
 0x495   : > { %14965 = vmatmul.mubr.msk.bf16.vlgmr.msra.gmra.mrb[0].mxu1 %vm5559_vm15, %v13814_v63  ;;  %v15501_v63 = vld [vmem:[#allocation3 + $0x10] ss:$8 sps:$4 sm:$0xff]   ;;  %v8456_v6 = vrot.slane %v8454_v26, 5  ;;  %v8580_v26 = vld [vmem:[#allocation3 + $0x20] sm:$0xe] }
 0x496   : > { %14973 = vmatpush3.bf16.msra.mxu1 %v18486_v43  ;;  %14968 = vmatprep.mubr.msk.bf16.mxu1 %vm5559_vm15, %v13815_v36  ;;  %v8038_v43 = vld [vmem:[#allocation3 + $0x20] sm:$0xe]  ;;  %v18572_v36 = vld [vmem:[#allocation3 + $0x1c] sm:$0x1] }
 0x497   : > { %14974 = vmatprep.subr.bf16.mxu1 %v15498_v15  ;;  %v13826_v4 = vrot.slane %v8038_v43, 9  ;;  %v8359_v43 = vor.u32 %v8358_v57, %v8355_v25  ;;  %v8442_v25 = vrot.slane %v8440_v39, 5  ;;  %v8453_v57 = vrot.slane %v8451_v47, 4  ;;  %v8581_v39 = vld [vmem:[#allocation3 + $0x28] sm:$0xe] }
 0x499   : > { %v8074_v19 = vsel %vm16646_vm12, %v13826_v4, %v8073_v46  ;;  %v8409_v4 = vshrl.u32 %v8344_v11, 16  ;;  %v8412_v46 = vshll.u32 %v8344_v11, 16  ;;  %v8360_v20 = vrot.slane %v8359_v43, 4  ;;  %v18602_v11 = vld [vmem:[#allocation3 + $0x4c] sm:$0x1] }
 0x49a   : > { %14975 = vmatpush3.bf16.msra.mxu1 %v15498_v15  ;;  %v13836_v55 = vcombine.low %v8070_v17, %v8074_v19  ;;  %v18569_v15 = vld [vmem:[#allocation3 + $0x14] sm:$0x1]  ;;  %v8443_v43 = vor.u32 %v8442_v25, %v8439_v58  ;;  %v8460_v59 = vshll.u32 %v18602_v11, 16  ;;  %v8585_v58 = vld [vmem:[#allocation3 + $0x48] sm:$0xe] }
 0x49b   : > { %14984 = vmatprep.subr.bf16.mxu1 %v15499_v49  ;;  %v8362_v42 = vshll.u32 %v18569_v15, 16  ;;  %v8411_v2 = vrot.slane %v8409_v4, 4  ;;  %v8579_v4 = vld [vmem:[#allocation3 + $0x18] sm:$0xe] }
 0x49c   : > { %v8444_v40 = vrot.slane %v8443_v43, 4  ;;  %v8462_v13 = vrot.slane %v8460_v59, 5  ;;  %v15525_v43 = vld [vmem:[%s20085_s5 + $0x40] sm:$0xff]  }
 0x49d   : > { %14969 = vmatmul.mubr.msk.bf16.gmra.mrb[4].mxu1 %vm5559_vm15, %v13816_v22  ;;  %v8384_v22 = vshll.u32 %v8340_v34, 16  ;;  %v8364_v19 = vrot.slane %v8362_v42, 5  ;;  %v8430_v34 = vrot.slane %v8429_v21, 4  ;;  %v8392_v42 = vrot.slane %v8390_v31, 5 }
 0x49e   : > { %14976 = vmatprep.mubr.msk.bf16.mxu1 %vm5559_vm15, %v13835_v16  ;;  %v8400_v16 = vrot.slane %v8398_v44, 5  ;;  %v8406_v44 = vrot.slane %v8404_v54, 5  ;;  %v8624_v31 = vrot.slane %v18590_v1, 5  ;;  %v13875_v54 = vrot.slane %v8580_v26, 9 }
 0x49f   : > { %v8386_v17 = vrot.slane %v8384_v22, 5  ;;  %v8420_v22 = vrot.slane %v8418_v51, 5  ;;  %v8628_v51 = vrot.slane %v18604_v12, 5 }
 0x4a1   : > { %v8387_v29 = vor.u32 %v8386_v17, %v8383_v27  ;;  %v8608_v27 = vrot.slane %v18572_v36, 5 }
 0x4a3   : > { %v8388_v5 = vrot.slane %v8387_v29, 4  ;;  %v8582_v29 = vld [vmem:[#allocation3 + $0x30] sm:$0xe] }
 0x4a5   : > { %14977 = vmatmul.mubr.msk.bf16.vlgmr.msra.gmra.mrb[0].mxu1 %vm5559_vm15, %v13836_v55  ;;  %v15507_v55 = vld [vmem:[%s20083_s3 + $0x80] sm:$0xff]  }
 0x4a6   : > { %14985 = vmatpush3.bf16.msra.mxu1 %v15499_v49  ;;  %14980 = vmatprep.mubr.msk.bf16.mxu1 %vm5559_vm15, %v13837_v53  ;;  %v8376_v49 = vshll.u32 %v18572_v36, 16  ;;  %v8414_v53 = vrot.slane %v8412_v46, 5  ;;  %v8583_v36 = vld [vmem:[#allocation3 + $0x38] sm:$0xe] }
 0x4a7   : > { %14986 = vmatprep.subr.bf16.mxu1 %v15500_v56  ;;  %v13878_v30 = vrot.slane %v8583_v36, 9 }
 0x4a8   : > { %v8378_v18 = vrot.slane %v8376_v49, 5 }
 0x4aa   : > { %14987 = vmatpush3.bf16.msra.mxu1 %v15500_v56  ;;  %v8379_v45 = vsel %vm16285_vm8, %v8374_v7, %v8378_v18  ;;  %v8401_v56 = vor.u32 %v8400_v16, %v8397_v41  ;;  %v8457_v7 = vor.u32 %v8456_v6, %v8453_v57  ;;  %v8393_v41 = vsel %vm16285_vm8, %v8388_v5, %v8392_v42 }
 0x4ab   : > { %14996 = vmatprep.subr.bf16.mxu1 %v15502_v50  ;;  %v8446_v16 = vshll.u32 %v18604_v12, 16 }
 0x4ac   : > { %v8402_v61 = vrot.slane %v8401_v56, 4  ;;  %v8458_v9 = vrot.slane %v8457_v7, 4  ;;  %v8604_v56 = vrot.slane %v18569_v15, 5  ;;  %v8616_v15 = vrot.slane %v18588_v35, 5  ;;  %v15526_v7 = vld [vmem:[%s20085_s5] sm:$0xff]  }
 0x4ad   : > { %14981 = vmatmul.mubr.msk.bf16.gmra.mrb[4].mxu1 %vm5559_vm15, %v13838_v23  ;;  %v8415_v23 = vor.u32 %v8414_v53, %v8411_v2  ;;  %v8448_v17 = vrot.slane %v8446_v16, 5  ;;  %v8625_v35 = vsel %vm16646_vm12, %v13878_v30, %v8624_v31 }
 0x4ae   : > { %14988 = vmatprep.mubr.msk.bf16.mxu1 %vm5559_vm15, %v15501_v63  ;;  %v8432_v63 = vshll.u32 %v18590_v1, 16  ;;  %v8463_v53 = vsel %vm16285_vm8, %v8458_v9, %v8462_v13 }
 0x4af   : > { %v8416_v49 = vrot.slane %v8415_v23, 4  ;;  %v8449_v2 = vsel %vm16285_vm8, %v8444_v40, %v8448_v17 }
 0x4b0   : > { %v8434_v8 = vrot.slane %v8432_v63, 5  ;;  %v8584_v63 = vld [vmem:[#allocation3 + $0x40] sm:$0xe] }
 0x4b1   : > { %v13879_v6 = vrot.slane %v8584_v63, 9 }
 0x4b3   : > { %v8629_v5 = vsel %vm16646_vm12, %v13879_v6, %v8628_v51 }
 0x4b5   : > { %14989 = vmatmul.mubr.msk.bf16.vlgmr.msra.gmra.mrb[0].mxu1 %vm5559_vm15, %v15503_v10  ;;  %v8407_v10 = vsel %vm16285_vm8, %v8402_v61, %v8406_v44  ;;  %v8620_v61 = vrot.slane %v18596_v38, 5  ;;  %v13880_v38 = vrot.slane %v8585_v58, 9 }
 0x4b6   : > { %14997 = vmatpush3.bf16.msra.mxu1 %v15502_v50  ;;  %14992 = vmatprep.mubr.msk.bf16.mxu1 %vm5559_vm15, %v15504_v24  ;;  %v8365_v50 = vsel %vm16285_vm8, %v8360_v20, %v8364_v19  ;;  %v13864_v46 = vcombine.low %v8393_v41, %v8407_v10  ;;  %v8421_v24 = vsel %vm16285_vm8, %v8416_v49, %v8420_v22  ;;  %v8578_v20 = vld [vmem:[#allocation3 + $0x10] sm:$0xe]  ;;  %v13874_v19 = vrot.slane %v8579_v4, 9 }
 0x4b7   : > { %14998 = vmatprep.subr.bf16.mxu1 %v15505_v48  ;;  %v13863_v52 = vcombine.low %v8365_v50, %v8379_v45  ;;  %v13873_v45 = vrot.slane %v8578_v20, 9  ;;  %v13876_v50 = vrot.slane %v8581_v39, 9 }
 0x4b8   : > { %v8609_v0 = vsel %vm16646_vm12, %v13874_v19, %v8608_v27 }
 0x4b9   : > { %v8605_v47 = vsel %vm16646_vm12, %v13873_v45, %v8604_v56  ;;  %v8617_v23 = vsel %vm16646_vm12, %v13876_v50, %v8616_v15 }
 0x4ba   : > { %14999 = vmatpush3.bf16.msra.mxu1 %v15505_v48  ;;  %v8435_v48 = vsel %vm16285_vm8, %v8430_v34, %v8434_v8  ;;  %v13885_v21 = vcombine.low %v8605_v47, %v8609_v0  ;;  %v8632_v34 = vrot.slane %v18602_v11, 5  ;;  %v15509_v11 = vld [vmem:[#allocation4] ss:$0 sps:$4 sm:$0x77]   ;;  %vm8908_vm8 = vcmask 516096  }
 0x4bb   : > { %15008 = vmatprep.subr.bf16.mxu1 %v15507_v55  ;;  %v13865_v18 = vcombine.low %v8421_v24, %v8435_v48  ;;  %v9238_v49 = vshrl.u32 %v15509_v11, 16  ;;  %v9240_v8 = vshll.u32 %v15509_v11, 16 }
 0x4bc   : > { %v8633_v44 = vsel %vm16646_vm12, %v13880_v38, %v8632_v34 }
 0x4bd   : > { %14993 = vmatmul.mubr.msk.bf16.gmra.mrb[4].mxu1 %vm5559_vm15, %v15506_v14  ;;  %v8612_v14 = vrot.slane %v18581_v33, 5  ;;  %v13888_v42 = vcombine.low %v8629_v5, %v8633_v44  ;;  %v9242_v12 = vrot.slane %v9240_v8, 1 }
 0x4be   : > { %15000 = vmatprep.mubr.msk.bf16.mxu1 %vm5559_vm15, %v13863_v52  ;;  %v13877_v52 = vrot.slane %v8582_v29, 9 }
 0x4bf   : > { %v8613_v25 = vsel %vm16646_vm12, %v13875_v54, %v8612_v14  ;;  %v9243_v10 = vor.u32 %v9242_v12, %v9238_v49 }
 0x4c0   : > { %v13886_v1 = vcombine.low %v8613_v25, %v8617_v23  ;;  %v8621_v57 = vsel %vm16646_vm12, %v13877_v52, %v8620_v61  ;;  %vm9173_vm12 = vsmask.f32 2304 }
 0x4c1   : > { %v13887_v33 = vcombine.low %v8621_v57, %v8625_v35  ;;  %9265 = vrot.lane.b32.xlu0 %v9243_v10, %s16131_s15  ;;  %vm18710_vm13 = vmand %vm1954_vm10, %vm9173_vm12  ;;  %vm9437_vm10 = vcmask 523264  }
 0x4c5   : > { %15001 = vmatmul.mubr.msk.bf16.vlgmr.msra.gmra.mrb[0].mxu1 %vm5559_vm15, %v13864_v46 }
 0x4c6   : > { %15009 = vmatpush3.bf16.msra.mxu1 %v15507_v55  ;;  %15004 = vmatprep.mubr.msk.bf16.mxu1 %vm5559_vm15, %v13865_v18  ;;  %v13866_v55 = vcombine.low %v8449_v2, %v8463_v53 }
 0x4c7   : > { %15010 = vmatprep.subr.bf16.mxu1 %v15508_v37 }
 0x4ca   : > { %15011 = vmatpush3.bf16.msra.mxu1 %v15508_v37 }
 0x4cb   : > { %14513 = vmatprep.subr.bf16.mxu1 %v15525_v43 }
 0x4cd   : > { %15005 = vmatmul.mubr.msk.bf16.gmra.mrb[4].mxu1 %vm5559_vm15, %v13866_v55 }
 0x4ce   : > { %15012 = vmatprep.mubr.msk.bf16.mxu1 %vm5559_vm15, %v13885_v21 }
 0x4d5   : > { %15013 = vmatmul.mubr.msk.bf16.vlgmr.msra.gmra.mrb[0].mxu1 %vm5559_vm15, %v13886_v1 }
 0x4d6   : > { %15016 = vmatprep.mubr.msk.bf16.mxu1 %vm5559_vm15, %v13887_v33  ;;  %14514 = vmatpush3.bf16.msra.mxu1 %v15526_v7 }
 0x4dd   : > { %15017 = vmatmul.mubr.msk.bf16.gmra.mrb[4].mxu1 %vm5559_vm15, %v13888_v42  ;;  %vm20178_vm15 = vcmask 1041408  }
 0x5a8   : > { %v15014_v59 = vpop.f32.mrb[0].mxu1 }
 0x5a9   : > { %v8757_v22 = vadd.f32 %v15014_v59, %v13895_v62  ;;  %v8709_v48 = vpop.f32.mrb[1].mxu1 }
 0x5aa   : > { %v8755_v41 = vadd.f32 %v13895_v62, %v8709_v48  ;;  %v15015_v16 = vpop.f32.mrb[2].mxu1 }
 0x5ab   : > { %v8765_v4 = vmax.f32 %v8757_v22, 0.0  ;;  %v8758_v46 = vadd.f32 %v15015_v16, %v13895_v62  ;;  %v8712_v24 = vpop.f32.mrb[3].mxu1 }
 0x5ac   : > { %v8763_v37 = vmax.f32 %v8755_v41, 0.0  ;;  %v8756_v18 = vadd.f32 %v13895_v62, %v8712_v24 }
 0x5ad   : > { %v8773_v40 = vpack.c.bf16 %v8765_v4, %v8765_v4  ;;  %v8766_v9 = vmax.f32 %v8758_v46, 0.0 }
 0x5ae   : > { %v8771_v13 = vpack.c.bf16 %v8763_v37, %v8763_v37  ;;  %v8764_v20 = vmax.f32 %v8756_v18, 0.0 }
 0x5af   : > { %v8774_v19 = vpack.c.bf16 %v8766_v9, %v8766_v9  ;;  %v8788_v45 = vsel %vm8779_vm1, %v8773_v40, 4286644096 }
 0x5b0   : > { %v8772_v27 = vpack.c.bf16 %v8764_v20, %v8764_v20  ;;  %v15018_v17 = vpop.f32.mrb[4].mxu1  ;;  %v8781_v0 = vsel %vm8779_vm1, %v8771_v13, 4286644096 }
 0x5b1   : > { %v8791_v56 = vsel %vm8779_vm1, %v8774_v19, 4286644096  ;;  %v8761_v2 = vadd.f32 %v15018_v17, %v13895_v62  ;;  %v8725_v53 = vpop.f32.mrb[5].mxu1 }
 0x5b2   : > { %v8793_v39 = vmax.bf16 %v8791_v56, %v8788_v45  ;;  %v8784_v36 = vsel %vm8779_vm1, %v8772_v27, 4286644096  ;;  %v8759_v55 = vadd.f32 %v13895_v62, %v8725_v53  ;;  %v15019_v47 = vpop.f32.mrb[6].mxu1 }
 0x5b3   : > { %v8786_v26 = vmax.bf16 %v8784_v36, %v8781_v0  ;;  %v8769_v21 = vmax.f32 %v8761_v2, 0.0  ;;  %v8762_v50 = vadd.f32 %v15019_v47, %v13895_v62  ;;  %v8728_v15 = vpop.f32.mrb[7].mxu1 }
 0x5b4   : > { %v8842_v29 = vrot.slane %v8793_v39, %v17902_v28  ;;  %v8767_v30 = vmax.f32 %v8759_v55, 0.0  ;;  %v18673_v31 = vadd.f32 %v13895_v62, %v8728_v15 }
 0x5b5   : > { %v8818_v54 = vrot.slane %v8786_v26, %v17902_v28  ;;  %v8777_v14 = vpack.c.bf16 %v8769_v21, %v8769_v21  ;;  %v8770_v52 = vmax.f32 %v8762_v50, 0.0 }
 0x5b6   : > { %v8843_v61 = vcombine.high %v8842_v29, %v8842_v29  ;;  %v8850_v23 = vrot.slane %v8842_v29, %v17902_v28  ;;  %v18677_v63 = vpack.c.bf16 %v8767_v30, %v8767_v30  ;;  %v8768_v1 = vmax.f32 %v18673_v31, 0.0 }
 0x5b7   : > { %v8819_v35 = vcombine.high %v8818_v54, %v8818_v54  ;;  %v8826_v58 = vrot.slane %v8818_v54, %v17902_v28  ;;  %v18681_v25 = vsel %vm8779_vm1, %v8777_v14, 4286644096  ;;  %v18686_v51 = vpack.c.bf16 %v8770_v52, %v8770_v52 }
 0x5b8   : > { %v8857_v57 = vrot.slane %v8843_v61, %v17902_v28  ;;  %v8858_v6 = vcombine.high %v8850_v23, %v8850_v23  ;;  %v8962_v33 = vsel %vm8908_vm8, %v8850_v23, 4286644096 }
 0x5b9   : > { %v8964_v38 = vunpack.i.l.bf16 %v8962_v33  ;;  %v8965_v34 = vunpack.i.h.bf16 %v8962_v33  ;;  %v8833_v5 = vrot.slane %v8819_v35, %v17902_v28  ;;  %v8834_v44 = vcombine.high %v8826_v58, %v8826_v58 }
 0x5ba   : > { %v8859_v42 = vcombine.high %v8857_v57, %v8857_v57  ;;  %v8975_v11 = vsel %vm8908_vm8, %v8857_v57, 4286644096  ;;  %v8988_v49 = vsel %vm8908_vm8, %v8858_v6, 4286644096  ;;  %v8910_v8 = vsel %vm8908_vm8, %v8826_v58, 4286644096 }
 0x5bb   : > { %v8966_v12 = vmax.f32 %v8964_v38, %v8965_v34  ;;  %v8977_v10 = vunpack.i.l.bf16 %v8975_v11  ;;  %v8978_v62 = vunpack.i.h.bf16 %v8975_v11  ;;  %v8990_v43 = vunpack.i.l.bf16 %v8988_v49 }
 0x5bc   : > { %v8991_v7 = vunpack.i.h.bf16 %v8988_v49  ;;  %v9001_v59 = vsel %vm8908_vm8, %v8859_v42, 4286644096  ;;  %v8835_v22 = vcombine.high %v8833_v5, %v8833_v5  ;;  %v8912_v48 = vunpack.i.l.bf16 %v8910_v8 }
 0x5bd   : > { %v8967_v41 = vrot.slane %v8966_v12, 4  ;;  %v8979_v16 = vmax.f32 %v8977_v10, %v8978_v62  ;;  %v9003_v4 = vunpack.i.l.bf16 %v9001_v59  ;;  %v9004_v46 = vunpack.i.h.bf16 %v9001_v59 }
 0x5be   : > { %v8992_v24 = vmax.f32 %v8990_v43, %v8991_v7  ;;  %v8913_v37 = vunpack.i.h.bf16 %v8910_v8  ;;  %v8923_v18 = vsel %vm8908_vm8, %v8833_v5, 4286644096  ;;  %v8936_v40 = vsel %vm8908_vm8, %v8834_v44, 4286644096 }
 0x5bf   : > { %v8968_v9 = vmax.f32 %v8966_v12, %v8967_v41  ;;  %v8980_v13 = vrot.slane %v8979_v16, 4  ;;  %v9005_v20 = vmax.f32 %v9003_v4, %v9004_v46  ;;  %v8925_v19 = vunpack.i.l.bf16 %v8923_v18 }
 0x5c0   : > { %v8993_v27 = vrot.slane %v8992_v24, 4  ;;  %v8914_v17 = vmax.f32 %v8912_v48, %v8913_v37  ;;  %v8926_v45 = vunpack.i.h.bf16 %v8923_v18  ;;  %v8938_v56 = vunpack.i.l.bf16 %v8936_v40 }
 0x5c1   : > { %v8969_v2 = vrot.slane %v8968_v9, 2  ;;  %v8981_v53 = vmax.f32 %v8979_v16, %v8980_v13  ;;  %v9006_v0 = vrot.slane %v9005_v20, 4  ;;  %v8939_v39 = vunpack.i.h.bf16 %v8936_v40 }
 0x5c2   : > { %v8994_v36 = vmax.f32 %v8992_v24, %v8993_v27  ;;  %v8915_v55 = vrot.slane %v8914_v17, 4  ;;  %v8927_v47 = vmax.f32 %v8925_v19, %v8926_v45  ;;  %v8949_v26 = vsel %vm8908_vm8, %v8835_v22, 4286644096 }
 0x5c3   : > { %v8970_v21 = vmax.f32 %v8968_v9, %v8969_v2  ;;  %v8982_v50 = vrot.slane %v8981_v53, 2  ;;  %v9007_v15 = vmax.f32 %v9005_v20, %v9006_v0  ;;  %v8940_v29 = vmax.f32 %v8938_v56, %v8939_v39 }
 0x5c4   : > { %v8995_v30 = vrot.slane %v8994_v36, 2  ;;  %v8916_v54 = vmax.f32 %v8914_v17, %v8915_v55  ;;  %v8928_v14 = vrot.slane %v8927_v47, 4  ;;  %v8951_v52 = vunpack.i.l.bf16 %v8949_v26 }
 0x5c5   : > { %v8971_v61 = vrot.slane %v8970_v21, 1  ;;  %v8983_v23 = vmax.f32 %v8981_v53, %v8982_v50  ;;  %v9008_v35 = vrot.slane %v9007_v15, 2  ;;  %v8941_v58 = vrot.slane %v8940_v29, 4 }
 0x5c6   : > { %v8996_v57 = vmax.f32 %v8994_v36, %v8995_v30  ;;  %v8917_v6 = vrot.slane %v8916_v54, 2  ;;  %v8929_v33 = vmax.f32 %v8927_v47, %v8928_v14  ;;  %v8952_v38 = vunpack.i.h.bf16 %v8949_v26 }
 0x5c7   : > { %v8972_v34 = vmax.f32 %v8970_v21, %v8971_v61  ;;  %v8984_v5 = vrot.slane %v8983_v23, 1  ;;  %v9009_v44 = vmax.f32 %v9007_v15, %v9008_v35  ;;  %v8942_v42 = vmax.f32 %v8940_v29, %v8941_v58 }
 0x5c8   : > { %v8997_v11 = vrot.slane %v8996_v57, 1  ;;  %v8918_v49 = vmax.f32 %v8916_v54, %v8917_v6  ;;  %v8930_v8 = vrot.slane %v8929_v33, 2  ;;  %v8953_v12 = vmax.f32 %v8951_v52, %v8952_v38 }
 0x5c9   : > { %v8973_v10 = vpack.i.bf16 %v8972_v34, %v8972_v34  ;;  %v8985_v62 = vmax.f32 %v8983_v23, %v8984_v5  ;;  %v9010_v43 = vrot.slane %v9009_v44, 1  ;;  %v8943_v7 = vrot.slane %v8942_v42, 2 }
 0x5ca   : > { %v8998_v59 = vmax.f32 %v8996_v57, %v8997_v11  ;;  %v8919_v22 = vrot.slane %v8918_v49, 1  ;;  %v8931_v48 = vmax.f32 %v8929_v33, %v8930_v8  ;;  %v8954_v41 = vrot.slane %v8953_v12, 4 }
 0x5cb   : > { %v8986_v16 = vpack.i.bf16 %v8985_v62, %v8985_v62  ;;  %v9011_v4 = vmax.f32 %v9009_v44, %v9010_v43  ;;  %v9137_v46 = vunpack.c.l.b16 %v8973_v10  ;;  %v8944_v24 = vmax.f32 %v8942_v42, %v8943_v7 }
 0x5cc   : > { %v8999_v37 = vpack.i.bf16 %v8998_v59, %v8998_v59  ;;  %v8920_v18 = vmax.f32 %v8918_v49, %v8919_v22  ;;  %v8932_v40 = vrot.slane %v8931_v48, 1  ;;  %v8955_v9 = vmax.f32 %v8953_v12, %v8954_v41 }
 0x5cd   : > { %v9012_v13 = vpack.i.bf16 %v9011_v4, %v9011_v4  ;;  %v9138_v20 = vunpack.c.l.b16 %v8986_v16  ;;  %v8945_v19 = vrot.slane %v8944_v24, 1  ;;  %v8805_v27 = vsel %vm8779_vm1, %v18686_v51, 4286644096 }
 0x5ce   : > { %v9139_v17 = vunpack.c.l.b16 %v8999_v37  ;;  %v8921_v45 = vpack.i.bf16 %v8920_v18, %v8920_v18  ;;  %v8933_v56 = vmax.f32 %v8931_v48, %v8932_v40  ;;  %v8956_v2 = vrot.slane %v8955_v9, 2 }
 0x5cf   : > { %v9140_v53 = vunpack.c.l.b16 %v9012_v13  ;;  %v9152_v0 = vsel %vm6978_vm2, %v9138_v20, %v9137_v46  ;;  %v8946_v39 = vmax.f32 %v8944_v24, %v8945_v19  ;;  %v8807_v36 = vmax.bf16 %v8805_v27, %v18681_v25  ;;  %v15539_v25 = vld [vmem:[%s20085_s5 + $0x68] sm:$0xff]  }
 0x5d0   : > { %v9153_v55 = vsel %vm6980_vm3, %v9139_v17, %v9152_v0  ;;  %v8934_v47 = vpack.i.bf16 %v8933_v56, %v8933_v56  ;;  %v8957_v26 = vmax.f32 %v8955_v9, %v8956_v2  ;;  %v8795_v21 = vsel %vm8779_vm1, %v18677_v63, 4286644096 }
 0x5d1   : > { %v9154_v50 = vsel %vm6982_vm4, %v9140_v53, %v9153_v55  ;;  %v8947_v51 = vpack.i.bf16 %v8946_v39, %v8946_v39  ;;  %v8890_v15 = vrot.slane %v8807_v36, %v17902_v28  ;;  %v8776_v29 = vpack.c.bf16 %v8768_v1, %v8768_v1  ;;  %v15529_v55 = vld [vmem:[%s20085_s5 + $0x48] sm:$0xff]  }
 0x5d2   : > { %v9162_v30 = vpack.c.b16 %v9154_v50, %v9154_v50  ;;  %v8958_v54 = vrot.slane %v8957_v26, 1  ;;  %v9133_v14 = vunpack.c.l.b16 %v8921_v45  ;;  %v9134_v52 = vunpack.c.l.b16 %v8934_v47  ;;  %14515 = vmatprep.subr.bf16.mxu1 %v15529_v55 }
 0x5d3   : > { %v9135_v63 = vunpack.c.l.b16 %v8947_v51  ;;  %v8891_v61 = vcombine.high %v8890_v15, %v8890_v15  ;;  %v8898_v23 = vrot.slane %v8890_v15, %v17902_v28  ;;  %v8798_v35 = vsel %vm8779_vm1, %v8776_v29, 4286644096 }
 0x5d4   : > { %v9170_v31 = vsel %vm16291_vm9, 0, %v9162_v30  ;;  %v8959_v1 = vmax.f32 %v8957_v26, %v8958_v54  ;;  %v9149_v58 = vsel %vm6978_vm2, %v9134_v52, %v9133_v14  ;;  %v8800_v57 = vmax.bf16 %v8798_v35, %v8795_v21 }
 0x5d5   : > { %v9176_v6 = vsel %vm18710_vm13, %v9170_v31, 0  ;;  %v8905_v33 = vrot.slane %v8891_v61, %v17902_v28  ;;  %v8906_v38 = vcombine.high %v8898_v23, %v8898_v23  ;;  %v9150_v5 = vsel %vm6980_vm3, %v9135_v63, %v9149_v58  ;;  %v15530_v61 = vld [vmem:[%s20085_s5 + $0x8] sm:$0xff]  }
 0x5d6   : > { %9182 = vst.msk [vmem:[#allocation4 + $0x8] sm:$0x7] %vm9180_vm0, %v9176_v6  ;;  %v8960_v34 = vpack.i.bf16 %v8959_v1, %v8959_v1  ;;  %v9066_v44 = vsel %vm8908_vm8, %v8898_v23, 4286644096  ;;  %v8866_v42 = vrot.slane %v8800_v57, %v17902_v28  ;;  %14516 = vmatpush3.bf16.msra.mxu1 %v15530_v61  ;;  %vm10217_vm1 = vsmask.f32 1280 }
 0x5d7   : > { %v8907_v11 = vcombine.high %v8905_v33, %v8905_v33  ;;  %v9068_v49 = vunpack.i.l.bf16 %v9066_v44  ;;  %v9069_v8 = vunpack.i.h.bf16 %v9066_v44  ;;  %v9079_v12 = vsel %vm8908_vm8, %v8905_v33, 4286644096 }
 0x5d8   : > { %v9136_v10 = vunpack.c.l.b16 %v8960_v34  ;;  %v9081_v62 = vunpack.i.l.bf16 %v9079_v12  ;;  %v9082_v43 = vunpack.i.h.bf16 %v9079_v12  ;;  %v9092_v7 = vsel %vm8908_vm8, %v8906_v38, 4286644096 }
 0x5d9   : > { %v9070_v59 = vmax.f32 %v9068_v49, %v9069_v8  ;;  %v9094_v22 = vunpack.i.l.bf16 %v9092_v7  ;;  %v9095_v48 = vunpack.i.h.bf16 %v9092_v7  ;;  %v9105_v41 = vsel %vm8908_vm8, %v8907_v11, 4286644096 }
 0x5da   : > { %v9151_v16 = vsel %vm6982_vm4, %v9136_v10, %v9150_v5  ;;  %v9083_v4 = vmax.f32 %v9081_v62, %v9082_v43  ;;  %v9107_v46 = vunpack.i.l.bf16 %v9105_v41  ;;  %v9108_v24 = vunpack.i.h.bf16 %v9105_v41 }
 0x5db   : > { %v9161_v37 = vpack.c.b16 %v9151_v16, %v9151_v16  ;;  %v9071_v18 = vrot.slane %v9070_v59, 4  ;;  %v9096_v40 = vmax.f32 %v9094_v22, %v9095_v48  ;;  %v8867_v9 = vcombine.high %v8866_v42, %v8866_v42 }
 0x5dc   : > { %v9084_v13 = vrot.slane %v9083_v4, 4  ;;  %v9109_v20 = vmax.f32 %v9107_v46, %v9108_v24  ;;  %v8874_v19 = vrot.slane %v8866_v42, %v17902_v28 }
 0x5dd   : > { %v9169_v27 = vsel %vm16291_vm9, 0, %v9161_v37  ;;  %v9072_v17 = vmax.f32 %v9070_v59, %v9071_v18  ;;  %v9097_v45 = vrot.slane %v9096_v40, 4  ;;  %v8881_v56 = vrot.slane %v8867_v9, %v17902_v28  ;;  %v15510_v36 = vld [vmem:[#allocation4 + $0x8] ss:$0 sps:$4 sm:$0x33]  }
 0x5de   : > { %v9175_v2 = vsel %vm18710_vm13, %v9169_v27, 0  ;;  %v9085_v53 = vmax.f32 %v9083_v4, %v9084_v13  ;;  %v9110_v0 = vrot.slane %v9109_v20, 4  ;;  %v8882_v39 = vcombine.high %v8874_v19, %v8874_v19  ;;  %9303 = vrot.lane.b32.xlu1 %v15510_v36, %s16131_s15  ;;  %v15512_v13 = vld [vmem:[#allocation4 + $0x8] ss:$0 sps:$4 sm:$0x77]  }
 0x5df   : > { %9181 = vst.msk [vmem:[#allocation4 + $0x4] sm:$0x7] %vm9180_vm0, %v9175_v2  ;;  %v9073_v47 = vrot.slane %v9072_v17, 2  ;;  %v9098_v26 = vmax.f32 %v9096_v40, %v9097_v45  ;;  %v8883_v21 = vcombine.high %v8881_v56, %v8881_v56  ;;  %v9014_v50 = vsel %vm8908_vm8, %v8874_v19, 4286644096  ;;  %v15531_v45 = vld [vmem:[%s20085_s5 + $0x50] sm:$0xff]  }
 0x5e0   : > { %v9086_v51 = vrot.slane %v9085_v53, 2  ;;  %v9111_v15 = vmax.f32 %v9109_v20, %v9110_v0  ;;  %v9016_v29 = vunpack.i.l.bf16 %v9014_v50  ;;  %v9017_v30 = vunpack.i.h.bf16 %v9014_v50  ;;  %14517 = vmatprep.subr.bf16.mxu1 %v15531_v45 }
 0x5e1   : > { %v9074_v54 = vmax.f32 %v9072_v17, %v9073_v47  ;;  %v9099_v14 = vrot.slane %v9098_v26, 2  ;;  %v9027_v52 = vsel %vm8908_vm8, %v8881_v56, 4286644096  ;;  %v9040_v63 = vsel %vm8908_vm8, %v8882_v39, 4286644096 }
 0x5e2   : > { %v9087_v23 = vmax.f32 %v9085_v53, %v9086_v51  ;;  %v9112_v35 = vrot.slane %v9111_v15, 2  ;;  %v9018_v31 = vmax.f32 %v9016_v29, %v9017_v30  ;;  %v9029_v1 = vunpack.i.l.bf16 %v9027_v52 }
 0x5e3   : > { %v9075_v58 = vrot.slane %v9074_v54, 1  ;;  %v9100_v57 = vmax.f32 %v9098_v26, %v9099_v14  ;;  %v9030_v6 = vunpack.i.h.bf16 %v9027_v52  ;;  %v9042_v33 = vunpack.i.l.bf16 %v9040_v63  ;;  %v15532_v14 = vld [vmem:[%s20085_s5 + $0x10] sm:$0xff]   ;;  %v15533_v52 = vld [vmem:[%s20085_s5 + $0x58] sm:$0xff]  }
 0x5e4   : > { %v9088_v38 = vrot.slane %v9087_v23, 1  ;;  %v9113_v34 = vmax.f32 %v9111_v15, %v9112_v35  ;;  %v9019_v5 = vrot.slane %v9018_v31, 4  ;;  %v9043_v44 = vunpack.i.h.bf16 %v9040_v63  ;;  %14518 = vmatpush3.bf16.msra.mxu1 %v15532_v14 }
 0x5e5   : > { %v9076_v42 = vmax.f32 %v9074_v54, %v9075_v58  ;;  %v9101_v11 = vrot.slane %v9100_v57, 1  ;;  %v9031_v49 = vmax.f32 %v9029_v1, %v9030_v6  ;;  %v9053_v8 = vsel %vm8908_vm8, %v8883_v21, 4286644096  ;;  %14519 = vmatprep.subr.bf16.mxu1 %v15533_v52 }
 0x5e6   : > { %v9089_v12 = vmax.f32 %v9087_v23, %v9088_v38  ;;  %v9114_v10 = vrot.slane %v9113_v34, 1  ;;  %v9020_v62 = vmax.f32 %v9018_v31, %v9019_v5  ;;  %v9044_v43 = vmax.f32 %v9042_v33, %v9043_v44  ;;  %v15511_v7 = vld [vmem:[#allocation4 + $0x4] ss:$0 sps:$4 sm:$0x33]  }
 0x5e7   : > { %v9077_v59 = vpack.i.bf16 %v9076_v42, %v9076_v42  ;;  %v9102_v22 = vmax.f32 %v9100_v57, %v9101_v11  ;;  %v9032_v48 = vrot.slane %v9031_v49, 4  ;;  %v9055_v41 = vunpack.i.l.bf16 %v9053_v8  ;;  %9301 = vrot.lane.b32.xlu0 %v15511_v7, %s16131_s15  ;;  %v15513_v0 = vld [vmem:[#allocation4 + $0x4] ss:$0 sps:$4 sm:$0x77]  }
 0x5e8   : > { %v9090_v16 = vpack.i.bf16 %v9089_v12, %v9089_v12  ;;  %v9115_v4 = vmax.f32 %v9113_v34, %v9114_v10  ;;  %v9021_v46 = vrot.slane %v9020_v62, 2  ;;  %v9045_v24 = vrot.slane %v9044_v43, 4 }
 0x5e9   : > { %v9103_v37 = vpack.i.bf16 %v9102_v22, %v9102_v22  ;;  %v9145_v18 = vunpack.c.l.b16 %v9077_v59  ;;  %v9033_v40 = vmax.f32 %v9031_v49, %v9032_v48  ;;  %v9056_v9 = vunpack.i.h.bf16 %v9053_v8 }
 0x5ea   : > { %v9116_v20 = vpack.i.bf16 %v9115_v4, %v9115_v4  ;;  %v9146_v19 = vunpack.c.l.b16 %v9090_v16  ;;  %v9022_v27 = vmax.f32 %v9020_v62, %v9021_v46  ;;  %v9046_v17 = vmax.f32 %v9044_v43, %v9045_v24 }
 0x5eb   : > { %v9147_v56 = vunpack.c.l.b16 %v9103_v37  ;;  %v9034_v2 = vrot.slane %v9033_v40, 2  ;;  %v9057_v53 = vmax.f32 %v9055_v41, %v9056_v9  ;;  %v9254_v51 = vshll.u32 %v15512_v13, 16  ;;  %v15538_v9 = vld [vmem:[%s20085_s5 + $0x20] sm:$0xff]  }
 0x5ec   : > { %v9148_v39 = vunpack.c.l.b16 %v9116_v20  ;;  %v9158_v36 = vsel %vm6978_vm2, %v9146_v19, %v9145_v18  ;;  %v9023_v55 = vrot.slane %v9022_v27, 1  ;;  %v9047_v47 = vrot.slane %v9046_v17, 2  ;;  %v15535_v18 = vld [vmem:[%s20085_s5 + $0x18] sm:$0xff]   ;;  %v15519_v20 = vld [vmem:[#allocation4 + $0x8] ss:$0 sps:$4 sm:$0x77]  }
 0x5ed   : > { %v9159_v26 = vsel %vm6980_vm3, %v9147_v56, %v9158_v36  ;;  %v9035_v21 = vmax.f32 %v9033_v40, %v9034_v2  ;;  %v9058_v50 = vrot.slane %v9057_v53, 4  ;;  %v9252_v54 = vshrl.u32 %v15512_v13, 16  ;;  %v15536_v40 = vld [vmem:[%s20085_s5 + $0x60] sm:$0xff]   ;;  %14520 = vmatpush3.bf16.msra.mxu1 %v15535_v18  ;;  %v15515_v13 = vld [vmem:[#allocation4 + $0x4] ss:$0 sps:$4 sm:$0x66]  }
 0x5ee   : > { %v9160_v15 = vsel %vm6982_vm4, %v9148_v39, %v9159_v26  ;;  %v9024_v29 = vmax.f32 %v9022_v27, %v9023_v55  ;;  %v9048_v30 = vmax.f32 %v9046_v17, %v9047_v47  ;;  %v9256_v35 = vrot.slane %v9254_v51, 1  ;;  %14521 = vmatprep.subr.bf16.mxu1 %v15536_v40  ;;  %v15542_v36 = vld [vmem:[%s20085_s5 + $0x28] sm:$0xff]   ;;  %v15543_v47 = vld [vmem:[%s20085_s5 + $0x70] sm:$0xff]  }
 0x5ef   : > { %v9164_v63 = vpack.c.b16 %v9160_v15, %v9160_v15  ;;  %v9036_v61 = vrot.slane %v9035_v21, 1  ;;  %v9059_v23 = vmax.f32 %v9057_v53, %v9058_v50  ;;  %v9247_v58 = vshll.u32 %v15513_v0, 16  ;;  %v15545_v51 = vld [vmem:[%s20085_s5 + $0x30] sm:$0xff]   ;;  %v15546_v15 = vld [vmem:[%s20085_s5 + $0x78] sm:$0xff]  }
 0x5f0   : > { %v9025_v31 = vpack.i.bf16 %v9024_v29, %v9024_v29  ;;  %v9049_v1 = vrot.slane %v9048_v30, 1  ;;  %v9257_v38 = vor.u32 %v9256_v35, %v9252_v54  ;;  %v9245_v44 = vshrl.u32 %v15513_v0, 16  ;;  %v15549_v35 = vld [vmem:[%s20085_s5 + $0xc0] sm:$0xff]  }
 0x5f1   : > { %v9172_v57 = vsel %vm16291_vm9, 0, %v9164_v63  ;;  %v9037_v6 = vmax.f32 %v9035_v21, %v9036_v61  ;;  %v9060_v33 = vrot.slane %v9059_v23, 2  ;;  %v9249_v42 = vrot.slane %v9247_v58, 1  ;;  %14522 = vmatpush3.bf16.msra.mxu1 %v15538_v9  ;;  %v15548_v61 = vld [vmem:[%s20085_s5 + $0x38] sm:$0xff]  }
 0x5f2   : > { %v9178_v34 = vsel %vm18710_vm13, %v9172_v57, 0  ;;  %v9050_v5 = vmax.f32 %v9048_v30, %v9049_v1  ;;  %9269 = vrot.lane.b32.xlu1 %v9257_v38, %s16131_s15  ;;  %v9141_v62 = vunpack.c.l.b16 %v9025_v31  ;;  %14523 = vmatprep.subr.bf16.mxu1 %v15539_v25  ;;  %v9361_v17 = vrot.slane %v15515_v13, 1  ;;  %v15520_v30 = vld [vmem:[#allocation4 + $0x8] ss:$0 sps:$4 sm:$0x66]  }
 0x5f3   : > { %9184 = vst.msk [vmem:[#allocation4 + $0x10] sm:$0x7] %vm9180_vm0, %v9178_v34  ;;  %v9038_v11 = vpack.i.bf16 %v9037_v6, %v9037_v6  ;;  %v9061_v49 = vmax.f32 %v9059_v23, %v9060_v33  ;;  %v9250_v12 = vor.u32 %v9249_v42, %v9245_v44  ;;  %v9388_v53 = vshll.u32 %v15519_v20, 16  ;;  %v15524_v23 = vld [vmem:[#allocation4 + $0x14] ss:$0 sps:$4 sm:$0x77]  }
 0x5f4   : > { %v9051_v8 = vpack.i.bf16 %v9050_v5, %v9050_v5  ;;  %v9386_v29 = vshrl.u32 %v15519_v20, 16  ;;  %v9362_v1 = vrot.slane %v15520_v30, 1  ;;  %v9409_v33 = vshll.u32 %v15524_v23, 16 }
 0x5f5   : > { %v9062_v10 = vrot.slane %v9061_v49, 1  ;;  %v9142_v43 = vunpack.c.l.b16 %v9038_v11  ;;  %9267 = vrot.lane.b32.xlu0 %v9250_v12, %s16131_s15  ;;  %v9390_v21 = vrot.slane %v9388_v53, 1  ;;  %14524 = vmatpush3.bf16.msra.mxu1 %v15542_v36  ;;  %v9407_v44 = vshrl.u32 %v15524_v23, 16 }
 0x5f6   : > { %v9143_v7 = vunpack.c.l.b16 %v9051_v8  ;;  %14525 = vmatprep.subr.bf16.mxu1 %v15543_v47  ;;  %v9411_v42 = vrot.slane %v9409_v33, 1  ;;  %v9266_v8 = vpop.permute.xlu0 %9265 }
 0x5f7   : > { %v9063_v59 = vmax.f32 %v9061_v49, %v9062_v10  ;;  %v9155_v22 = vsel %vm6978_vm2, %v9142_v43, %v9141_v62  ;;  %v9391_v52 = vor.u32 %v9390_v21, %v9386_v29  ;;  %v15528_v62 = vld [vmem:[#allocation4] ss:$0 sps:$4 sm:$0x66]  }
 0x5f8   : > { %v9156_v41 = vsel %vm6980_vm3, %v9143_v7, %v9155_v22  ;;  %v9412_v49 = vor.u32 %v9411_v42, %v9407_v44  ;;  %v15527_v7 = vld [vmem:[#allocation4 + $0x4] ss:$0 sps:$4 sm:$0x66]   ;;  %v16132_v22 = vmov 1983009808   ;;  %vm20179_vm3 = vmmov %vm20178_vm15 }
 0x5f9   : > { %v9064_v48 = vpack.i.bf16 %v9063_v59, %v9063_v59  ;;  %14526 = vmatpush3.bf16.msra.mxu1 %v15545_v51  ;;  %vm20181_vm5 = vmmov %vm20179_vm3 }
 0x5fa   : > { %v15521_v56 = vld [vmem:[#allocation4 + $0x10] ss:$0 sps:$4 sm:$0x77]   ;;  %14527 = vmatprep.subr.bf16.mxu1 %v15546_v15  ;;  %vm20186_vm8 = vmmov %vm20179_vm3 }
 0x5fb   : > { %v9144_v16 = vunpack.c.l.b16 %v9064_v48  ;;  %v9402_v50 = vshll.u32 %v15521_v56, 16  ;;  %v15518_v54 = vld [vmem:[#allocation4 + $0x10] ss:$0 sps:$4 sm:$0x33]   ;;  %v9400_v31 = vshrl.u32 %v15521_v56, 16  ;;  %v9505_v48 = vunpack.c.l.s4 %v16132_v22  ;;  %v15550_v22 = vld [vmem:[%s20085_s5 + $0x80] sm:$0xff]   ;;  %vm10218_vm12 = vmand %vm20186_vm8, %vm10217_vm1 }
 0x5fc   : > { %v15522_v58 = vld [vmem:[#allocation4 + $0x10] ss:$0 sps:$4 sm:$0x66]  }
 0x5fd   : > { %v9157_v4 = vsel %vm6982_vm4, %v9144_v16, %v9156_v41  ;;  %v9404_v63 = vrot.slane %v9402_v50, 1  ;;  %14528 = vmatpush3.bf16.msra.mxu1 %v15548_v61  ;;  %v9364_v38 = vrot.slane %v15522_v58, 1  ;;  %v9285_v41 = vrot.slane %v15528_v62, 1  ;;  %v15534_v16 = vld [vmem:[#allocation4 + $0x8] ss:$0 sps:$4 sm:$0x66]   ;;  %vm20180_vm4 = vmmov %vm20179_vm3 }
 0x5fe   : > { %v9163_v46 = vpack.c.b16 %v9157_v4, %v9157_v4  ;;  %14535 = vmatprep.subr.bf16.mxu1 %v15549_v35  ;;  %v9188_v4 = vld [vmem:[#allocation4] sm:$0x3]  ;;  %v9506_v9 = vunpack.c.0.s8 %v9505_v48  ;;  %v15547_v23 = vld [vmem:[#allocation4 + $0x10] ss:$0 sps:$4 sm:$0x77]  }
 0x5ff   : > { %v9405_v6 = vor.u32 %v9404_v63, %v9400_v31  ;;  %v9440_v25 = vsel %vm9437_vm10, %v9188_v4, %v9266_v8  ;;  %v9213_v62 = vld [vmem:[#allocation4 + $0x8] sm:$0x3] }
 0x600   : > { %v9171_v24 = vsel %vm16291_vm9, 0, %v9163_v46 }
 0x601   : > { %v9177_v37 = vsel %vm18710_vm13, %v9171_v24, 0  ;;  %v9189_v24 = vld [vmem:[#allocation4 + $0x4] sm:$0x3] }
 0x602   : > { %9183 = vst.msk [vmem:[#allocation4 + $0xc] sm:$0x7] %vm9180_vm0, %v9177_v37  ;;  %v9286_v37 = vrot.slane %v15527_v7, 1  ;;  %vm20185_vm0 = vmmov %vm20182_vm6 }
 0x603   : > { %vm20189_vm13 = vmmov %vm20185_vm0 }
 0x609   : > { %v15514_v19 = vld [vmem:[#allocation4 + $0xc] ss:$0 sps:$4 sm:$0x33]  }
 0x60a   : > { %v15516_v27 = vld [vmem:[#allocation4 + $0xc] ss:$0 sps:$4 sm:$0x77]   ;;  %9305 = vrot.lane.b32.xlu0 %v15514_v19, %s16131_s15  ;;  %v9287_v19 = vrot.slane %v15534_v16, 1 }
 0x60b   : > { %v9261_v45 = vshll.u32 %v15516_v27, 16  ;;  %v15517_v2 = vld [vmem:[#allocation4 + $0xc] ss:$0 sps:$4 sm:$0x66]   ;;  %v9259_v0 = vshrl.u32 %v15516_v27, 16 }
 0x60c   : > { %v9363_v26 = vrot.slane %v15517_v2, 1  ;;  %v15523_v14 = vld [vmem:[#allocation4 + $0xc] ss:$0 sps:$4 sm:$0x77]   ;;  %v18825_v2 = vsub.s32 %v9506_v9, %v17898_v32 }
 0x60d   : > { %v9263_v39 = vrot.slane %v9261_v45, 1  ;;  %v9395_v57 = vshll.u32 %v15523_v14, 16  ;;  %v9393_v5 = vshrl.u32 %v15523_v14, 16  ;;  %v15541_v27 = vld [vmem:[#allocation4 + $0xc] ss:$0 sps:$4 sm:$0x66]  }
 0x60e   : > { %9365 = vrot.lane.b32.xlu0 %v9361_v17, %s16131_s15  ;;  %v9288_v47 = vrot.slane %v15541_v27, 1  ;;  %v9191_v51 = vld [vmem:[#allocation4 + $0xc] sm:$0x3] }
 0x60f   : > { %v9264_v55 = vor.u32 %v9263_v39, %v9259_v0  ;;  %v9397_v34 = vrot.slane %v9395_v57, 1  ;;  %v9190_v0 = vld [vmem:[#allocation4 + $0x8] sm:$0x3]  ;;  %v15537_v39 = vld [vmem:[#allocation4 + $0x4] ss:$0 sps:$4 sm:$0x77]  }
 0x610   : > { %v15540_v15 = vld [vmem:[#allocation4 + $0xc] ss:$0 sps:$4 sm:$0x77]   ;;  %v9324_v63 = vshll.u32 %v15537_v39, 16  ;;  %v9322_v8 = vshrl.u32 %v15537_v39, 16 }
 0x611   : > { %9271 = vrot.lane.b32.xlu1 %v9264_v55, %s16131_s15  ;;  %v9398_v11 = vor.u32 %v9397_v34, %v9393_v5  ;;  %v9345_v5 = vshll.u32 %v15547_v23, 16  ;;  %v9214_v9 = vld [vmem:[#allocation4 + $0xc] sm:$0x3] }
 0x612   : > { %9369 = vrot.lane.b32.xlu0 %v9363_v26, %s16131_s15  ;;  %v15544_v26 = vld [vmem:[#allocation4 + $0x8] ss:$0 sps:$4 sm:$0x77]  }
 0x613   : > { %v9331_v61 = vshll.u32 %v15544_v26, 16  ;;  %v9347_v4 = vrot.slane %v9345_v5, 1  ;;  %v15572_v5 = vld [vmem:[#allocation4 + $0x14] ss:$0 sps:$4 sm:$0x66]  }
 0x615   : > { %9307 = vrot.lane.b32.xlu1 %v15518_v54, %s16131_s15  ;;  %v9333_v34 = vrot.slane %v9331_v61, 1  ;;  %v15557_v61 = vld [vmem:[%s20085_s5 + $0xe0] sm:$0xff]  }
 0x616   : > { %9413 = vrot.lane.b32.xlu0 %v9391_v52, %s16131_s15 }
 0x619   : > { %9367 = vrot.lane.b32.xlu1 %v9362_v1, %s16131_s15  ;;  %v9338_v1 = vshll.u32 %v15540_v15, 16 }
 0x61a   : > { %9417 = vrot.lane.b32.xlu0 %v9405_v6, %s16131_s15 }
 0x61b   : > { %v9340_v44 = vrot.slane %v9338_v1, 1  ;;  %v15558_v1 = vld [vmem:[%s20085_s5 + $0xa0] sm:$0xff]  }
 0x61d   : > { %9371 = vrot.lane.b32.xlu1 %v9364_v38, %s16131_s15  ;;  %v9326_v38 = vrot.slane %v9324_v63, 1  ;;  %v15556_v63 = vld [vmem:[%s20085_s5 + $0x98] sm:$0xff]  }
 0x61f   : > { %v9327_v48 = vor.u32 %v9326_v38, %v9322_v8  ;;  %v15563_v38 = vld [vmem:[%s20085_s5 + $0xf8] sm:$0xff]   ;;  %v9436_v8 = vrot.slane %v15572_v5, 1  ;;  %v15629_v5 = vld [vmem:[%s20087_s7 + $0x124] ss:$16 sps:$4 sm:$0xff]  }
 0x621   : > { %9415 = vrot.lane.b32.xlu1 %v9398_v11, %s16131_s15 }
 0x625   : > { %9419 = vrot.lane.b32.xlu1 %v9412_v49, %s16131_s15 }
 0x650   : > { %v9304_v43 = vpop.permute.xlu1 %9303 }
 0x651   : > { %v9455_v13 = vsel %vm9437_vm10, %v9286_v37, %v9304_v43  ;;  %v9215_v37 = vld [vmem:[#allocation4 + $0x10] sm:$0x3] }
 0x659   : > { %v9302_v12 = vpop.permute.xlu0 %9301 }
 0x65a   : > { %v9452_v20 = vsel %vm9437_vm10, %v9285_v41, %v9302_v12  ;;  %v9329_v12 = vshrl.u32 %v15544_v26, 16 }
 0x65b   : > { %v9502_v53 = vcombine.low %v9440_v25, %v9452_v20 }
 0x65c   : > { %v9334_v16 = vor.u32 %v9333_v34, %v9329_v12  ;;  %v15564_v34 = vld [vmem:[%s20085_s5 + $0xb8] sm:$0xff]  }
 0x65d   : > { %v9510_v14 = vrot.slane %v9502_v53, %v18825_v2  ;;  %v15552_v53 = vld [vmem:[%s20085_s5 + $0x88] sm:$0xff]  }
 0x664   : > { %v9270_v46 = vpop.permute.xlu1 %9269 }
 0x665   : > { %v9446_v55 = vsel %vm9437_vm10, %v9190_v0, %v9270_v46  ;;  %v15551_v46 = vld [vmem:[%s20085_s5 + $0xc8] sm:$0xff]  }
 0x667   : > { %v9268_v10 = vpop.permute.xlu0 %9267 }
 0x668   : > { %v9443_v18 = vsel %vm9437_vm10, %v9189_v24, %v9268_v10  ;;  %v9336_v10 = vshrl.u32 %v15540_v15, 16 }
 0x669   : > { %v9526_v17 = vcombine.low %v9443_v18, %v9455_v13  ;;  %v9343_v18 = vshrl.u32 %v15547_v23, 16 }
 0x66a   : > { %v9341_v24 = vor.u32 %v9340_v44, %v9336_v10  ;;  %v15570_v44 = vld [vmem:[#allocation4 + $0xc] ss:$0 sps:$4 sm:$0x66]   ;;  %v16133_v10 = vmov 0.0  }
 0x66b   : > { %v9534_v21 = vrot.slane %v9526_v17, %v18825_v2  ;;  %v9348_v39 = vor.u32 %v9347_v4, %v9343_v18  ;;  %v15567_v4 = vld [vmem:[%s20085_s5 + $0x110] sm:$0xff]  }
 0x66d   : > { %v13925_v35 = vcombine.low %v9510_v14, %v9534_v21 }
 0x66f   : > { %v9687_v11 = vrot.slane %v13925_v35, %v18825_v2 }
 0x67c   : > { %v9306_v59 = vpop.permute.xlu0 %9305 }
 0x67d   : > { %v9458_v56 = vsel %vm9437_vm10, %v9287_v19, %v9306_v59 }
 0x67e   : > { %v9550_v50 = vcombine.low %v9446_v55, %v9458_v56  ;;  %v9216_v56 = vld [vmem:[#allocation4 + $0x14] sm:$0x3] }
 0x680   : > { %v18818_v40 = vpop.permute.xlu0 %9365  ;;  %v9558_v31 = vrot.slane %v9550_v50, %v18825_v2 }
 0x681   : > { %v9464_v13 = vsel %vm9437_vm10, %v9327_v48, %v18818_v40  ;;  %v15553_v40 = vld [vmem:[%s20085_s5 + $0xd0] sm:$0xff]  }
 0x683   : > { %v9272_v45 = vpop.permute.xlu1 %9271 }
 0x684   : > { %v9370_v36 = vpop.permute.xlu0 %9369  ;;  %v9449_v30 = vsel %vm9437_vm10, %v9191_v51, %v9272_v45 }
 0x685   : > { %v9470_v0 = vsel %vm9437_vm10, %v9341_v24, %v9370_v36  ;;  %v15554_v36 = vld [vmem:[%s20085_s5 + $0x90] sm:$0xff]  }
 0x687   : > { %v9308_v29 = vpop.permute.xlu1 %9307 }
 0x688   : > { %v9461_v54 = vsel %vm9437_vm10, %v9288_v47, %v9308_v29  ;;  %v9414_v57 = vpop.permute.xlu0 %9413  ;;  %v15555_v29 = vld [vmem:[%s20085_s5 + $0xd8] sm:$0xff]  }
 0x689   : > { %v9574_v52 = vcombine.low %v9449_v30, %v9461_v54  ;;  %v9476_v41 = vsel %vm9437_vm10, %v9213_v62, %v9414_v57  ;;  %v15560_v57 = vld [vmem:[%s20085_s5 + $0xa8] sm:$0xff]   ;;  %v9434_v62 = vrot.slane %v15570_v44, 1  ;;  %v15632_v44 = vld [vmem:[%s20087_s7 + $0x324] ss:$16 sps:$4 sm:$0xff]  }
 0x68a   : > { %v9503_v17 = vcombine.low %v9464_v13, %v9476_v41  ;;  %v9597_v41 = vrot.slane %v9436_v8, %v18825_v2  ;;  %v15573_v13 = vld [vmem:[%s20087_s7] ss:$16 sps:$4 sm:$0xff]  }
 0x68b   : > { %v9582_v58 = vrot.slane %v9574_v52, %v18825_v2  ;;  %v9368_v6 = vpop.permute.xlu1 %9367 }
 0x68c   : > { %v9418_v43 = vpop.permute.xlu0 %9417  ;;  %v9467_v20 = vsel %vm9437_vm10, %v9334_v16, %v9368_v6  ;;  %v9517_v51 = vrot.slane %v9503_v17, %v18825_v2  ;;  %v15561_v6 = vld [vmem:[%s20085_s5 + $0xf0] sm:$0xff]  }
 0x68d   : > { %v13927_v33 = vcombine.low %v9558_v31, %v9582_v58  ;;  %v9482_v19 = vsel %vm9437_vm10, %v9215_v37, %v9418_v43  ;;  %v15559_v58 = vld [vmem:[%s20085_s5 + $0xe8] sm:$0xff]   ;;  %v15568_v37 = vld [vmem:[%s20085_s5 + $0x118] sm:$0xff]   ;;  %v15581_v17 = vld [vmem:[%s20087_s7 + $0x24] ss:$16 sps:$4 sm:$0xff]  }
 0x68e   : > { %v9551_v55 = vcombine.low %v9470_v0, %v9482_v19  ;;  %v15576_v19 = vld [vmem:[%s20087_s7 + $0x200] ss:$16 sps:$4 sm:$0xff]   ;;  %v15587_v0 = vld [vmem:[%s20087_s7 + $0x44] ss:$16 sps:$4 sm:$0xff]  }
 0x68f   : > { %v9372_v42 = vpop.permute.xlu1 %9371  ;;  %v9701_v49 = vrot.slane %v13927_v33, %v18825_v2  ;;  %v15562_v33 = vld [vmem:[%s20085_s5 + $0xb0] sm:$0xff]  }
 0x690   : > { %v9473_v21 = vsel %vm9437_vm10, %v9348_v39, %v9372_v42  ;;  %v9565_v30 = vrot.slane %v9551_v55, %v18825_v2  ;;  %v15571_v42 = vld [vmem:[#allocation4 + $0x10] ss:$0 sps:$4 sm:$0x66]   ;;  %v15590_v39 = vld [vmem:[%s20087_s7 + $0x244] ss:$16 sps:$4 sm:$0xff]  }
 0x691   : > { %v9709_v7 = vcombine.low %v9687_v11, %v9701_v49  ;;  %v9710_v59 = vcombine.high %v9687_v11, %v9701_v49  ;;  %v15569_v11 = vld [vmem:[#allocation4 + $0x8] ss:$0 sps:$4 sm:$0x66]   ;;  %v15565_v49 = vld [vmem:[%s20085_s5 + $0x100] sm:$0xff]   ;;  %v9435_v43 = vrot.slane %v15571_v42, 1 }
 0x692   : > { %v15588_v55 = vld [vmem:[%s20087_s7 + $0x240] ss:$16 sps:$4 sm:$0xff]  }
 0x693   : > { %v9416_v25 = vpop.permute.xlu1 %9415  ;;  %9985 = vmatprep.mubr.bf16.mxu1 %v9710_v59  ;;  %v15566_v59 = vld [vmem:[%s20085_s5 + $0x108] sm:$0xff]   ;;  %v9573_v48 = vrot.slane %v9435_v43, %v18825_v2 }
 0x694   : > { %v9479_v27 = vsel %vm9437_vm10, %v9214_v9, %v9416_v25  ;;  %9986 = vmatmul.mubr.bf16.vlgmr.msra.gmra.mrb[8].mxu1 %v9709_v7  ;;  %v9433_v7 = vrot.slane %v15569_v11, 1 }
 0x695   : > { %v9527_v45 = vcombine.low %v9467_v20, %v9479_v27  ;;  %14536 = vmatpush3.bf16.msra.mxu1 %v15550_v22  ;;  %v9549_v22 = vrot.slane %v9434_v62, %v18825_v2  ;;  %v9714_v24 = vcombine.low %v9573_v48, %v9597_v41  ;;  %v15575_v20 = vld [vmem:[%s20087_s7 + $0x4] ss:$16 sps:$4 sm:$0xff]   ;;  %v15636_v48 = vld [vmem:[%s20087_s7 + $0x340] ss:$16 sps:$4 sm:$0xff]  }
 0x696   : > { %14537 = vmatprep.subr.bf16.mxu1 %v15551_v46  ;;  %v9525_v16 = vrot.slane %v9433_v7, %v18825_v2  ;;  %v15578_v27 = vld [vmem:[%s20087_s7 + $0x204] ss:$16 sps:$4 sm:$0xff]   ;;  %12346 = vmatprep.subr.bf16.mxu0 %v15575_v20  ;;  %v15651_v20 = vld [vmem:[%s20087_s7 + $0x1a0] ss:$16 sps:$4 sm:$0xff]  }
 0x697   : > { %v9541_v47 = vrot.slane %v9527_v45, %v18825_v2  ;;  %v9420_v26 = vpop.permute.xlu1 %9419  ;;  %v9728_v9 = vrot.slane %v9714_v24, %v18825_v2  ;;  %v15584_v45 = vld [vmem:[%s20087_s7 + $0x224] ss:$16 sps:$4 sm:$0xff]   ;;  %12347 = vmatpush1.bf16.msra.mxu0 %v15573_v13 }
 0x698   : > { %v9485_v50 = vsel %vm9437_vm10, %v9216_v56, %v9420_v26  ;;  %v9713_v46 = vcombine.low %v9525_v16, %v9549_v22  ;;  %v15579_v56 = vld [vmem:[%s20087_s7 + $0x20] ss:$16 sps:$4 sm:$0xff]   ;;  %12348 = vmatprep.subr.bf16.mxu0 %v15581_v17  ;;  %v15596_v26 = vld [vmem:[%s20087_s7 + $0x264] ss:$16 sps:$4 sm:$0xff]  }
 0x699   : > { %v9575_v15 = vcombine.low %v9473_v21, %v9485_v50  ;;  %14538 = vmatpush3.bf16.msra.mxu1 %v15552_v53  ;;  %v13926_v54 = vcombine.low %v9517_v51, %v9541_v47  ;;  %v15582_v53 = vld [vmem:[%s20087_s7 + $0x220] ss:$16 sps:$4 sm:$0xff]   ;;  %v15593_v47 = vld [vmem:[%s20087_s7 + $0x64] ss:$16 sps:$4 sm:$0xff]  }
 0x69a   : > { %14539 = vmatprep.subr.bf16.mxu1 %v15553_v40  ;;  %v9721_v18 = vrot.slane %v9713_v46, %v18825_v2  ;;  %v15585_v40 = vld [vmem:[%s20087_s7 + $0x40] ss:$16 sps:$4 sm:$0xff]   ;;  %v15599_v51 = vld [vmem:[%s20087_s7 + $0x84] ss:$16 sps:$4 sm:$0xff]  }
 0x69b   : > { %v9589_v14 = vrot.slane %v9575_v15, %v18825_v2  ;;  %v9694_v23 = vrot.slane %v13926_v54, %v18825_v2  ;;  %12349 = vmatpush1.bf16.msra.mxu0 %v15579_v56  ;;  %v15591_v21 = vld [vmem:[%s20087_s7 + $0x60] ss:$16 sps:$4 sm:$0xff]   ;;  %v15602_v15 = vld [vmem:[%s20087_s7 + $0x284] ss:$16 sps:$4 sm:$0xff]  }
 0x69c   : > { %v9729_v25 = vcombine.low %v9721_v18, %v9728_v9  ;;  %12350 = vmatprep.subr.bf16.mxu0 %v15587_v0  ;;  %v15594_v50 = vld [vmem:[%s20087_s7 + $0x260] ss:$16 sps:$4 sm:$0xff]   ;;  %v15608_v54 = vld [vmem:[%s20087_s7 + $0x2a4] ss:$16 sps:$4 sm:$0xff]  }
 0x69d   : > { %v13928_v52 = vcombine.low %v9565_v30, %v9589_v14  ;;  %14540 = vmatpush3.bf16.msra.mxu1 %v15554_v36  ;;  %v15597_v36 = vld [vmem:[%s20087_s7 + $0x80] ss:$16 sps:$4 sm:$0xff]   ;;  %v15605_v30 = vld [vmem:[%s20087_s7 + $0xa4] ss:$16 sps:$4 sm:$0xff]  }
 0x69e   : > { %14541 = vmatprep.subr.bf16.mxu1 %v15555_v29  ;;  %v15600_v29 = vld [vmem:[%s20087_s7 + $0x280] ss:$16 sps:$4 sm:$0xff]   ;;  %v15635_v62 = vld [vmem:[%s20087_s7 + $0x144] ss:$16 sps:$4 sm:$0xff]  }
 0x69f   : > { %v9708_v35 = vrot.slane %v13928_v52, %v18825_v2  ;;  %12351 = vmatpush1.bf16.msra.mxu0 %v15585_v40  ;;  %v15603_v14 = vld [vmem:[%s20087_s7 + $0xa0] ss:$16 sps:$4 sm:$0xff]   ;;  %v15638_v7 = vld [vmem:[%s20087_s7 + $0x344] ss:$16 sps:$4 sm:$0xff]  }
 0x6a0   : > { %12352 = vmatprep.subr.bf16.mxu0 %v15593_v47  ;;  %v15606_v52 = vld [vmem:[%s20087_s7 + $0x2a0] ss:$16 sps:$4 sm:$0xff]   ;;  %v15641_v41 = vld [vmem:[%s20087_s7 + $0x164] ss:$16 sps:$4 sm:$0xff]  }
 0x6a1   : > { %14542 = vmatpush3.bf16.msra.mxu1 %v15556_v63  ;;  %v9712_v31 = vcombine.high %v9694_v23, %v9708_v35  ;;  %v9711_v12 = vcombine.low %v9694_v23, %v9708_v35  ;;  %v15611_v63 = vld [vmem:[%s20087_s7 + $0xc4] ss:$16 sps:$4 sm:$0xff]   ;;  %v15609_v23 = vld [vmem:[%s20087_s7 + $0xc0] ss:$16 sps:$4 sm:$0xff]  }
 0x6a2   : > { %14543 = vmatprep.subr.bf16.mxu1 %v15557_v61  ;;  %v15614_v61 = vld [vmem:[%s20087_s7 + $0x2c4] ss:$16 sps:$4 sm:$0xff]   ;;  %v15612_v35 = vld [vmem:[%s20087_s7 + $0x2c0] ss:$16 sps:$4 sm:$0xff]  }
 0x6a3   : > { %10026 = vmatprep.mubr.bf16.mxu1 %v9712_v31  ;;  %12353 = vmatpush1.bf16.msra.mxu0 %v15591_v21  ;;  %v15617_v31 = vld [vmem:[%s20087_s7 + $0xe4] ss:$16 sps:$4 sm:$0xff]   ;;  %v15633_v22 = vld [vmem:[%s20087_s7 + $0x140] ss:$16 sps:$4 sm:$0xff]  }
 0x6a4   : > { %12354 = vmatprep.subr.bf16.mxu0 %v15599_v51  ;;  %v15644_v16 = vld [vmem:[%s20087_s7 + $0x364] ss:$16 sps:$4 sm:$0xff]   ;;  %v15642_v46 = vld [vmem:[%s20087_s7 + $0x360] ss:$16 sps:$4 sm:$0xff]  }
 0x6a5   : > { %14544 = vmatpush3.bf16.msra.mxu1 %v15558_v1  ;;  %v15620_v1 = vld [vmem:[%s20087_s7 + $0x2e4] ss:$16 sps:$4 sm:$0xff]   ;;  %v15645_v18 = vld [vmem:[%s20087_s7 + $0x180] ss:$16 sps:$4 sm:$0xff]  }
 0x6a6   : > { %14545 = vmatprep.subr.bf16.mxu1 %v15559_v58  ;;  %v15615_v58 = vld [vmem:[%s20087_s7 + $0xe0] ss:$16 sps:$4 sm:$0xff]   ;;  %v15647_v24 = vld [vmem:[%s20087_s7 + $0x184] ss:$16 sps:$4 sm:$0xff]  }
 0x6a7   : > { %12355 = vmatpush1.bf16.msra.mxu0 %v15597_v36  ;;  %v15648_v9 = vld [vmem:[%s20087_s7 + $0x380] ss:$16 sps:$4 sm:$0xff]   ;;  %v15656_v13 = vld [vmem:[%s20087_s7 + $0x3a4] ss:$16 sps:$4 sm:$0xff]  }
 0x6a8   : > { %12356 = vmatprep.subr.bf16.mxu0 %v15605_v30  ;;  %v15662_v17 = vld [vmem:[%s20087_s7 + $0x3c4] ss:$16 sps:$4 sm:$0xff]   ;;  %v15660_v56 = vld [vmem:[%s20087_s7 + $0x3c0] ss:$16 sps:$4 sm:$0xff]  }
 0x6a9   : > { %14546 = vmatpush3.bf16.msra.mxu1 %v15560_v57  ;;  %v15618_v57 = vld [vmem:[%s20087_s7 + $0x2e0] ss:$16 sps:$4 sm:$0xff]   ;;  %v15668_v0 = vld [vmem:[%s20087_s7 + $0x3e4] ss:$16 sps:$4 sm:$0xff]  }
 0x6aa   : > { %14547 = vmatprep.subr.bf16.mxu1 %v15561_v6  ;;  %v15623_v6 = vld [vmem:[%s20087_s7 + $0x104] ss:$16 sps:$4 sm:$0xff]   ;;  %v15666_v40 = vld [vmem:[%s20087_s7 + $0x3e0] ss:$16 sps:$4 sm:$0xff]  }
 0x6ab   : > { %12357 = vmatpush1.bf16.msra.mxu0 %v15603_v14  ;;  %v15674_v47 = vld [vmem:[%s20087_s7 + $0x404] ss:$16 sps:$4 sm:$0xff]  }
 0x6ac   : > { %12358 = vmatprep.subr.bf16.mxu0 %v15611_v63 }
 0x6ad   : > { %14548 = vmatpush3.bf16.msra.mxu1 %v15562_v33  ;;  %v15626_v33 = vld [vmem:[%s20087_s7 + $0x304] ss:$16 sps:$4 sm:$0xff]  }
 0x6ae   : > { %14549 = vmatprep.subr.bf16.mxu1 %v15563_v38  ;;  %v15621_v38 = vld [vmem:[%s20087_s7 + $0x100] ss:$16 sps:$4 sm:$0xff]  }
 0x6af   : > { %12359 = vmatpush1.bf16.msra.mxu0 %v15609_v23 }
 0x6b0   : > { %12360 = vmatprep.subr.bf16.mxu0 %v15617_v31 }
 0x6b1   : > { %14550 = vmatpush3.bf16.msra.mxu1 %v15564_v34  ;;  %v15624_v34 = vld [vmem:[%s20087_s7 + $0x300] ss:$16 sps:$4 sm:$0xff]  }
 0x6b2   : > { %15020 = vmatprep.subr.bf16.mxu1 %v16133_v10 }
 0x6b3   : > { %12361 = vmatpush1.bf16.msra.mxu0 %v15615_v58 }
 0x6b4   : > { %10027 = vmatmul.mubr.bf16.vlgmr.msra.gmra.mrb[12].mxu1 %v9711_v12  ;;  %12362 = vmatprep.subr.bf16.mxu0 %v15623_v6 }
 0x6b5   : > { %15021 = vmatpush3.bf16.msra.mxu1 %v15565_v49  ;;  %15028 = vmatprep.mubr.msk.bf16.mxu1 %vm16134_vm14, %v16133_v10  ;;  %v15627_v49 = vld [vmem:[%s20087_s7 + $0x120] ss:$16 sps:$4 sm:$0xff]   ;;  %vm20191_vm14 = vmmov %vm20185_vm0 }
 0x6b6   : > { %15022 = vmatprep.subr.bf16.mxu1 %v16133_v10 }
 0x6b7   : > { %12363 = vmatpush1.bf16.msra.mxu0 %v15621_v38 }
 0x6b8   : > { %12364 = vmatprep.subr.bf16.mxu0 %v15629_v5 }
 0x6b9   : > { %15023 = vmatpush3.bf16.msra.mxu1 %v15566_v59 }
 0x6ba   : > { %15024 = vmatprep.subr.bf16.mxu1 %v16133_v10 }
 0x6bb   : > { %12365 = vmatpush1.bf16.msra.mxu0 %v15627_v49 }
 0x6bc   : > { %12366 = vmatprep.subr.bf16.mxu0 %v15635_v62 }
 0x6bd   : > { %15025 = vmatpush3.bf16.msra.mxu1 %v15567_v4  ;;  %v15639_v4 = vld [vmem:[%s20087_s7 + $0x160] ss:$16 sps:$4 sm:$0xff]  }
 0x6be   : > { %15026 = vmatprep.subr.bf16.mxu1 %v16133_v10  ;;  %v15630_v10 = vld [vmem:[%s20087_s7 + $0x320] ss:$16 sps:$4 sm:$0xff]  }
 0x6bf   : > { %12367 = vmatpush1.bf16.msra.mxu0 %v15633_v22 }
 0x6c0   : > { %12368 = vmatprep.subr.bf16.mxu0 %v15641_v41 }
 0x6c1   : > { %15027 = vmatpush3.bf16.msra.mxu1 %v15568_v37  ;;  %v15650_v37 = vld [vmem:[%s20087_s7 + $0x384] ss:$16 sps:$4 sm:$0xff]  }
 0x6c2   : > { %12387 = vmatprep.subr.bf16.mxu1 %v15578_v27  ;;  %v15659_v27 = vld [vmem:[%s20087_s7 + $0x1c4] ss:$16 sps:$4 sm:$0xff]  }
 0x6c3   : > { %12369 = vmatpush1.bf16.msra.mxu0 %v15639_v4 }
 0x6c4   : > { %15029 = vmatmul.mubr.msk.bf16.vlgmr.msra.gmra.mrb[16].mxu1 %vm9437_vm10, %v9729_v25  ;;  %12370 = vmatprep.subr.bf16.mxu0 %v15647_v24  ;;  %v15653_v25 = vld [vmem:[%s20087_s7 + $0x1a4] ss:$16 sps:$4 sm:$0xff]   ;;  %vm20190_vm10 = vmmov %vm20185_vm0 }
 0x6c5   : > { %12388 = vmatpush1.bf16.msra.mxu1 %v15576_v19  ;;  %v15654_v19 = vld [vmem:[%s20087_s7 + $0x3a0] ss:$16 sps:$4 sm:$0xff]  }
 0x6c6   : > { %12389 = vmatprep.subr.bf16.mxu1 %v15584_v45  ;;  %v15657_v45 = vld [vmem:[%s20087_s7 + $0x1c0] ss:$16 sps:$4 sm:$0xff]  }
 0x6c7   : > { %12371 = vmatpush1.bf16.msra.mxu0 %v15645_v18 }
 0x6c8   : > { %12372 = vmatprep.subr.bf16.mxu0 %v15653_v25 }
 0x6c9   : > { %12390 = vmatpush1.bf16.msra.mxu1 %v15582_v53  ;;  %v15665_v53 = vld [vmem:[%s20087_s7 + $0x1e4] ss:$16 sps:$4 sm:$0xff]  }
 0x6ca   : > { %12391 = vmatprep.subr.bf16.mxu1 %v15590_v39  ;;  %v15663_v39 = vld [vmem:[%s20087_s7 + $0x1e0] ss:$16 sps:$4 sm:$0xff]  }
 0x6cb   : > { %12373 = vmatpush1.bf16.msra.mxu0 %v15651_v20 }
 0x6cc   : > { %12374 = vmatprep.subr.bf16.mxu0 %v15659_v27 }
 0x6cd   : > { %12392 = vmatpush1.bf16.msra.mxu1 %v15588_v55  ;;  %v15671_v55 = vld [vmem:[%s20087_s7 + $0x804] ss:$16 sps:$4 sm:$0xff]  }
 0x6ce   : > { %12393 = vmatprep.subr.bf16.mxu1 %v15596_v26  ;;  %v13924_v26 = vld [vmem:[%s20086_s6] ss:$0 sm:$0xff] }
 0x6cf   : > { %12375 = vmatpush1.bf16.msra.mxu0 %v15657_v45 }
 0x6d0   : > { %12376 = vmatprep.subr.bf16.mxu0 %v15665_v53 }
 0x6d1   : > { %12394 = vmatpush1.bf16.msra.mxu1 %v15594_v50 }
 0x6d2   : > { %12395 = vmatprep.subr.bf16.mxu1 %v15602_v15 }
 0x6d3   : > { %12377 = vmatpush1.bf16.msra.mxu0 %v15663_v39 }
 0x6d4   : > { %12510 = vmatprep.subr.bf16.mxu0 %v15671_v55 }
 0x6d5   : > { %12396 = vmatpush1.bf16.msra.mxu1 %v15600_v29 }
 0x6d6   : > { %12397 = vmatprep.subr.bf16.mxu1 %v15608_v54 }
 0x6d9   : > { %12398 = vmatpush1.bf16.msra.mxu1 %v15606_v52 }
 0x6da   : > { %12399 = vmatprep.subr.bf16.mxu1 %v15614_v61 }
 0x6dd   : > { %12400 = vmatpush1.bf16.msra.mxu1 %v15612_v35 }
 0x6de   : > { %12401 = vmatprep.subr.bf16.mxu1 %v15620_v1 }
 0x6e1   : > { %12402 = vmatpush1.bf16.msra.mxu1 %v15618_v57 }
 0x6e2   : > { %12403 = vmatprep.subr.bf16.mxu1 %v15626_v33 }
 0x6e5   : > { %12404 = vmatpush1.bf16.msra.mxu1 %v15624_v34 }
 0x6e6   : > { %12405 = vmatprep.subr.bf16.mxu1 %v15632_v44 }
 0x6e9   : > { %12406 = vmatpush1.bf16.msra.mxu1 %v15630_v10 }
 0x6ea   : > { %12407 = vmatprep.subr.bf16.mxu1 %v15638_v7 }
 0x6ed   : > { %12408 = vmatpush1.bf16.msra.mxu1 %v15636_v48 }
 0x6ee   : > { %12409 = vmatprep.subr.bf16.mxu1 %v15644_v16 }
 0x6f1   : > { %12410 = vmatpush1.bf16.msra.mxu1 %v15642_v46 }
 0x6f2   : > { %12411 = vmatprep.subr.bf16.mxu1 %v15650_v37 }
 0x6f5   : > { %12412 = vmatpush1.bf16.msra.mxu1 %v15648_v9 }
 0x6f6   : > { %12413 = vmatprep.subr.bf16.mxu1 %v15656_v13 }
 0x6f9   : > { %12414 = vmatpush1.bf16.msra.mxu1 %v15654_v19 }
 0x6fa   : > { %12415 = vmatprep.subr.bf16.mxu1 %v15662_v17 }
 0x6fd   : > { %12416 = vmatpush1.bf16.msra.mxu1 %v15660_v56 }
 0x6fe   : > { %12417 = vmatprep.subr.bf16.mxu1 %v15668_v0 }
 0x701   : > { %12418 = vmatpush1.bf16.msra.mxu1 %v15666_v40 }
 0x702   : > { %12428 = vmatprep.subr.bf16.mxu1 %v15674_v47 }
 0x767   : > { %v14529_v42 = vpop.f32.mrb[8].mxu1 }
 0x768   : > { %v14530_v11 = vpop.f32.mrb[9].mxu1 }
 0x769   : > { %v19032_v8 = vadd.f32 %v14530_v11, %v14529_v42  ;;  %v14532_v12 = vpop.f32.mrb[10].mxu1 }
 0x76a   : > { %v14533_v43 = vpop.f32.mrb[11].mxu1 }
 0x76b   : > { %v14534_v59 = vadd.f32 %v14533_v43, %v14532_v12  ;;  %v9988_v51 = vadd.f32 %v19032_v8, %v13924_v26 }
 0x76d   : > { %v9991_v30 = vadd.f32 %v14534_v59, %v13924_v26 }
 0x787   : > { %v14551_v21 = vpop.f32.mrb[12].mxu1 }
 0x788   : > { %v14552_v50 = vpop.f32.mrb[13].mxu1 }
 0x789   : > { %v14553_v15 = vadd.f32 %v14552_v50, %v14551_v21  ;;  %v14554_v36 = vpop.f32.mrb[14].mxu1 }
 0x78a   : > { %v14555_v29 = vpop.f32.mrb[15].mxu1 }
 0x78b   : > { %v14556_v54 = vadd.f32 %v14555_v29, %v14554_v36  ;;  %v10029_v14 = vadd.f32 %v14553_v15, %v9988_v51 }
 0x78d   : > { %v10032_v52 = vadd.f32 %v14556_v54, %v9991_v30 }
 0x797   : > { %v10069_v63 = vpop.f32.mrb[16].mxu1 }
 0x798   : > { %v10070_v61 = vadd.f32 %v10069_v63, %v10029_v14  ;;  %v15030_v23 = vpop.f32.mrb[17].mxu1 }
 0x799   : > { %v10072_v35 = vpop.f32.mrb[18].mxu1 }
 0x79a   : > { %v10076_v31 = vmax.f32 %v10070_v61, 0.0  ;;  %v10073_v1 = vadd.f32 %v10072_v35, %v10032_v52  ;;  %v15031_v58 = vpop.f32.mrb[19].mxu1 }
 0x79c   : > { %v10080_v57 = vcombine.high %v10076_v31, %v10076_v31  ;;  %v10084_v6 = vpack.c.bf16 %v10076_v31, %v10076_v31  ;;  %v10077_v33 = vmax.f32 %v10073_v1, 0.0 }
 0x79e   : > { %v10085_v38 = vpack.c.bf16 %v10080_v57, %v10080_v57  ;;  %v10081_v34 = vcombine.high %v10077_v33, %v10077_v33  ;;  %v10086_v5 = vpack.c.bf16 %v10077_v33, %v10077_v33  ;;  %v10089_v44 = vsel %vm20178_vm15, %v10084_v6, 4286644096  ;;  %vm20192_vm15 = vmmov %vm20185_vm0 }
 0x7a0   : > { %v10092_v42 = vsel %vm20179_vm3, %v10085_v38, 4286644096  ;;  %v10087_v11 = vpack.c.bf16 %v10081_v34, %v10081_v34  ;;  %v10096_v8 = vsel %vm20180_vm4, %v10086_v5, 4286644096  ;;  %vm20193_vm3 = vmmov %vm20185_vm0 }
 0x7a1   : > { %v10094_v49 = vmax.bf16 %v10092_v42, %v10089_v44  ;;  %vm20194_vm4 = vmmov %vm20185_vm0 }
 0x7a2   : > { %v10099_v12 = vsel %vm20181_vm5, %v10087_v11, 4286644096  ;;  %v13966_v11 = vld.sshfl [vmem:[#allocation5] sm:$0x3 pattern:$0x76325410]  ;;  %vm20195_vm5 = vmmov %vm20185_vm0 }
 0x7a3   : > { %v10110_v10 = vrot.slane %v10094_v49, %v17902_v28  ;;  %v10101_v62 = vmax.bf16 %v10099_v12, %v10096_v8 }
 0x7a5   : > { %v10111_v43 = vcombine.high %v10110_v10, %v10110_v10  ;;  %v10118_v7 = vrot.slane %v10110_v10, %v17902_v28  ;;  %v10132_v59 = vrot.slane %v10101_v62, %v17902_v28 }
 0x7a7   : > { %v10125_v22 = vrot.slane %v10111_v43, %v17902_v28  ;;  %v10149_v48 = vsel %vm20182_vm6, %v10118_v7, 4286644096  ;;  %v10133_v41 = vcombine.high %v10132_v59, %v10132_v59  ;;  %v10140_v16 = vrot.slane %v10132_v59, %v17902_v28  ;;  %vm20196_vm6 = vmmov %vm20185_vm0 }
 0x7a8   : > { %v10151_v4 = vunpack.i.l.bf16 %v10149_v48  ;;  %v10152_v46 = vunpack.i.h.bf16 %v10149_v48  ;;  %v10265_v43 = vshll.u32 %v13966_v11, 16  ;;  %v13975_v48 = vld.sshfl [vmem:[#allocation5 + $0x6] sm:$0x3 pattern:$0x76325410] }
 0x7a9   : > { %v10162_v24 = vsel %vm20183_vm7, %v10125_v22, 4286644096  ;;  %v10147_v37 = vrot.slane %v10133_v41, %v17902_v28  ;;  %v10175_v18 = vsel %vm20184_vm11, %v10140_v16, 4286644096  ;;  %vm20197_vm7 = vmmov %vm20185_vm0 }
 0x7aa   : > { %v10153_v9 = vmax.f32 %v10151_v4, %v10152_v46  ;;  %v10164_v25 = vunpack.i.l.bf16 %v10162_v24  ;;  %v10165_v13 = vunpack.i.h.bf16 %v10162_v24  ;;  %v10177_v20 = vunpack.i.l.bf16 %v10175_v18  ;;  %v13968_v24 = vld.sshfl [vmem:[#allocation5] sm:$0x2 pattern:$0x76325410]  ;;  %vm20198_vm11 = vmmov %vm20185_vm0 }
 0x7ab   : > { %v10178_v19 = vunpack.i.h.bf16 %v10175_v18  ;;  %v10188_v27 = vsel %vm20185_vm0, %v10147_v37, 4286644096  ;;  %v10263_v4 = vshrl.u32 %v13966_v11, 16  ;;  %v10267_v46 = vrot.slane %v10265_v43, 1 }
 0x7ac   : > { %v10154_v17 = vrot.slane %v10153_v9, 4  ;;  %v10166_v45 = vmax.f32 %v10164_v25, %v10165_v13  ;;  %v10190_v56 = vunpack.i.l.bf16 %v10188_v27  ;;  %v10191_v53 = vunpack.i.h.bf16 %v10188_v27  ;;  %v10227_v25 = vld [vmem:[#allocation5] sm:$0x1] }
 0x7ad   : > { %v10179_v0 = vmax.f32 %v10177_v20, %v10178_v19  ;;  %v10368_v37 = vshll.u32 %v13975_v48, 16  ;;  %v10268_v18 = vor.u32 %v10267_v46, %v10263_v4  ;;  %v10366_v13 = vshrl.u32 %v13975_v48, 16  ;;  %v15669_v4 = vld [vmem:[%s20087_s7 + $0x800] ss:$16 sps:$4 sm:$0xff]  }
 0x7ae   : > { %v10155_v39 = vmax.f32 %v10153_v9, %v10154_v17  ;;  %v10167_v40 = vrot.slane %v10166_v45, 4  ;;  %v10192_v55 = vmax.f32 %v10190_v56, %v10191_v53  ;;  %v10292_v9 = vrot.slane %v13968_v24, 1  ;;  %v15677_v24 = vld [vmem:[%s20087_s7 + $0x824] ss:$16 sps:$4 sm:$0xff]  }
 0x7af   : > { %v10180_v47 = vrot.slane %v10179_v0, 4  ;;  %v10370_v20 = vrot.slane %v10368_v37, 1  ;;  %v10396_v53 = vcombine.low %v10227_v25, %v10268_v18  ;;  %v15672_v18 = vld [vmem:[%s20087_s7 + $0x400] ss:$16 sps:$4 sm:$0xff]   ;;  %v15680_v25 = vld [vmem:[%s20087_s7 + $0x424] ss:$16 sps:$4 sm:$0xff]  }
 0x7b0   : > { %v10156_v26 = vrot.slane %v10155_v39, 2  ;;  %v10168_v21 = vmax.f32 %v10166_v45, %v10167_v40  ;;  %v10193_v50 = vrot.slane %v10192_v55, 4 }
 0x7b1   : > { %v10181_v51 = vmax.f32 %v10179_v0, %v10180_v47  ;;  %v10371_v40 = vor.u32 %v10370_v20, %v10366_v13  ;;  %v15675_v20 = vld [vmem:[%s20087_s7 + $0x820] ss:$16 sps:$4 sm:$0xff]  }
 0x7b2   : > { %v10157_v15 = vmax.f32 %v10155_v39, %v10156_v26  ;;  %v10169_v36 = vrot.slane %v10168_v21, 2  ;;  %v10194_v29 = vmax.f32 %v10192_v55, %v10193_v50  ;;  %v10241_v26 = vld [vmem:[#allocation5 + $0x6] sm:$0x1] }
 0x7b3   : > { %v10182_v30 = vrot.slane %v10181_v51, 2 }
 0x7b4   : > { %v10158_v54 = vrot.slane %v10157_v15, 1  ;;  %v10170_v14 = vmax.f32 %v10168_v21, %v10169_v36  ;;  %v10195_v52 = vrot.slane %v10194_v29, 2 }
 0x7b5   : > { %v10183_v63 = vmax.f32 %v10181_v51, %v10182_v30  ;;  %v10406_v51 = vrot.slane %v10396_v53, %v17902_v28  ;;  %v15684_v53 = vld [vmem:[%s20087_s7 + $0x440] ss:$16 sps:$4 sm:$0xff]  }
 0x7b6   : > { %v10159_v61 = vmax.f32 %v10157_v15, %v10158_v54  ;;  %v10171_v23 = vrot.slane %v10170_v14, 1  ;;  %v10196_v35 = vmax.f32 %v10194_v29, %v10195_v52  ;;  %v10462_v52 = vcombine.low %v10241_v26, %v10371_v40  ;;  %v15695_v40 = vld [vmem:[%s20087_s7 + $0x884] ss:$16 sps:$4 sm:$0xff]  }
 0x7b7   : > { %v10184_v31 = vrot.slane %v10183_v63, 1  ;;  %v15698_v26 = vld [vmem:[%s20087_s7 + $0x484] ss:$16 sps:$4 sm:$0xff]  }
 0x7b8   : > { %v10160_v1 = vpack.i.bf16 %v10159_v61, %v10159_v61  ;;  %v10172_v58 = vmax.f32 %v10170_v14, %v10171_v23  ;;  %v10197_v57 = vrot.slane %v10196_v35, 1 }
 0x7b9   : > { %v10185_v6 = vmax.f32 %v10183_v63, %v10184_v31 }
 0x7ba   : > { %v10173_v33 = vpack.i.bf16 %v10172_v58, %v10172_v58  ;;  %v10198_v38 = vmax.f32 %v10196_v35, %v10197_v57  ;;  %v10204_v5 = vunpack.c.l.b16 %v10160_v1 }
 0x7bb   : > { %v10186_v34 = vpack.i.bf16 %v10185_v6, %v10185_v6 }
 0x7bc   : > { %v10205_v44 = vunpack.c.l.b16 %v10173_v33  ;;  %v10199_v42 = vpack.i.bf16 %v10198_v38, %v10198_v38  ;;  %v10490_v38 = vrot.slane %v10462_v52, %v17902_v28 }
 0x7bd   : > { %v10206_v8 = vunpack.c.l.b16 %v10186_v34 }
 0x7be   : > { %v10208_v49 = vsel %vm6978_vm2, %v10205_v44, %v10204_v5  ;;  %v10207_v12 = vunpack.c.l.b16 %v10199_v42 }
 0x7bf   : > { %v10210_v10 = vpack.c.b16 %v10208_v49, %v10208_v49 }
 0x7c0   : > { %v10209_v62 = vsel %vm6978_vm2, %v10207_v12, %v10206_v8  ;;  %vm20188_vm2 = vmmov %vm20185_vm0 }
 0x7c1   : > { %v10214_v7 = vsel %vm16291_vm9, 0, %v10210_v10  ;;  %v10211_v59 = vpack.c.b16 %v10209_v62, %v10209_v62 }
 0x7c2   : > { %v10219_v22 = vsel %vm10218_vm12, %v10214_v7, 0 }
 0x7c3   : > { %10222 = vst [vmem:[#allocation5 + $0x2] sm:$0x3] %v10219_v22  ;;  %v10215_v41 = vsel %vm16291_vm9, 0, %v10211_v59  ;;  %vm20187_vm9 = vmmov %vm20185_vm0 }
 0x7c4   : > { %v10220_v16 = vsel %vm10218_vm12, %v10215_v41, 0 }
 0x7c5   : > { %10223 = vst [vmem:[#allocation5 + $0x4] sm:$0x3] %v10220_v16 }
 0x7ca   : > { %v13967_v19 = vld.sshfl [vmem:[#allocation5 + $0x2] sm:$0x3 pattern:$0x76325410] }
 0x7cb   : > { %v13969_v27 = vld.sshfl [vmem:[#allocation5 + $0x2] sm:$0x2 pattern:$0x76325410]  ;;  %v10233_v17 = vld [vmem:[#allocation5 + $0x2] sm:$0x1] }
 0x7cc   : > { %v10272_v45 = vshll.u32 %v13967_v19, 16  ;;  %v10293_v56 = vrot.slane %v13969_v27, 1  ;;  %v10397_v0 = vcombine.low %v10292_v9, %v10233_v17  ;;  %v10234_v3 = vld [vmem:[#allocation5 + $0x4] sm:$0x1]  ;;  %v10270_v55 = vshrl.u32 %v13967_v19, 16 }
 0x7cd   : > { %v13971_v39 = vld.sshfl [vmem:[#allocation5 + $0x4] sm:$0x3 pattern:$0x76325410]  ;;  %v10228_v30 = vld [vmem:[#allocation5 + $0x2] sm:$0x1] }
 0x7ce   : > { %v10274_v47 = vrot.slane %v10272_v45, 1  ;;  %v10320_v21 = vshll.u32 %v13971_v39, 16  ;;  %v10413_v15 = vrot.slane %v10397_v0, %v17902_v28  ;;  %v10460_v36 = vcombine.low %v10293_v56, %v10234_v3  ;;  %v19142_v29 = vld.sshfl [vmem:[#allocation5 + $0x4] sm:$0x2 pattern:$0x76325410] }
 0x7cf   : > { %v10318_v54 = vshrl.u32 %v13971_v39, 16  ;;  %v10341_v23 = vrot.slane %v19142_v29, 1  ;;  %v10240_v57 = vld [vmem:[#allocation5 + $0x4] sm:$0x1]  ;;  %v15678_v27 = vld [vmem:[%s20087_s7 + $0x420] ss:$16 sps:$4 sm:$0xff]  }
 0x7d0   : > { %v10275_v50 = vor.u32 %v10274_v47, %v10270_v55  ;;  %v10322_v14 = vrot.slane %v10320_v21, 1  ;;  %v10428_v31 = vcombine.low %v10406_v51, %v10413_v15  ;;  %v10476_v58 = vrot.slane %v10460_v36, %v17902_v28  ;;  %v15683_v19 = vld [vmem:[%s20087_s7 + $0x844] ss:$16 sps:$4 sm:$0xff]   ;;  %v15681_v45 = vld [vmem:[%s20087_s7 + $0x840] ss:$16 sps:$4 sm:$0xff]  }
 0x7d1   : > { %v15686_v17 = vld [vmem:[%s20087_s7 + $0x444] ss:$16 sps:$4 sm:$0xff]   ;;  %v15687_v39 = vld [vmem:[%s20087_s7 + $0x860] ss:$16 sps:$4 sm:$0xff]   ;;  %v10451_v51 = vrot.slane %v10341_v23, %v17902_v28 }
 0x7d2   : > { %v10459_v63 = vcombine.low %v10228_v30, %v10275_v50  ;;  %v10323_v61 = vor.u32 %v10322_v14, %v10318_v54  ;;  %v10398_v35 = vcombine.low %v10275_v50, %v10293_v56  ;;  %v10436_v11 = vrot.slane %v10428_v31, %v17902_v28  ;;  %v15689_v56 = vld [vmem:[%s20087_s7 + $0x864] ss:$16 sps:$4 sm:$0xff]   ;;  %v15690_v47 = vld [vmem:[%s20087_s7 + $0x460] ss:$16 sps:$4 sm:$0xff]  }
 0x7d3   : > { %v13977_v0 = vld.sshfl [vmem:[#allocation5 + $0x6] sm:$0x2 pattern:$0x76325410]  ;;  %v15693_v21 = vld [vmem:[%s20087_s7 + $0x880] ss:$16 sps:$4 sm:$0xff]   ;;  %v10458_v14 = vrot.slane %v10451_v51, %v17902_v28 }
 0x7d4   : > { %v10469_v1 = vrot.slane %v10459_v63, %v17902_v28  ;;  %v10399_v6 = vcombine.low %v10240_v57, %v10323_v61  ;;  %v10461_v33 = vcombine.low %v10323_v61, %v10341_v23  ;;  %v10420_v5 = vrot.slane %v10398_v35, %v17902_v28  ;;  %v15692_v3 = vld [vmem:[%s20087_s7 + $0x464] ss:$16 sps:$4 sm:$0xff]   ;;  %v15696_v36 = vld [vmem:[%s20087_s7 + $0x480] ss:$16 sps:$4 sm:$0xff]  }
 0x7d5   : > { %v10389_v55 = vrot.slane %v13977_v0, 1  ;;  %v15701_v50 = vld [vmem:[%s20087_s7 + $0x8a4] ss:$16 sps:$4 sm:$0xff]   ;;  %v15699_v54 = vld [vmem:[%s20087_s7 + $0x8a0] ss:$16 sps:$4 sm:$0xff]  }
 0x7d6   : > { %v10491_v34 = vcombine.low %v10469_v1, %v10476_v58  ;;  %v10427_v44 = vrot.slane %v10399_v6, %v17902_v28  ;;  %v10483_v42 = vrot.slane %v10461_v33, %v17902_v28  ;;  %v15704_v30 = vld [vmem:[%s20087_s7 + $0x4a4] ss:$16 sps:$4 sm:$0xff]   ;;  %v15702_v63 = vld [vmem:[%s20087_s7 + $0x4a0] ss:$16 sps:$4 sm:$0xff]  }
 0x7d7   : > { %v10514_v15 = vrot.slane %v10389_v55, %v17902_v28  ;;  %v15707_v29 = vld [vmem:[%s20087_s7 + $0x8c4] ss:$16 sps:$4 sm:$0xff]   ;;  %v15705_v23 = vld [vmem:[%s20087_s7 + $0x8c0] ss:$16 sps:$4 sm:$0xff]  }
 0x7d8   : > { %v10499_v49 = vrot.slane %v10491_v34, %v17902_v28  ;;  %v10429_v8 = vcombine.low %v10420_v5, %v10427_v44  ;;  %v10492_v12 = vcombine.low %v10483_v42, %v10490_v38  ;;  %v15710_v61 = vld [vmem:[%s20087_s7 + $0x4c4] ss:$16 sps:$4 sm:$0xff]   ;;  %v15708_v1 = vld [vmem:[%s20087_s7 + $0x4c0] ss:$16 sps:$4 sm:$0xff]  }
 0x7d9   : > { %v10521_v52 = vrot.slane %v10514_v15, %v17902_v28  ;;  %v15713_v35 = vld [vmem:[%s20087_s7 + $0x8e4] ss:$16 sps:$4 sm:$0xff]   ;;  %v15711_v57 = vld [vmem:[%s20087_s7 + $0x8e0] ss:$16 sps:$4 sm:$0xff]  }
 0x7da   : > { %v13978_v10 = vcombine.low %v10436_v11, %v10499_v49  ;;  %v10443_v62 = vrot.slane %v10429_v8, %v17902_v28  ;;  %v10506_v43 = vrot.slane %v10492_v12, %v17902_v28  ;;  %v15716_v58 = vld [vmem:[%s20087_s7 + $0x4e4] ss:$16 sps:$4 sm:$0xff]   ;;  %v15714_v33 = vld [vmem:[%s20087_s7 + $0x4e0] ss:$16 sps:$4 sm:$0xff]  }
 0x7db   : > { %v10882_v31 = vcombine.low %v10458_v14, %v10521_v52  ;;  %v15719_v38 = vld [vmem:[%s20087_s7 + $0x504] ss:$16 sps:$4 sm:$0xff]   ;;  %v15717_v5 = vld [vmem:[%s20087_s7 + $0x500] ss:$16 sps:$4 sm:$0xff]  }
 0x7dc   : > { %v10840_v7 = vrot.slane %v13978_v10, %v17902_v28  ;;  %v13979_v59 = vcombine.low %v10443_v62, %v10506_v43  ;;  %v15722_v44 = vld [vmem:[%s20087_s7 + $0x524] ss:$16 sps:$4 sm:$0xff]   ;;  %v15720_v42 = vld [vmem:[%s20087_s7 + $0x520] ss:$16 sps:$4 sm:$0xff]  }
 0x7dd   : > { %v10889_v6 = vrot.slane %v10882_v31, %v17902_v28  ;;  %v15725_v11 = vld [vmem:[%s20087_s7 + $0x544] ss:$16 sps:$4 sm:$0xff]   ;;  %v15723_v49 = vld [vmem:[%s20087_s7 + $0x540] ss:$16 sps:$4 sm:$0xff]  }
 0x7de   : > { %v10848_v22 = vcombine.high %v10840_v7, %v10840_v7  ;;  %v19159_v48 = vrot.slane %v10840_v7, %v17902_v28  ;;  %v19162_v41 = vrot.slane %v13979_v59, %v17902_v28  ;;  %v15728_v8 = vld [vmem:[%s20087_s7 + $0x564] ss:$16 sps:$4 sm:$0xff]   ;;  %v15726_v12 = vld [vmem:[%s20087_s7 + $0x560] ss:$16 sps:$4 sm:$0xff]  }
 0x7df   : > { %v19287_v34 = vrot.slane %v10889_v6, %v17902_v28  ;;  %v15731_v10 = vld [vmem:[%s20087_s7 + $0x584] ss:$16 sps:$4 sm:$0xff]   ;;  %v15729_v62 = vld [vmem:[%s20087_s7 + $0x580] ss:$16 sps:$4 sm:$0xff]   ;;  %v15794_v6 = vld [vmem:[%s20087_s7 + $0x2c] ss:$16 sps:$4 sm:$0xff]  }
 0x7e0   : > { %v19165_v16 = vrot.slane %v10848_v22, %v17902_v28  ;;  %v10849_v46 = vcombine.high %v19162_v41, %v19162_v41  ;;  %v19186_v9 = vcombine.high %v19159_v48, %v19159_v48  ;;  %v15734_v43 = vld [vmem:[%s20087_s7 + $0x5a4] ss:$16 sps:$4 sm:$0xff]   ;;  %v15732_v7 = vld [vmem:[%s20087_s7 + $0x5a0] ss:$16 sps:$4 sm:$0xff]  }
 0x7e1   : > { %v15737_v59 = vld [vmem:[%s20087_s7 + $0x5c4] ss:$16 sps:$4 sm:$0xff]   ;;  %v15735_v22 = vld [vmem:[%s20087_s7 + $0x5c0] ss:$16 sps:$4 sm:$0xff]  }
 0x7e2   : > { %12378 = vmatprep.mubr.bf16.mxu0 %v19165_v16  ;;  %v19178_v37 = vcombine.high %v19165_v16, %v19165_v16  ;;  %v19193_v13 = vrot.slane %v10849_v46, %v17902_v28  ;;  %v15738_v46 = vld [vmem:[%s20087_s7 + $0x5e0] ss:$16 sps:$4 sm:$0xff]   ;;  %v15758_v0 = vld [vmem:[%s20087_s7 + $0x6a4] ss:$16 sps:$4 sm:$0xff]  }
 0x7e3   : > { %12379 = vmatmul.mubr.bf16.vlgmr.msra.gmra.mrb[32].mxu0 %v19159_v48  ;;  %v15764_v55 = vld [vmem:[%s20087_s7 + $0x6e4] ss:$16 sps:$4 sm:$0xff]   ;;  %v15768_v51 = vld [vmem:[%s20087_s7 + $0x720] ss:$16 sps:$4 sm:$0xff]  }
 0x7e4   : > { %12511 = vmatpush1.bf16.msra.mxu0 %v15669_v4  ;;  %12419 = vmatprep.mubr.bf16.mxu1 %v19178_v37  ;;  %v15740_v4 = vld [vmem:[%s20087_s7 + $0x5e4] ss:$16 sps:$4 sm:$0xff]   ;;  %v15777_v14 = vld [vmem:[%s20087_s7 + $0x780] ss:$16 sps:$4 sm:$0xff]  }
 0x7e5   : > { %12420 = vmatmul.mubr.bf16.vlgmr.msra.gmra.mrb[20].mxu1 %v19186_v9  ;;  %12512 = vmatprep.subr.bf16.mxu0 %v15677_v24  ;;  %v15743_v24 = vld [vmem:[%s20087_s7 + $0x604] ss:$16 sps:$4 sm:$0xff]   ;;  %v15786_v31 = vld [vmem:[%s20087_s7 + $0x7e0] ss:$16 sps:$4 sm:$0xff]  }
 0x7e6   : > { %12429 = vmatpush1.bf16.msra.mxu1 %v15672_v18  ;;  %12460 = vmatprep.mubr.bf16.mxu1 %v19193_v13  ;;  %v15741_v18 = vld [vmem:[%s20087_s7 + $0x600] ss:$16 sps:$4 sm:$0xff]   ;;  %v15773_v15 = vld [vmem:[%s20087_s7 + $0x744] ss:$16 sps:$4 sm:$0xff]  }
 0x7e7   : > { %12430 = vmatprep.subr.bf16.mxu1 %v15680_v25  ;;  %12542 = vmatprep.mubr.bf16.mxu0 %v20172_v60  ;;  %v19343_v25 = vrot.slane %v19162_v41, %v17902_v28  ;;  %v15749_v28 = vld [vmem:[%s20087_s7 + $0x644] ss:$16 sps:$4 sm:$0xff]   ;;  %v15747_v41 = vld [vmem:[%s20087_s7 + $0x640] ss:$16 sps:$4 sm:$0xff]  }
 0x7e8   : > { %12513 = vmatpush1.bf16.msra.mxu0 %v15675_v20  ;;  %v15746_v20 = vld [vmem:[%s20087_s7 + $0x624] ss:$16 sps:$4 sm:$0xff]  }
 0x7e9   : > { %12514 = vmatprep.subr.bf16.mxu0 %v15683_v19  ;;  %v19350_v19 = vcombine.high %v19193_v13, %v19193_v13  ;;  %v15782_v52 = vld [vmem:[%s20087_s7 + $0x7a4] ss:$16 sps:$4 sm:$0xff]  }
 0x7ea   : > { %12431 = vmatpush1.bf16.msra.mxu1 %v15678_v27  ;;  %v15744_v27 = vld [vmem:[%s20087_s7 + $0x620] ss:$16 sps:$4 sm:$0xff]  }
 0x7eb   : > { %12432 = vmatprep.subr.bf16.mxu1 %v15686_v17  ;;  %v15752_v17 = vld [vmem:[%s20087_s7 + $0x664] ss:$16 sps:$4 sm:$0xff]  }
 0x7ec   : > { %12515 = vmatpush1.bf16.msra.mxu0 %v15681_v45  ;;  %v15750_v45 = vld [vmem:[%s20087_s7 + $0x660] ss:$16 sps:$4 sm:$0xff]  }
 0x7ed   : > { %12516 = vmatprep.subr.bf16.mxu0 %v15689_v56  ;;  %v15755_v56 = vld [vmem:[%s20087_s7 + $0x684] ss:$16 sps:$4 sm:$0xff]  }
 0x7ee   : > { %12433 = vmatpush1.bf16.msra.mxu1 %v15684_v53  ;;  %v15753_v53 = vld [vmem:[%s20087_s7 + $0x680] ss:$16 sps:$4 sm:$0xff]  }
 0x7ef   : > { %12434 = vmatprep.subr.bf16.mxu1 %v15692_v3  ;;  %v15756_v3 = vld [vmem:[%s20087_s7 + $0x6a0] ss:$16 sps:$4 sm:$0xff]  }
 0x7f0   : > { %12517 = vmatpush1.bf16.msra.mxu0 %v15687_v39  ;;  %v15761_v39 = vld [vmem:[%s20087_s7 + $0x6c4] ss:$16 sps:$4 sm:$0xff]  }
 0x7f1   : > { %12518 = vmatprep.subr.bf16.mxu0 %v15695_v40  ;;  %v15759_v40 = vld [vmem:[%s20087_s7 + $0x6c0] ss:$16 sps:$4 sm:$0xff]  }
 0x7f2   : > { %12435 = vmatpush1.bf16.msra.mxu1 %v15690_v47  ;;  %v15762_v47 = vld [vmem:[%s20087_s7 + $0x6e0] ss:$16 sps:$4 sm:$0xff]  }
 0x7f3   : > { %12436 = vmatprep.subr.bf16.mxu1 %v15698_v26  ;;  %v15767_v26 = vld [vmem:[%s20087_s7 + $0x704] ss:$16 sps:$4 sm:$0xff]  }
 0x7f4   : > { %12519 = vmatpush1.bf16.msra.mxu0 %v15693_v21  ;;  %v15765_v21 = vld [vmem:[%s20087_s7 + $0x700] ss:$16 sps:$4 sm:$0xff]  }
 0x7f5   : > { %12520 = vmatprep.subr.bf16.mxu0 %v15701_v50  ;;  %v15770_v50 = vld [vmem:[%s20087_s7 + $0x724] ss:$16 sps:$4 sm:$0xff]  }
 0x7f6   : > { %12437 = vmatpush1.bf16.msra.mxu1 %v15696_v36  ;;  %v15771_v36 = vld [vmem:[%s20087_s7 + $0x740] ss:$16 sps:$4 sm:$0xff]  }
 0x7f7   : > { %12438 = vmatprep.subr.bf16.mxu1 %v15704_v30  ;;  %v15776_v30 = vld [vmem:[%s20087_s7 + $0x764] ss:$16 sps:$4 sm:$0xff]  }
 0x7f8   : > { %12521 = vmatpush1.bf16.msra.mxu0 %v15699_v54  ;;  %v15774_v54 = vld [vmem:[%s20087_s7 + $0x760] ss:$16 sps:$4 sm:$0xff]  }
 0x7f9   : > { %12522 = vmatprep.subr.bf16.mxu0 %v15707_v29  ;;  %v15779_v29 = vld [vmem:[%s20087_s7 + $0x784] ss:$16 sps:$4 sm:$0xff]  }
 0x7fa   : > { %12439 = vmatpush1.bf16.msra.mxu1 %v15702_v63  ;;  %v15780_v63 = vld [vmem:[%s20087_s7 + $0x7a0] ss:$16 sps:$4 sm:$0xff]  }
 0x7fb   : > { %12440 = vmatprep.subr.bf16.mxu1 %v15710_v61  ;;  %v15785_v61 = vld [vmem:[%s20087_s7 + $0x7c4] ss:$16 sps:$4 sm:$0xff]  }
 0x7fc   : > { %12523 = vmatpush1.bf16.msra.mxu0 %v15705_v23  ;;  %v15783_v23 = vld [vmem:[%s20087_s7 + $0x7c0] ss:$16 sps:$4 sm:$0xff]  }
 0x7fd   : > { %12524 = vmatprep.subr.bf16.mxu0 %v15713_v35  ;;  %v15788_v35 = vld [vmem:[%s20087_s7 + $0x7e4] ss:$16 sps:$4 sm:$0xff]  }
 0x7fe   : > { %12441 = vmatpush1.bf16.msra.mxu1 %v15708_v1  ;;  %v15791_v1 = vld [vmem:[%s20087_s7 + $0xc] ss:$16 sps:$4 sm:$0xff]  }
 0x7ff   : > { %12442 = vmatprep.subr.bf16.mxu1 %v15716_v58  ;;  %v15789_v58 = vld [vmem:[%s20087_s7 + $0x8] ss:$16 sps:$4 sm:$0xff]  }
 0x800   : > { %12525 = vmatpush1.bf16.msra.mxu0 %v15711_v57  ;;  %v19449_v57 = vcombine.high %v19343_v25, %v19343_v25 }
 0x802   : > { %12443 = vmatpush1.bf16.msra.mxu1 %v15714_v33  ;;  %v15792_v33 = vld [vmem:[%s20087_s7 + $0x28] ss:$16 sps:$4 sm:$0xff]  }
 0x803   : > { %12543 = vmatmul.mubr.bf16.vlgmr.msra.gmra.mrb[36].mxu0 %v19287_v34  ;;  %12444 = vmatprep.subr.bf16.mxu1 %v15719_v38  ;;  %v15797_v38 = vld [vmem:[%s20087_s7 + $0x4c] ss:$16 sps:$4 sm:$0xff]  }
 0x806   : > { %12445 = vmatpush1.bf16.msra.mxu1 %v15717_v5  ;;  %v15795_v5 = vld [vmem:[%s20087_s7 + $0x48] ss:$16 sps:$4 sm:$0xff]  }
 0x807   : > { %12446 = vmatprep.subr.bf16.mxu1 %v15722_v44  ;;  %v15800_v44 = vld [vmem:[%s20087_s7 + $0x6c] ss:$16 sps:$4 sm:$0xff]  }
 0x80a   : > { %12447 = vmatpush1.bf16.msra.mxu1 %v15720_v42  ;;  %v15803_v42 = vld [vmem:[%s20087_s7 + $0x8c] ss:$16 sps:$4 sm:$0xff]  }
 0x80b   : > { %12448 = vmatprep.subr.bf16.mxu1 %v15725_v11  ;;  %v15801_v11 = vld [vmem:[%s20087_s7 + $0x88] ss:$16 sps:$4 sm:$0xff]  }
 0x80e   : > { %12449 = vmatpush1.bf16.msra.mxu1 %v15723_v49  ;;  %v15806_v49 = vld [vmem:[%s20087_s7 + $0xac] ss:$16 sps:$4 sm:$0xff]  }
 0x80f   : > { %12450 = vmatprep.subr.bf16.mxu1 %v15728_v8  ;;  %v15804_v8 = vld [vmem:[%s20087_s7 + $0xa8] ss:$16 sps:$4 sm:$0xff]  }
 0x812   : > { %12451 = vmatpush1.bf16.msra.mxu1 %v15726_v12  ;;  %v15809_v12 = vld [vmem:[%s20087_s7 + $0xcc] ss:$16 sps:$4 sm:$0xff]  }
 0x813   : > { %12452 = vmatprep.subr.bf16.mxu1 %v15731_v10  ;;  %v15807_v10 = vld [vmem:[%s20087_s7 + $0xc8] ss:$16 sps:$4 sm:$0xff]  }
 0x816   : > { %12453 = vmatpush1.bf16.msra.mxu1 %v15729_v62  ;;  %v15812_v62 = vld [vmem:[%s20087_s7 + $0xec] ss:$16 sps:$4 sm:$0xff]  }
 0x817   : > { %12454 = vmatprep.subr.bf16.mxu1 %v15734_v43  ;;  %v15810_v43 = vld [vmem:[%s20087_s7 + $0xe8] ss:$16 sps:$4 sm:$0xff]  }
 0x81a   : > { %12455 = vmatpush1.bf16.msra.mxu1 %v15732_v7  ;;  %v15815_v7 = vld [vmem:[%s20087_s7 + $0x10c] ss:$16 sps:$4 sm:$0xff]  }
 0x81b   : > { %12456 = vmatprep.subr.bf16.mxu1 %v15737_v59  ;;  %v15813_v59 = vld [vmem:[%s20087_s7 + $0x108] ss:$16 sps:$4 sm:$0xff]  }
 0x81e   : > { %12457 = vmatpush1.bf16.msra.mxu1 %v15735_v22  ;;  %v15818_v22 = vld [vmem:[%s20087_s7 + $0x12c] ss:$16 sps:$4 sm:$0xff]  }
 0x81f   : > { %12458 = vmatprep.subr.bf16.mxu1 %v15740_v4  ;;  %v15816_v4 = vld [vmem:[%s20087_s7 + $0x128] ss:$16 sps:$4 sm:$0xff]  }
 0x822   : > { %12459 = vmatpush1.bf16.msra.mxu1 %v15738_v46  ;;  %v15821_v46 = vld [vmem:[%s20087_s7 + $0x14c] ss:$16 sps:$4 sm:$0xff]  }
 0x823   : > { %12469 = vmatprep.subr.bf16.mxu1 %v15743_v24  ;;  %v15819_v24 = vld [vmem:[%s20087_s7 + $0x148] ss:$16 sps:$4 sm:$0xff]  }
 0x825   : > { %12461 = vmatmul.mubr.bf16.vlgmr.msra.gmra.mrb[20].mxu1 %v19343_v25 }
 0x826   : > { %12470 = vmatpush1.bf16.msra.mxu1 %v15741_v18  ;;  %12501 = vmatprep.mubr.bf16.mxu1 %v19350_v19  ;;  %v15824_v18 = vld [vmem:[%s20087_s7 + $0x16c] ss:$16 sps:$4 sm:$0xff]  }
 0x827   : > { %12471 = vmatprep.subr.bf16.mxu1 %v15746_v20  ;;  %v15822_v20 = vld [vmem:[%s20087_s7 + $0x168] ss:$16 sps:$4 sm:$0xff]  }
 0x82a   : > { %12472 = vmatpush1.bf16.msra.mxu1 %v15744_v27  ;;  %v15827_v27 = vld [vmem:[%s20087_s7 + $0x18c] ss:$16 sps:$4 sm:$0xff]  }
 0x82b   : > { %12473 = vmatprep.subr.bf16.mxu1 %v15749_v28  ;;  %v15825_v28 = vld [vmem:[%s20087_s7 + $0x188] ss:$16 sps:$4 sm:$0xff]  }
 0x82e   : > { %12474 = vmatpush1.bf16.msra.mxu1 %v15747_v41  ;;  %v15830_v41 = vld [vmem:[%s20087_s7 + $0x1ac] ss:$16 sps:$4 sm:$0xff]  }
 0x82f   : > { %12475 = vmatprep.subr.bf16.mxu1 %v15752_v17  ;;  %v15828_v17 = vld [vmem:[%s20087_s7 + $0x1a8] ss:$16 sps:$4 sm:$0xff]  }
 0x832   : > { %12476 = vmatpush1.bf16.msra.mxu1 %v15750_v45  ;;  %v15833_v45 = vld [vmem:[%s20087_s7 + $0x1cc] ss:$16 sps:$4 sm:$0xff]  }
 0x833   : > { %12477 = vmatprep.subr.bf16.mxu1 %v15755_v56  ;;  %v15831_v56 = vld [vmem:[%s20087_s7 + $0x1c8] ss:$16 sps:$4 sm:$0xff]  }
 0x836   : > { %12478 = vmatpush1.bf16.msra.mxu1 %v15753_v53  ;;  %v15836_v53 = vld [vmem:[%s20087_s7 + $0x1ec] ss:$16 sps:$4 sm:$0xff]  }
 0x837   : > { %12479 = vmatprep.subr.bf16.mxu1 %v15758_v0  ;;  %v15834_v0 = vld [vmem:[%s20087_s7 + $0x1e8] ss:$16 sps:$4 sm:$0xff]  }
 0x83a   : > { %12480 = vmatpush1.bf16.msra.mxu1 %v15756_v3  ;;  %v15839_v3 = vld [vmem:[%s20087_s7 + $0x20c] ss:$16 sps:$4 sm:$0xff]  }
 0x83b   : > { %12481 = vmatprep.subr.bf16.mxu1 %v15761_v39  ;;  %v15837_v39 = vld [vmem:[%s20087_s7 + $0x208] ss:$16 sps:$4 sm:$0xff]  }
 0x83e   : > { %12482 = vmatpush1.bf16.msra.mxu1 %v15759_v40  ;;  %v15842_v40 = vld [vmem:[%s20087_s7 + $0x22c] ss:$16 sps:$4 sm:$0xff]  }
 0x83f   : > { %12483 = vmatprep.subr.bf16.mxu1 %v15764_v55  ;;  %v15840_v55 = vld [vmem:[%s20087_s7 + $0x228] ss:$16 sps:$4 sm:$0xff]  }
 0x842   : > { %12484 = vmatpush1.bf16.msra.mxu1 %v15762_v47  ;;  %v15845_v47 = vld [vmem:[%s20087_s7 + $0x24c] ss:$16 sps:$4 sm:$0xff]  }
 0x843   : > { %12485 = vmatprep.subr.bf16.mxu1 %v15767_v26  ;;  %v15843_v26 = vld [vmem:[%s20087_s7 + $0x248] ss:$16 sps:$4 sm:$0xff]  }
 0x846   : > { %12486 = vmatpush1.bf16.msra.mxu1 %v15765_v21  ;;  %v15851_v21 = vld [vmem:[%s20087_s7 + $0x28c] ss:$16 sps:$4 sm:$0xff]  }
 0x847   : > { %12487 = vmatprep.subr.bf16.mxu1 %v15770_v50  ;;  %v15849_v50 = vld [vmem:[%s20087_s7 + $0x288] ss:$16 sps:$4 sm:$0xff]  }
 0x84a   : > { %12488 = vmatpush1.bf16.msra.mxu1 %v15768_v51  ;;  %v15854_v51 = vld [vmem:[%s20087_s7 + $0x2ac] ss:$16 sps:$4 sm:$0xff]  }
 0x84b   : > { %12489 = vmatprep.subr.bf16.mxu1 %v15773_v15 }
 0x84e   : > { %12490 = vmatpush1.bf16.msra.mxu1 %v15771_v36  ;;  %v15852_v36 = vld [vmem:[%s20087_s7 + $0x2a8] ss:$16 sps:$4 sm:$0xff]  }
 0x84f   : > { %12491 = vmatprep.subr.bf16.mxu1 %v15776_v30 }
 0x852   : > { %12492 = vmatpush1.bf16.msra.mxu1 %v15774_v54  ;;  %v15857_v54 = vld [vmem:[%s20087_s7 + $0x2cc] ss:$16 sps:$4 sm:$0xff]  }
 0x853   : > { %12493 = vmatprep.subr.bf16.mxu1 %v15779_v29 }
 0x856   : > { %12494 = vmatpush1.bf16.msra.mxu1 %v15777_v14 }
 0x857   : > { %12495 = vmatprep.subr.bf16.mxu1 %v15782_v52  ;;  %v15855_v52 = vld [vmem:[%s20087_s7 + $0x2c8] ss:$16 sps:$4 sm:$0xff]  }
 0x85a   : > { %12496 = vmatpush1.bf16.msra.mxu1 %v15780_v63  ;;  %v15860_v63 = vld [vmem:[%s20087_s7 + $0x2ec] ss:$16 sps:$4 sm:$0xff]  }
 0x85b   : > { %12497 = vmatprep.subr.bf16.mxu1 %v15785_v61  ;;  %v15858_v61 = vld [vmem:[%s20087_s7 + $0x2e8] ss:$16 sps:$4 sm:$0xff]  }
 0x85e   : > { %12498 = vmatpush1.bf16.msra.mxu1 %v15783_v23  ;;  %v15863_v23 = vld [vmem:[%s20087_s7 + $0x30c] ss:$16 sps:$4 sm:$0xff]  }
 0x85f   : > { %12499 = vmatprep.subr.bf16.mxu1 %v15788_v35  ;;  %v15861_v35 = vld [vmem:[%s20087_s7 + $0x308] ss:$16 sps:$4 sm:$0xff]  }
 0x862   : > { %12500 = vmatpush1.bf16.msra.mxu1 %v15786_v31  ;;  %v15866_v31 = vld [vmem:[%s20087_s7 + $0x32c] ss:$16 sps:$4 sm:$0xff]  }
 0x863   : > { %12551 = vmatprep.subr.bf16.mxu1 %v15791_v1  ;;  %v15864_v1 = vld [vmem:[%s20087_s7 + $0x328] ss:$16 sps:$4 sm:$0xff]  }
 0x865   : > { %12502 = vmatmul.mubr.bf16.vlgmr.msra.gmra.mrb[20].mxu1 %v19449_v57 }
 0x866   : > { %12552 = vmatpush1.bf16.msra.mxu1 %v15789_v58  ;;  %12583 = vmatprep.mubr.bf16.mxu1 %v19165_v16  ;;  %v15798_v16 = vld [vmem:[%s20087_s7 + $0x68] ss:$16 sps:$4 sm:$0xff]   ;;  %v15869_v58 = vld [vmem:[%s20087_s7 + $0x34c] ss:$16 sps:$4 sm:$0xff]  }
 0x867   : > { %12553 = vmatprep.subr.bf16.mxu1 %v15794_v6  ;;  %v15867_v6 = vld [vmem:[%s20087_s7 + $0x348] ss:$16 sps:$4 sm:$0xff]  }
 0x86a   : > { %12554 = vmatpush1.bf16.msra.mxu1 %v15792_v33  ;;  %v15872_v33 = vld [vmem:[%s20087_s7 + $0x36c] ss:$16 sps:$4 sm:$0xff]  }
 0x86b   : > { %12555 = vmatprep.subr.bf16.mxu1 %v15797_v38  ;;  %v15870_v38 = vld [vmem:[%s20087_s7 + $0x368] ss:$16 sps:$4 sm:$0xff]  }
 0x86e   : > { %12556 = vmatpush1.bf16.msra.mxu1 %v15795_v5  ;;  %v15875_v5 = vld [vmem:[%s20087_s7 + $0x38c] ss:$16 sps:$4 sm:$0xff]  }
 0x86f   : > { %12557 = vmatprep.subr.bf16.mxu1 %v15800_v44  ;;  %v15873_v44 = vld [vmem:[%s20087_s7 + $0x388] ss:$16 sps:$4 sm:$0xff]  }
 0x872   : > { %12558 = vmatpush1.bf16.msra.mxu1 %v15798_v16  ;;  %v15878_v16 = vld [vmem:[%s20087_s7 + $0x3ac] ss:$16 sps:$4 sm:$0xff]  }
 0x873   : > { %12559 = vmatprep.subr.bf16.mxu1 %v15803_v42 }
 0x876   : > { %12560 = vmatpush1.bf16.msra.mxu1 %v15801_v11  ;;  %v15876_v11 = vld [vmem:[%s20087_s7 + $0x3a8] ss:$16 sps:$4 sm:$0xff]  }
 0x877   : > { %12561 = vmatprep.subr.bf16.mxu1 %v15806_v49 }
 0x87a   : > { %12562 = vmatpush1.bf16.msra.mxu1 %v15804_v8  ;;  %v15881_v8 = vld [vmem:[%s20087_s7 + $0x3cc] ss:$16 sps:$4 sm:$0xff]  }
 0x87b   : > { %12563 = vmatprep.subr.bf16.mxu1 %v15809_v12 }
 0x87e   : > { %12564 = vmatpush1.bf16.msra.mxu1 %v15807_v10 }
 0x87f   : > { %12565 = vmatprep.subr.bf16.mxu1 %v15812_v62  ;;  %v15879_v62 = vld [vmem:[%s20087_s7 + $0x3c8] ss:$16 sps:$4 sm:$0xff]  }
 0x882   : > { %12566 = vmatpush1.bf16.msra.mxu1 %v15810_v43  ;;  %v15884_v43 = vld [vmem:[%s20087_s7 + $0x3ec] ss:$16 sps:$4 sm:$0xff]  }
 0x883   : > { %12567 = vmatprep.subr.bf16.mxu1 %v15815_v7  ;;  %v15882_v7 = vld [vmem:[%s20087_s7 + $0x3e8] ss:$16 sps:$4 sm:$0xff]  }
 0x886   : > { %12568 = vmatpush1.bf16.msra.mxu1 %v15813_v59  ;;  %v15887_v59 = vld [vmem:[%s20087_s7 + $0x40c] ss:$16 sps:$4 sm:$0xff]  }
 0x887   : > { %12569 = vmatprep.subr.bf16.mxu1 %v15818_v22  ;;  %v15885_v22 = vld [vmem:[%s20087_s7 + $0x408] ss:$16 sps:$4 sm:$0xff]  }
 0x88a   : > { %12570 = vmatpush1.bf16.msra.mxu1 %v15816_v4  ;;  %v15890_v4 = vld [vmem:[%s20087_s7 + $0x42c] ss:$16 sps:$4 sm:$0xff]  }
 0x88b   : > { %12571 = vmatprep.subr.bf16.mxu1 %v15821_v46  ;;  %v15888_v46 = vld [vmem:[%s20087_s7 + $0x428] ss:$16 sps:$4 sm:$0xff]  }
 0x88e   : > { %12572 = vmatpush1.bf16.msra.mxu1 %v15819_v24  ;;  %v15893_v24 = vld [vmem:[%s20087_s7 + $0x44c] ss:$16 sps:$4 sm:$0xff]  }
 0x88f   : > { %12573 = vmatprep.subr.bf16.mxu1 %v15824_v18  ;;  %v15891_v18 = vld [vmem:[%s20087_s7 + $0x448] ss:$16 sps:$4 sm:$0xff]  }
 0x892   : > { %12574 = vmatpush1.bf16.msra.mxu1 %v15822_v20  ;;  %v15899_v20 = vld [vmem:[%s20087_s7 + $0x48c] ss:$16 sps:$4 sm:$0xff]  }
 0x893   : > { %12575 = vmatprep.subr.bf16.mxu1 %v15827_v27  ;;  %v15897_v27 = vld [vmem:[%s20087_s7 + $0x488] ss:$16 sps:$4 sm:$0xff]  }
 0x896   : > { %12576 = vmatpush1.bf16.msra.mxu1 %v15825_v28  ;;  %v15902_v28 = vld [vmem:[%s20087_s7 + $0x4ac] ss:$16 sps:$4 sm:$0xff]  }
 0x897   : > { %12577 = vmatprep.subr.bf16.mxu1 %v15830_v41  ;;  %v15900_v41 = vld [vmem:[%s20087_s7 + $0x4a8] ss:$16 sps:$4 sm:$0xff]  }
 0x89a   : > { %12578 = vmatpush1.bf16.msra.mxu1 %v15828_v17  ;;  %v15905_v17 = vld [vmem:[%s20087_s7 + $0x4cc] ss:$16 sps:$4 sm:$0xff]  }
 0x89b   : > { %12579 = vmatprep.subr.bf16.mxu1 %v15833_v45  ;;  %v15903_v45 = vld [vmem:[%s20087_s7 + $0x4c8] ss:$16 sps:$4 sm:$0xff]  }
 0x89e   : > { %12580 = vmatpush1.bf16.msra.mxu1 %v15831_v56  ;;  %v15908_v56 = vld [vmem:[%s20087_s7 + $0x4ec] ss:$16 sps:$4 sm:$0xff]  }
 0x89f   : > { %12581 = vmatprep.subr.bf16.mxu1 %v15836_v53  ;;  %v15906_v53 = vld [vmem:[%s20087_s7 + $0x4e8] ss:$16 sps:$4 sm:$0xff]  }
 0x8a2   : > { %12582 = vmatpush1.bf16.msra.mxu1 %v15834_v0  ;;  %v15911_v0 = vld [vmem:[%s20087_s7 + $0x50c] ss:$16 sps:$4 sm:$0xff]  }
 0x8a3   : > { %12592 = vmatprep.subr.bf16.mxu1 %v15839_v3  ;;  %v15909_v3 = vld [vmem:[%s20087_s7 + $0x508] ss:$16 sps:$4 sm:$0xff]  }
 0x8a5   : > { %12584 = vmatmul.mubr.bf16.vlgmr.msra.gmra.mrb[24].mxu1 %v19159_v48  ;;  %v15848_v48 = vld [vmem:[%s20087_s7 + $0x26c] ss:$16 sps:$4 sm:$0xff]  }
 0x8a6   : > { %12593 = vmatpush1.bf16.msra.mxu1 %v15837_v39  ;;  %12624 = vmatprep.mubr.bf16.mxu1 %v19178_v37  ;;  %v15846_v37 = vld [vmem:[%s20087_s7 + $0x268] ss:$16 sps:$4 sm:$0xff]   ;;  %v15914_v39 = vld [vmem:[%s20087_s7 + $0x52c] ss:$16 sps:$4 sm:$0xff]  }
 0x8a7   : > { %12594 = vmatprep.subr.bf16.mxu1 %v15842_v40  ;;  %v15912_v40 = vld [vmem:[%s20087_s7 + $0x528] ss:$16 sps:$4 sm:$0xff]  }
 0x8aa   : > { %12595 = vmatpush1.bf16.msra.mxu1 %v15840_v55  ;;  %v15917_v55 = vld [vmem:[%s20087_s7 + $0x54c] ss:$16 sps:$4 sm:$0xff]  }
 0x8ab   : > { %12596 = vmatprep.subr.bf16.mxu1 %v15845_v47  ;;  %v15915_v47 = vld [vmem:[%s20087_s7 + $0x548] ss:$16 sps:$4 sm:$0xff]  }
 0x8ae   : > { %12597 = vmatpush1.bf16.msra.mxu1 %v15843_v26  ;;  %v15920_v26 = vld [vmem:[%s20087_s7 + $0x56c] ss:$16 sps:$4 sm:$0xff]  }
 0x8af   : > { %12598 = vmatprep.subr.bf16.mxu1 %v15848_v48  ;;  %v15918_v48 = vld [vmem:[%s20087_s7 + $0x568] ss:$16 sps:$4 sm:$0xff]  }
 0x8b2   : > { %12599 = vmatpush1.bf16.msra.mxu1 %v15846_v37  ;;  %v15923_v37 = vld [vmem:[%s20087_s7 + $0x58c] ss:$16 sps:$4 sm:$0xff]  }
 0x8b3   : > { %12600 = vmatprep.subr.bf16.mxu1 %v15851_v21  ;;  %v15921_v21 = vld [vmem:[%s20087_s7 + $0x588] ss:$16 sps:$4 sm:$0xff]  }
 0x8b6   : > { %12601 = vmatpush1.bf16.msra.mxu1 %v15849_v50  ;;  %v19578_v15 = vpop.f32.mrb[32].mxu0  ;;  %v15926_v50 = vld [vmem:[%s20087_s7 + $0x5ac] ss:$16 sps:$4 sm:$0xff]  }
 0x8b7   : > { %v19583_v30 = vpop.f32.mrb[33].mxu0  ;;  %12602 = vmatprep.subr.bf16.mxu1 %v15854_v51  ;;  %v15924_v51 = vld [vmem:[%s20087_s7 + $0x5a8] ss:$16 sps:$4 sm:$0xff]  }
 0x8b8   : > { %v12384_v29 = vpop.f32.mrb[34].mxu0 }
 0x8b9   : > { %v12385_v14 = vpop.f32.mrb[35].mxu0  ;;  %v15932_v29 = vld [vmem:[%s20087_s7 + $0x5ec] ss:$16 sps:$4 sm:$0xff]  }
 0x8ba   : > { %12603 = vmatpush1.bf16.msra.mxu1 %v15852_v36  ;;  %v15929_v36 = vld [vmem:[%s20087_s7 + $0x5cc] ss:$16 sps:$4 sm:$0xff]   ;;  %v15930_v14 = vld [vmem:[%s20087_s7 + $0x5e8] ss:$16 sps:$4 sm:$0xff]  }
 0x8bb   : > { %12604 = vmatprep.subr.bf16.mxu1 %v15857_v54  ;;  %v15927_v54 = vld [vmem:[%s20087_s7 + $0x5c8] ss:$16 sps:$4 sm:$0xff]  }
 0x8be   : > { %12605 = vmatpush1.bf16.msra.mxu1 %v15855_v52  ;;  %v15935_v52 = vld [vmem:[%s20087_s7 + $0x60c] ss:$16 sps:$4 sm:$0xff]  }
 0x8bf   : > { %12606 = vmatprep.subr.bf16.mxu1 %v15860_v63  ;;  %v15933_v63 = vld [vmem:[%s20087_s7 + $0x608] ss:$16 sps:$4 sm:$0xff]  }
 0x8c2   : > { %12607 = vmatpush1.bf16.msra.mxu1 %v15858_v61  ;;  %v15938_v61 = vld [vmem:[%s20087_s7 + $0x62c] ss:$16 sps:$4 sm:$0xff]  }
 0x8c3   : > { %12608 = vmatprep.subr.bf16.mxu1 %v15863_v23  ;;  %v15936_v23 = vld [vmem:[%s20087_s7 + $0x628] ss:$16 sps:$4 sm:$0xff]  }
 0x8c6   : > { %12609 = vmatpush1.bf16.msra.mxu1 %v15861_v35  ;;  %v15941_v35 = vld [vmem:[%s20087_s7 + $0x64c] ss:$16 sps:$4 sm:$0xff]  }
 0x8c7   : > { %12610 = vmatprep.subr.bf16.mxu1 %v15866_v31  ;;  %v15939_v31 = vld [vmem:[%s20087_s7 + $0x648] ss:$16 sps:$4 sm:$0xff]  }
 0x8ca   : > { %12611 = vmatpush1.bf16.msra.mxu1 %v15864_v1  ;;  %v10814_v1 = vsub.s32 0, %v17898_v32 }
 0x8cb   : > { %12612 = vmatprep.subr.bf16.mxu1 %v15869_v58  ;;  %v15947_v58 = vld [vmem:[%s20087_s7 + $0x68c] ss:$16 sps:$4 sm:$0xff]  }
 0x8ce   : > { %12613 = vmatpush1.bf16.msra.mxu1 %v15867_v6  ;;  %v19780_v6 = vld [vmem:[%s20088_s8] sm:$0xf] }
 0x8cf   : > { %12614 = vmatprep.subr.bf16.mxu1 %v15872_v33  ;;  %v10818_v33 = vsub.s32 1, %v17898_v32 }
 0x8d2   : > { %12615 = vmatpush1.bf16.msra.mxu1 %v15870_v38  ;;  %v15945_v38 = vld [vmem:[%s20087_s7 + $0x688] ss:$16 sps:$4 sm:$0xff]  }
 0x8d3   : > { %12616 = vmatprep.subr.bf16.mxu1 %v15875_v5  ;;  %v10815_v5 = vrot.slane %v19780_v6, %v10814_v1  ;;  %v16008_v1 = vld [vmem:[%s20089_s9 + $0x8] sm:$0xff]  }
 0x8d6   : > { %v19630_v42 = vpop.f32.mrb[36].mxu0  ;;  %12617 = vmatpush1.bf16.msra.mxu1 %v15873_v44  ;;  %v15950_v44 = vld [vmem:[%s20087_s7 + $0x6ac] ss:$16 sps:$4 sm:$0xff]  }
 0x8d7   : > { %v19635_v49 = vpop.f32.mrb[37].mxu0  ;;  %12618 = vmatprep.subr.bf16.mxu1 %v15878_v16  ;;  %v10819_v16 = vrot.slane %v19780_v6, %v10818_v33  ;;  %v16011_v33 = vld [vmem:[%s20089_s9 + $0x58] sm:$0xff]  }
 0x8d8   : > { %v12548_v12 = vpop.f32.mrb[38].mxu0 }
 0x8d9   : > { %v12549_v10 = vpop.f32.mrb[39].mxu0  ;;  %v15953_v12 = vld [vmem:[%s20087_s7 + $0x6cc] ss:$16 sps:$4 sm:$0xff]  }
 0x8da   : > { %12619 = vmatpush1.bf16.msra.mxu1 %v15876_v11  ;;  %v15948_v11 = vld [vmem:[%s20087_s7 + $0x6a8] ss:$16 sps:$4 sm:$0xff]   ;;  %v12383_v10 = vadd.f32 %v19583_v30, %v10819_v16 }
 0x8db   : > { %12620 = vmatprep.subr.bf16.mxu1 %v15881_v8  ;;  %v12381_v8 = vadd.f32 %v19578_v15, %v10815_v5  ;;  %v16013_v5 = vld [vmem:[%s20089_s9 + $0x60] sm:$0xff]   ;;  %v16015_v16 = vld [vmem:[%s20089_s9 + $0x68] sm:$0xff]  }
 0x8de   : > { %12621 = vmatpush1.bf16.msra.mxu1 %v15879_v62 }
 0x8df   : > { %12622 = vmatprep.subr.bf16.mxu1 %v15884_v43 }
 0x8e2   : > { %12623 = vmatpush1.bf16.msra.mxu1 %v15882_v7 }
 0x8e3   : > { %12633 = vmatprep.subr.bf16.mxu1 %v15887_v59 }
 0x8e5   : > { %12625 = vmatmul.mubr.bf16.vlgmr.msra.gmra.mrb[24].mxu1 %v19186_v9  ;;  %v15896_v9 = vld [vmem:[%s20087_s7 + $0x46c] ss:$16 sps:$4 sm:$0xff]  }
 0x8e6   : > { %12634 = vmatpush1.bf16.msra.mxu1 %v15885_v22  ;;  %12665 = vmatprep.mubr.bf16.mxu1 %v19193_v13  ;;  %v15894_v13 = vld [vmem:[%s20087_s7 + $0x468] ss:$16 sps:$4 sm:$0xff]  }
 0x8e7   : > { %12635 = vmatprep.subr.bf16.mxu1 %v15890_v4  ;;  %v15951_v4 = vld [vmem:[%s20087_s7 + $0x6c8] ss:$16 sps:$4 sm:$0xff]  }
 0x8ea   : > { %12636 = vmatpush1.bf16.msra.mxu1 %v15888_v46 }
 0x8eb   : > { %12637 = vmatprep.subr.bf16.mxu1 %v15893_v24  ;;  %v15956_v24 = vld [vmem:[%s20087_s7 + $0x6ec] ss:$16 sps:$4 sm:$0xff]  }
 0x8ee   : > { %12638 = vmatpush1.bf16.msra.mxu1 %v15891_v18 }
 0x8ef   : > { %12639 = vmatprep.subr.bf16.mxu1 %v15896_v9 }
 0x8f2   : > { %12640 = vmatpush1.bf16.msra.mxu1 %v15894_v13  ;;  %v15954_v13 = vld [vmem:[%s20087_s7 + $0x6e8] ss:$16 sps:$4 sm:$0xff]  }
 0x8f3   : > { %12641 = vmatprep.subr.bf16.mxu1 %v15899_v20 }
 0x8f6   : > { %12642 = vmatpush1.bf16.msra.mxu1 %v15897_v27  ;;  %v15957_v27 = vld [vmem:[%s20087_s7 + $0x708] ss:$16 sps:$4 sm:$0xff]  }
 0x8f7   : > { %12643 = vmatprep.subr.bf16.mxu1 %v15902_v28  ;;  %v15960_v28 = vld [vmem:[%s20087_s7 + $0x728] ss:$16 sps:$4 sm:$0xff]  }
 0x8fa   : > { %12644 = vmatpush1.bf16.msra.mxu1 %v15900_v41  ;;  %v15965_v41 = vld [vmem:[%s20087_s7 + $0x74c] ss:$16 sps:$4 sm:$0xff]  }
 0x8fb   : > { %12645 = vmatprep.subr.bf16.mxu1 %v15905_v17  ;;  %v15963_v17 = vld [vmem:[%s20087_s7 + $0x748] ss:$16 sps:$4 sm:$0xff]  }
 0x8fe   : > { %12646 = vmatpush1.bf16.msra.mxu1 %v15903_v45  ;;  %v15968_v45 = vld [vmem:[%s20087_s7 + $0x76c] ss:$16 sps:$4 sm:$0xff]  }
 0x8ff   : > { %12647 = vmatprep.subr.bf16.mxu1 %v15908_v56  ;;  %v15966_v56 = vld [vmem:[%s20087_s7 + $0x768] ss:$16 sps:$4 sm:$0xff]  }
 0x902   : > { %12648 = vmatpush1.bf16.msra.mxu1 %v15906_v53  ;;  %v15971_v53 = vld [vmem:[%s20087_s7 + $0x78c] ss:$16 sps:$4 sm:$0xff]  }
 0x903   : > { %12649 = vmatprep.subr.bf16.mxu1 %v15911_v0  ;;  %v15969_v0 = vld [vmem:[%s20087_s7 + $0x788] ss:$16 sps:$4 sm:$0xff]  }
 0x906   : > { %12650 = vmatpush1.bf16.msra.mxu1 %v15909_v3  ;;  %v15974_v3 = vld [vmem:[%s20087_s7 + $0x7ac] ss:$16 sps:$4 sm:$0xff]  }
 0x907   : > { %12651 = vmatprep.subr.bf16.mxu1 %v15914_v39  ;;  %v15972_v39 = vld [vmem:[%s20087_s7 + $0x7a8] ss:$16 sps:$4 sm:$0xff]  }
 0x90a   : > { %12652 = vmatpush1.bf16.msra.mxu1 %v15912_v40  ;;  %v15977_v40 = vld [vmem:[%s20087_s7 + $0x7cc] ss:$16 sps:$4 sm:$0xff]  }
 0x90b   : > { %12653 = vmatprep.subr.bf16.mxu1 %v15917_v55  ;;  %v15975_v55 = vld [vmem:[%s20087_s7 + $0x7c8] ss:$16 sps:$4 sm:$0xff]  }
 0x90e   : > { %12654 = vmatpush1.bf16.msra.mxu1 %v15915_v47  ;;  %v15980_v47 = vld [vmem:[%s20087_s7 + $0x7ec] ss:$16 sps:$4 sm:$0xff]  }
 0x90f   : > { %12655 = vmatprep.subr.bf16.mxu1 %v15920_v26  ;;  %v15978_v26 = vld [vmem:[%s20087_s7 + $0x7e8] ss:$16 sps:$4 sm:$0xff]  }
 0x912   : > { %12656 = vmatpush1.bf16.msra.mxu1 %v15918_v48  ;;  %v15983_v48 = vld [vmem:[%s20087_s7 + $0x80c] ss:$16 sps:$4 sm:$0xff]  }
 0x913   : > { %12657 = vmatprep.subr.bf16.mxu1 %v15923_v37  ;;  %v15981_v37 = vld [vmem:[%s20087_s7 + $0x808] ss:$16 sps:$4 sm:$0xff]  }
 0x916   : > { %12658 = vmatpush1.bf16.msra.mxu1 %v15921_v21  ;;  %v15986_v21 = vld [vmem:[%s20087_s7 + $0x82c] ss:$16 sps:$4 sm:$0xff]  }
 0x917   : > { %12659 = vmatprep.subr.bf16.mxu1 %v15926_v50  ;;  %v15984_v50 = vld [vmem:[%s20087_s7 + $0x828] ss:$16 sps:$4 sm:$0xff]  }
 0x91a   : > { %12660 = vmatpush1.bf16.msra.mxu1 %v15924_v51  ;;  %v15989_v51 = vld [vmem:[%s20087_s7 + $0x84c] ss:$16 sps:$4 sm:$0xff]  }
 0x91b   : > { %12661 = vmatprep.subr.bf16.mxu1 %v15929_v36  ;;  %v15987_v36 = vld [vmem:[%s20087_s7 + $0x848] ss:$16 sps:$4 sm:$0xff]  }
 0x91e   : > { %12662 = vmatpush1.bf16.msra.mxu1 %v15927_v54  ;;  %v15995_v54 = vld [vmem:[%s20087_s7 + $0x88c] ss:$16 sps:$4 sm:$0xff]  }
 0x91f   : > { %12663 = vmatprep.subr.bf16.mxu1 %v15932_v29  ;;  %v15993_v29 = vld [vmem:[%s20087_s7 + $0x888] ss:$16 sps:$4 sm:$0xff]  }
 0x922   : > { %12664 = vmatpush1.bf16.msra.mxu1 %v15930_v14  ;;  %v15998_v14 = vld [vmem:[%s20087_s7 + $0x8ac] ss:$16 sps:$4 sm:$0xff]  }
 0x923   : > { %12674 = vmatprep.subr.bf16.mxu1 %v15935_v52  ;;  %v15996_v52 = vld [vmem:[%s20087_s7 + $0x8a8] ss:$16 sps:$4 sm:$0xff]  }
 0x925   : > { %12666 = vmatmul.mubr.bf16.vlgmr.msra.gmra.mrb[24].mxu1 %v19343_v25  ;;  %v15944_v25 = vld [vmem:[%s20087_s7 + $0x66c] ss:$16 sps:$4 sm:$0xff]  }
 0x926   : > { %12675 = vmatpush1.bf16.msra.mxu1 %v15933_v63  ;;  %12706 = vmatprep.mubr.bf16.mxu1 %v19350_v19  ;;  %v15942_v19 = vld [vmem:[%s20087_s7 + $0x668] ss:$16 sps:$4 sm:$0xff]   ;;  %v16001_v63 = vld [vmem:[%s20087_s7 + $0x8cc] ss:$16 sps:$4 sm:$0xff]  }
 0x927   : > { %12676 = vmatprep.subr.bf16.mxu1 %v15938_v61  ;;  %v15999_v61 = vld [vmem:[%s20087_s7 + $0x8c8] ss:$16 sps:$4 sm:$0xff]  }
 0x92a   : > { %12677 = vmatpush1.bf16.msra.mxu1 %v15936_v23  ;;  %v16004_v23 = vld [vmem:[%s20087_s7 + $0x8ec] ss:$16 sps:$4 sm:$0xff]  }
 0x92b   : > { %12678 = vmatprep.subr.bf16.mxu1 %v15941_v35  ;;  %v16002_v35 = vld [vmem:[%s20087_s7 + $0x8e8] ss:$16 sps:$4 sm:$0xff]  }
 0x92e   : > { %12679 = vmatpush1.bf16.msra.mxu1 %v15939_v31  ;;  %v16005_v31 = vld [vmem:[%s20089_s9 + $0x40] sm:$0xff]  }
 0x92f   : > { %12680 = vmatprep.subr.bf16.mxu1 %v15944_v25  ;;  %v16006_v25 = vld [vmem:[%s20089_s9] sm:$0xff]   ;;  %14562 = vmatprep.subr.bf16.mxu0 %v16005_v31 }
 0x930   : > { %14563 = vmatpush3.bf16.msra.mxu0 %v16006_v25 }
 0x932   : > { %12681 = vmatpush1.bf16.msra.mxu1 %v15942_v19  ;;  %v16007_v19 = vld [vmem:[%s20089_s9 + $0x48] sm:$0xff]  }
 0x933   : > { %12682 = vmatprep.subr.bf16.mxu1 %v15947_v58  ;;  %14564 = vmatprep.subr.bf16.mxu0 %v16007_v19  ;;  %v16010_v58 = vld [vmem:[%s20089_s9 + $0x10] sm:$0xff]  }
 0x934   : > { %14565 = vmatpush3.bf16.msra.mxu0 %v16008_v1 }
 0x936   : > { %12683 = vmatpush1.bf16.msra.mxu1 %v15945_v38  ;;  %v16012_v38 = vld [vmem:[%s20089_s9 + $0x18] sm:$0xff]  }
 0x937   : > { %12684 = vmatprep.subr.bf16.mxu1 %v15950_v44  ;;  %v16014_v44 = vld [vmem:[%s20089_s9 + $0x20] sm:$0xff]  }
 0x938   : > { %v12503_v62 = vpop.f32.mrb[20].mxu1 }
 0x939   : > { %v15033_v43 = vadd.f32 %v12503_v62, %v12381_v8  ;;  %v12505_v7 = vpop.f32.mrb[21].mxu1  ;;  %v16017_v8 = vld [vmem:[%s20089_s9 + $0x70] sm:$0xff]   ;;  %v16020_v62 = vld [vmem:[%s20089_s9 + $0x38] sm:$0xff]  }
 0x93a   : > { %v15036_v59 = vadd.f32 %v12505_v7, %v12383_v10  ;;  %v12507_v22 = vpop.f32.mrb[22].mxu1  ;;  %12685 = vmatpush1.bf16.msra.mxu1 %v15948_v11  ;;  %v16016_v11 = vld [vmem:[%s20089_s9 + $0x28] sm:$0xff]   ;;  %v16019_v10 = vld [vmem:[%s20089_s9 + $0x78] sm:$0xff]   ;;  %v10822_v7 = vsub.s32 2, %v17898_v32 }
 0x93b   : > { %v15034_v46 = vadd.f32 %v15033_v43, %v19630_v42  ;;  %v12508_v15 = vpop.f32.mrb[23].mxu1  ;;  %12686 = vmatprep.subr.bf16.mxu1 %v15953_v12  ;;  %v15959_v42 = vld [vmem:[%s20087_s7 + $0x70c] ss:$16 sps:$4 sm:$0xff]   ;;  %v16018_v12 = vld [vmem:[%s20089_s9 + $0x30] sm:$0xff]   ;;  %v16021_v43 = vld [vmem:[%s20089_s9 + $0xc0] sm:$0xff]  }
 0x93c   : > { %v15037_v30 = vadd.f32 %v15036_v59, %v19635_v49  ;;  %v15962_v49 = vld [vmem:[%s20087_s7 + $0x72c] ss:$16 sps:$4 sm:$0xff]   ;;  %v10826_v59 = vsub.s32 3, %v17898_v32  ;;  %v10823_v22 = vrot.slane %v19780_v6, %v10822_v7 }
 0x93d   : > { %v12756_v18 = vmax.f32 %v15034_v46, 0.0 }
 0x93e   : > { %v12757_v9 = vmax.f32 %v15037_v30, 0.0  ;;  %12687 = vmatpush1.bf16.msra.mxu1 %v15951_v4  ;;  %v10827_v4 = vrot.slane %v19780_v6, %v10826_v59 }
 0x93f   : > { %12688 = vmatprep.subr.bf16.mxu1 %v15956_v24 }
 0x940   : > { %v19813_v20 = vcombine.low %v12756_v18, %v12757_v9 }
 0x942   : > { %12689 = vmatpush1.bf16.msra.mxu1 %v15954_v13 }
 0x943   : > { %12690 = vmatprep.subr.bf16.mxu1 %v15959_v42 }
 0x946   : > { %12691 = vmatpush1.bf16.msra.mxu1 %v15957_v27 }
 0x947   : > { %12692 = vmatprep.subr.bf16.mxu1 %v15962_v49  ;;  %v12772_v49 = vrot.slane %v19813_v20, %v18825_v2 }
 0x94a   : > { %12693 = vmatpush1.bf16.msra.mxu1 %v15960_v28 }
 0x94b   : > { %12694 = vmatprep.subr.bf16.mxu1 %v15965_v41 }
 0x94e   : > { %12695 = vmatpush1.bf16.msra.mxu1 %v15963_v17 }
 0x94f   : > { %12696 = vmatprep.subr.bf16.mxu1 %v15968_v45 }
 0x952   : > { %12697 = vmatpush1.bf16.msra.mxu1 %v15966_v56 }
 0x953   : > { %12698 = vmatprep.subr.bf16.mxu1 %v15971_v53 }
 0x956   : > { %12699 = vmatpush1.bf16.msra.mxu1 %v15969_v0 }
 0x957   : > { %12700 = vmatprep.subr.bf16.mxu1 %v15974_v3 }
 0x95a   : > { %12701 = vmatpush1.bf16.msra.mxu1 %v15972_v39 }
 0x95b   : > { %12702 = vmatprep.subr.bf16.mxu1 %v15977_v40 }
 0x95e   : > { %12703 = vmatpush1.bf16.msra.mxu1 %v15975_v55 }
 0x95f   : > { %12704 = vmatprep.subr.bf16.mxu1 %v15980_v47 }
 0x962   : > { %12705 = vmatpush1.bf16.msra.mxu1 %v15978_v26 }
 0x963   : > { %12715 = vmatprep.subr.bf16.mxu1 %v15983_v48 }
 0x965   : > { %12707 = vmatmul.mubr.bf16.vlgmr.msra.gmra.mrb[24].mxu1 %v19449_v57  ;;  %v15992_v57 = vld [vmem:[%s20087_s7 + $0x86c] ss:$16 sps:$4 sm:$0xff]  }
 0x966   : > { %12716 = vmatpush1.bf16.msra.mxu1 %v15981_v37  ;;  %12747 = vmatprep.mubr.bf16.mxu1 %v20172_v60  ;;  %v15990_v60 = vld [vmem:[%s20087_s7 + $0x868] ss:$16 sps:$4 sm:$0xff]  }
 0x967   : > { %12717 = vmatprep.subr.bf16.mxu1 %v15986_v21 }
 0x96a   : > { %12718 = vmatpush1.bf16.msra.mxu1 %v15984_v50 }
 0x96b   : > { %12719 = vmatprep.subr.bf16.mxu1 %v15989_v51 }
 0x96e   : > { %12720 = vmatpush1.bf16.msra.mxu1 %v15987_v36 }
 0x96f   : > { %12721 = vmatprep.subr.bf16.mxu1 %v15992_v57 }
 0x972   : > { %12722 = vmatpush1.bf16.msra.mxu1 %v15990_v60 }
 0x973   : > { %12723 = vmatprep.subr.bf16.mxu1 %v15995_v54 }
 0x976   : > { %12724 = vmatpush1.bf16.msra.mxu1 %v15993_v29 }
 0x977   : > { %12725 = vmatprep.subr.bf16.mxu1 %v15998_v14 }
 0x97a   : > { %12726 = vmatpush1.bf16.msra.mxu1 %v15996_v52 }
 0x97b   : > { %12727 = vmatprep.subr.bf16.mxu1 %v16001_v63 }
 0x97e   : > { %12728 = vmatpush1.bf16.msra.mxu1 %v15999_v61 }
 0x97f   : > { %12729 = vmatprep.subr.bf16.mxu1 %v16004_v23 }
 0x982   : > { %12730 = vmatpush1.bf16.msra.mxu1 %v16002_v35 }
 0x985   : > { %12748 = vmatmul.mubr.bf16.vlgmr.msra.gmra.mrb[24].mxu1 %v19287_v34  ;;  %v16009_v34 = vld [vmem:[%s20089_s9 + $0x50] sm:$0xff]  }
 0x986   : > { %14566 = vmatprep.subr.bf16.mxu0 %v16009_v34 }
 0x987   : > { %14567 = vmatpush3.bf16.msra.mxu0 %v16010_v58 }
 0x988   : > { %14568 = vmatprep.subr.bf16.mxu0 %v16011_v33 }
 0x98b   : > { %14569 = vmatpush3.bf16.msra.mxu0 %v16012_v38 }
 0x98c   : > { %14570 = vmatprep.subr.bf16.mxu0 %v16013_v5 }
 0x98f   : > { %14571 = vmatpush3.bf16.msra.mxu0 %v16014_v44 }
 0x990   : > { %14572 = vmatprep.subr.bf16.mxu0 %v16015_v16 }
 0x993   : > { %14573 = vmatpush3.bf16.msra.mxu0 %v16016_v11 }
 0x994   : > { %14574 = vmatprep.subr.bf16.mxu0 %v16017_v8 }
 0x997   : > { %14575 = vmatpush3.bf16.msra.mxu0 %v16018_v12 }
 0x998   : > { %14576 = vmatprep.subr.bf16.mxu0 %v16019_v10 }
 0x99b   : > { %14577 = vmatpush3.bf16.msra.mxu0 %v16020_v62 }
 0x99c   : > { %14584 = vmatprep.subr.bf16.mxu0 %v16021_v43 }
 0xa58   : > { %v12749_v46 = vpop.f32.mrb[24].mxu1 }
 0xa59   : > { %v15038_v15 = vadd.f32 %v12749_v46, %v10823_v22  ;;  %v12751_v24 = vpop.f32.mrb[25].mxu1 }
 0xa5a   : > { %v15039_v30 = vadd.f32 %v12751_v24, %v10827_v4  ;;  %v12753_v18 = vpop.f32.mrb[26].mxu1 }
 0xa5b   : > { %v12758_v9 = vmax.f32 %v15038_v15, 0.0  ;;  %v12754_v13 = vpop.f32.mrb[27].mxu1 }
 0xa5c   : > { %v12759_v42 = vmax.f32 %v15039_v30, 0.0 }
 0xa5e   : > { %v12765_v27 = vcombine.low %v12758_v9, %v12759_v42 }
 0xa60   : > { %v12779_v28 = vrot.slane %v12765_v27, %v18825_v2 }
 0xa62   : > { %v12780_v41 = vcombine.low %v12772_v49, %v12779_v28  ;;  %v12781_v32 = vcombine.high %v12772_v49, %v12779_v28  ;;  %v14268_v17 = vcombine.low %v12779_v28, %v12779_v28  ;;  %v14269_v45 = vcombine.high %v12779_v28, %v12779_v28 }
 0xa64   : > { %v12789_v6 = vrot.slane %v12780_v41, %v18825_v2  ;;  %v12796_v56 = vrot.slane %v14268_v17, %v18825_v2  ;;  %v12806_v53 = vrot.slane %v12781_v32, %v18825_v2  ;;  %v12813_v0 = vrot.slane %v14269_v45, %v18825_v2  ;;  %v16022_v41 = vld [vmem:[%s20089_s9 + $0x80] sm:$0xff]   ;;  %v16023_v17 = vld [vmem:[%s20089_s9 + $0xc8] sm:$0xff]  }
 0xa66   : > { %v12797_v3 = vcombine.high %v12789_v6, %v12789_v6  ;;  %v12798_v39 = vcombine.high %v12796_v56, %v12796_v56  ;;  %v12814_v40 = vcombine.high %v12806_v53, %v12806_v53  ;;  %v12815_v55 = vcombine.high %v12813_v0, %v12813_v0 }
 0xa67   : > { %v12824_v47 = vpack.c.bf16 %v12789_v6, %v12789_v6  ;;  %v12828_v20 = vpack.c.bf16 %v12806_v53, %v12806_v53  ;;  %v12826_v33 = vpack.c.bf16 %v12796_v56, %v12796_v56  ;;  %v12830_v38 = vpack.c.bf16 %v12813_v0, %v12813_v0  ;;  %v16024_v53 = vld [vmem:[%s20089_s9 + $0x88] sm:$0xff]   ;;  %v16025_v0 = vld [vmem:[%s20089_s9 + $0xd0] sm:$0xff]  }
 0xa68   : > { %v12825_v26 = vpack.c.bf16 %v12797_v3, %v12797_v3  ;;  %v12827_v48 = vpack.c.bf16 %v12798_v39, %v12798_v39  ;;  %v12829_v37 = vpack.c.bf16 %v12814_v40, %v12814_v40  ;;  %v12831_v21 = vpack.c.bf16 %v12815_v55, %v12815_v55  ;;  %v16026_v39 = vld [vmem:[%s20089_s9 + $0x90] sm:$0xff]   ;;  %v16027_v40 = vld [vmem:[%s20089_s9 + $0xd8] sm:$0xff]  }
 0xa69   : > { %v12833_v50 = vsel %vm20187_vm9, %v12824_v47, 4286644096  ;;  %v12836_v51 = vsel %vm20188_vm2, %v12828_v20, 4286644096  ;;  %v12847_v10 = vsel %vm20196_vm6, %v12826_v33, 4286644096 }
 0xa6a   : > { %v12840_v36 = vsel %vm20189_vm13, %v12825_v26, 4286644096  ;;  %v12843_v57 = vsel %vm20190_vm10, %v12829_v37, 4286644096  ;;  %v12838_v60 = vmax.bf16 %v12836_v51, %v12833_v50  ;;  %v12854_v54 = vsel %vm20191_vm14, %v12827_v48, 4286644096 }
 0xa6b   : > { %v12845_v2 = vmax.bf16 %v12843_v57, %v12840_v36  ;;  %v12857_v29 = vsel %vm20192_vm15, %v12831_v21, 4286644096  ;;  %v12850_v62 = vsel %vm20197_vm7, %v12830_v38, 4286644096  ;;  %v16028_v47 = vld [vmem:[%s20089_s9 + $0x98] sm:$0xff]   ;;  %v16029_v20 = vld [vmem:[%s20089_s9 + $0xe0] sm:$0xff]  }
 0xa6c   : > { %v12861_v14 = vsel %vm20193_vm3, %v12838_v60, 4286644096  ;;  %v12859_v52 = vmax.bf16 %v12857_v29, %v12854_v54  ;;  %v12852_v15 = vmax.bf16 %v12850_v62, %v12847_v10  ;;  %v16030_v48 = vld [vmem:[%s20089_s9 + $0xa0] sm:$0xff]   ;;  %v16031_v37 = vld [vmem:[%s20089_s9 + $0xe8] sm:$0xff]   ;;  %v16033_v51 = vld [vmem:[%s20089_s9 + $0xf0] sm:$0xff]  }
 0xa6d   : > { %v12874_v63 = vsel %vm20194_vm4, %v12845_v2, 4286644096  ;;  %v12863_v61 = vunpack.i.l.bf16 %v12861_v14  ;;  %v12864_v23 = vunpack.i.h.bf16 %v12861_v14  ;;  %v16032_v50 = vld [vmem:[%s20089_s9 + $0xa8] sm:$0xff]   ;;  %v16034_v57 = vld [vmem:[%s20089_s9 + $0xb0] sm:$0xff]   ;;  %v16035_v60 = vld [vmem:[%s20089_s9 + $0xf8] sm:$0xff]  }
 0xa6e   : > { %v12876_v35 = vunpack.i.l.bf16 %v12874_v63  ;;  %v12877_v31 = vunpack.i.h.bf16 %v12874_v63  ;;  %v12900_v25 = vsel %vm20195_vm5, %v12859_v52, 4286644096  ;;  %v12887_v27 = vsel %vm20198_vm11, %v12852_v15, 4286644096  ;;  %v16036_v54 = vld [vmem:[%s20089_s9 + $0xb8] sm:$0xff]  }
 0xa6f   : > { %v12865_v19 = vmax.f32 %v12863_v61, %v12864_v23  ;;  %v12902_v1 = vunpack.i.l.bf16 %v12900_v25  ;;  %v12903_v34 = vunpack.i.h.bf16 %v12900_v25  ;;  %v12889_v45 = vunpack.i.l.bf16 %v12887_v27 }
 0xa70   : > { %v12878_v58 = vmax.f32 %v12876_v35, %v12877_v31  ;;  %v12890_v6 = vunpack.i.h.bf16 %v12887_v27  ;;  %v12976_v31 = vld [vmem:[%s20090_s10] sm:$0x1] }
 0xa71   : > { %v12866_v5 = vrot.slane %v12865_v19, 4  ;;  %v12904_v44 = vmax.f32 %v12902_v1, %v12903_v34 }
 0xa72   : > { %v12879_v16 = vrot.slane %v12878_v58, 4  ;;  %v12891_v3 = vmax.f32 %v12889_v45, %v12890_v6 }
 0xa73   : > { %v12867_v11 = vmax.f32 %v12865_v19, %v12866_v5  ;;  %v12905_v8 = vrot.slane %v12904_v44, 4 }
 0xa74   : > { %v12880_v12 = vmax.f32 %v12878_v58, %v12879_v16  ;;  %v12892_v55 = vrot.slane %v12891_v3, 4 }
 0xa75   : > { %v12868_v43 = vrot.slane %v12867_v11, 2  ;;  %v12906_v7 = vmax.f32 %v12904_v44, %v12905_v8 }
 0xa76   : > { %v12881_v59 = vrot.slane %v12880_v12, 2  ;;  %v12893_v26 = vmax.f32 %v12891_v3, %v12892_v55 }
 0xa77   : > { %v12869_v22 = vmax.f32 %v12867_v11, %v12868_v43  ;;  %v12907_v4 = vrot.slane %v12906_v7, 2 }
 0xa78   : > { %v12882_v46 = vmax.f32 %v12880_v12, %v12881_v59  ;;  %v12894_v21 = vrot.slane %v12893_v26, 2 }
 0xa79   : > { %v12870_v24 = vrot.slane %v12869_v22, 1  ;;  %v12908_v30 = vmax.f32 %v12906_v7, %v12907_v4 }
 0xa7a   : > { %v12883_v18 = vrot.slane %v12882_v46, 1  ;;  %v12895_v36 = vmax.f32 %v12893_v26, %v12894_v21 }
 0xa7b   : > { %v12871_v9 = vmax.f32 %v12869_v22, %v12870_v24  ;;  %v12909_v13 = vrot.slane %v12908_v30, 1 }
 0xa7c   : > { %v12884_v42 = vmax.f32 %v12882_v46, %v12883_v18  ;;  %v12896_v2 = vrot.slane %v12895_v36, 1 }
 0xa7d   : > { %v12910_v49 = vmax.f32 %v12908_v30, %v12909_v13  ;;  %v12872_v32 = vpack.i.bf16 %v12871_v9, %v12871_v9 }
 0xa7e   : > { %v12885_v28 = vpack.i.bf16 %v12884_v42, %v12884_v42  ;;  %v12897_v29 = vmax.f32 %v12895_v36, %v12896_v2 }
 0xa7f   : > { %v12911_v56 = vpack.i.bf16 %v12910_v49, %v12910_v49 }
 0xa80   : > { %13201 = vmatprep.mubr.bf16.mxu0 %v12885_v28  ;;  %v12898_v14 = vpack.i.bf16 %v12897_v29, %v12897_v29 }
 0xa81   : > { %13202 = vmatmul.mubr.bf16.vlgmr.msra.gmra.mrb[40].mxu0 %v12872_v32 }
 0xa82   : > { %14585 = vmatpush3.bf16.msra.mxu0 %v16022_v41  ;;  %13241 = vmatprep.mubr.bf16.mxu0 %v12911_v56 }
 0xa83   : > { %14586 = vmatprep.subr.bf16.mxu0 %v16023_v17 }
 0xa86   : > { %14587 = vmatpush3.bf16.msra.mxu0 %v16024_v53 }
 0xa87   : > { %14588 = vmatprep.subr.bf16.mxu0 %v16025_v0 }
 0xa8a   : > { %14589 = vmatpush3.bf16.msra.mxu0 %v16026_v39 }
 0xa8b   : > { %14590 = vmatprep.subr.bf16.mxu0 %v16027_v40 }
 0xa8e   : > { %14591 = vmatpush3.bf16.msra.mxu0 %v16028_v47 }
 0xa8f   : > { %14592 = vmatprep.subr.bf16.mxu0 %v16029_v20 }
 0xa92   : > { %14593 = vmatpush3.bf16.msra.mxu0 %v16030_v48 }
 0xa93   : > { %14594 = vmatprep.subr.bf16.mxu0 %v16031_v37 }
 0xa96   : > { %14595 = vmatpush3.bf16.msra.mxu0 %v16032_v50 }
 0xa97   : > { %14596 = vmatprep.subr.bf16.mxu0 %v16033_v51 }
 0xa9a   : > { %14597 = vmatpush3.bf16.msra.mxu0 %v16034_v57 }
 0xa9b   : > { %14598 = vmatprep.subr.bf16.mxu0 %v16035_v60 }
 0xa9e   : > { %14599 = vmatpush3.bf16.msra.mxu0 %v16036_v54 }
 0xaa1   : > { %13242 = vmatmul.mubr.bf16.vlgmr.msra.gmra.mrb[44].mxu0 %v12898_v14 }
 0xb54   : > { %v14578_v52 = vpop.f32.mrb[40].mxu0 }
 0xb55   : > { %v14579_v63 = vpop.f32.mrb[41].mxu0 }
 0xb56   : > { %v14580_v61 = vadd.f32 %v14579_v63, %v14578_v52  ;;  %v14581_v23 = vpop.f32.mrb[42].mxu0 }
 0xb57   : > { %v14582_v35 = vpop.f32.mrb[43].mxu0 }
 0xb58   : > { %v13204_v1 = vadd.f32 %v14580_v61, %v12976_v31 }
 0xb74   : > { %v14600_v25 = vpop.f32.mrb[44].mxu0 }
 0xb75   : > { %v14601_v19 = vpop.f32.mrb[45].mxu0 }
 0xb76   : > { %v14602_v34 = vadd.f32 %v14601_v19, %v14600_v25  ;;  %v14603_v58 = vpop.f32.mrb[46].mxu0 }
 0xb77   : > { %v14604_v33 = vpop.f32.mrb[47].mxu0 }
 0xb78   : > { %v13244_v38 = vadd.f32 %v14602_v34, %v13204_v1 }
 0xb7a   : > { %13249 = vst [vmem:[%s378_s12] sm:$0x1] %v13244_v38 }
 0xb7b   : > { %16077 = shalt.err (!%p16074_p3)
}
 0xb7c   : > { %s16078_s25 = scalar_lea.hbm %s20038_s16, 16  ;;  %s16082_s14 = scalar_lea.hbm %s20091_s11, 32 }
 0xb7d   : > { %p16079_p4 = scmp.ne.s32.totalorder %s20038_s16, %s16078_s25  ;;  %p16083_p9 = scmp.lt.u32.totalorder %s20038_s16, %s20091_s11 }
 0xb7e   : > { %p16084_p10 = scmp.lt.u32.totalorder %s16082_s14, %s16078_s25  ;;  %p16086_p12 = scmp.lt.u32.totalorder %s16078_s25, %s20038_s16 }
 0xb7f   : > { %p16080_p7 = pnand %p16079_p4, %p16234_p5 }
 0xb80   : > { %p16085_p11 = por %p16084_p10, %p16083_p9 }
 0xb81   : > { %p16081_p8 = pneg %p16080_p7 }
 0xb82   : > { %p16087_p13 = por %p16086_p12, %p16085_p11 }
 0xb84   : > { %p16088_p0 = pnand %p16087_p13, %p16081_p8 }
 0xb86   : > { %16091 = shalt.err (!%p16088_p0)
}
 0xb87   : > { %15384 = dma.vmem_to_hbm [thread:$0]  (%p16234_p5), %s20040_s13, 16, %s20038_s16, %s13251_s22  }
 0xb88 PF: > { %p15390_p1 = scmp.ge.s32.totalorder %s16126_s20, 2  ;;  %s13275_s21 = sand.u32 1, %s16114_s17  }
 0xb89   : > { %s13276_s29 = scalar_lea.sflag [#allocation7], %s13275_s21 }
 0xb8a   : > { %p15387_p2 = pnand %p15390_p1, %p16238_p6 }
 0xb8c   : > { %16109 = dma.done.wait (!%p15387_p2), %s13276_s29, 16  }
 0xb8d   : > { %16111 = vsyncadd (!%p15387_p2), %s13276_s29, 4294967280  ;;  %p21_p3 = scmp.ge.s32.totalorder %s16221_s23, 4   ;;  %s20199_s17 = smov %s16118_s18 }
 0xb8e   : > { %s20200_s18 = smov %s16122_s19  ;;  %s20201_s19 = smov %s16232_s26 }
 0xb8f   : > { %s20202_s20 = smov %s16221_s23  ;;  %23 = sbr.rel (!%p21_p3) target bundleno = 5 (0x5), region = 127 }
 0xb96   :  { %13280 = vsyncpa [#allocation7], 1 }
 0xb97   :  { %13282 = vsyncpa [#allocation7 + $0x1], 1 }

</bundles_post_ra>
